<compile_context>
chip_gen: v6e
topology: v6e:2x2x1
jax: 0.10.0
libtpu: 0.0.40
codegen_flags: <defaults>
</compile_context>

<pallas_src>
import functools
import numpy as np

import jax
import jax.numpy as jnp
from jax.experimental import pallas as pl
from jax.experimental.pallas import tpu as pltpu


# --------------------------------------------------------------------------
# In-kernel helpers
# --------------------------------------------------------------------------

def _dot(a, b):
    return jnp.dot(a, b, preferred_element_type=jnp.float32)


def _dot_nt(a, b):
    # a (M, K), b (N, K) -> (M, N): contract over the last dim of both
    # (no explicit materialized transpose of b).
    return jax.lax.dot_general(a, b, (((1,), (1,)), ((), ())),
                               preferred_element_type=jnp.float32)


def _layernorm(x, g, b, eps=1e-5):
    mu = jnp.mean(x, axis=-1, keepdims=True)
    var = jnp.mean((x - mu) ** 2, axis=-1, keepdims=True)
    return (x - mu) * jax.lax.rsqrt(var + eps) * g + b      # rsqrt -> EUP


def _encoder_block(x, blk, l, n_heads):
    """Post-LN transformer encoder block on a single (S, C) tile (f32 in/out).

    `blk` is a dict of VMEM refs whose leading dim is the block index `l`.
    Attention weights are pre-split per head (no lane slicing / concat inside
    the kernel); the 1/sqrt(dh) scale is pre-folded into wq/bq.  Reductions
    stay in f32, MXU operands are bf16.
    """
    xb = x.astype(jnp.bfloat16)

    attn = None
    for h in range(n_heads):                        # static, tiny (n_heads == 2)
        q = _dot(xb, blk['wq'][l, h]) + blk['bq'][l, h]      # (S, dh) f32, pre-scaled
        k = _dot(xb, blk['wk'][l, h]) + blk['bk'][l, h]
        v = _dot(xb, blk['wv'][l, h]) + blk['bv'][l, h]
        s = _dot_nt(q.astype(jnp.bfloat16), k.astype(jnp.bfloat16))      # (S, S)
        s = s - jnp.max(s, axis=-1, keepdims=True)           # f32 softmax stats
        p = jnp.exp(s)
        p = p * pl.reciprocal(jnp.sum(p, axis=-1, keepdims=True), approx=True)
        o_h = _dot(p.astype(jnp.bfloat16), v.astype(jnp.bfloat16))       # (S, dh)
        c_h = _dot(o_h.astype(jnp.bfloat16), blk['wo'][l, h])            # (S, C)
        attn = c_h if attn is None else attn + c_h
    attn = attn + blk['bo'][l]

    x1 = _layernorm(x + attn, blk['g1'][l], blk['be1'][l])   # residual + LN1
    hid = jnp.maximum(_dot(x1.astype(jnp.bfloat16), blk['w1'][l]) + blk['b1'][l], 0.0)
    ff = _dot(hid.astype(jnp.bfloat16), blk['w2'][l]) + blk['b2'][l]
    return _layernorm(x1 + ff, blk['g2'][l], blk['be2'][l])  # residual + LN2


# --------------------------------------------------------------------------
# Fused forward kernel (one grid step == one batch element)
# --------------------------------------------------------------------------

def _fused_forward_kernel(img_ref, pts_ref, *rest, treedef, n_blocks, n_heads):
    param_refs = rest[:-1]
    o_ref = rest[-1]
    p = jax.tree_util.tree_unflatten(treedef, list(param_refs))

    # ---- CameraTrans (Cam_ViT approx.): patch embed + (pos emb + bias) + blocks
    # TODO(synk): Cam_ViT's conv patch / position-encoding variants are not in
    # the reference file; a standard ViT patch embedding is used instead.
    x_img = img_ref[0].astype(jnp.bfloat16)                  # (Np, patch_dim)
    img_tok = _dot(x_img, p['patch_w'][...]) + p['pos_tok'][...]
    for l in range(n_blocks):
        img_tok = _encoder_block(img_tok, p['cam'], l, n_heads)

    # ---- PCloudTrans (PC_Trs approx., pc_arch='PCTrans')
    # TODO(synk): KPConv / ball_query / clustering stages are external ops; the
    # point branch uses a per-point linear embedding + transformer blocks.
    x_pts = pts_ref[0].astype(jnp.bfloat16)                  # (Npts, pc_in)
    pc_tok = _dot(x_pts, p['point_w'][...]) + p['point_b'][...]
    for l in range(n_blocks):
        pc_tok = _encoder_block(pc_tok, p['pc'], l, n_heads)

    # ---- concat along the sequence axis; reshape(B,-1,mlp_feature) is identity
    all_feat = jnp.concatenate([img_tok, pc_tok], axis=0)     # (L, F) f32

    # ---- allFeatPool: AdaptiveAvgPool2d((rt_hidden, rt_channels)) == A @ X @ B^T
    tmp = _dot(all_feat.astype(jnp.bfloat16), p['pool_bT'][...])      # (L, rt_c)
    pooled = _dot(p['pool_a'][...], tmp.astype(jnp.bfloat16))         # (rt_h, rt_c)

    # ---- EncBlocks on (rt_hidden, rt_channels)
    # NOTE: rt_channels=8 is lane-sparse, but everything stays VMEM-resident
    # inside this fused kernel, so no masked HBM stores are produced.
    for l in range(n_blocks):
        pooled = _encoder_block(pooled, p['rt'], l, n_heads)

    # ---- avgpoolRot (mean over the sequence; the reference uses it for BOTH
    # rot & tran) + fused BasicRNN heads; output = [Tran(3), Rot(3)].
    # TODO(synk): BasicRNN is not defined in the reference file; modeled as a
    # single-step Elman RNN with zero initial hidden state.
    feat = jnp.mean(pooled, axis=0, keepdims=True).astype(jnp.bfloat16)  # (1, rt_c)
    h_rt = jnp.tanh(_dot(feat, p['wih_rt'][...]) + p['bih_rt'][...])     # (1, 2*rt_h)
    out = _dot(h_rt.astype(jnp.bfloat16), p['who_rt'][...]) + p['bho_rt'][...]
    o_ref[0] = out.astype(o_ref.dtype)                                   # (1, 6)


# --------------------------------------------------------------------------
# Parameter init (synthetic, deterministic) / glue
# --------------------------------------------------------------------------

def _dense_f32(key, din, dout):
    kw, kb = jax.random.split(key)
    w = jax.random.normal(kw, (din, dout), jnp.float32) / np.sqrt(din)
    b = jax.random.normal(kb, (1, dout), jnp.float32) * 0.01
    return w, b


def _dense_bf16(key, din, dout):
    w, b = _dense_f32(key, din, dout)
    return w.astype(jnp.bfloat16), b            # weight bf16 (MXU), bias f32


def _enc_block_params(key, c, hidden, heads):
    dh = c // heads
    ks = jax.random.split(key, 6)
    wq, bq = _dense_f32(ks[0], c, c)
    # Fold the 1/sqrt(dh) attention scale into the q projection (one-time).
    scale = np.float32(1.0 / np.sqrt(dh))
    wq = wq * scale
    bq = bq * scale
    wk, bk = _dense_f32(ks[1], c, c)
    wv, bv = _dense_f32(ks[2], c, c)
    wo, bo = _dense_f32(ks[3], c, c)
    w1, b1 = _dense_f32(ks[4], c, hidden)
    w2, b2 = _dense_f32(ks[5], hidden, c)

    def split_out(w, b):
        # (C, C) -> (H, C, dh) split on output dim; (1, C) -> (H, 1, dh)
        w_s = jnp.transpose(w.reshape(c, heads, dh), (1, 0, 2)).astype(jnp.bfloat16)
        b_s = b.reshape(heads, 1, dh)
        return w_s, b_s

    wq_s, bq_s = split_out(wq, bq)
    wk_s, bk_s = split_out(wk, bk)
    wv_s, bv_s = split_out(wv, bv)
    wo_s = wo.reshape(heads, dh, c).astype(jnp.bfloat16)   # split on input dim

    return dict(wq=wq_s, bq=bq_s, wk=wk_s, bk=bk_s, wv=wv_s, bv=bv_s,
                wo=wo_s, bo=bo,
                w1=w1.astype(jnp.bfloat16), b1=b1,
                w2=w2.astype(jnp.bfloat16), b2=b2,
                g1=jnp.ones((1, c), jnp.float32), be1=jnp.zeros((1, c), jnp.float32),
                g2=jnp.ones((1, c), jnp.float32), be2=jnp.zeros((1, c), jnp.float32))


def _stack_blocks(blocks):
    return {k: jnp.stack([b[k] for b in blocks]) for k in blocks[0]}


def adaptive_avg_pool_matrix(in_size, out_size):
    # Exact PyTorch adaptive-avg-pool window semantics as an (out, in) matrix.
    m = np.zeros((out_size, in_size), np.float32)
    for i in range(out_size):
        s = (i * in_size) // out_size
        e = -((-(i + 1) * in_size) // out_size)
        m[i, s:e] = 1.0 / (e - s)
    return m


def init_params(key, *, img_depth, patch, n_patches, n_points, pc_in_dim,
                mlp_blocks, mlp_feature, mlp_heads, mlp_hidden,
                rt_channels, rt_hidden):
    ks = jax.random.split(key, 8)
    p = {}
    patch_dim = img_depth * patch * patch
    p['patch_w'], patch_b = _dense_bf16(ks[0], patch_dim, mlp_feature)
    pos_emb = jax.random.normal(ks[1], (n_patches, mlp_feature), jnp.float32) * 0.02
    p['pos_tok'] = pos_emb + patch_b        # fold patch-embed bias into pos emb
    p['point_w'], p['point_b'] = _dense_bf16(ks[2], pc_in_dim, mlp_feature)
    p['cam'] = _stack_blocks([_enc_block_params(k, mlp_feature, mlp_hidden, mlp_heads)
                              for k in jax.random.split(ks[3], mlp_blocks)])
    p['pc'] = _stack_blocks([_enc_block_params(k, mlp_feature, mlp_hidden, mlp_heads)
                             for k in jax.random.split(ks[4], mlp_blocks)])
    p['rt'] = _stack_blocks([_enc_block_params(k, rt_channels, rt_hidden, mlp_heads)
                             for k in jax.random.split(ks[5], mlp_blocks)])

    # ---- fused rot/tran BasicRNN heads (output order = [Tran, Rot]) ----
    kh = jax.random.split(ks[6], 4)
    wih_r, bih_r = _dense_bf16(kh[0], rt_channels, rt_hidden)
    who_r, bho_r = _dense_f32(kh[1], rt_hidden, 3)
    wih_t, bih_t = _dense_bf16(kh[2], rt_channels, rt_hidden)
    who_t, bho_t = _dense_f32(kh[3], rt_hidden, 3)
    p['wih_rt'] = jnp.concatenate([wih_t, wih_r], axis=1)          # (rt_c, 2*rt_h) bf16
    p['bih_rt'] = jnp.concatenate([bih_t, bih_r], axis=1)          # (1, 2*rt_h) f32
    who = jnp.zeros((2 * rt_hidden, 6), jnp.float32)
    who = who.at[:rt_hidden, 0:3].set(who_t).at[rt_hidden:, 3:6].set(who_r)
    p['who_rt'] = who.astype(jnp.bfloat16)                         # block-diagonal
    p['bho_rt'] = jnp.concatenate([bho_t, bho_r], axis=1)          # (1, 6) f32

    # AdaptiveAvgPool2d on a 3-D (B, L, F) tensor pools over (L, F) per batch.
    L = n_patches + n_points
    p['pool_a'] = jnp.asarray(adaptive_avg_pool_matrix(L, rt_hidden), jnp.bfloat16)
    p['pool_bT'] = jnp.asarray(adaptive_avg_pool_matrix(mlp_feature, rt_channels).T,
                               jnp.bfloat16)
    return p


def transformer_calib_forward(image, position, feature, params, *,
                              patch, mlp_heads, mlp_blocks):
    B, C, H, W = image.shape                                  # NCHW
    n_patches = (H // patch) * (W // patch)

    # Patch extraction / point concat: plain-JAX HBM-level layout glue.
    x = image.reshape(B, C, H // patch, patch, W // patch, patch)
    img_patches = x.transpose(0, 2, 4, 1, 3, 5).reshape(B, n_patches,
                                                        C * patch * patch)
    pts = jnp.concatenate([position, feature], axis=2)

    flat, treedef = jax.tree_util.tree_flatten(params)
    kern = functools.partial(_fused_forward_kernel, treedef=treedef,
                             n_blocks=mlp_blocks, n_heads=mlp_heads)

    def full_spec(a):
        # Full-extent block, constant index -> DMA'd into VMEM once.
        return pl.BlockSpec(a.shape, lambda b, n=a.ndim: (0,) * n)

    out = pl.pallas_call(
        kern,
        out_shape=jax.ShapeDtypeStruct((B, 1, 6), jnp.float32),
        grid=(B,),
        in_specs=[pl.BlockSpec((1,) + img_patches.shape[1:], lambda b: (b, 0, 0)),
                  pl.BlockSpec((1,) + pts.shape[1:], lambda b: (b, 0, 0))]
                 + [full_spec(a) for a in flat],
        out_specs=pl.BlockSpec((1, 1, 6), lambda b: (b, 0, 0)),
        compiler_params=pltpu.CompilerParams(
            dimension_semantics=("parallel",)),    # 2 TCs on v7x; no-op elsewhere
    )(img_patches, pts, *flat)
    return out.reshape(B, 6)


# --------------------------------------------------------------------------

if __name__ == "__main__":
    # Small config consistent with the module's constructor args.
    B = 2
    IMG_C, IMG_H, IMG_W, PATCH = 3, 16, 16, 4
    N_PTS, PC_FEAT_DIM = 16, 1
    MLP_BLOCKS, MLP_FEATURE, MLP_HEADS, MLP_HIDDEN = 2, 32, 2, 64
    RT_CHANNELS, RT_HIDDEN = 8, 32

    key = jax.random.PRNGKey(0)
    k_img, k_pos, k_feat = jax.random.split(key, 3)
    image = jax.random.normal(k_img, (B, IMG_C, IMG_H, IMG_W), jnp.float32)   # NCHW
    position = jax.random.normal(k_pos, (B, N_PTS, 3), jnp.float32)
    feature = jax.random.normal(k_feat, (B, N_PTS, PC_FEAT_DIM), jnp.float32)

    params = init_params(
        jax.random.PRNGKey(42),
        img_depth=IMG_C, patch=PATCH,
        n_patches=(IMG_H // PATCH) * (IMG_W // PATCH), n_points=N_PTS,
        pc_in_dim=3 + PC_FEAT_DIM, mlp_blocks=MLP_BLOCKS, mlp_feature=MLP_FEATURE,
        mlp_heads=MLP_HEADS, mlp_hidden=MLP_HIDDEN,
        rt_channels=RT_CHANNELS, rt_hidden=RT_HIDDEN)

    fwd = jax.jit(functools.partial(transformer_calib_forward,
                                    patch=PATCH, mlp_heads=MLP_HEADS,
                                    mlp_blocks=MLP_BLOCKS))
    out = jax.block_until_ready(fwd(image, position, feature, params))
    assert out.shape == (B, 6) and bool(jnp.all(jnp.isfinite(out)))
    print("KERNEL_OK")
</pallas_src>

<mosaic_0001>
module attributes {stable_mosaic.version = 11 : i64} {
  func.func @_fused_forward_kernel(%arg0: i32, %arg1: memref<1x16x48xf32, #tpu.memory_space<vmem>>, %arg2: memref<1x16x4xf32, #tpu.memory_space<vmem>>, %arg3: memref<1x6xf32, #tpu.memory_space<vmem>>, %arg4: memref<1x64xf32, #tpu.memory_space<vmem>>, %arg5: memref<2x1x64xf32, #tpu.memory_space<vmem>>, %arg6: memref<2x1x32xf32, #tpu.memory_space<vmem>>, %arg7: memref<2x1x32xf32, #tpu.memory_space<vmem>>, %arg8: memref<2x1x32xf32, #tpu.memory_space<vmem>>, %arg9: memref<2x2x1x16xf32, #tpu.memory_space<vmem>>, %arg10: memref<2x1x32xf32, #tpu.memory_space<vmem>>, %arg11: memref<2x2x1x16xf32, #tpu.memory_space<vmem>>, %arg12: memref<2x2x1x16xf32, #tpu.memory_space<vmem>>, %arg13: memref<2x1x32xf32, #tpu.memory_space<vmem>>, %arg14: memref<2x1x32xf32, #tpu.memory_space<vmem>>, %arg15: memref<2x32x64xbf16, #tpu.memory_space<vmem>>, %arg16: memref<2x64x32xbf16, #tpu.memory_space<vmem>>, %arg17: memref<2x2x32x16xbf16, #tpu.memory_space<vmem>>, %arg18: memref<2x2x16x32xbf16, #tpu.memory_space<vmem>>, %arg19: memref<2x2x32x16xbf16, #tpu.memory_space<vmem>>, %arg20: memref<2x2x32x16xbf16, #tpu.memory_space<vmem>>, %arg21: memref<48x32xbf16, #tpu.memory_space<vmem>>, %arg22: memref<2x1x64xf32, #tpu.memory_space<vmem>>, %arg23: memref<2x1x32xf32, #tpu.memory_space<vmem>>, %arg24: memref<2x1x32xf32, #tpu.memory_space<vmem>>, %arg25: memref<2x1x32xf32, #tpu.memory_space<vmem>>, %arg26: memref<2x2x1x16xf32, #tpu.memory_space<vmem>>, %arg27: memref<2x1x32xf32, #tpu.memory_space<vmem>>, %arg28: memref<2x2x1x16xf32, #tpu.memory_space<vmem>>, %arg29: memref<2x2x1x16xf32, #tpu.memory_space<vmem>>, %arg30: memref<2x1x32xf32, #tpu.memory_space<vmem>>, %arg31: memref<2x1x32xf32, #tpu.memory_space<vmem>>, %arg32: memref<2x32x64xbf16, #tpu.memory_space<vmem>>, %arg33: memref<2x64x32xbf16, #tpu.memory_space<vmem>>, %arg34: memref<2x2x32x16xbf16, #tpu.memory_space<vmem>>, %arg35: memref<2x2x16x32xbf16, #tpu.memory_space<vmem>>, %arg36: memref<2x2x32x16xbf16, #tpu.memory_space<vmem>>, %arg37: memref<2x2x32x16xbf16, #tpu.memory_space<vmem>>, %arg38: memref<1x32xf32, #tpu.memory_space<vmem>>, %arg39: memref<4x32xbf16, #tpu.memory_space<vmem>>, %arg40: memref<32x32xbf16, #tpu.memory_space<vmem>>, %arg41: memref<32x8xbf16, #tpu.memory_space<vmem>>, %arg42: memref<16x32xf32, #tpu.memory_space<vmem>>, %arg43: memref<2x1x32xf32, #tpu.memory_space<vmem>>, %arg44: memref<2x1x8xf32, #tpu.memory_space<vmem>>, %arg45: memref<2x1x8xf32, #tpu.memory_space<vmem>>, %arg46: memref<2x1x8xf32, #tpu.memory_space<vmem>>, %arg47: memref<2x2x1x4xf32, #tpu.memory_space<vmem>>, %arg48: memref<2x1x8xf32, #tpu.memory_space<vmem>>, %arg49: memref<2x2x1x4xf32, #tpu.memory_space<vmem>>, %arg50: memref<2x2x1x4xf32, #tpu.memory_space<vmem>>, %arg51: memref<2x1x8xf32, #tpu.memory_space<vmem>>, %arg52: memref<2x1x8xf32, #tpu.memory_space<vmem>>, %arg53: memref<2x8x32xbf16, #tpu.memory_space<vmem>>, %arg54: memref<2x32x8xbf16, #tpu.memory_space<vmem>>, %arg55: memref<2x2x8x4xbf16, #tpu.memory_space<vmem>>, %arg56: memref<2x2x4x8xbf16, #tpu.memory_space<vmem>>, %arg57: memref<2x2x8x4xbf16, #tpu.memory_space<vmem>>, %arg58: memref<2x2x8x4xbf16, #tpu.memory_space<vmem>>, %arg59: memref<64x6xbf16, #tpu.memory_space<vmem>>, %arg60: memref<8x64xbf16, #tpu.memory_space<vmem>>, %arg61: memref<1x1x6xf32, #tpu.memory_space<vmem>>) attributes {dimension_semantics = [#tpu.dimension_semantics<parallel>], iteration_bounds = array<i64: 2>, scalar_prefetch = 0 : i64, scratch_operands = 0 : i64, tpu.core_type = #tpu.core_type<tc>, window_params = [{transform_indices = @transform_0, window_bounds = array<i64: 1, 16, 48>}, {transform_indices = @transform_1, window_bounds = array<i64: 1, 16, 4>}, {pipeline_mode = #tpu.pipeline_mode<synchronous>, transform_indices = @transform_2, window_bounds = array<i64: 1, 6>}, {pipeline_mode = #tpu.pipeline_mode<synchronous>, transform_indices = @transform_3, window_bounds = array<i64: 1, 64>}, {pipeline_mode = #tpu.pipeline_mode<synchronous>, transform_indices = @transform_4, window_bounds = array<i64: 2, 1, 64>}, {pipeline_mode = #tpu.pipeline_mode<synchronous>, transform_indices = @transform_5, window_bounds = array<i64: 2, 1, 32>}, {pipeline_mode = #tpu.pipeline_mode<synchronous>, transform_indices = @transform_6, window_bounds = array<i64: 2, 1, 32>}, {pipeline_mode = #tpu.pipeline_mode<synchronous>, transform_indices = @transform_7, window_bounds = array<i64: 2, 1, 32>}, {pipeline_mode = #tpu.pipeline_mode<synchronous>, transform_indices = @transform_8, window_bounds = array<i64: 2, 2, 1, 16>}, {pipeline_mode = #tpu.pipeline_mode<synchronous>, transform_indices = @transform_9, window_bounds = array<i64: 2, 1, 32>}, {pipeline_mode = #tpu.pipeline_mode<synchronous>, transform_indices = @transform_10, window_bounds = array<i64: 2, 2, 1, 16>}, {pipeline_mode = #tpu.pipeline_mode<synchronous>, transform_indices = @transform_11, window_bounds = array<i64: 2, 2, 1, 16>}, {pipeline_mode = #tpu.pipeline_mode<synchronous>, transform_indices = @transform_12, window_bounds = array<i64: 2, 1, 32>}, {pipeline_mode = #tpu.pipeline_mode<synchronous>, transform_indices = @transform_13, window_bounds = array<i64: 2, 1, 32>}, {pipeline_mode = #tpu.pipeline_mode<synchronous>, transform_indices = @transform_14, window_bounds = array<i64: 2, 32, 64>}, {pipeline_mode = #tpu.pipeline_mode<synchronous>, transform_indices = @transform_15, window_bounds = array<i64: 2, 64, 32>}, {pipeline_mode = #tpu.pipeline_mode<synchronous>, transform_indices = @transform_16, window_bounds = array<i64: 2, 2, 32, 16>}, {pipeline_mode = #tpu.pipeline_mode<synchronous>, transform_indices = @transform_17, window_bounds = array<i64: 2, 2, 16, 32>}, {pipeline_mode = #tpu.pipeline_mode<synchronous>, transform_indices = @transform_18, window_bounds = array<i64: 2, 2, 32, 16>}, {pipeline_mode = #tpu.pipeline_mode<synchronous>, transform_indices = @transform_19, window_bounds = array<i64: 2, 2, 32, 16>}, {pipeline_mode = #tpu.pipeline_mode<synchronous>, transform_indices = @transform_20, window_bounds = array<i64: 48, 32>}, {pipeline_mode = #tpu.pipeline_mode<synchronous>, transform_indices = @transform_21, window_bounds = array<i64: 2, 1, 64>}, {pipeline_mode = #tpu.pipeline_mode<synchronous>, transform_indices = @transform_22, window_bounds = array<i64: 2, 1, 32>}, {pipeline_mode = #tpu.pipeline_mode<synchronous>, transform_indices = @transform_23, window_bounds = array<i64: 2, 1, 32>}, {pipeline_mode = #tpu.pipeline_mode<synchronous>, transform_indices = @transform_24, window_bounds = array<i64: 2, 1, 32>}, {pipeline_mode = #tpu.pipeline_mode<synchronous>, transform_indices = @transform_25, window_bounds = array<i64: 2, 2, 1, 16>}, {pipeline_mode = #tpu.pipeline_mode<synchronous>, transform_indices = @transform_26, window_bounds = array<i64: 2, 1, 32>}, {pipeline_mode = #tpu.pipeline_mode<synchronous>, transform_indices = @transform_27, window_bounds = array<i64: 2, 2, 1, 16>}, {pipeline_mode = #tpu.pipeline_mode<synchronous>, transform_indices = @transform_28, window_bounds = array<i64: 2, 2, 1, 16>}, {pipeline_mode = #tpu.pipeline_mode<synchronous>, transform_indices = @transform_29, window_bounds = array<i64: 2, 1, 32>}, {pipeline_mode = #tpu.pipeline_mode<synchronous>, transform_indices = @transform_30, window_bounds = array<i64: 2, 1, 32>}, {pipeline_mode = #tpu.pipeline_mode<synchronous>, transform_indices = @transform_31, window_bounds = array<i64: 2, 32, 64>}, {pipeline_mode = #tpu.pipeline_mode<synchronous>, transform_indices = @transform_32, window_bounds = array<i64: 2, 64, 32>}, {pipeline_mode = #tpu.pipeline_mode<synchronous>, transform_indices = @transform_33, window_bounds = array<i64: 2, 2, 32, 16>}, {pipeline_mode = #tpu.pipeline_mode<synchronous>, transform_indices = @transform_34, window_bounds = array<i64: 2, 2, 16, 32>}, {pipeline_mode = #tpu.pipeline_mode<synchronous>, transform_indices = @transform_35, window_bounds = array<i64: 2, 2, 32, 16>}, {pipeline_mode = #tpu.pipeline_mode<synchronous>, transform_indices = @transform_36, window_bounds = array<i64: 2, 2, 32, 16>}, {pipeline_mode = #tpu.pipeline_mode<synchronous>, transform_indices = @transform_37, window_bounds = array<i64: 1, 32>}, {pipeline_mode = #tpu.pipeline_mode<synchronous>, transform_indices = @transform_38, window_bounds = array<i64: 4, 32>}, {pipeline_mode = #tpu.pipeline_mode<synchronous>, transform_indices = @transform_39, window_bounds = array<i64: 32, 32>}, {pipeline_mode = #tpu.pipeline_mode<synchronous>, transform_indices = @transform_40, window_bounds = array<i64: 32, 8>}, {pipeline_mode = #tpu.pipeline_mode<synchronous>, transform_indices = @transform_41, window_bounds = array<i64: 16, 32>}, {pipeline_mode = #tpu.pipeline_mode<synchronous>, transform_indices = @transform_42, window_bounds = array<i64: 2, 1, 32>}, {pipeline_mode = #tpu.pipeline_mode<synchronous>, transform_indices = @transform_43, window_bounds = array<i64: 2, 1, 8>}, {pipeline_mode = #tpu.pipeline_mode<synchronous>, transform_indices = @transform_44, window_bounds = array<i64: 2, 1, 8>}, {pipeline_mode = #tpu.pipeline_mode<synchronous>, transform_indices = @transform_45, window_bounds = array<i64: 2, 1, 8>}, {pipeline_mode = #tpu.pipeline_mode<synchronous>, transform_indices = @transform_46, window_bounds = array<i64: 2, 2, 1, 4>}, {pipeline_mode = #tpu.pipeline_mode<synchronous>, transform_indices = @transform_47, window_bounds = array<i64: 2, 1, 8>}, {pipeline_mode = #tpu.pipeline_mode<synchronous>, transform_indices = @transform_48, window_bounds = array<i64: 2, 2, 1, 4>}, {pipeline_mode = #tpu.pipeline_mode<synchronous>, transform_indices = @transform_49, window_bounds = array<i64: 2, 2, 1, 4>}, {pipeline_mode = #tpu.pipeline_mode<synchronous>, transform_indices = @transform_50, window_bounds = array<i64: 2, 1, 8>}, {pipeline_mode = #tpu.pipeline_mode<synchronous>, transform_indices = @transform_51, window_bounds = array<i64: 2, 1, 8>}, {pipeline_mode = #tpu.pipeline_mode<synchronous>, transform_indices = @transform_52, window_bounds = array<i64: 2, 8, 32>}, {pipeline_mode = #tpu.pipeline_mode<synchronous>, transform_indices = @transform_53, window_bounds = array<i64: 2, 32, 8>}, {pipeline_mode = #tpu.pipeline_mode<synchronous>, transform_indices = @transform_54, window_bounds = array<i64: 2, 2, 8, 4>}, {pipeline_mode = #tpu.pipeline_mode<synchronous>, transform_indices = @transform_55, window_bounds = array<i64: 2, 2, 4, 8>}, {pipeline_mode = #tpu.pipeline_mode<synchronous>, transform_indices = @transform_56, window_bounds = array<i64: 2, 2, 8, 4>}, {pipeline_mode = #tpu.pipeline_mode<synchronous>, transform_indices = @transform_57, window_bounds = array<i64: 2, 2, 8, 4>}, {pipeline_mode = #tpu.pipeline_mode<synchronous>, transform_indices = @transform_58, window_bounds = array<i64: 64, 6>}, {pipeline_mode = #tpu.pipeline_mode<synchronous>, transform_indices = @transform_59, window_bounds = array<i64: 8, 64>}, {transform_indices = @transform_60, window_bounds = array<i64: 1, 1, 6>}]} {
    %c0 = arith.constant 0 : index
    %c0_0 = arith.constant 0 : index
    %c0_1 = arith.constant 0 : index
    %0 = vector.load %arg1[%c0, %c0_0, %c0_1] : memref<1x16x48xf32, #tpu.memory_space<vmem>>, vector<1x16x48xf32>
    %1 = vector.shape_cast %0 : vector<1x16x48xf32> to vector<16x48xf32>
    %2 = arith.truncf %1 : vector<16x48xf32> to vector<16x48xbf16>
    %c0_2 = arith.constant 0 : index
    %c0_3 = arith.constant 0 : index
    %3 = vector.load %arg21[%c0_2, %c0_3] : memref<48x32xbf16, #tpu.memory_space<vmem>>, vector<48x32xbf16>
    %cst = arith.constant dense<0.000000e+00> : vector<16x32xf32>
    %4 = tpu.matmul %2, %3, %cst {dimension_numbers = #tpu.dot_dimension_numbers<[1], [0], [0], [1], [0, 0, 1, 1], [], []>} : vector<16x48xbf16>, vector<48x32xbf16>, vector<16x32xf32> -> vector<16x32xf32>
    %c0_4 = arith.constant 0 : index
    %c0_5 = arith.constant 0 : index
    %5 = vector.load %arg42[%c0_4, %c0_5] : memref<16x32xf32, #tpu.memory_space<vmem>>, vector<16x32xf32>
    %6 = arith.addf %4, %5 : vector<16x32xf32>
    %7 = arith.truncf %6 : vector<16x32xf32> to vector<16x32xbf16>
    %c0_6 = arith.constant 0 : index
    %c0_7 = arith.constant 0 : index
    %c0_8 = arith.constant 0 : index
    %c0_9 = arith.constant 0 : index
    %8 = vector.load %arg19[%c0_6, %c0_7, %c0_8, %c0_9] : memref<2x2x32x16xbf16, #tpu.memory_space<vmem>>, vector<1x1x32x16xbf16>
    %9 = vector.shape_cast %8 : vector<1x1x32x16xbf16> to vector<32x16xbf16>
    %cst_10 = arith.constant dense<0.000000e+00> : vector<16x16xf32>
    %10 = tpu.matmul %7, %9, %cst_10 {dimension_numbers = #tpu.dot_dimension_numbers<[1], [0], [0], [1], [0, 0, 1, 1], [], []>} : vector<16x32xbf16>, vector<32x16xbf16>, vector<16x16xf32> -> vector<16x16xf32>
    %c0_11 = arith.constant 0 : index
    %c0_12 = arith.constant 0 : index
    %c0_13 = arith.constant 0 : index
    %c0_14 = arith.constant 0 : index
    %11 = vector.load %arg11[%c0_11, %c0_12, %c0_13, %c0_14] : memref<2x2x1x16xf32, #tpu.memory_space<vmem>>, vector<1x1x1x16xf32>
    %12 = vector.shape_cast %11 : vector<1x1x1x16xf32> to vector<1x16xf32>
    %13 = vector.broadcast %12 : vector<1x16xf32> to vector<16x16xf32>
    %14 = arith.addf %10, %13 : vector<16x16xf32>
    %c0_15 = arith.constant 0 : index
    %c0_16 = arith.constant 0 : index
    %c0_17 = arith.constant 0 : index
    %c0_18 = arith.constant 0 : index
    %15 = vector.load %arg17[%c0_15, %c0_16, %c0_17, %c0_18] : memref<2x2x32x16xbf16, #tpu.memory_space<vmem>>, vector<1x1x32x16xbf16>
    %16 = vector.shape_cast %15 : vector<1x1x32x16xbf16> to vector<32x16xbf16>
    %cst_19 = arith.constant dense<0.000000e+00> : vector<16x16xf32>
    %17 = tpu.matmul %7, %16, %cst_19 {dimension_numbers = #tpu.dot_dimension_numbers<[1], [0], [0], [1], [0, 0, 1, 1], [], []>} : vector<16x32xbf16>, vector<32x16xbf16>, vector<16x16xf32> -> vector<16x16xf32>
    %c0_20 = arith.constant 0 : index
    %c0_21 = arith.constant 0 : index
    %c0_22 = arith.constant 0 : index
    %c0_23 = arith.constant 0 : index
    %18 = vector.load %arg9[%c0_20, %c0_21, %c0_22, %c0_23] : memref<2x2x1x16xf32, #tpu.memory_space<vmem>>, vector<1x1x1x16xf32>
    %19 = vector.shape_cast %18 : vector<1x1x1x16xf32> to vector<1x16xf32>
    %20 = vector.broadcast %19 : vector<1x16xf32> to vector<16x16xf32>
    %21 = arith.addf %17, %20 : vector<16x16xf32>
    %c0_24 = arith.constant 0 : index
    %c0_25 = arith.constant 0 : index
    %c0_26 = arith.constant 0 : index
    %c0_27 = arith.constant 0 : index
    %22 = vector.load %arg20[%c0_24, %c0_25, %c0_26, %c0_27] : memref<2x2x32x16xbf16, #tpu.memory_space<vmem>>, vector<1x1x32x16xbf16>
    %23 = vector.shape_cast %22 : vector<1x1x32x16xbf16> to vector<32x16xbf16>
    %cst_28 = arith.constant dense<0.000000e+00> : vector<16x16xf32>
    %24 = tpu.matmul %7, %23, %cst_28 {dimension_numbers = #tpu.dot_dimension_numbers<[1], [0], [0], [1], [0, 0, 1, 1], [], []>} : vector<16x32xbf16>, vector<32x16xbf16>, vector<16x16xf32> -> vector<16x16xf32>
    %c0_29 = arith.constant 0 : index
    %c0_30 = arith.constant 0 : index
    %c0_31 = arith.constant 0 : index
    %c0_32 = arith.constant 0 : index
    %25 = vector.load %arg12[%c0_29, %c0_30, %c0_31, %c0_32] : memref<2x2x1x16xf32, #tpu.memory_space<vmem>>, vector<1x1x1x16xf32>
    %26 = vector.shape_cast %25 : vector<1x1x1x16xf32> to vector<1x16xf32>
    %27 = vector.broadcast %26 : vector<1x16xf32> to vector<16x16xf32>
    %28 = arith.addf %24, %27 : vector<16x16xf32>
    %29 = arith.truncf %14 : vector<16x16xf32> to vector<16x16xbf16>
    %30 = arith.truncf %21 : vector<16x16xf32> to vector<16x16xbf16>
    %cst_33 = arith.constant dense<0.000000e+00> : vector<16x16xf32>
    %31 = tpu.matmul %29, %30, %cst_33 {dimension_numbers = #tpu.dot_dimension_numbers<[1], [1], [0], [0], [0, 0, 1, 0], [], []>} : vector<16x16xbf16>, vector<16x16xbf16>, vector<16x16xf32> -> vector<16x16xf32>
    %cst_34 = arith.constant dense<0xFF800000> : vector<16xf32>
    %32 = vector.multi_reduction <maximumf>, %31, %cst_34 [1] : vector<16x16xf32> to vector<16xf32>
    %33 = vector.shape_cast %32 : vector<16xf32> to vector<16x1xf32>
    %34 = vector.broadcast %33 : vector<16x1xf32> to vector<16x16xf32>
    %35 = arith.subf %31, %34 : vector<16x16xf32>
    %36 = math.exp %35 : vector<16x16xf32>
    %cst_35 = arith.constant dense<0.000000e+00> : vector<16xf32>
    %37 = vector.multi_reduction <add>, %36, %cst_35 [1] : vector<16x16xf32> to vector<16xf32>
    %38 = vector.shape_cast %37 : vector<16xf32> to vector<16x1xf32>
    %39 = tpu.reciprocal %38 {approx = true} : vector<16x1xf32> -> vector<16x1xf32>
    %40 = vector.broadcast %39 : vector<16x1xf32> to vector<16x16xf32>
    %41 = arith.mulf %36, %40 : vector<16x16xf32>
    %42 = arith.truncf %41 : vector<16x16xf32> to vector<16x16xbf16>
    %43 = arith.truncf %28 : vector<16x16xf32> to vector<16x16xbf16>
    %cst_36 = arith.constant dense<0.000000e+00> : vector<16x16xf32>
    %44 = tpu.matmul %42, %43, %cst_36 {dimension_numbers = #tpu.dot_dimension_numbers<[1], [0], [0], [1], [0, 0, 1, 1], [], []>} : vector<16x16xbf16>, vector<16x16xbf16>, vector<16x16xf32> -> vector<16x16xf32>
    %45 = arith.truncf %44 : vector<16x16xf32> to vector<16x16xbf16>
    %c0_37 = arith.constant 0 : index
    %c0_38 = arith.constant 0 : index
    %c0_39 = arith.constant 0 : index
    %c0_40 = arith.constant 0 : index
    %46 = vector.load %arg18[%c0_37, %c0_38, %c0_39, %c0_40] : memref<2x2x16x32xbf16, #tpu.memory_space<vmem>>, vector<1x1x16x32xbf16>
    %47 = vector.shape_cast %46 : vector<1x1x16x32xbf16> to vector<16x32xbf16>
    %cst_41 = arith.constant dense<0.000000e+00> : vector<16x32xf32>
    %48 = tpu.matmul %45, %47, %cst_41 {dimension_numbers = #tpu.dot_dimension_numbers<[1], [0], [0], [1], [0, 0, 1, 1], [], []>} : vector<16x16xbf16>, vector<16x32xbf16>, vector<16x32xf32> -> vector<16x32xf32>
    %c0_42 = arith.constant 0 : index
    %c1 = arith.constant 1 : index
    %c0_43 = arith.constant 0 : index
    %c0_44 = arith.constant 0 : index
    %49 = vector.load %arg19[%c0_42, %c1, %c0_43, %c0_44] : memref<2x2x32x16xbf16, #tpu.memory_space<vmem>>, vector<1x1x32x16xbf16>
    %50 = vector.shape_cast %49 : vector<1x1x32x16xbf16> to vector<32x16xbf16>
    %cst_45 = arith.constant dense<0.000000e+00> : vector<16x16xf32>
    %51 = tpu.matmul %7, %50, %cst_45 {dimension_numbers = #tpu.dot_dimension_numbers<[1], [0], [0], [1], [0, 0, 1, 1], [], []>} : vector<16x32xbf16>, vector<32x16xbf16>, vector<16x16xf32> -> vector<16x16xf32>
    %c0_46 = arith.constant 0 : index
    %c1_47 = arith.constant 1 : index
    %c0_48 = arith.constant 0 : index
    %c0_49 = arith.constant 0 : index
    %52 = vector.load %arg11[%c0_46, %c1_47, %c0_48, %c0_49] : memref<2x2x1x16xf32, #tpu.memory_space<vmem>>, vector<1x1x1x16xf32>
    %53 = vector.shape_cast %52 : vector<1x1x1x16xf32> to vector<1x16xf32>
    %54 = vector.broadcast %53 : vector<1x16xf32> to vector<16x16xf32>
    %55 = arith.addf %51, %54 : vector<16x16xf32>
    %c0_50 = arith.constant 0 : index
    %c1_51 = arith.constant 1 : index
    %c0_52 = arith.constant 0 : index
    %c0_53 = arith.constant 0 : index
    %56 = vector.load %arg17[%c0_50, %c1_51, %c0_52, %c0_53] : memref<2x2x32x16xbf16, #tpu.memory_space<vmem>>, vector<1x1x32x16xbf16>
    %57 = vector.shape_cast %56 : vector<1x1x32x16xbf16> to vector<32x16xbf16>
    %cst_54 = arith.constant dense<0.000000e+00> : vector<16x16xf32>
    %58 = tpu.matmul %7, %57, %cst_54 {dimension_numbers = #tpu.dot_dimension_numbers<[1], [0], [0], [1], [0, 0, 1, 1], [], []>} : vector<16x32xbf16>, vector<32x16xbf16>, vector<16x16xf32> -> vector<16x16xf32>
    %c0_55 = arith.constant 0 : index
    %c1_56 = arith.constant 1 : index
    %c0_57 = arith.constant 0 : index
    %c0_58 = arith.constant 0 : index
    %59 = vector.load %arg9[%c0_55, %c1_56, %c0_57, %c0_58] : memref<2x2x1x16xf32, #tpu.memory_space<vmem>>, vector<1x1x1x16xf32>
    %60 = vector.shape_cast %59 : vector<1x1x1x16xf32> to vector<1x16xf32>
    %61 = vector.broadcast %60 : vector<1x16xf32> to vector<16x16xf32>
    %62 = arith.addf %58, %61 : vector<16x16xf32>
    %c0_59 = arith.constant 0 : index
    %c1_60 = arith.constant 1 : index
    %c0_61 = arith.constant 0 : index
    %c0_62 = arith.constant 0 : index
    %63 = vector.load %arg20[%c0_59, %c1_60, %c0_61, %c0_62] : memref<2x2x32x16xbf16, #tpu.memory_space<vmem>>, vector<1x1x32x16xbf16>
    %64 = vector.shape_cast %63 : vector<1x1x32x16xbf16> to vector<32x16xbf16>
    %cst_63 = arith.constant dense<0.000000e+00> : vector<16x16xf32>
    %65 = tpu.matmul %7, %64, %cst_63 {dimension_numbers = #tpu.dot_dimension_numbers<[1], [0], [0], [1], [0, 0, 1, 1], [], []>} : vector<16x32xbf16>, vector<32x16xbf16>, vector<16x16xf32> -> vector<16x16xf32>
    %c0_64 = arith.constant 0 : index
    %c1_65 = arith.constant 1 : index
    %c0_66 = arith.constant 0 : index
    %c0_67 = arith.constant 0 : index
    %66 = vector.load %arg12[%c0_64, %c1_65, %c0_66, %c0_67] : memref<2x2x1x16xf32, #tpu.memory_space<vmem>>, vector<1x1x1x16xf32>
    %67 = vector.shape_cast %66 : vector<1x1x1x16xf32> to vector<1x16xf32>
    %68 = vector.broadcast %67 : vector<1x16xf32> to vector<16x16xf32>
    %69 = arith.addf %65, %68 : vector<16x16xf32>
    %70 = arith.truncf %55 : vector<16x16xf32> to vector<16x16xbf16>
    %71 = arith.truncf %62 : vector<16x16xf32> to vector<16x16xbf16>
    %cst_68 = arith.constant dense<0.000000e+00> : vector<16x16xf32>
    %72 = tpu.matmul %70, %71, %cst_68 {dimension_numbers = #tpu.dot_dimension_numbers<[1], [1], [0], [0], [0, 0, 1, 0], [], []>} : vector<16x16xbf16>, vector<16x16xbf16>, vector<16x16xf32> -> vector<16x16xf32>
    %cst_69 = arith.constant dense<0xFF800000> : vector<16xf32>
    %73 = vector.multi_reduction <maximumf>, %72, %cst_69 [1] : vector<16x16xf32> to vector<16xf32>
    %74 = vector.shape_cast %73 : vector<16xf32> to vector<16x1xf32>
    %75 = vector.broadcast %74 : vector<16x1xf32> to vector<16x16xf32>
    %76 = arith.subf %72, %75 : vector<16x16xf32>
    %77 = math.exp %76 : vector<16x16xf32>
    %cst_70 = arith.constant dense<0.000000e+00> : vector<16xf32>
    %78 = vector.multi_reduction <add>, %77, %cst_70 [1] : vector<16x16xf32> to vector<16xf32>
    %79 = vector.shape_cast %78 : vector<16xf32> to vector<16x1xf32>
    %80 = tpu.reciprocal %79 {approx = true} : vector<16x1xf32> -> vector<16x1xf32>
    %81 = vector.broadcast %80 : vector<16x1xf32> to vector<16x16xf32>
    %82 = arith.mulf %77, %81 : vector<16x16xf32>
    %83 = arith.truncf %82 : vector<16x16xf32> to vector<16x16xbf16>
    %84 = arith.truncf %69 : vector<16x16xf32> to vector<16x16xbf16>
    %cst_71 = arith.constant dense<0.000000e+00> : vector<16x16xf32>
    %85 = tpu.matmul %83, %84, %cst_71 {dimension_numbers = #tpu.dot_dimension_numbers<[1], [0], [0], [1], [0, 0, 1, 1], [], []>} : vector<16x16xbf16>, vector<16x16xbf16>, vector<16x16xf32> -> vector<16x16xf32>
    %86 = arith.truncf %85 : vector<16x16xf32> to vector<16x16xbf16>
    %c0_72 = arith.constant 0 : index
    %c1_73 = arith.constant 1 : index
    %c0_74 = arith.constant 0 : index
    %c0_75 = arith.constant 0 : index
    %87 = vector.load %arg18[%c0_72, %c1_73, %c0_74, %c0_75] : memref<2x2x16x32xbf16, #tpu.memory_space<vmem>>, vector<1x1x16x32xbf16>
    %88 = vector.shape_cast %87 : vector<1x1x16x32xbf16> to vector<16x32xbf16>
    %cst_76 = arith.constant dense<0.000000e+00> : vector<16x32xf32>
    %89 = tpu.matmul %86, %88, %cst_76 {dimension_numbers = #tpu.dot_dimension_numbers<[1], [0], [0], [1], [0, 0, 1, 1], [], []>} : vector<16x16xbf16>, vector<16x32xbf16>, vector<16x32xf32> -> vector<16x32xf32>
    %90 = arith.addf %48, %89 : vector<16x32xf32>
    %c0_77 = arith.constant 0 : index
    %c0_78 = arith.constant 0 : index
    %c0_79 = arith.constant 0 : index
    %91 = vector.load %arg10[%c0_77, %c0_78, %c0_79] : memref<2x1x32xf32, #tpu.memory_space<vmem>>, vector<1x1x32xf32>
    %92 = vector.shape_cast %91 : vector<1x1x32xf32> to vector<1x32xf32>
    %93 = vector.broadcast %92 : vector<1x32xf32> to vector<16x32xf32>
    %94 = arith.addf %90, %93 : vector<16x32xf32>
    %95 = arith.addf %6, %94 : vector<16x32xf32>
    %c0_80 = arith.constant 0 : index
    %c0_81 = arith.constant 0 : index
    %c0_82 = arith.constant 0 : index
    %96 = vector.load %arg13[%c0_80, %c0_81, %c0_82] : memref<2x1x32xf32, #tpu.memory_space<vmem>>, vector<1x1x32xf32>
    %97 = vector.shape_cast %96 : vector<1x1x32xf32> to vector<1x32xf32>
    %c0_83 = arith.constant 0 : index
    %c0_84 = arith.constant 0 : index
    %c0_85 = arith.constant 0 : index
    %98 = vector.load %arg7[%c0_83, %c0_84, %c0_85] : memref<2x1x32xf32, #tpu.memory_space<vmem>>, vector<1x1x32xf32>
    %99 = vector.shape_cast %98 : vector<1x1x32xf32> to vector<1x32xf32>
    %cst_86 = arith.constant dense<0.000000e+00> : vector<16xf32>
    %100 = vector.multi_reduction <add>, %95, %cst_86 [1] : vector<16x32xf32> to vector<16xf32>
    %101 = vector.shape_cast %100 : vector<16xf32> to vector<16x1xf32>
    %cst_87 = arith.constant 3.200000e+01 : f32
    %102 = vector.broadcast %cst_87 : f32 to vector<16x1xf32>
    %103 = arith.divf %101, %102 : vector<16x1xf32>
    %104 = vector.broadcast %103 : vector<16x1xf32> to vector<16x32xf32>
    %105 = arith.subf %95, %104 : vector<16x32xf32>
    %106 = arith.mulf %105, %105 : vector<16x32xf32>
    %cst_88 = arith.constant dense<0.000000e+00> : vector<16xf32>
    %107 = vector.multi_reduction <add>, %106, %cst_88 [1] : vector<16x32xf32> to vector<16xf32>
    %108 = vector.shape_cast %107 : vector<16xf32> to vector<16x1xf32>
    %cst_89 = arith.constant 3.200000e+01 : f32
    %109 = vector.broadcast %cst_89 : f32 to vector<16x1xf32>
    %110 = arith.divf %108, %109 : vector<16x1xf32>
    %111 = vector.broadcast %103 : vector<16x1xf32> to vector<16x32xf32>
    %112 = arith.subf %95, %111 : vector<16x32xf32>
    %cst_90 = arith.constant 9.99999974E-6 : f32
    %113 = vector.broadcast %cst_90 : f32 to vector<16x1xf32>
    %114 = arith.addf %110, %113 : vector<16x1xf32>
    %115 = math.rsqrt %114 : vector<16x1xf32>
    %116 = vector.broadcast %115 : vector<16x1xf32> to vector<16x32xf32>
    %117 = arith.mulf %112, %116 : vector<16x32xf32>
    %118 = vector.broadcast %97 : vector<1x32xf32> to vector<16x32xf32>
    %119 = arith.mulf %117, %118 : vector<16x32xf32>
    %120 = vector.broadcast %99 : vector<1x32xf32> to vector<16x32xf32>
    %121 = arith.addf %119, %120 : vector<16x32xf32>
    %122 = arith.truncf %121 : vector<16x32xf32> to vector<16x32xbf16>
    %c0_91 = arith.constant 0 : index
    %c0_92 = arith.constant 0 : index
    %c0_93 = arith.constant 0 : index
    %123 = vector.load %arg15[%c0_91, %c0_92, %c0_93] : memref<2x32x64xbf16, #tpu.memory_space<vmem>>, vector<1x32x64xbf16>
    %124 = vector.shape_cast %123 : vector<1x32x64xbf16> to vector<32x64xbf16>
    %cst_94 = arith.constant dense<0.000000e+00> : vector<16x64xf32>
    %125 = tpu.matmul %122, %124, %cst_94 {dimension_numbers = #tpu.dot_dimension_numbers<[1], [0], [0], [1], [0, 0, 1, 1], [], []>} : vector<16x32xbf16>, vector<32x64xbf16>, vector<16x64xf32> -> vector<16x64xf32>
    %c0_95 = arith.constant 0 : index
    %c0_96 = arith.constant 0 : index
    %c0_97 = arith.constant 0 : index
    %126 = vector.load %arg5[%c0_95, %c0_96, %c0_97] : memref<2x1x64xf32, #tpu.memory_space<vmem>>, vector<1x1x64xf32>
    %127 = vector.shape_cast %126 : vector<1x1x64xf32> to vector<1x64xf32>
    %128 = vector.broadcast %127 : vector<1x64xf32> to vector<16x64xf32>
    %129 = arith.addf %125, %128 : vector<16x64xf32>
    %cst_98 = arith.constant 0.000000e+00 : f32
    %130 = vector.broadcast %cst_98 : f32 to vector<16x64xf32>
    %131 = arith.maximumf %129, %130 : vector<16x64xf32>
    %132 = arith.truncf %131 : vector<16x64xf32> to vector<16x64xbf16>
    %c0_99 = arith.constant 0 : index
    %c0_100 = arith.constant 0 : index
    %c0_101 = arith.constant 0 : index
    %133 = vector.load %arg16[%c0_99, %c0_100, %c0_101] : memref<2x64x32xbf16, #tpu.memory_space<vmem>>, vector<1x64x32xbf16>
    %134 = vector.shape_cast %133 : vector<1x64x32xbf16> to vector<64x32xbf16>
    %cst_102 = arith.constant dense<0.000000e+00> : vector<16x32xf32>
    %135 = tpu.matmul %132, %134, %cst_102 {dimension_numbers = #tpu.dot_dimension_numbers<[1], [0], [0], [1], [0, 0, 1, 1], [], []>} : vector<16x64xbf16>, vector<64x32xbf16>, vector<16x32xf32> -> vector<16x32xf32>
    %c0_103 = arith.constant 0 : index
    %c0_104 = arith.constant 0 : index
    %c0_105 = arith.constant 0 : index
    %136 = vector.load %arg6[%c0_103, %c0_104, %c0_105] : memref<2x1x32xf32, #tpu.memory_space<vmem>>, vector<1x1x32xf32>
    %137 = vector.shape_cast %136 : vector<1x1x32xf32> to vector<1x32xf32>
    %138 = vector.broadcast %137 : vector<1x32xf32> to vector<16x32xf32>
    %139 = arith.addf %135, %138 : vector<16x32xf32>
    %140 = arith.addf %121, %139 : vector<16x32xf32>
    %c0_106 = arith.constant 0 : index
    %c0_107 = arith.constant 0 : index
    %c0_108 = arith.constant 0 : index
    %141 = vector.load %arg14[%c0_106, %c0_107, %c0_108] : memref<2x1x32xf32, #tpu.memory_space<vmem>>, vector<1x1x32xf32>
    %142 = vector.shape_cast %141 : vector<1x1x32xf32> to vector<1x32xf32>
    %c0_109 = arith.constant 0 : index
    %c0_110 = arith.constant 0 : index
    %c0_111 = arith.constant 0 : index
    %143 = vector.load %arg8[%c0_109, %c0_110, %c0_111] : memref<2x1x32xf32, #tpu.memory_space<vmem>>, vector<1x1x32xf32>
    %144 = vector.shape_cast %143 : vector<1x1x32xf32> to vector<1x32xf32>
    %cst_112 = arith.constant dense<0.000000e+00> : vector<16xf32>
    %145 = vector.multi_reduction <add>, %140, %cst_112 [1] : vector<16x32xf32> to vector<16xf32>
    %146 = vector.shape_cast %145 : vector<16xf32> to vector<16x1xf32>
    %cst_113 = arith.constant 3.200000e+01 : f32
    %147 = vector.broadcast %cst_113 : f32 to vector<16x1xf32>
    %148 = arith.divf %146, %147 : vector<16x1xf32>
    %149 = vector.broadcast %148 : vector<16x1xf32> to vector<16x32xf32>
    %150 = arith.subf %140, %149 : vector<16x32xf32>
    %151 = arith.mulf %150, %150 : vector<16x32xf32>
    %cst_114 = arith.constant dense<0.000000e+00> : vector<16xf32>
    %152 = vector.multi_reduction <add>, %151, %cst_114 [1] : vector<16x32xf32> to vector<16xf32>
    %153 = vector.shape_cast %152 : vector<16xf32> to vector<16x1xf32>
    %cst_115 = arith.constant 3.200000e+01 : f32
    %154 = vector.broadcast %cst_115 : f32 to vector<16x1xf32>
    %155 = arith.divf %153, %154 : vector<16x1xf32>
    %156 = vector.broadcast %148 : vector<16x1xf32> to vector<16x32xf32>
    %157 = arith.subf %140, %156 : vector<16x32xf32>
    %cst_116 = arith.constant 9.99999974E-6 : f32
    %158 = vector.broadcast %cst_116 : f32 to vector<16x1xf32>
    %159 = arith.addf %155, %158 : vector<16x1xf32>
    %160 = math.rsqrt %159 : vector<16x1xf32>
    %161 = vector.broadcast %160 : vector<16x1xf32> to vector<16x32xf32>
    %162 = arith.mulf %157, %161 : vector<16x32xf32>
    %163 = vector.broadcast %142 : vector<1x32xf32> to vector<16x32xf32>
    %164 = arith.mulf %162, %163 : vector<16x32xf32>
    %165 = vector.broadcast %144 : vector<1x32xf32> to vector<16x32xf32>
    %166 = arith.addf %164, %165 : vector<16x32xf32>
    %167 = arith.truncf %166 : vector<16x32xf32> to vector<16x32xbf16>
    %c1_117 = arith.constant 1 : index
    %c0_118 = arith.constant 0 : index
    %c0_119 = arith.constant 0 : index
    %c0_120 = arith.constant 0 : index
    %168 = vector.load %arg19[%c1_117, %c0_118, %c0_119, %c0_120] : memref<2x2x32x16xbf16, #tpu.memory_space<vmem>>, vector<1x1x32x16xbf16>
    %169 = vector.shape_cast %168 : vector<1x1x32x16xbf16> to vector<32x16xbf16>
    %cst_121 = arith.constant dense<0.000000e+00> : vector<16x16xf32>
    %170 = tpu.matmul %167, %169, %cst_121 {dimension_numbers = #tpu.dot_dimension_numbers<[1], [0], [0], [1], [0, 0, 1, 1], [], []>} : vector<16x32xbf16>, vector<32x16xbf16>, vector<16x16xf32> -> vector<16x16xf32>
    %c1_122 = arith.constant 1 : index
    %c0_123 = arith.constant 0 : index
    %c0_124 = arith.constant 0 : index
    %c0_125 = arith.constant 0 : index
    %171 = vector.load %arg11[%c1_122, %c0_123, %c0_124, %c0_125] : memref<2x2x1x16xf32, #tpu.memory_space<vmem>>, vector<1x1x1x16xf32>
    %172 = vector.shape_cast %171 : vector<1x1x1x16xf32> to vector<1x16xf32>
    %173 = vector.broadcast %172 : vector<1x16xf32> to vector<16x16xf32>
    %174 = arith.addf %170, %173 : vector<16x16xf32>
    %c1_126 = arith.constant 1 : index
    %c0_127 = arith.constant 0 : index
    %c0_128 = arith.constant 0 : index
    %c0_129 = arith.constant 0 : index
    %175 = vector.load %arg17[%c1_126, %c0_127, %c0_128, %c0_129] : memref<2x2x32x16xbf16, #tpu.memory_space<vmem>>, vector<1x1x32x16xbf16>
    %176 = vector.shape_cast %175 : vector<1x1x32x16xbf16> to vector<32x16xbf16>
    %cst_130 = arith.constant dense<0.000000e+00> : vector<16x16xf32>
    %177 = tpu.matmul %167, %176, %cst_130 {dimension_numbers = #tpu.dot_dimension_numbers<[1], [0], [0], [1], [0, 0, 1, 1], [], []>} : vector<16x32xbf16>, vector<32x16xbf16>, vector<16x16xf32> -> vector<16x16xf32>
    %c1_131 = arith.constant 1 : index
    %c0_132 = arith.constant 0 : index
    %c0_133 = arith.constant 0 : index
    %c0_134 = arith.constant 0 : index
    %178 = vector.load %arg9[%c1_131, %c0_132, %c0_133, %c0_134] : memref<2x2x1x16xf32, #tpu.memory_space<vmem>>, vector<1x1x1x16xf32>
    %179 = vector.shape_cast %178 : vector<1x1x1x16xf32> to vector<1x16xf32>
    %180 = vector.broadcast %179 : vector<1x16xf32> to vector<16x16xf32>
    %181 = arith.addf %177, %180 : vector<16x16xf32>
    %c1_135 = arith.constant 1 : index
    %c0_136 = arith.constant 0 : index
    %c0_137 = arith.constant 0 : index
    %c0_138 = arith.constant 0 : index
    %182 = vector.load %arg20[%c1_135, %c0_136, %c0_137, %c0_138] : memref<2x2x32x16xbf16, #tpu.memory_space<vmem>>, vector<1x1x32x16xbf16>
    %183 = vector.shape_cast %182 : vector<1x1x32x16xbf16> to vector<32x16xbf16>
    %cst_139 = arith.constant dense<0.000000e+00> : vector<16x16xf32>
    %184 = tpu.matmul %167, %183, %cst_139 {dimension_numbers = #tpu.dot_dimension_numbers<[1], [0], [0], [1], [0, 0, 1, 1], [], []>} : vector<16x32xbf16>, vector<32x16xbf16>, vector<16x16xf32> -> vector<16x16xf32>
    %c1_140 = arith.constant 1 : index
    %c0_141 = arith.constant 0 : index
    %c0_142 = arith.constant 0 : index
    %c0_143 = arith.constant 0 : index
    %185 = vector.load %arg12[%c1_140, %c0_141, %c0_142, %c0_143] : memref<2x2x1x16xf32, #tpu.memory_space<vmem>>, vector<1x1x1x16xf32>
    %186 = vector.shape_cast %185 : vector<1x1x1x16xf32> to vector<1x16xf32>
    %187 = vector.broadcast %186 : vector<1x16xf32> to vector<16x16xf32>
    %188 = arith.addf %184, %187 : vector<16x16xf32>
    %189 = arith.truncf %174 : vector<16x16xf32> to vector<16x16xbf16>
    %190 = arith.truncf %181 : vector<16x16xf32> to vector<16x16xbf16>
    %cst_144 = arith.constant dense<0.000000e+00> : vector<16x16xf32>
    %191 = tpu.matmul %189, %190, %cst_144 {dimension_numbers = #tpu.dot_dimension_numbers<[1], [1], [0], [0], [0, 0, 1, 0], [], []>} : vector<16x16xbf16>, vector<16x16xbf16>, vector<16x16xf32> -> vector<16x16xf32>
    %cst_145 = arith.constant dense<0xFF800000> : vector<16xf32>
    %192 = vector.multi_reduction <maximumf>, %191, %cst_145 [1] : vector<16x16xf32> to vector<16xf32>
    %193 = vector.shape_cast %192 : vector<16xf32> to vector<16x1xf32>
    %194 = vector.broadcast %193 : vector<16x1xf32> to vector<16x16xf32>
    %195 = arith.subf %191, %194 : vector<16x16xf32>
    %196 = math.exp %195 : vector<16x16xf32>
    %cst_146 = arith.constant dense<0.000000e+00> : vector<16xf32>
    %197 = vector.multi_reduction <add>, %196, %cst_146 [1] : vector<16x16xf32> to vector<16xf32>
    %198 = vector.shape_cast %197 : vector<16xf32> to vector<16x1xf32>
    %199 = tpu.reciprocal %198 {approx = true} : vector<16x1xf32> -> vector<16x1xf32>
    %200 = vector.broadcast %199 : vector<16x1xf32> to vector<16x16xf32>
    %201 = arith.mulf %196, %200 : vector<16x16xf32>
    %202 = arith.truncf %201 : vector<16x16xf32> to vector<16x16xbf16>
    %203 = arith.truncf %188 : vector<16x16xf32> to vector<16x16xbf16>
    %cst_147 = arith.constant dense<0.000000e+00> : vector<16x16xf32>
    %204 = tpu.matmul %202, %203, %cst_147 {dimension_numbers = #tpu.dot_dimension_numbers<[1], [0], [0], [1], [0, 0, 1, 1], [], []>} : vector<16x16xbf16>, vector<16x16xbf16>, vector<16x16xf32> -> vector<16x16xf32>
    %205 = arith.truncf %204 : vector<16x16xf32> to vector<16x16xbf16>
    %c1_148 = arith.constant 1 : index
    %c0_149 = arith.constant 0 : index
    %c0_150 = arith.constant 0 : index
    %c0_151 = arith.constant 0 : index
    %206 = vector.load %arg18[%c1_148, %c0_149, %c0_150, %c0_151] : memref<2x2x16x32xbf16, #tpu.memory_space<vmem>>, vector<1x1x16x32xbf16>
    %207 = vector.shape_cast %206 : vector<1x1x16x32xbf16> to vector<16x32xbf16>
    %cst_152 = arith.constant dense<0.000000e+00> : vector<16x32xf32>
    %208 = tpu.matmul %205, %207, %cst_152 {dimension_numbers = #tpu.dot_dimension_numbers<[1], [0], [0], [1], [0, 0, 1, 1], [], []>} : vector<16x16xbf16>, vector<16x32xbf16>, vector<16x32xf32> -> vector<16x32xf32>
    %c1_153 = arith.constant 1 : index
    %c1_154 = arith.constant 1 : index
    %c0_155 = arith.constant 0 : index
    %c0_156 = arith.constant 0 : index
    %209 = vector.load %arg19[%c1_153, %c1_154, %c0_155, %c0_156] : memref<2x2x32x16xbf16, #tpu.memory_space<vmem>>, vector<1x1x32x16xbf16>
    %210 = vector.shape_cast %209 : vector<1x1x32x16xbf16> to vector<32x16xbf16>
    %cst_157 = arith.constant dense<0.000000e+00> : vector<16x16xf32>
    %211 = tpu.matmul %167, %210, %cst_157 {dimension_numbers = #tpu.dot_dimension_numbers<[1], [0], [0], [1], [0, 0, 1, 1], [], []>} : vector<16x32xbf16>, vector<32x16xbf16>, vector<16x16xf32> -> vector<16x16xf32>
    %c1_158 = arith.constant 1 : index
    %c1_159 = arith.constant 1 : index
    %c0_160 = arith.constant 0 : index
    %c0_161 = arith.constant 0 : index
    %212 = vector.load %arg11[%c1_158, %c1_159, %c0_160, %c0_161] : memref<2x2x1x16xf32, #tpu.memory_space<vmem>>, vector<1x1x1x16xf32>
    %213 = vector.shape_cast %212 : vector<1x1x1x16xf32> to vector<1x16xf32>
    %214 = vector.broadcast %213 : vector<1x16xf32> to vector<16x16xf32>
    %215 = arith.addf %211, %214 : vector<16x16xf32>
    %c1_162 = arith.constant 1 : index
    %c1_163 = arith.constant 1 : index
    %c0_164 = arith.constant 0 : index
    %c0_165 = arith.constant 0 : index
    %216 = vector.load %arg17[%c1_162, %c1_163, %c0_164, %c0_165] : memref<2x2x32x16xbf16, #tpu.memory_space<vmem>>, vector<1x1x32x16xbf16>
    %217 = vector.shape_cast %216 : vector<1x1x32x16xbf16> to vector<32x16xbf16>
    %cst_166 = arith.constant dense<0.000000e+00> : vector<16x16xf32>
    %218 = tpu.matmul %167, %217, %cst_166 {dimension_numbers = #tpu.dot_dimension_numbers<[1], [0], [0], [1], [0, 0, 1, 1], [], []>} : vector<16x32xbf16>, vector<32x16xbf16>, vector<16x16xf32> -> vector<16x16xf32>
    %c1_167 = arith.constant 1 : index
    %c1_168 = arith.constant 1 : index
    %c0_169 = arith.constant 0 : index
    %c0_170 = arith.constant 0 : index
    %219 = vector.load %arg9[%c1_167, %c1_168, %c0_169, %c0_170] : memref<2x2x1x16xf32, #tpu.memory_space<vmem>>, vector<1x1x1x16xf32>
    %220 = vector.shape_cast %219 : vector<1x1x1x16xf32> to vector<1x16xf32>
    %221 = vector.broadcast %220 : vector<1x16xf32> to vector<16x16xf32>
    %222 = arith.addf %218, %221 : vector<16x16xf32>
    %c1_171 = arith.constant 1 : index
    %c1_172 = arith.constant 1 : index
    %c0_173 = arith.constant 0 : index
    %c0_174 = arith.constant 0 : index
    %223 = vector.load %arg20[%c1_171, %c1_172, %c0_173, %c0_174] : memref<2x2x32x16xbf16, #tpu.memory_space<vmem>>, vector<1x1x32x16xbf16>
    %224 = vector.shape_cast %223 : vector<1x1x32x16xbf16> to vector<32x16xbf16>
    %cst_175 = arith.constant dense<0.000000e+00> : vector<16x16xf32>
    %225 = tpu.matmul %167, %224, %cst_175 {dimension_numbers = #tpu.dot_dimension_numbers<[1], [0], [0], [1], [0, 0, 1, 1], [], []>} : vector<16x32xbf16>, vector<32x16xbf16>, vector<16x16xf32> -> vector<16x16xf32>
    %c1_176 = arith.constant 1 : index
    %c1_177 = arith.constant 1 : index
    %c0_178 = arith.constant 0 : index
    %c0_179 = arith.constant 0 : index
    %226 = vector.load %arg12[%c1_176, %c1_177, %c0_178, %c0_179] : memref<2x2x1x16xf32, #tpu.memory_space<vmem>>, vector<1x1x1x16xf32>
    %227 = vector.shape_cast %226 : vector<1x1x1x16xf32> to vector<1x16xf32>
    %228 = vector.broadcast %227 : vector<1x16xf32> to vector<16x16xf32>
    %229 = arith.addf %225, %228 : vector<16x16xf32>
    %230 = arith.truncf %215 : vector<16x16xf32> to vector<16x16xbf16>
    %231 = arith.truncf %222 : vector<16x16xf32> to vector<16x16xbf16>
    %cst_180 = arith.constant dense<0.000000e+00> : vector<16x16xf32>
    %232 = tpu.matmul %230, %231, %cst_180 {dimension_numbers = #tpu.dot_dimension_numbers<[1], [1], [0], [0], [0, 0, 1, 0], [], []>} : vector<16x16xbf16>, vector<16x16xbf16>, vector<16x16xf32> -> vector<16x16xf32>
    %cst_181 = arith.constant dense<0xFF800000> : vector<16xf32>
    %233 = vector.multi_reduction <maximumf>, %232, %cst_181 [1] : vector<16x16xf32> to vector<16xf32>
    %234 = vector.shape_cast %233 : vector<16xf32> to vector<16x1xf32>
    %235 = vector.broadcast %234 : vector<16x1xf32> to vector<16x16xf32>
    %236 = arith.subf %232, %235 : vector<16x16xf32>
    %237 = math.exp %236 : vector<16x16xf32>
    %cst_182 = arith.constant dense<0.000000e+00> : vector<16xf32>
    %238 = vector.multi_reduction <add>, %237, %cst_182 [1] : vector<16x16xf32> to vector<16xf32>
    %239 = vector.shape_cast %238 : vector<16xf32> to vector<16x1xf32>
    %240 = tpu.reciprocal %239 {approx = true} : vector<16x1xf32> -> vector<16x1xf32>
    %241 = vector.broadcast %240 : vector<16x1xf32> to vector<16x16xf32>
    %242 = arith.mulf %237, %241 : vector<16x16xf32>
    %243 = arith.truncf %242 : vector<16x16xf32> to vector<16x16xbf16>
    %244 = arith.truncf %229 : vector<16x16xf32> to vector<16x16xbf16>
    %cst_183 = arith.constant dense<0.000000e+00> : vector<16x16xf32>
    %245 = tpu.matmul %243, %244, %cst_183 {dimension_numbers = #tpu.dot_dimension_numbers<[1], [0], [0], [1], [0, 0, 1, 1], [], []>} : vector<16x16xbf16>, vector<16x16xbf16>, vector<16x16xf32> -> vector<16x16xf32>
    %246 = arith.truncf %245 : vector<16x16xf32> to vector<16x16xbf16>
    %c1_184 = arith.constant 1 : index
    %c1_185 = arith.constant 1 : index
    %c0_186 = arith.constant 0 : index
    %c0_187 = arith.constant 0 : index
    %247 = vector.load %arg18[%c1_184, %c1_185, %c0_186, %c0_187] : memref<2x2x16x32xbf16, #tpu.memory_space<vmem>>, vector<1x1x16x32xbf16>
    %248 = vector.shape_cast %247 : vector<1x1x16x32xbf16> to vector<16x32xbf16>
    %cst_188 = arith.constant dense<0.000000e+00> : vector<16x32xf32>
    %249 = tpu.matmul %246, %248, %cst_188 {dimension_numbers = #tpu.dot_dimension_numbers<[1], [0], [0], [1], [0, 0, 1, 1], [], []>} : vector<16x16xbf16>, vector<16x32xbf16>, vector<16x32xf32> -> vector<16x32xf32>
    %250 = arith.addf %208, %249 : vector<16x32xf32>
    %c1_189 = arith.constant 1 : index
    %c0_190 = arith.constant 0 : index
    %c0_191 = arith.constant 0 : index
    %251 = vector.load %arg10[%c1_189, %c0_190, %c0_191] : memref<2x1x32xf32, #tpu.memory_space<vmem>>, vector<1x1x32xf32>
    %252 = vector.shape_cast %251 : vector<1x1x32xf32> to vector<1x32xf32>
    %253 = vector.broadcast %252 : vector<1x32xf32> to vector<16x32xf32>
    %254 = arith.addf %250, %253 : vector<16x32xf32>
    %255 = arith.addf %166, %254 : vector<16x32xf32>
    %c1_192 = arith.constant 1 : index
    %c0_193 = arith.constant 0 : index
    %c0_194 = arith.constant 0 : index
    %256 = vector.load %arg13[%c1_192, %c0_193, %c0_194] : memref<2x1x32xf32, #tpu.memory_space<vmem>>, vector<1x1x32xf32>
    %257 = vector.shape_cast %256 : vector<1x1x32xf32> to vector<1x32xf32>
    %c1_195 = arith.constant 1 : index
    %c0_196 = arith.constant 0 : index
    %c0_197 = arith.constant 0 : index
    %258 = vector.load %arg7[%c1_195, %c0_196, %c0_197] : memref<2x1x32xf32, #tpu.memory_space<vmem>>, vector<1x1x32xf32>
    %259 = vector.shape_cast %258 : vector<1x1x32xf32> to vector<1x32xf32>
    %cst_198 = arith.constant dense<0.000000e+00> : vector<16xf32>
    %260 = vector.multi_reduction <add>, %255, %cst_198 [1] : vector<16x32xf32> to vector<16xf32>
    %261 = vector.shape_cast %260 : vector<16xf32> to vector<16x1xf32>
    %cst_199 = arith.constant 3.200000e+01 : f32
    %262 = vector.broadcast %cst_199 : f32 to vector<16x1xf32>
    %263 = arith.divf %261, %262 : vector<16x1xf32>
    %264 = vector.broadcast %263 : vector<16x1xf32> to vector<16x32xf32>
    %265 = arith.subf %255, %264 : vector<16x32xf32>
    %266 = arith.mulf %265, %265 : vector<16x32xf32>
    %cst_200 = arith.constant dense<0.000000e+00> : vector<16xf32>
    %267 = vector.multi_reduction <add>, %266, %cst_200 [1] : vector<16x32xf32> to vector<16xf32>
    %268 = vector.shape_cast %267 : vector<16xf32> to vector<16x1xf32>
    %cst_201 = arith.constant 3.200000e+01 : f32
    %269 = vector.broadcast %cst_201 : f32 to vector<16x1xf32>
    %270 = arith.divf %268, %269 : vector<16x1xf32>
    %271 = vector.broadcast %263 : vector<16x1xf32> to vector<16x32xf32>
    %272 = arith.subf %255, %271 : vector<16x32xf32>
    %cst_202 = arith.constant 9.99999974E-6 : f32
    %273 = vector.broadcast %cst_202 : f32 to vector<16x1xf32>
    %274 = arith.addf %270, %273 : vector<16x1xf32>
    %275 = math.rsqrt %274 : vector<16x1xf32>
    %276 = vector.broadcast %275 : vector<16x1xf32> to vector<16x32xf32>
    %277 = arith.mulf %272, %276 : vector<16x32xf32>
    %278 = vector.broadcast %257 : vector<1x32xf32> to vector<16x32xf32>
    %279 = arith.mulf %277, %278 : vector<16x32xf32>
    %280 = vector.broadcast %259 : vector<1x32xf32> to vector<16x32xf32>
    %281 = arith.addf %279, %280 : vector<16x32xf32>
    %282 = arith.truncf %281 : vector<16x32xf32> to vector<16x32xbf16>
    %c1_203 = arith.constant 1 : index
    %c0_204 = arith.constant 0 : index
    %c0_205 = arith.constant 0 : index
    %283 = vector.load %arg15[%c1_203, %c0_204, %c0_205] : memref<2x32x64xbf16, #tpu.memory_space<vmem>>, vector<1x32x64xbf16>
    %284 = vector.shape_cast %283 : vector<1x32x64xbf16> to vector<32x64xbf16>
    %cst_206 = arith.constant dense<0.000000e+00> : vector<16x64xf32>
    %285 = tpu.matmul %282, %284, %cst_206 {dimension_numbers = #tpu.dot_dimension_numbers<[1], [0], [0], [1], [0, 0, 1, 1], [], []>} : vector<16x32xbf16>, vector<32x64xbf16>, vector<16x64xf32> -> vector<16x64xf32>
    %c1_207 = arith.constant 1 : index
    %c0_208 = arith.constant 0 : index
    %c0_209 = arith.constant 0 : index
    %286 = vector.load %arg5[%c1_207, %c0_208, %c0_209] : memref<2x1x64xf32, #tpu.memory_space<vmem>>, vector<1x1x64xf32>
    %287 = vector.shape_cast %286 : vector<1x1x64xf32> to vector<1x64xf32>
    %288 = vector.broadcast %287 : vector<1x64xf32> to vector<16x64xf32>
    %289 = arith.addf %285, %288 : vector<16x64xf32>
    %cst_210 = arith.constant 0.000000e+00 : f32
    %290 = vector.broadcast %cst_210 : f32 to vector<16x64xf32>
    %291 = arith.maximumf %289, %290 : vector<16x64xf32>
    %292 = arith.truncf %291 : vector<16x64xf32> to vector<16x64xbf16>
    %c1_211 = arith.constant 1 : index
    %c0_212 = arith.constant 0 : index
    %c0_213 = arith.constant 0 : index
    %293 = vector.load %arg16[%c1_211, %c0_212, %c0_213] : memref<2x64x32xbf16, #tpu.memory_space<vmem>>, vector<1x64x32xbf16>
    %294 = vector.shape_cast %293 : vector<1x64x32xbf16> to vector<64x32xbf16>
    %cst_214 = arith.constant dense<0.000000e+00> : vector<16x32xf32>
    %295 = tpu.matmul %292, %294, %cst_214 {dimension_numbers = #tpu.dot_dimension_numbers<[1], [0], [0], [1], [0, 0, 1, 1], [], []>} : vector<16x64xbf16>, vector<64x32xbf16>, vector<16x32xf32> -> vector<16x32xf32>
    %c1_215 = arith.constant 1 : index
    %c0_216 = arith.constant 0 : index
    %c0_217 = arith.constant 0 : index
    %296 = vector.load %arg6[%c1_215, %c0_216, %c0_217] : memref<2x1x32xf32, #tpu.memory_space<vmem>>, vector<1x1x32xf32>
    %297 = vector.shape_cast %296 : vector<1x1x32xf32> to vector<1x32xf32>
    %298 = vector.broadcast %297 : vector<1x32xf32> to vector<16x32xf32>
    %299 = arith.addf %295, %298 : vector<16x32xf32>
    %300 = arith.addf %281, %299 : vector<16x32xf32>
    %c1_218 = arith.constant 1 : index
    %c0_219 = arith.constant 0 : index
    %c0_220 = arith.constant 0 : index
    %301 = vector.load %arg14[%c1_218, %c0_219, %c0_220] : memref<2x1x32xf32, #tpu.memory_space<vmem>>, vector<1x1x32xf32>
    %302 = vector.shape_cast %301 : vector<1x1x32xf32> to vector<1x32xf32>
    %c1_221 = arith.constant 1 : index
    %c0_222 = arith.constant 0 : index
    %c0_223 = arith.constant 0 : index
    %303 = vector.load %arg8[%c1_221, %c0_222, %c0_223] : memref<2x1x32xf32, #tpu.memory_space<vmem>>, vector<1x1x32xf32>
    %304 = vector.shape_cast %303 : vector<1x1x32xf32> to vector<1x32xf32>
    %cst_224 = arith.constant dense<0.000000e+00> : vector<16xf32>
    %305 = vector.multi_reduction <add>, %300, %cst_224 [1] : vector<16x32xf32> to vector<16xf32>
    %306 = vector.shape_cast %305 : vector<16xf32> to vector<16x1xf32>
    %cst_225 = arith.constant 3.200000e+01 : f32
    %307 = vector.broadcast %cst_225 : f32 to vector<16x1xf32>
    %308 = arith.divf %306, %307 : vector<16x1xf32>
    %309 = vector.broadcast %308 : vector<16x1xf32> to vector<16x32xf32>
    %310 = arith.subf %300, %309 : vector<16x32xf32>
    %311 = arith.mulf %310, %310 : vector<16x32xf32>
    %cst_226 = arith.constant dense<0.000000e+00> : vector<16xf32>
    %312 = vector.multi_reduction <add>, %311, %cst_226 [1] : vector<16x32xf32> to vector<16xf32>
    %313 = vector.shape_cast %312 : vector<16xf32> to vector<16x1xf32>
    %cst_227 = arith.constant 3.200000e+01 : f32
    %314 = vector.broadcast %cst_227 : f32 to vector<16x1xf32>
    %315 = arith.divf %313, %314 : vector<16x1xf32>
    %316 = vector.broadcast %308 : vector<16x1xf32> to vector<16x32xf32>
    %317 = arith.subf %300, %316 : vector<16x32xf32>
    %cst_228 = arith.constant 9.99999974E-6 : f32
    %318 = vector.broadcast %cst_228 : f32 to vector<16x1xf32>
    %319 = arith.addf %315, %318 : vector<16x1xf32>
    %320 = math.rsqrt %319 : vector<16x1xf32>
    %321 = vector.broadcast %320 : vector<16x1xf32> to vector<16x32xf32>
    %322 = arith.mulf %317, %321 : vector<16x32xf32>
    %323 = vector.broadcast %302 : vector<1x32xf32> to vector<16x32xf32>
    %324 = arith.mulf %322, %323 : vector<16x32xf32>
    %325 = vector.broadcast %304 : vector<1x32xf32> to vector<16x32xf32>
    %326 = arith.addf %324, %325 : vector<16x32xf32>
    %c0_229 = arith.constant 0 : index
    %c0_230 = arith.constant 0 : index
    %c0_231 = arith.constant 0 : index
    %327 = vector.load %arg2[%c0_229, %c0_230, %c0_231] : memref<1x16x4xf32, #tpu.memory_space<vmem>>, vector<1x16x4xf32>
    %328 = vector.shape_cast %327 : vector<1x16x4xf32> to vector<16x4xf32>
    %329 = arith.truncf %328 : vector<16x4xf32> to vector<16x4xbf16>
    %c0_232 = arith.constant 0 : index
    %c0_233 = arith.constant 0 : index
    %330 = vector.load %arg39[%c0_232, %c0_233] : memref<4x32xbf16, #tpu.memory_space<vmem>>, vector<4x32xbf16>
    %cst_234 = arith.constant dense<0.000000e+00> : vector<16x32xf32>
    %331 = tpu.matmul %329, %330, %cst_234 {dimension_numbers = #tpu.dot_dimension_numbers<[1], [0], [0], [1], [0, 0, 1, 1], [], []>} : vector<16x4xbf16>, vector<4x32xbf16>, vector<16x32xf32> -> vector<16x32xf32>
    %c0_235 = arith.constant 0 : index
    %c0_236 = arith.constant 0 : index
    %332 = vector.load %arg38[%c0_235, %c0_236] : memref<1x32xf32, #tpu.memory_space<vmem>>, vector<1x32xf32>
    %333 = vector.broadcast %332 : vector<1x32xf32> to vector<16x32xf32>
    %334 = arith.addf %331, %333 : vector<16x32xf32>
    %335 = arith.truncf %334 : vector<16x32xf32> to vector<16x32xbf16>
    %c0_237 = arith.constant 0 : index
    %c0_238 = arith.constant 0 : index
    %c0_239 = arith.constant 0 : index
    %c0_240 = arith.constant 0 : index
    %336 = vector.load %arg36[%c0_237, %c0_238, %c0_239, %c0_240] : memref<2x2x32x16xbf16, #tpu.memory_space<vmem>>, vector<1x1x32x16xbf16>
    %337 = vector.shape_cast %336 : vector<1x1x32x16xbf16> to vector<32x16xbf16>
    %cst_241 = arith.constant dense<0.000000e+00> : vector<16x16xf32>
    %338 = tpu.matmul %335, %337, %cst_241 {dimension_numbers = #tpu.dot_dimension_numbers<[1], [0], [0], [1], [0, 0, 1, 1], [], []>} : vector<16x32xbf16>, vector<32x16xbf16>, vector<16x16xf32> -> vector<16x16xf32>
    %c0_242 = arith.constant 0 : index
    %c0_243 = arith.constant 0 : index
    %c0_244 = arith.constant 0 : index
    %c0_245 = arith.constant 0 : index
    %339 = vector.load %arg28[%c0_242, %c0_243, %c0_244, %c0_245] : memref<2x2x1x16xf32, #tpu.memory_space<vmem>>, vector<1x1x1x16xf32>
    %340 = vector.shape_cast %339 : vector<1x1x1x16xf32> to vector<1x16xf32>
    %341 = vector.broadcast %340 : vector<1x16xf32> to vector<16x16xf32>
    %342 = arith.addf %338, %341 : vector<16x16xf32>
    %c0_246 = arith.constant 0 : index
    %c0_247 = arith.constant 0 : index
    %c0_248 = arith.constant 0 : index
    %c0_249 = arith.constant 0 : index
    %343 = vector.load %arg34[%c0_246, %c0_247, %c0_248, %c0_249] : memref<2x2x32x16xbf16, #tpu.memory_space<vmem>>, vector<1x1x32x16xbf16>
    %344 = vector.shape_cast %343 : vector<1x1x32x16xbf16> to vector<32x16xbf16>
    %cst_250 = arith.constant dense<0.000000e+00> : vector<16x16xf32>
    %345 = tpu.matmul %335, %344, %cst_250 {dimension_numbers = #tpu.dot_dimension_numbers<[1], [0], [0], [1], [0, 0, 1, 1], [], []>} : vector<16x32xbf16>, vector<32x16xbf16>, vector<16x16xf32> -> vector<16x16xf32>
    %c0_251 = arith.constant 0 : index
    %c0_252 = arith.constant 0 : index
    %c0_253 = arith.constant 0 : index
    %c0_254 = arith.constant 0 : index
    %346 = vector.load %arg26[%c0_251, %c0_252, %c0_253, %c0_254] : memref<2x2x1x16xf32, #tpu.memory_space<vmem>>, vector<1x1x1x16xf32>
    %347 = vector.shape_cast %346 : vector<1x1x1x16xf32> to vector<1x16xf32>
    %348 = vector.broadcast %347 : vector<1x16xf32> to vector<16x16xf32>
    %349 = arith.addf %345, %348 : vector<16x16xf32>
    %c0_255 = arith.constant 0 : index
    %c0_256 = arith.constant 0 : index
    %c0_257 = arith.constant 0 : index
    %c0_258 = arith.constant 0 : index
    %350 = vector.load %arg37[%c0_255, %c0_256, %c0_257, %c0_258] : memref<2x2x32x16xbf16, #tpu.memory_space<vmem>>, vector<1x1x32x16xbf16>
    %351 = vector.shape_cast %350 : vector<1x1x32x16xbf16> to vector<32x16xbf16>
    %cst_259 = arith.constant dense<0.000000e+00> : vector<16x16xf32>
    %352 = tpu.matmul %335, %351, %cst_259 {dimension_numbers = #tpu.dot_dimension_numbers<[1], [0], [0], [1], [0, 0, 1, 1], [], []>} : vector<16x32xbf16>, vector<32x16xbf16>, vector<16x16xf32> -> vector<16x16xf32>
    %c0_260 = arith.constant 0 : index
    %c0_261 = arith.constant 0 : index
    %c0_262 = arith.constant 0 : index
    %c0_263 = arith.constant 0 : index
    %353 = vector.load %arg29[%c0_260, %c0_261, %c0_262, %c0_263] : memref<2x2x1x16xf32, #tpu.memory_space<vmem>>, vector<1x1x1x16xf32>
    %354 = vector.shape_cast %353 : vector<1x1x1x16xf32> to vector<1x16xf32>
    %355 = vector.broadcast %354 : vector<1x16xf32> to vector<16x16xf32>
    %356 = arith.addf %352, %355 : vector<16x16xf32>
    %357 = arith.truncf %342 : vector<16x16xf32> to vector<16x16xbf16>
    %358 = arith.truncf %349 : vector<16x16xf32> to vector<16x16xbf16>
    %cst_264 = arith.constant dense<0.000000e+00> : vector<16x16xf32>
    %359 = tpu.matmul %357, %358, %cst_264 {dimension_numbers = #tpu.dot_dimension_numbers<[1], [1], [0], [0], [0, 0, 1, 0], [], []>} : vector<16x16xbf16>, vector<16x16xbf16>, vector<16x16xf32> -> vector<16x16xf32>
    %cst_265 = arith.constant dense<0xFF800000> : vector<16xf32>
    %360 = vector.multi_reduction <maximumf>, %359, %cst_265 [1] : vector<16x16xf32> to vector<16xf32>
    %361 = vector.shape_cast %360 : vector<16xf32> to vector<16x1xf32>
    %362 = vector.broadcast %361 : vector<16x1xf32> to vector<16x16xf32>
    %363 = arith.subf %359, %362 : vector<16x16xf32>
    %364 = math.exp %363 : vector<16x16xf32>
    %cst_266 = arith.constant dense<0.000000e+00> : vector<16xf32>
    %365 = vector.multi_reduction <add>, %364, %cst_266 [1] : vector<16x16xf32> to vector<16xf32>
    %366 = vector.shape_cast %365 : vector<16xf32> to vector<16x1xf32>
    %367 = tpu.reciprocal %366 {approx = true} : vector<16x1xf32> -> vector<16x1xf32>
    %368 = vector.broadcast %367 : vector<16x1xf32> to vector<16x16xf32>
    %369 = arith.mulf %364, %368 : vector<16x16xf32>
    %370 = arith.truncf %369 : vector<16x16xf32> to vector<16x16xbf16>
    %371 = arith.truncf %356 : vector<16x16xf32> to vector<16x16xbf16>
    %cst_267 = arith.constant dense<0.000000e+00> : vector<16x16xf32>
    %372 = tpu.matmul %370, %371, %cst_267 {dimension_numbers = #tpu.dot_dimension_numbers<[1], [0], [0], [1], [0, 0, 1, 1], [], []>} : vector<16x16xbf16>, vector<16x16xbf16>, vector<16x16xf32> -> vector<16x16xf32>
    %373 = arith.truncf %372 : vector<16x16xf32> to vector<16x16xbf16>
    %c0_268 = arith.constant 0 : index
    %c0_269 = arith.constant 0 : index
    %c0_270 = arith.constant 0 : index
    %c0_271 = arith.constant 0 : index
    %374 = vector.load %arg35[%c0_268, %c0_269, %c0_270, %c0_271] : memref<2x2x16x32xbf16, #tpu.memory_space<vmem>>, vector<1x1x16x32xbf16>
    %375 = vector.shape_cast %374 : vector<1x1x16x32xbf16> to vector<16x32xbf16>
    %cst_272 = arith.constant dense<0.000000e+00> : vector<16x32xf32>
    %376 = tpu.matmul %373, %375, %cst_272 {dimension_numbers = #tpu.dot_dimension_numbers<[1], [0], [0], [1], [0, 0, 1, 1], [], []>} : vector<16x16xbf16>, vector<16x32xbf16>, vector<16x32xf32> -> vector<16x32xf32>
    %c0_273 = arith.constant 0 : index
    %c1_274 = arith.constant 1 : index
    %c0_275 = arith.constant 0 : index
    %c0_276 = arith.constant 0 : index
    %377 = vector.load %arg36[%c0_273, %c1_274, %c0_275, %c0_276] : memref<2x2x32x16xbf16, #tpu.memory_space<vmem>>, vector<1x1x32x16xbf16>
    %378 = vector.shape_cast %377 : vector<1x1x32x16xbf16> to vector<32x16xbf16>
    %cst_277 = arith.constant dense<0.000000e+00> : vector<16x16xf32>
    %379 = tpu.matmul %335, %378, %cst_277 {dimension_numbers = #tpu.dot_dimension_numbers<[1], [0], [0], [1], [0, 0, 1, 1], [], []>} : vector<16x32xbf16>, vector<32x16xbf16>, vector<16x16xf32> -> vector<16x16xf32>
    %c0_278 = arith.constant 0 : index
    %c1_279 = arith.constant 1 : index
    %c0_280 = arith.constant 0 : index
    %c0_281 = arith.constant 0 : index
    %380 = vector.load %arg28[%c0_278, %c1_279, %c0_280, %c0_281] : memref<2x2x1x16xf32, #tpu.memory_space<vmem>>, vector<1x1x1x16xf32>
    %381 = vector.shape_cast %380 : vector<1x1x1x16xf32> to vector<1x16xf32>
    %382 = vector.broadcast %381 : vector<1x16xf32> to vector<16x16xf32>
    %383 = arith.addf %379, %382 : vector<16x16xf32>
    %c0_282 = arith.constant 0 : index
    %c1_283 = arith.constant 1 : index
    %c0_284 = arith.constant 0 : index
    %c0_285 = arith.constant 0 : index
    %384 = vector.load %arg34[%c0_282, %c1_283, %c0_284, %c0_285] : memref<2x2x32x16xbf16, #tpu.memory_space<vmem>>, vector<1x1x32x16xbf16>
    %385 = vector.shape_cast %384 : vector<1x1x32x16xbf16> to vector<32x16xbf16>
    %cst_286 = arith.constant dense<0.000000e+00> : vector<16x16xf32>
    %386 = tpu.matmul %335, %385, %cst_286 {dimension_numbers = #tpu.dot_dimension_numbers<[1], [0], [0], [1], [0, 0, 1, 1], [], []>} : vector<16x32xbf16>, vector<32x16xbf16>, vector<16x16xf32> -> vector<16x16xf32>
    %c0_287 = arith.constant 0 : index
    %c1_288 = arith.constant 1 : index
    %c0_289 = arith.constant 0 : index
    %c0_290 = arith.constant 0 : index
    %387 = vector.load %arg26[%c0_287, %c1_288, %c0_289, %c0_290] : memref<2x2x1x16xf32, #tpu.memory_space<vmem>>, vector<1x1x1x16xf32>
    %388 = vector.shape_cast %387 : vector<1x1x1x16xf32> to vector<1x16xf32>
    %389 = vector.broadcast %388 : vector<1x16xf32> to vector<16x16xf32>
    %390 = arith.addf %386, %389 : vector<16x16xf32>
    %c0_291 = arith.constant 0 : index
    %c1_292 = arith.constant 1 : index
    %c0_293 = arith.constant 0 : index
    %c0_294 = arith.constant 0 : index
    %391 = vector.load %arg37[%c0_291, %c1_292, %c0_293, %c0_294] : memref<2x2x32x16xbf16, #tpu.memory_space<vmem>>, vector<1x1x32x16xbf16>
    %392 = vector.shape_cast %391 : vector<1x1x32x16xbf16> to vector<32x16xbf16>
    %cst_295 = arith.constant dense<0.000000e+00> : vector<16x16xf32>
    %393 = tpu.matmul %335, %392, %cst_295 {dimension_numbers = #tpu.dot_dimension_numbers<[1], [0], [0], [1], [0, 0, 1, 1], [], []>} : vector<16x32xbf16>, vector<32x16xbf16>, vector<16x16xf32> -> vector<16x16xf32>
    %c0_296 = arith.constant 0 : index
    %c1_297 = arith.constant 1 : index
    %c0_298 = arith.constant 0 : index
    %c0_299 = arith.constant 0 : index
    %394 = vector.load %arg29[%c0_296, %c1_297, %c0_298, %c0_299] : memref<2x2x1x16xf32, #tpu.memory_space<vmem>>, vector<1x1x1x16xf32>
    %395 = vector.shape_cast %394 : vector<1x1x1x16xf32> to vector<1x16xf32>
    %396 = vector.broadcast %395 : vector<1x16xf32> to vector<16x16xf32>
    %397 = arith.addf %393, %396 : vector<16x16xf32>
    %398 = arith.truncf %383 : vector<16x16xf32> to vector<16x16xbf16>
    %399 = arith.truncf %390 : vector<16x16xf32> to vector<16x16xbf16>
    %cst_300 = arith.constant dense<0.000000e+00> : vector<16x16xf32>
    %400 = tpu.matmul %398, %399, %cst_300 {dimension_numbers = #tpu.dot_dimension_numbers<[1], [1], [0], [0], [0, 0, 1, 0], [], []>} : vector<16x16xbf16>, vector<16x16xbf16>, vector<16x16xf32> -> vector<16x16xf32>
    %cst_301 = arith.constant dense<0xFF800000> : vector<16xf32>
    %401 = vector.multi_reduction <maximumf>, %400, %cst_301 [1] : vector<16x16xf32> to vector<16xf32>
    %402 = vector.shape_cast %401 : vector<16xf32> to vector<16x1xf32>
    %403 = vector.broadcast %402 : vector<16x1xf32> to vector<16x16xf32>
    %404 = arith.subf %400, %403 : vector<16x16xf32>
    %405 = math.exp %404 : vector<16x16xf32>
    %cst_302 = arith.constant dense<0.000000e+00> : vector<16xf32>
    %406 = vector.multi_reduction <add>, %405, %cst_302 [1] : vector<16x16xf32> to vector<16xf32>
    %407 = vector.shape_cast %406 : vector<16xf32> to vector<16x1xf32>
    %408 = tpu.reciprocal %407 {approx = true} : vector<16x1xf32> -> vector<16x1xf32>
    %409 = vector.broadcast %408 : vector<16x1xf32> to vector<16x16xf32>
    %410 = arith.mulf %405, %409 : vector<16x16xf32>
    %411 = arith.truncf %410 : vector<16x16xf32> to vector<16x16xbf16>
    %412 = arith.truncf %397 : vector<16x16xf32> to vector<16x16xbf16>
    %cst_303 = arith.constant dense<0.000000e+00> : vector<16x16xf32>
    %413 = tpu.matmul %411, %412, %cst_303 {dimension_numbers = #tpu.dot_dimension_numbers<[1], [0], [0], [1], [0, 0, 1, 1], [], []>} : vector<16x16xbf16>, vector<16x16xbf16>, vector<16x16xf32> -> vector<16x16xf32>
    %414 = arith.truncf %413 : vector<16x16xf32> to vector<16x16xbf16>
    %c0_304 = arith.constant 0 : index
    %c1_305 = arith.constant 1 : index
    %c0_306 = arith.constant 0 : index
    %c0_307 = arith.constant 0 : index
    %415 = vector.load %arg35[%c0_304, %c1_305, %c0_306, %c0_307] : memref<2x2x16x32xbf16, #tpu.memory_space<vmem>>, vector<1x1x16x32xbf16>
    %416 = vector.shape_cast %415 : vector<1x1x16x32xbf16> to vector<16x32xbf16>
    %cst_308 = arith.constant dense<0.000000e+00> : vector<16x32xf32>
    %417 = tpu.matmul %414, %416, %cst_308 {dimension_numbers = #tpu.dot_dimension_numbers<[1], [0], [0], [1], [0, 0, 1, 1], [], []>} : vector<16x16xbf16>, vector<16x32xbf16>, vector<16x32xf32> -> vector<16x32xf32>
    %418 = arith.addf %376, %417 : vector<16x32xf32>
    %c0_309 = arith.constant 0 : index
    %c0_310 = arith.constant 0 : index
    %c0_311 = arith.constant 0 : index
    %419 = vector.load %arg27[%c0_309, %c0_310, %c0_311] : memref<2x1x32xf32, #tpu.memory_space<vmem>>, vector<1x1x32xf32>
    %420 = vector.shape_cast %419 : vector<1x1x32xf32> to vector<1x32xf32>
    %421 = vector.broadcast %420 : vector<1x32xf32> to vector<16x32xf32>
    %422 = arith.addf %418, %421 : vector<16x32xf32>
    %423 = arith.addf %334, %422 : vector<16x32xf32>
    %c0_312 = arith.constant 0 : index
    %c0_313 = arith.constant 0 : index
    %c0_314 = arith.constant 0 : index
    %424 = vector.load %arg30[%c0_312, %c0_313, %c0_314] : memref<2x1x32xf32, #tpu.memory_space<vmem>>, vector<1x1x32xf32>
    %425 = vector.shape_cast %424 : vector<1x1x32xf32> to vector<1x32xf32>
    %c0_315 = arith.constant 0 : index
    %c0_316 = arith.constant 0 : index
    %c0_317 = arith.constant 0 : index
    %426 = vector.load %arg24[%c0_315, %c0_316, %c0_317] : memref<2x1x32xf32, #tpu.memory_space<vmem>>, vector<1x1x32xf32>
    %427 = vector.shape_cast %426 : vector<1x1x32xf32> to vector<1x32xf32>
    %cst_318 = arith.constant dense<0.000000e+00> : vector<16xf32>
    %428 = vector.multi_reduction <add>, %423, %cst_318 [1] : vector<16x32xf32> to vector<16xf32>
    %429 = vector.shape_cast %428 : vector<16xf32> to vector<16x1xf32>
    %cst_319 = arith.constant 3.200000e+01 : f32
    %430 = vector.broadcast %cst_319 : f32 to vector<16x1xf32>
    %431 = arith.divf %429, %430 : vector<16x1xf32>
    %432 = vector.broadcast %431 : vector<16x1xf32> to vector<16x32xf32>
    %433 = arith.subf %423, %432 : vector<16x32xf32>
    %434 = arith.mulf %433, %433 : vector<16x32xf32>
    %cst_320 = arith.constant dense<0.000000e+00> : vector<16xf32>
    %435 = vector.multi_reduction <add>, %434, %cst_320 [1] : vector<16x32xf32> to vector<16xf32>
    %436 = vector.shape_cast %435 : vector<16xf32> to vector<16x1xf32>
    %cst_321 = arith.constant 3.200000e+01 : f32
    %437 = vector.broadcast %cst_321 : f32 to vector<16x1xf32>
    %438 = arith.divf %436, %437 : vector<16x1xf32>
    %439 = vector.broadcast %431 : vector<16x1xf32> to vector<16x32xf32>
    %440 = arith.subf %423, %439 : vector<16x32xf32>
    %cst_322 = arith.constant 9.99999974E-6 : f32
    %441 = vector.broadcast %cst_322 : f32 to vector<16x1xf32>
    %442 = arith.addf %438, %441 : vector<16x1xf32>
    %443 = math.rsqrt %442 : vector<16x1xf32>
    %444 = vector.broadcast %443 : vector<16x1xf32> to vector<16x32xf32>
    %445 = arith.mulf %440, %444 : vector<16x32xf32>
    %446 = vector.broadcast %425 : vector<1x32xf32> to vector<16x32xf32>
    %447 = arith.mulf %445, %446 : vector<16x32xf32>
    %448 = vector.broadcast %427 : vector<1x32xf32> to vector<16x32xf32>
    %449 = arith.addf %447, %448 : vector<16x32xf32>
    %450 = arith.truncf %449 : vector<16x32xf32> to vector<16x32xbf16>
    %c0_323 = arith.constant 0 : index
    %c0_324 = arith.constant 0 : index
    %c0_325 = arith.constant 0 : index
    %451 = vector.load %arg32[%c0_323, %c0_324, %c0_325] : memref<2x32x64xbf16, #tpu.memory_space<vmem>>, vector<1x32x64xbf16>
    %452 = vector.shape_cast %451 : vector<1x32x64xbf16> to vector<32x64xbf16>
    %cst_326 = arith.constant dense<0.000000e+00> : vector<16x64xf32>
    %453 = tpu.matmul %450, %452, %cst_326 {dimension_numbers = #tpu.dot_dimension_numbers<[1], [0], [0], [1], [0, 0, 1, 1], [], []>} : vector<16x32xbf16>, vector<32x64xbf16>, vector<16x64xf32> -> vector<16x64xf32>
    %c0_327 = arith.constant 0 : index
    %c0_328 = arith.constant 0 : index
    %c0_329 = arith.constant 0 : index
    %454 = vector.load %arg22[%c0_327, %c0_328, %c0_329] : memref<2x1x64xf32, #tpu.memory_space<vmem>>, vector<1x1x64xf32>
    %455 = vector.shape_cast %454 : vector<1x1x64xf32> to vector<1x64xf32>
    %456 = vector.broadcast %455 : vector<1x64xf32> to vector<16x64xf32>
    %457 = arith.addf %453, %456 : vector<16x64xf32>
    %cst_330 = arith.constant 0.000000e+00 : f32
    %458 = vector.broadcast %cst_330 : f32 to vector<16x64xf32>
    %459 = arith.maximumf %457, %458 : vector<16x64xf32>
    %460 = arith.truncf %459 : vector<16x64xf32> to vector<16x64xbf16>
    %c0_331 = arith.constant 0 : index
    %c0_332 = arith.constant 0 : index
    %c0_333 = arith.constant 0 : index
    %461 = vector.load %arg33[%c0_331, %c0_332, %c0_333] : memref<2x64x32xbf16, #tpu.memory_space<vmem>>, vector<1x64x32xbf16>
    %462 = vector.shape_cast %461 : vector<1x64x32xbf16> to vector<64x32xbf16>
    %cst_334 = arith.constant dense<0.000000e+00> : vector<16x32xf32>
    %463 = tpu.matmul %460, %462, %cst_334 {dimension_numbers = #tpu.dot_dimension_numbers<[1], [0], [0], [1], [0, 0, 1, 1], [], []>} : vector<16x64xbf16>, vector<64x32xbf16>, vector<16x32xf32> -> vector<16x32xf32>
    %c0_335 = arith.constant 0 : index
    %c0_336 = arith.constant 0 : index
    %c0_337 = arith.constant 0 : index
    %464 = vector.load %arg23[%c0_335, %c0_336, %c0_337] : memref<2x1x32xf32, #tpu.memory_space<vmem>>, vector<1x1x32xf32>
    %465 = vector.shape_cast %464 : vector<1x1x32xf32> to vector<1x32xf32>
    %466 = vector.broadcast %465 : vector<1x32xf32> to vector<16x32xf32>
    %467 = arith.addf %463, %466 : vector<16x32xf32>
    %468 = arith.addf %449, %467 : vector<16x32xf32>
    %c0_338 = arith.constant 0 : index
    %c0_339 = arith.constant 0 : index
    %c0_340 = arith.constant 0 : index
    %469 = vector.load %arg31[%c0_338, %c0_339, %c0_340] : memref<2x1x32xf32, #tpu.memory_space<vmem>>, vector<1x1x32xf32>
    %470 = vector.shape_cast %469 : vector<1x1x32xf32> to vector<1x32xf32>
    %c0_341 = arith.constant 0 : index
    %c0_342 = arith.constant 0 : index
    %c0_343 = arith.constant 0 : index
    %471 = vector.load %arg25[%c0_341, %c0_342, %c0_343] : memref<2x1x32xf32, #tpu.memory_space<vmem>>, vector<1x1x32xf32>
    %472 = vector.shape_cast %471 : vector<1x1x32xf32> to vector<1x32xf32>
    %cst_344 = arith.constant dense<0.000000e+00> : vector<16xf32>
    %473 = vector.multi_reduction <add>, %468, %cst_344 [1] : vector<16x32xf32> to vector<16xf32>
    %474 = vector.shape_cast %473 : vector<16xf32> to vector<16x1xf32>
    %cst_345 = arith.constant 3.200000e+01 : f32
    %475 = vector.broadcast %cst_345 : f32 to vector<16x1xf32>
    %476 = arith.divf %474, %475 : vector<16x1xf32>
    %477 = vector.broadcast %476 : vector<16x1xf32> to vector<16x32xf32>
    %478 = arith.subf %468, %477 : vector<16x32xf32>
    %479 = arith.mulf %478, %478 : vector<16x32xf32>
    %cst_346 = arith.constant dense<0.000000e+00> : vector<16xf32>
    %480 = vector.multi_reduction <add>, %479, %cst_346 [1] : vector<16x32xf32> to vector<16xf32>
    %481 = vector.shape_cast %480 : vector<16xf32> to vector<16x1xf32>
    %cst_347 = arith.constant 3.200000e+01 : f32
    %482 = vector.broadcast %cst_347 : f32 to vector<16x1xf32>
    %483 = arith.divf %481, %482 : vector<16x1xf32>
    %484 = vector.broadcast %476 : vector<16x1xf32> to vector<16x32xf32>
    %485 = arith.subf %468, %484 : vector<16x32xf32>
    %cst_348 = arith.constant 9.99999974E-6 : f32
    %486 = vector.broadcast %cst_348 : f32 to vector<16x1xf32>
    %487 = arith.addf %483, %486 : vector<16x1xf32>
    %488 = math.rsqrt %487 : vector<16x1xf32>
    %489 = vector.broadcast %488 : vector<16x1xf32> to vector<16x32xf32>
    %490 = arith.mulf %485, %489 : vector<16x32xf32>
    %491 = vector.broadcast %470 : vector<1x32xf32> to vector<16x32xf32>
    %492 = arith.mulf %490, %491 : vector<16x32xf32>
    %493 = vector.broadcast %472 : vector<1x32xf32> to vector<16x32xf32>
    %494 = arith.addf %492, %493 : vector<16x32xf32>
    %495 = arith.truncf %494 : vector<16x32xf32> to vector<16x32xbf16>
    %c1_349 = arith.constant 1 : index
    %c0_350 = arith.constant 0 : index
    %c0_351 = arith.constant 0 : index
    %c0_352 = arith.constant 0 : index
    %496 = vector.load %arg36[%c1_349, %c0_350, %c0_351, %c0_352] : memref<2x2x32x16xbf16, #tpu.memory_space<vmem>>, vector<1x1x32x16xbf16>
    %497 = vector.shape_cast %496 : vector<1x1x32x16xbf16> to vector<32x16xbf16>
    %cst_353 = arith.constant dense<0.000000e+00> : vector<16x16xf32>
    %498 = tpu.matmul %495, %497, %cst_353 {dimension_numbers = #tpu.dot_dimension_numbers<[1], [0], [0], [1], [0, 0, 1, 1], [], []>} : vector<16x32xbf16>, vector<32x16xbf16>, vector<16x16xf32> -> vector<16x16xf32>
    %c1_354 = arith.constant 1 : index
    %c0_355 = arith.constant 0 : index
    %c0_356 = arith.constant 0 : index
    %c0_357 = arith.constant 0 : index
    %499 = vector.load %arg28[%c1_354, %c0_355, %c0_356, %c0_357] : memref<2x2x1x16xf32, #tpu.memory_space<vmem>>, vector<1x1x1x16xf32>
    %500 = vector.shape_cast %499 : vector<1x1x1x16xf32> to vector<1x16xf32>
    %501 = vector.broadcast %500 : vector<1x16xf32> to vector<16x16xf32>
    %502 = arith.addf %498, %501 : vector<16x16xf32>
    %c1_358 = arith.constant 1 : index
    %c0_359 = arith.constant 0 : index
    %c0_360 = arith.constant 0 : index
    %c0_361 = arith.constant 0 : index
    %503 = vector.load %arg34[%c1_358, %c0_359, %c0_360, %c0_361] : memref<2x2x32x16xbf16, #tpu.memory_space<vmem>>, vector<1x1x32x16xbf16>
    %504 = vector.shape_cast %503 : vector<1x1x32x16xbf16> to vector<32x16xbf16>
    %cst_362 = arith.constant dense<0.000000e+00> : vector<16x16xf32>
    %505 = tpu.matmul %495, %504, %cst_362 {dimension_numbers = #tpu.dot_dimension_numbers<[1], [0], [0], [1], [0, 0, 1, 1], [], []>} : vector<16x32xbf16>, vector<32x16xbf16>, vector<16x16xf32> -> vector<16x16xf32>
    %c1_363 = arith.constant 1 : index
    %c0_364 = arith.constant 0 : index
    %c0_365 = arith.constant 0 : index
    %c0_366 = arith.constant 0 : index
    %506 = vector.load %arg26[%c1_363, %c0_364, %c0_365, %c0_366] : memref<2x2x1x16xf32, #tpu.memory_space<vmem>>, vector<1x1x1x16xf32>
    %507 = vector.shape_cast %506 : vector<1x1x1x16xf32> to vector<1x16xf32>
    %508 = vector.broadcast %507 : vector<1x16xf32> to vector<16x16xf32>
    %509 = arith.addf %505, %508 : vector<16x16xf32>
    %c1_367 = arith.constant 1 : index
    %c0_368 = arith.constant 0 : index
    %c0_369 = arith.constant 0 : index
    %c0_370 = arith.constant 0 : index
    %510 = vector.load %arg37[%c1_367, %c0_368, %c0_369, %c0_370] : memref<2x2x32x16xbf16, #tpu.memory_space<vmem>>, vector<1x1x32x16xbf16>
    %511 = vector.shape_cast %510 : vector<1x1x32x16xbf16> to vector<32x16xbf16>
    %cst_371 = arith.constant dense<0.000000e+00> : vector<16x16xf32>
    %512 = tpu.matmul %495, %511, %cst_371 {dimension_numbers = #tpu.dot_dimension_numbers<[1], [0], [0], [1], [0, 0, 1, 1], [], []>} : vector<16x32xbf16>, vector<32x16xbf16>, vector<16x16xf32> -> vector<16x16xf32>
    %c1_372 = arith.constant 1 : index
    %c0_373 = arith.constant 0 : index
    %c0_374 = arith.constant 0 : index
    %c0_375 = arith.constant 0 : index
    %513 = vector.load %arg29[%c1_372, %c0_373, %c0_374, %c0_375] : memref<2x2x1x16xf32, #tpu.memory_space<vmem>>, vector<1x1x1x16xf32>
    %514 = vector.shape_cast %513 : vector<1x1x1x16xf32> to vector<1x16xf32>
    %515 = vector.broadcast %514 : vector<1x16xf32> to vector<16x16xf32>
    %516 = arith.addf %512, %515 : vector<16x16xf32>
    %517 = arith.truncf %502 : vector<16x16xf32> to vector<16x16xbf16>
    %518 = arith.truncf %509 : vector<16x16xf32> to vector<16x16xbf16>
    %cst_376 = arith.constant dense<0.000000e+00> : vector<16x16xf32>
    %519 = tpu.matmul %517, %518, %cst_376 {dimension_numbers = #tpu.dot_dimension_numbers<[1], [1], [0], [0], [0, 0, 1, 0], [], []>} : vector<16x16xbf16>, vector<16x16xbf16>, vector<16x16xf32> -> vector<16x16xf32>
    %cst_377 = arith.constant dense<0xFF800000> : vector<16xf32>
    %520 = vector.multi_reduction <maximumf>, %519, %cst_377 [1] : vector<16x16xf32> to vector<16xf32>
    %521 = vector.shape_cast %520 : vector<16xf32> to vector<16x1xf32>
    %522 = vector.broadcast %521 : vector<16x1xf32> to vector<16x16xf32>
    %523 = arith.subf %519, %522 : vector<16x16xf32>
    %524 = math.exp %523 : vector<16x16xf32>
    %cst_378 = arith.constant dense<0.000000e+00> : vector<16xf32>
    %525 = vector.multi_reduction <add>, %524, %cst_378 [1] : vector<16x16xf32> to vector<16xf32>
    %526 = vector.shape_cast %525 : vector<16xf32> to vector<16x1xf32>
    %527 = tpu.reciprocal %526 {approx = true} : vector<16x1xf32> -> vector<16x1xf32>
    %528 = vector.broadcast %527 : vector<16x1xf32> to vector<16x16xf32>
    %529 = arith.mulf %524, %528 : vector<16x16xf32>
    %530 = arith.truncf %529 : vector<16x16xf32> to vector<16x16xbf16>
    %531 = arith.truncf %516 : vector<16x16xf32> to vector<16x16xbf16>
    %cst_379 = arith.constant dense<0.000000e+00> : vector<16x16xf32>
    %532 = tpu.matmul %530, %531, %cst_379 {dimension_numbers = #tpu.dot_dimension_numbers<[1], [0], [0], [1], [0, 0, 1, 1], [], []>} : vector<16x16xbf16>, vector<16x16xbf16>, vector<16x16xf32> -> vector<16x16xf32>
    %533 = arith.truncf %532 : vector<16x16xf32> to vector<16x16xbf16>
    %c1_380 = arith.constant 1 : index
    %c0_381 = arith.constant 0 : index
    %c0_382 = arith.constant 0 : index
    %c0_383 = arith.constant 0 : index
    %534 = vector.load %arg35[%c1_380, %c0_381, %c0_382, %c0_383] : memref<2x2x16x32xbf16, #tpu.memory_space<vmem>>, vector<1x1x16x32xbf16>
    %535 = vector.shape_cast %534 : vector<1x1x16x32xbf16> to vector<16x32xbf16>
    %cst_384 = arith.constant dense<0.000000e+00> : vector<16x32xf32>
    %536 = tpu.matmul %533, %535, %cst_384 {dimension_numbers = #tpu.dot_dimension_numbers<[1], [0], [0], [1], [0, 0, 1, 1], [], []>} : vector<16x16xbf16>, vector<16x32xbf16>, vector<16x32xf32> -> vector<16x32xf32>
    %c1_385 = arith.constant 1 : index
    %c1_386 = arith.constant 1 : index
    %c0_387 = arith.constant 0 : index
    %c0_388 = arith.constant 0 : index
    %537 = vector.load %arg36[%c1_385, %c1_386, %c0_387, %c0_388] : memref<2x2x32x16xbf16, #tpu.memory_space<vmem>>, vector<1x1x32x16xbf16>
    %538 = vector.shape_cast %537 : vector<1x1x32x16xbf16> to vector<32x16xbf16>
    %cst_389 = arith.constant dense<0.000000e+00> : vector<16x16xf32>
    %539 = tpu.matmul %495, %538, %cst_389 {dimension_numbers = #tpu.dot_dimension_numbers<[1], [0], [0], [1], [0, 0, 1, 1], [], []>} : vector<16x32xbf16>, vector<32x16xbf16>, vector<16x16xf32> -> vector<16x16xf32>
    %c1_390 = arith.constant 1 : index
    %c1_391 = arith.constant 1 : index
    %c0_392 = arith.constant 0 : index
    %c0_393 = arith.constant 0 : index
    %540 = vector.load %arg28[%c1_390, %c1_391, %c0_392, %c0_393] : memref<2x2x1x16xf32, #tpu.memory_space<vmem>>, vector<1x1x1x16xf32>
    %541 = vector.shape_cast %540 : vector<1x1x1x16xf32> to vector<1x16xf32>
    %542 = vector.broadcast %541 : vector<1x16xf32> to vector<16x16xf32>
    %543 = arith.addf %539, %542 : vector<16x16xf32>
    %c1_394 = arith.constant 1 : index
    %c1_395 = arith.constant 1 : index
    %c0_396 = arith.constant 0 : index
    %c0_397 = arith.constant 0 : index
    %544 = vector.load %arg34[%c1_394, %c1_395, %c0_396, %c0_397] : memref<2x2x32x16xbf16, #tpu.memory_space<vmem>>, vector<1x1x32x16xbf16>
    %545 = vector.shape_cast %544 : vector<1x1x32x16xbf16> to vector<32x16xbf16>
    %cst_398 = arith.constant dense<0.000000e+00> : vector<16x16xf32>
    %546 = tpu.matmul %495, %545, %cst_398 {dimension_numbers = #tpu.dot_dimension_numbers<[1], [0], [0], [1], [0, 0, 1, 1], [], []>} : vector<16x32xbf16>, vector<32x16xbf16>, vector<16x16xf32> -> vector<16x16xf32>
    %c1_399 = arith.constant 1 : index
    %c1_400 = arith.constant 1 : index
    %c0_401 = arith.constant 0 : index
    %c0_402 = arith.constant 0 : index
    %547 = vector.load %arg26[%c1_399, %c1_400, %c0_401, %c0_402] : memref<2x2x1x16xf32, #tpu.memory_space<vmem>>, vector<1x1x1x16xf32>
    %548 = vector.shape_cast %547 : vector<1x1x1x16xf32> to vector<1x16xf32>
    %549 = vector.broadcast %548 : vector<1x16xf32> to vector<16x16xf32>
    %550 = arith.addf %546, %549 : vector<16x16xf32>
    %c1_403 = arith.constant 1 : index
    %c1_404 = arith.constant 1 : index
    %c0_405 = arith.constant 0 : index
    %c0_406 = arith.constant 0 : index
    %551 = vector.load %arg37[%c1_403, %c1_404, %c0_405, %c0_406] : memref<2x2x32x16xbf16, #tpu.memory_space<vmem>>, vector<1x1x32x16xbf16>
    %552 = vector.shape_cast %551 : vector<1x1x32x16xbf16> to vector<32x16xbf16>
    %cst_407 = arith.constant dense<0.000000e+00> : vector<16x16xf32>
    %553 = tpu.matmul %495, %552, %cst_407 {dimension_numbers = #tpu.dot_dimension_numbers<[1], [0], [0], [1], [0, 0, 1, 1], [], []>} : vector<16x32xbf16>, vector<32x16xbf16>, vector<16x16xf32> -> vector<16x16xf32>
    %c1_408 = arith.constant 1 : index
    %c1_409 = arith.constant 1 : index
    %c0_410 = arith.constant 0 : index
    %c0_411 = arith.constant 0 : index
    %554 = vector.load %arg29[%c1_408, %c1_409, %c0_410, %c0_411] : memref<2x2x1x16xf32, #tpu.memory_space<vmem>>, vector<1x1x1x16xf32>
    %555 = vector.shape_cast %554 : vector<1x1x1x16xf32> to vector<1x16xf32>
    %556 = vector.broadcast %555 : vector<1x16xf32> to vector<16x16xf32>
    %557 = arith.addf %553, %556 : vector<16x16xf32>
    %558 = arith.truncf %543 : vector<16x16xf32> to vector<16x16xbf16>
    %559 = arith.truncf %550 : vector<16x16xf32> to vector<16x16xbf16>
    %cst_412 = arith.constant dense<0.000000e+00> : vector<16x16xf32>
    %560 = tpu.matmul %558, %559, %cst_412 {dimension_numbers = #tpu.dot_dimension_numbers<[1], [1], [0], [0], [0, 0, 1, 0], [], []>} : vector<16x16xbf16>, vector<16x16xbf16>, vector<16x16xf32> -> vector<16x16xf32>
    %cst_413 = arith.constant dense<0xFF800000> : vector<16xf32>
    %561 = vector.multi_reduction <maximumf>, %560, %cst_413 [1] : vector<16x16xf32> to vector<16xf32>
    %562 = vector.shape_cast %561 : vector<16xf32> to vector<16x1xf32>
    %563 = vector.broadcast %562 : vector<16x1xf32> to vector<16x16xf32>
    %564 = arith.subf %560, %563 : vector<16x16xf32>
    %565 = math.exp %564 : vector<16x16xf32>
    %cst_414 = arith.constant dense<0.000000e+00> : vector<16xf32>
    %566 = vector.multi_reduction <add>, %565, %cst_414 [1] : vector<16x16xf32> to vector<16xf32>
    %567 = vector.shape_cast %566 : vector<16xf32> to vector<16x1xf32>
    %568 = tpu.reciprocal %567 {approx = true} : vector<16x1xf32> -> vector<16x1xf32>
    %569 = vector.broadcast %568 : vector<16x1xf32> to vector<16x16xf32>
    %570 = arith.mulf %565, %569 : vector<16x16xf32>
    %571 = arith.truncf %570 : vector<16x16xf32> to vector<16x16xbf16>
    %572 = arith.truncf %557 : vector<16x16xf32> to vector<16x16xbf16>
    %cst_415 = arith.constant dense<0.000000e+00> : vector<16x16xf32>
    %573 = tpu.matmul %571, %572, %cst_415 {dimension_numbers = #tpu.dot_dimension_numbers<[1], [0], [0], [1], [0, 0, 1, 1], [], []>} : vector<16x16xbf16>, vector<16x16xbf16>, vector<16x16xf32> -> vector<16x16xf32>
    %574 = arith.truncf %573 : vector<16x16xf32> to vector<16x16xbf16>
    %c1_416 = arith.constant 1 : index
    %c1_417 = arith.constant 1 : index
    %c0_418 = arith.constant 0 : index
    %c0_419 = arith.constant 0 : index
    %575 = vector.load %arg35[%c1_416, %c1_417, %c0_418, %c0_419] : memref<2x2x16x32xbf16, #tpu.memory_space<vmem>>, vector<1x1x16x32xbf16>
    %576 = vector.shape_cast %575 : vector<1x1x16x32xbf16> to vector<16x32xbf16>
    %cst_420 = arith.constant dense<0.000000e+00> : vector<16x32xf32>
    %577 = tpu.matmul %574, %576, %cst_420 {dimension_numbers = #tpu.dot_dimension_numbers<[1], [0], [0], [1], [0, 0, 1, 1], [], []>} : vector<16x16xbf16>, vector<16x32xbf16>, vector<16x32xf32> -> vector<16x32xf32>
    %578 = arith.addf %536, %577 : vector<16x32xf32>
    %c1_421 = arith.constant 1 : index
    %c0_422 = arith.constant 0 : index
    %c0_423 = arith.constant 0 : index
    %579 = vector.load %arg27[%c1_421, %c0_422, %c0_423] : memref<2x1x32xf32, #tpu.memory_space<vmem>>, vector<1x1x32xf32>
    %580 = vector.shape_cast %579 : vector<1x1x32xf32> to vector<1x32xf32>
    %581 = vector.broadcast %580 : vector<1x32xf32> to vector<16x32xf32>
    %582 = arith.addf %578, %581 : vector<16x32xf32>
    %583 = arith.addf %494, %582 : vector<16x32xf32>
    %c1_424 = arith.constant 1 : index
    %c0_425 = arith.constant 0 : index
    %c0_426 = arith.constant 0 : index
    %584 = vector.load %arg30[%c1_424, %c0_425, %c0_426] : memref<2x1x32xf32, #tpu.memory_space<vmem>>, vector<1x1x32xf32>
    %585 = vector.shape_cast %584 : vector<1x1x32xf32> to vector<1x32xf32>
    %c1_427 = arith.constant 1 : index
    %c0_428 = arith.constant 0 : index
    %c0_429 = arith.constant 0 : index
    %586 = vector.load %arg24[%c1_427, %c0_428, %c0_429] : memref<2x1x32xf32, #tpu.memory_space<vmem>>, vector<1x1x32xf32>
    %587 = vector.shape_cast %586 : vector<1x1x32xf32> to vector<1x32xf32>
    %cst_430 = arith.constant dense<0.000000e+00> : vector<16xf32>
    %588 = vector.multi_reduction <add>, %583, %cst_430 [1] : vector<16x32xf32> to vector<16xf32>
    %589 = vector.shape_cast %588 : vector<16xf32> to vector<16x1xf32>
    %cst_431 = arith.constant 3.200000e+01 : f32
    %590 = vector.broadcast %cst_431 : f32 to vector<16x1xf32>
    %591 = arith.divf %589, %590 : vector<16x1xf32>
    %592 = vector.broadcast %591 : vector<16x1xf32> to vector<16x32xf32>
    %593 = arith.subf %583, %592 : vector<16x32xf32>
    %594 = arith.mulf %593, %593 : vector<16x32xf32>
    %cst_432 = arith.constant dense<0.000000e+00> : vector<16xf32>
    %595 = vector.multi_reduction <add>, %594, %cst_432 [1] : vector<16x32xf32> to vector<16xf32>
    %596 = vector.shape_cast %595 : vector<16xf32> to vector<16x1xf32>
    %cst_433 = arith.constant 3.200000e+01 : f32
    %597 = vector.broadcast %cst_433 : f32 to vector<16x1xf32>
    %598 = arith.divf %596, %597 : vector<16x1xf32>
    %599 = vector.broadcast %591 : vector<16x1xf32> to vector<16x32xf32>
    %600 = arith.subf %583, %599 : vector<16x32xf32>
    %cst_434 = arith.constant 9.99999974E-6 : f32
    %601 = vector.broadcast %cst_434 : f32 to vector<16x1xf32>
    %602 = arith.addf %598, %601 : vector<16x1xf32>
    %603 = math.rsqrt %602 : vector<16x1xf32>
    %604 = vector.broadcast %603 : vector<16x1xf32> to vector<16x32xf32>
    %605 = arith.mulf %600, %604 : vector<16x32xf32>
    %606 = vector.broadcast %585 : vector<1x32xf32> to vector<16x32xf32>
    %607 = arith.mulf %605, %606 : vector<16x32xf32>
    %608 = vector.broadcast %587 : vector<1x32xf32> to vector<16x32xf32>
    %609 = arith.addf %607, %608 : vector<16x32xf32>
    %610 = arith.truncf %609 : vector<16x32xf32> to vector<16x32xbf16>
    %c1_435 = arith.constant 1 : index
    %c0_436 = arith.constant 0 : index
    %c0_437 = arith.constant 0 : index
    %611 = vector.load %arg32[%c1_435, %c0_436, %c0_437] : memref<2x32x64xbf16, #tpu.memory_space<vmem>>, vector<1x32x64xbf16>
    %612 = vector.shape_cast %611 : vector<1x32x64xbf16> to vector<32x64xbf16>
    %cst_438 = arith.constant dense<0.000000e+00> : vector<16x64xf32>
    %613 = tpu.matmul %610, %612, %cst_438 {dimension_numbers = #tpu.dot_dimension_numbers<[1], [0], [0], [1], [0, 0, 1, 1], [], []>} : vector<16x32xbf16>, vector<32x64xbf16>, vector<16x64xf32> -> vector<16x64xf32>
    %c1_439 = arith.constant 1 : index
    %c0_440 = arith.constant 0 : index
    %c0_441 = arith.constant 0 : index
    %614 = vector.load %arg22[%c1_439, %c0_440, %c0_441] : memref<2x1x64xf32, #tpu.memory_space<vmem>>, vector<1x1x64xf32>
    %615 = vector.shape_cast %614 : vector<1x1x64xf32> to vector<1x64xf32>
    %616 = vector.broadcast %615 : vector<1x64xf32> to vector<16x64xf32>
    %617 = arith.addf %613, %616 : vector<16x64xf32>
    %cst_442 = arith.constant 0.000000e+00 : f32
    %618 = vector.broadcast %cst_442 : f32 to vector<16x64xf32>
    %619 = arith.maximumf %617, %618 : vector<16x64xf32>
    %620 = arith.truncf %619 : vector<16x64xf32> to vector<16x64xbf16>
    %c1_443 = arith.constant 1 : index
    %c0_444 = arith.constant 0 : index
    %c0_445 = arith.constant 0 : index
    %621 = vector.load %arg33[%c1_443, %c0_444, %c0_445] : memref<2x64x32xbf16, #tpu.memory_space<vmem>>, vector<1x64x32xbf16>
    %622 = vector.shape_cast %621 : vector<1x64x32xbf16> to vector<64x32xbf16>
    %cst_446 = arith.constant dense<0.000000e+00> : vector<16x32xf32>
    %623 = tpu.matmul %620, %622, %cst_446 {dimension_numbers = #tpu.dot_dimension_numbers<[1], [0], [0], [1], [0, 0, 1, 1], [], []>} : vector<16x64xbf16>, vector<64x32xbf16>, vector<16x32xf32> -> vector<16x32xf32>
    %c1_447 = arith.constant 1 : index
    %c0_448 = arith.constant 0 : index
    %c0_449 = arith.constant 0 : index
    %624 = vector.load %arg23[%c1_447, %c0_448, %c0_449] : memref<2x1x32xf32, #tpu.memory_space<vmem>>, vector<1x1x32xf32>
    %625 = vector.shape_cast %624 : vector<1x1x32xf32> to vector<1x32xf32>
    %626 = vector.broadcast %625 : vector<1x32xf32> to vector<16x32xf32>
    %627 = arith.addf %623, %626 : vector<16x32xf32>
    %628 = arith.addf %609, %627 : vector<16x32xf32>
    %c1_450 = arith.constant 1 : index
    %c0_451 = arith.constant 0 : index
    %c0_452 = arith.constant 0 : index
    %629 = vector.load %arg31[%c1_450, %c0_451, %c0_452] : memref<2x1x32xf32, #tpu.memory_space<vmem>>, vector<1x1x32xf32>
    %630 = vector.shape_cast %629 : vector<1x1x32xf32> to vector<1x32xf32>
    %c1_453 = arith.constant 1 : index
    %c0_454 = arith.constant 0 : index
    %c0_455 = arith.constant 0 : index
    %631 = vector.load %arg25[%c1_453, %c0_454, %c0_455] : memref<2x1x32xf32, #tpu.memory_space<vmem>>, vector<1x1x32xf32>
    %632 = vector.shape_cast %631 : vector<1x1x32xf32> to vector<1x32xf32>
    %cst_456 = arith.constant dense<0.000000e+00> : vector<16xf32>
    %633 = vector.multi_reduction <add>, %628, %cst_456 [1] : vector<16x32xf32> to vector<16xf32>
    %634 = vector.shape_cast %633 : vector<16xf32> to vector<16x1xf32>
    %cst_457 = arith.constant 3.200000e+01 : f32
    %635 = vector.broadcast %cst_457 : f32 to vector<16x1xf32>
    %636 = arith.divf %634, %635 : vector<16x1xf32>
    %637 = vector.broadcast %636 : vector<16x1xf32> to vector<16x32xf32>
    %638 = arith.subf %628, %637 : vector<16x32xf32>
    %639 = arith.mulf %638, %638 : vector<16x32xf32>
    %cst_458 = arith.constant dense<0.000000e+00> : vector<16xf32>
    %640 = vector.multi_reduction <add>, %639, %cst_458 [1] : vector<16x32xf32> to vector<16xf32>
    %641 = vector.shape_cast %640 : vector<16xf32> to vector<16x1xf32>
    %cst_459 = arith.constant 3.200000e+01 : f32
    %642 = vector.broadcast %cst_459 : f32 to vector<16x1xf32>
    %643 = arith.divf %641, %642 : vector<16x1xf32>
    %644 = vector.broadcast %636 : vector<16x1xf32> to vector<16x32xf32>
    %645 = arith.subf %628, %644 : vector<16x32xf32>
    %cst_460 = arith.constant 9.99999974E-6 : f32
    %646 = vector.broadcast %cst_460 : f32 to vector<16x1xf32>
    %647 = arith.addf %643, %646 : vector<16x1xf32>
    %648 = math.rsqrt %647 : vector<16x1xf32>
    %649 = vector.broadcast %648 : vector<16x1xf32> to vector<16x32xf32>
    %650 = arith.mulf %645, %649 : vector<16x32xf32>
    %651 = vector.broadcast %630 : vector<1x32xf32> to vector<16x32xf32>
    %652 = arith.mulf %650, %651 : vector<16x32xf32>
    %653 = vector.broadcast %632 : vector<1x32xf32> to vector<16x32xf32>
    %654 = arith.addf %652, %653 : vector<16x32xf32>
    %655 = tpu.concatenate %326, %654 in 0 : vector<16x32xf32>, vector<16x32xf32> -> vector<32x32xf32>
    %656 = arith.truncf %655 : vector<32x32xf32> to vector<32x32xbf16>
    %c0_461 = arith.constant 0 : index
    %c0_462 = arith.constant 0 : index
    %657 = vector.load %arg41[%c0_461, %c0_462] : memref<32x8xbf16, #tpu.memory_space<vmem>>, vector<32x8xbf16>
    %cst_463 = arith.constant dense<0.000000e+00> : vector<32x8xf32>
    %658 = tpu.matmul %656, %657, %cst_463 {dimension_numbers = #tpu.dot_dimension_numbers<[1], [0], [0], [1], [0, 0, 1, 1], [], []>} : vector<32x32xbf16>, vector<32x8xbf16>, vector<32x8xf32> -> vector<32x8xf32>
    %c0_464 = arith.constant 0 : index
    %c0_465 = arith.constant 0 : index
    %659 = vector.load %arg40[%c0_464, %c0_465] : memref<32x32xbf16, #tpu.memory_space<vmem>>, vector<32x32xbf16>
    %660 = arith.truncf %658 : vector<32x8xf32> to vector<32x8xbf16>
    %cst_466 = arith.constant dense<0.000000e+00> : vector<32x8xf32>
    %661 = tpu.matmul %659, %660, %cst_466 {dimension_numbers = #tpu.dot_dimension_numbers<[1], [0], [0], [1], [0, 0, 1, 1], [], []>} : vector<32x32xbf16>, vector<32x8xbf16>, vector<32x8xf32> -> vector<32x8xf32>
    %662 = arith.truncf %661 : vector<32x8xf32> to vector<32x8xbf16>
    %c0_467 = arith.constant 0 : index
    %c0_468 = arith.constant 0 : index
    %c0_469 = arith.constant 0 : index
    %c0_470 = arith.constant 0 : index
    %663 = vector.load %arg57[%c0_467, %c0_468, %c0_469, %c0_470] : memref<2x2x8x4xbf16, #tpu.memory_space<vmem>>, vector<1x1x8x4xbf16>
    %664 = vector.shape_cast %663 : vector<1x1x8x4xbf16> to vector<8x4xbf16>
    %cst_471 = arith.constant dense<0.000000e+00> : vector<32x4xf32>
    %665 = tpu.matmul %662, %664, %cst_471 {dimension_numbers = #tpu.dot_dimension_numbers<[1], [0], [0], [1], [0, 0, 1, 1], [], []>} : vector<32x8xbf16>, vector<8x4xbf16>, vector<32x4xf32> -> vector<32x4xf32>
    %c0_472 = arith.constant 0 : index
    %c0_473 = arith.constant 0 : index
    %c0_474 = arith.constant 0 : index
    %c0_475 = arith.constant 0 : index
    %666 = vector.load %arg49[%c0_472, %c0_473, %c0_474, %c0_475] : memref<2x2x1x4xf32, #tpu.memory_space<vmem>>, vector<1x1x1x4xf32>
    %667 = vector.shape_cast %666 : vector<1x1x1x4xf32> to vector<1x4xf32>
    %668 = vector.broadcast %667 : vector<1x4xf32> to vector<32x4xf32>
    %669 = arith.addf %665, %668 : vector<32x4xf32>
    %c0_476 = arith.constant 0 : index
    %c0_477 = arith.constant 0 : index
    %c0_478 = arith.constant 0 : index
    %c0_479 = arith.constant 0 : index
    %670 = vector.load %arg55[%c0_476, %c0_477, %c0_478, %c0_479] : memref<2x2x8x4xbf16, #tpu.memory_space<vmem>>, vector<1x1x8x4xbf16>
    %671 = vector.shape_cast %670 : vector<1x1x8x4xbf16> to vector<8x4xbf16>
    %cst_480 = arith.constant dense<0.000000e+00> : vector<32x4xf32>
    %672 = tpu.matmul %662, %671, %cst_480 {dimension_numbers = #tpu.dot_dimension_numbers<[1], [0], [0], [1], [0, 0, 1, 1], [], []>} : vector<32x8xbf16>, vector<8x4xbf16>, vector<32x4xf32> -> vector<32x4xf32>
    %c0_481 = arith.constant 0 : index
    %c0_482 = arith.constant 0 : index
    %c0_483 = arith.constant 0 : index
    %c0_484 = arith.constant 0 : index
    %673 = vector.load %arg47[%c0_481, %c0_482, %c0_483, %c0_484] : memref<2x2x1x4xf32, #tpu.memory_space<vmem>>, vector<1x1x1x4xf32>
    %674 = vector.shape_cast %673 : vector<1x1x1x4xf32> to vector<1x4xf32>
    %675 = vector.broadcast %674 : vector<1x4xf32> to vector<32x4xf32>
    %676 = arith.addf %672, %675 : vector<32x4xf32>
    %c0_485 = arith.constant 0 : index
    %c0_486 = arith.constant 0 : index
    %c0_487 = arith.constant 0 : index
    %c0_488 = arith.constant 0 : index
    %677 = vector.load %arg58[%c0_485, %c0_486, %c0_487, %c0_488] : memref<2x2x8x4xbf16, #tpu.memory_space<vmem>>, vector<1x1x8x4xbf16>
    %678 = vector.shape_cast %677 : vector<1x1x8x4xbf16> to vector<8x4xbf16>
    %cst_489 = arith.constant dense<0.000000e+00> : vector<32x4xf32>
    %679 = tpu.matmul %662, %678, %cst_489 {dimension_numbers = #tpu.dot_dimension_numbers<[1], [0], [0], [1], [0, 0, 1, 1], [], []>} : vector<32x8xbf16>, vector<8x4xbf16>, vector<32x4xf32> -> vector<32x4xf32>
    %c0_490 = arith.constant 0 : index
    %c0_491 = arith.constant 0 : index
    %c0_492 = arith.constant 0 : index
    %c0_493 = arith.constant 0 : index
    %680 = vector.load %arg50[%c0_490, %c0_491, %c0_492, %c0_493] : memref<2x2x1x4xf32, #tpu.memory_space<vmem>>, vector<1x1x1x4xf32>
    %681 = vector.shape_cast %680 : vector<1x1x1x4xf32> to vector<1x4xf32>
    %682 = vector.broadcast %681 : vector<1x4xf32> to vector<32x4xf32>
    %683 = arith.addf %679, %682 : vector<32x4xf32>
    %684 = arith.truncf %669 : vector<32x4xf32> to vector<32x4xbf16>
    %685 = arith.truncf %676 : vector<32x4xf32> to vector<32x4xbf16>
    %cst_494 = arith.constant dense<0.000000e+00> : vector<32x32xf32>
    %686 = tpu.matmul %684, %685, %cst_494 {dimension_numbers = #tpu.dot_dimension_numbers<[1], [1], [0], [0], [0, 0, 1, 0], [], []>} : vector<32x4xbf16>, vector<32x4xbf16>, vector<32x32xf32> -> vector<32x32xf32>
    %cst_495 = arith.constant dense<0xFF800000> : vector<32xf32>
    %687 = vector.multi_reduction <maximumf>, %686, %cst_495 [1] : vector<32x32xf32> to vector<32xf32>
    %688 = vector.shape_cast %687 : vector<32xf32> to vector<32x1xf32>
    %689 = vector.broadcast %688 : vector<32x1xf32> to vector<32x32xf32>
    %690 = arith.subf %686, %689 : vector<32x32xf32>
    %691 = math.exp %690 : vector<32x32xf32>
    %cst_496 = arith.constant dense<0.000000e+00> : vector<32xf32>
    %692 = vector.multi_reduction <add>, %691, %cst_496 [1] : vector<32x32xf32> to vector<32xf32>
    %693 = vector.shape_cast %692 : vector<32xf32> to vector<32x1xf32>
    %694 = tpu.reciprocal %693 {approx = true} : vector<32x1xf32> -> vector<32x1xf32>
    %695 = vector.broadcast %694 : vector<32x1xf32> to vector<32x32xf32>
    %696 = arith.mulf %691, %695 : vector<32x32xf32>
    %697 = arith.truncf %696 : vector<32x32xf32> to vector<32x32xbf16>
    %698 = arith.truncf %683 : vector<32x4xf32> to vector<32x4xbf16>
    %cst_497 = arith.constant dense<0.000000e+00> : vector<32x4xf32>
    %699 = tpu.matmul %697, %698, %cst_497 {dimension_numbers = #tpu.dot_dimension_numbers<[1], [0], [0], [1], [0, 0, 1, 1], [], []>} : vector<32x32xbf16>, vector<32x4xbf16>, vector<32x4xf32> -> vector<32x4xf32>
    %700 = arith.truncf %699 : vector<32x4xf32> to vector<32x4xbf16>
    %c0_498 = arith.constant 0 : index
    %c0_499 = arith.constant 0 : index
    %c0_500 = arith.constant 0 : index
    %c0_501 = arith.constant 0 : index
    %701 = vector.load %arg56[%c0_498, %c0_499, %c0_500, %c0_501] : memref<2x2x4x8xbf16, #tpu.memory_space<vmem>>, vector<1x1x4x8xbf16>
    %702 = vector.shape_cast %701 : vector<1x1x4x8xbf16> to vector<4x8xbf16>
    %cst_502 = arith.constant dense<0.000000e+00> : vector<32x8xf32>
    %703 = tpu.matmul %700, %702, %cst_502 {dimension_numbers = #tpu.dot_dimension_numbers<[1], [0], [0], [1], [0, 0, 1, 1], [], []>} : vector<32x4xbf16>, vector<4x8xbf16>, vector<32x8xf32> -> vector<32x8xf32>
    %c0_503 = arith.constant 0 : index
    %c1_504 = arith.constant 1 : index
    %c0_505 = arith.constant 0 : index
    %c0_506 = arith.constant 0 : index
    %704 = vector.load %arg57[%c0_503, %c1_504, %c0_505, %c0_506] : memref<2x2x8x4xbf16, #tpu.memory_space<vmem>>, vector<1x1x8x4xbf16>
    %705 = vector.shape_cast %704 : vector<1x1x8x4xbf16> to vector<8x4xbf16>
    %cst_507 = arith.constant dense<0.000000e+00> : vector<32x4xf32>
    %706 = tpu.matmul %662, %705, %cst_507 {dimension_numbers = #tpu.dot_dimension_numbers<[1], [0], [0], [1], [0, 0, 1, 1], [], []>} : vector<32x8xbf16>, vector<8x4xbf16>, vector<32x4xf32> -> vector<32x4xf32>
    %c0_508 = arith.constant 0 : index
    %c1_509 = arith.constant 1 : index
    %c0_510 = arith.constant 0 : index
    %c0_511 = arith.constant 0 : index
    %707 = vector.load %arg49[%c0_508, %c1_509, %c0_510, %c0_511] : memref<2x2x1x4xf32, #tpu.memory_space<vmem>>, vector<1x1x1x4xf32>
    %708 = vector.shape_cast %707 : vector<1x1x1x4xf32> to vector<1x4xf32>
    %709 = vector.broadcast %708 : vector<1x4xf32> to vector<32x4xf32>
    %710 = arith.addf %706, %709 : vector<32x4xf32>
    %c0_512 = arith.constant 0 : index
    %c1_513 = arith.constant 1 : index
    %c0_514 = arith.constant 0 : index
    %c0_515 = arith.constant 0 : index
    %711 = vector.load %arg55[%c0_512, %c1_513, %c0_514, %c0_515] : memref<2x2x8x4xbf16, #tpu.memory_space<vmem>>, vector<1x1x8x4xbf16>
    %712 = vector.shape_cast %711 : vector<1x1x8x4xbf16> to vector<8x4xbf16>
    %cst_516 = arith.constant dense<0.000000e+00> : vector<32x4xf32>
    %713 = tpu.matmul %662, %712, %cst_516 {dimension_numbers = #tpu.dot_dimension_numbers<[1], [0], [0], [1], [0, 0, 1, 1], [], []>} : vector<32x8xbf16>, vector<8x4xbf16>, vector<32x4xf32> -> vector<32x4xf32>
    %c0_517 = arith.constant 0 : index
    %c1_518 = arith.constant 1 : index
    %c0_519 = arith.constant 0 : index
    %c0_520 = arith.constant 0 : index
    %714 = vector.load %arg47[%c0_517, %c1_518, %c0_519, %c0_520] : memref<2x2x1x4xf32, #tpu.memory_space<vmem>>, vector<1x1x1x4xf32>
    %715 = vector.shape_cast %714 : vector<1x1x1x4xf32> to vector<1x4xf32>
    %716 = vector.broadcast %715 : vector<1x4xf32> to vector<32x4xf32>
    %717 = arith.addf %713, %716 : vector<32x4xf32>
    %c0_521 = arith.constant 0 : index
    %c1_522 = arith.constant 1 : index
    %c0_523 = arith.constant 0 : index
    %c0_524 = arith.constant 0 : index
    %718 = vector.load %arg58[%c0_521, %c1_522, %c0_523, %c0_524] : memref<2x2x8x4xbf16, #tpu.memory_space<vmem>>, vector<1x1x8x4xbf16>
    %719 = vector.shape_cast %718 : vector<1x1x8x4xbf16> to vector<8x4xbf16>
    %cst_525 = arith.constant dense<0.000000e+00> : vector<32x4xf32>
    %720 = tpu.matmul %662, %719, %cst_525 {dimension_numbers = #tpu.dot_dimension_numbers<[1], [0], [0], [1], [0, 0, 1, 1], [], []>} : vector<32x8xbf16>, vector<8x4xbf16>, vector<32x4xf32> -> vector<32x4xf32>
    %c0_526 = arith.constant 0 : index
    %c1_527 = arith.constant 1 : index
    %c0_528 = arith.constant 0 : index
    %c0_529 = arith.constant 0 : index
    %721 = vector.load %arg50[%c0_526, %c1_527, %c0_528, %c0_529] : memref<2x2x1x4xf32, #tpu.memory_space<vmem>>, vector<1x1x1x4xf32>
    %722 = vector.shape_cast %721 : vector<1x1x1x4xf32> to vector<1x4xf32>
    %723 = vector.broadcast %722 : vector<1x4xf32> to vector<32x4xf32>
    %724 = arith.addf %720, %723 : vector<32x4xf32>
    %725 = arith.truncf %710 : vector<32x4xf32> to vector<32x4xbf16>
    %726 = arith.truncf %717 : vector<32x4xf32> to vector<32x4xbf16>
    %cst_530 = arith.constant dense<0.000000e+00> : vector<32x32xf32>
    %727 = tpu.matmul %725, %726, %cst_530 {dimension_numbers = #tpu.dot_dimension_numbers<[1], [1], [0], [0], [0, 0, 1, 0], [], []>} : vector<32x4xbf16>, vector<32x4xbf16>, vector<32x32xf32> -> vector<32x32xf32>
    %cst_531 = arith.constant dense<0xFF800000> : vector<32xf32>
    %728 = vector.multi_reduction <maximumf>, %727, %cst_531 [1] : vector<32x32xf32> to vector<32xf32>
    %729 = vector.shape_cast %728 : vector<32xf32> to vector<32x1xf32>
    %730 = vector.broadcast %729 : vector<32x1xf32> to vector<32x32xf32>
    %731 = arith.subf %727, %730 : vector<32x32xf32>
    %732 = math.exp %731 : vector<32x32xf32>
    %cst_532 = arith.constant dense<0.000000e+00> : vector<32xf32>
    %733 = vector.multi_reduction <add>, %732, %cst_532 [1] : vector<32x32xf32> to vector<32xf32>
    %734 = vector.shape_cast %733 : vector<32xf32> to vector<32x1xf32>
    %735 = tpu.reciprocal %734 {approx = true} : vector<32x1xf32> -> vector<32x1xf32>
    %736 = vector.broadcast %735 : vector<32x1xf32> to vector<32x32xf32>
    %737 = arith.mulf %732, %736 : vector<32x32xf32>
    %738 = arith.truncf %737 : vector<32x32xf32> to vector<32x32xbf16>
    %739 = arith.truncf %724 : vector<32x4xf32> to vector<32x4xbf16>
    %cst_533 = arith.constant dense<0.000000e+00> : vector<32x4xf32>
    %740 = tpu.matmul %738, %739, %cst_533 {dimension_numbers = #tpu.dot_dimension_numbers<[1], [0], [0], [1], [0, 0, 1, 1], [], []>} : vector<32x32xbf16>, vector<32x4xbf16>, vector<32x4xf32> -> vector<32x4xf32>
    %741 = arith.truncf %740 : vector<32x4xf32> to vector<32x4xbf16>
    %c0_534 = arith.constant 0 : index
    %c1_535 = arith.constant 1 : index
    %c0_536 = arith.constant 0 : index
    %c0_537 = arith.constant 0 : index
    %742 = vector.load %arg56[%c0_534, %c1_535, %c0_536, %c0_537] : memref<2x2x4x8xbf16, #tpu.memory_space<vmem>>, vector<1x1x4x8xbf16>
    %743 = vector.shape_cast %742 : vector<1x1x4x8xbf16> to vector<4x8xbf16>
    %cst_538 = arith.constant dense<0.000000e+00> : vector<32x8xf32>
    %744 = tpu.matmul %741, %743, %cst_538 {dimension_numbers = #tpu.dot_dimension_numbers<[1], [0], [0], [1], [0, 0, 1, 1], [], []>} : vector<32x4xbf16>, vector<4x8xbf16>, vector<32x8xf32> -> vector<32x8xf32>
    %745 = arith.addf %703, %744 : vector<32x8xf32>
    %c0_539 = arith.constant 0 : index
    %c0_540 = arith.constant 0 : index
    %c0_541 = arith.constant 0 : index
    %746 = vector.load %arg48[%c0_539, %c0_540, %c0_541] : memref<2x1x8xf32, #tpu.memory_space<vmem>>, vector<1x1x8xf32>
    %747 = vector.shape_cast %746 : vector<1x1x8xf32> to vector<1x8xf32>
    %748 = vector.broadcast %747 : vector<1x8xf32> to vector<32x8xf32>
    %749 = arith.addf %745, %748 : vector<32x8xf32>
    %750 = arith.addf %661, %749 : vector<32x8xf32>
    %c0_542 = arith.constant 0 : index
    %c0_543 = arith.constant 0 : index
    %c0_544 = arith.constant 0 : index
    %751 = vector.load %arg51[%c0_542, %c0_543, %c0_544] : memref<2x1x8xf32, #tpu.memory_space<vmem>>, vector<1x1x8xf32>
    %752 = vector.shape_cast %751 : vector<1x1x8xf32> to vector<1x8xf32>
    %c0_545 = arith.constant 0 : index
    %c0_546 = arith.constant 0 : index
    %c0_547 = arith.constant 0 : index
    %753 = vector.load %arg45[%c0_545, %c0_546, %c0_547] : memref<2x1x8xf32, #tpu.memory_space<vmem>>, vector<1x1x8xf32>
    %754 = vector.shape_cast %753 : vector<1x1x8xf32> to vector<1x8xf32>
    %cst_548 = arith.constant dense<0.000000e+00> : vector<32xf32>
    %755 = vector.multi_reduction <add>, %750, %cst_548 [1] : vector<32x8xf32> to vector<32xf32>
    %756 = vector.shape_cast %755 : vector<32xf32> to vector<32x1xf32>
    %cst_549 = arith.constant 8.000000e+00 : f32
    %757 = vector.broadcast %cst_549 : f32 to vector<32x1xf32>
    %758 = arith.divf %756, %757 : vector<32x1xf32>
    %759 = vector.broadcast %758 : vector<32x1xf32> to vector<32x8xf32>
    %760 = arith.subf %750, %759 : vector<32x8xf32>
    %761 = arith.mulf %760, %760 : vector<32x8xf32>
    %cst_550 = arith.constant dense<0.000000e+00> : vector<32xf32>
    %762 = vector.multi_reduction <add>, %761, %cst_550 [1] : vector<32x8xf32> to vector<32xf32>
    %763 = vector.shape_cast %762 : vector<32xf32> to vector<32x1xf32>
    %cst_551 = arith.constant 8.000000e+00 : f32
    %764 = vector.broadcast %cst_551 : f32 to vector<32x1xf32>
    %765 = arith.divf %763, %764 : vector<32x1xf32>
    %766 = vector.broadcast %758 : vector<32x1xf32> to vector<32x8xf32>
    %767 = arith.subf %750, %766 : vector<32x8xf32>
    %cst_552 = arith.constant 9.99999974E-6 : f32
    %768 = vector.broadcast %cst_552 : f32 to vector<32x1xf32>
    %769 = arith.addf %765, %768 : vector<32x1xf32>
    %770 = math.rsqrt %769 : vector<32x1xf32>
    %771 = vector.broadcast %770 : vector<32x1xf32> to vector<32x8xf32>
    %772 = arith.mulf %767, %771 : vector<32x8xf32>
    %773 = vector.broadcast %752 : vector<1x8xf32> to vector<32x8xf32>
    %774 = arith.mulf %772, %773 : vector<32x8xf32>
    %775 = vector.broadcast %754 : vector<1x8xf32> to vector<32x8xf32>
    %776 = arith.addf %774, %775 : vector<32x8xf32>
    %777 = arith.truncf %776 : vector<32x8xf32> to vector<32x8xbf16>
    %c0_553 = arith.constant 0 : index
    %c0_554 = arith.constant 0 : index
    %c0_555 = arith.constant 0 : index
    %778 = vector.load %arg53[%c0_553, %c0_554, %c0_555] : memref<2x8x32xbf16, #tpu.memory_space<vmem>>, vector<1x8x32xbf16>
    %779 = vector.shape_cast %778 : vector<1x8x32xbf16> to vector<8x32xbf16>
    %cst_556 = arith.constant dense<0.000000e+00> : vector<32x32xf32>
    %780 = tpu.matmul %777, %779, %cst_556 {dimension_numbers = #tpu.dot_dimension_numbers<[1], [0], [0], [1], [0, 0, 1, 1], [], []>} : vector<32x8xbf16>, vector<8x32xbf16>, vector<32x32xf32> -> vector<32x32xf32>
    %c0_557 = arith.constant 0 : index
    %c0_558 = arith.constant 0 : index
    %c0_559 = arith.constant 0 : index
    %781 = vector.load %arg43[%c0_557, %c0_558, %c0_559] : memref<2x1x32xf32, #tpu.memory_space<vmem>>, vector<1x1x32xf32>
    %782 = vector.shape_cast %781 : vector<1x1x32xf32> to vector<1x32xf32>
    %783 = vector.broadcast %782 : vector<1x32xf32> to vector<32x32xf32>
    %784 = arith.addf %780, %783 : vector<32x32xf32>
    %cst_560 = arith.constant 0.000000e+00 : f32
    %785 = vector.broadcast %cst_560 : f32 to vector<32x32xf32>
    %786 = arith.maximumf %784, %785 : vector<32x32xf32>
    %787 = arith.truncf %786 : vector<32x32xf32> to vector<32x32xbf16>
    %c0_561 = arith.constant 0 : index
    %c0_562 = arith.constant 0 : index
    %c0_563 = arith.constant 0 : index
    %788 = vector.load %arg54[%c0_561, %c0_562, %c0_563] : memref<2x32x8xbf16, #tpu.memory_space<vmem>>, vector<1x32x8xbf16>
    %789 = vector.shape_cast %788 : vector<1x32x8xbf16> to vector<32x8xbf16>
    %cst_564 = arith.constant dense<0.000000e+00> : vector<32x8xf32>
    %790 = tpu.matmul %787, %789, %cst_564 {dimension_numbers = #tpu.dot_dimension_numbers<[1], [0], [0], [1], [0, 0, 1, 1], [], []>} : vector<32x32xbf16>, vector<32x8xbf16>, vector<32x8xf32> -> vector<32x8xf32>
    %c0_565 = arith.constant 0 : index
    %c0_566 = arith.constant 0 : index
    %c0_567 = arith.constant 0 : index
    %791 = vector.load %arg44[%c0_565, %c0_566, %c0_567] : memref<2x1x8xf32, #tpu.memory_space<vmem>>, vector<1x1x8xf32>
    %792 = vector.shape_cast %791 : vector<1x1x8xf32> to vector<1x8xf32>
    %793 = vector.broadcast %792 : vector<1x8xf32> to vector<32x8xf32>
    %794 = arith.addf %790, %793 : vector<32x8xf32>
    %795 = arith.addf %776, %794 : vector<32x8xf32>
    %c0_568 = arith.constant 0 : index
    %c0_569 = arith.constant 0 : index
    %c0_570 = arith.constant 0 : index
    %796 = vector.load %arg52[%c0_568, %c0_569, %c0_570] : memref<2x1x8xf32, #tpu.memory_space<vmem>>, vector<1x1x8xf32>
    %797 = vector.shape_cast %796 : vector<1x1x8xf32> to vector<1x8xf32>
    %c0_571 = arith.constant 0 : index
    %c0_572 = arith.constant 0 : index
    %c0_573 = arith.constant 0 : index
    %798 = vector.load %arg46[%c0_571, %c0_572, %c0_573] : memref<2x1x8xf32, #tpu.memory_space<vmem>>, vector<1x1x8xf32>
    %799 = vector.shape_cast %798 : vector<1x1x8xf32> to vector<1x8xf32>
    %cst_574 = arith.constant dense<0.000000e+00> : vector<32xf32>
    %800 = vector.multi_reduction <add>, %795, %cst_574 [1] : vector<32x8xf32> to vector<32xf32>
    %801 = vector.shape_cast %800 : vector<32xf32> to vector<32x1xf32>
    %cst_575 = arith.constant 8.000000e+00 : f32
    %802 = vector.broadcast %cst_575 : f32 to vector<32x1xf32>
    %803 = arith.divf %801, %802 : vector<32x1xf32>
    %804 = vector.broadcast %803 : vector<32x1xf32> to vector<32x8xf32>
    %805 = arith.subf %795, %804 : vector<32x8xf32>
    %806 = arith.mulf %805, %805 : vector<32x8xf32>
    %cst_576 = arith.constant dense<0.000000e+00> : vector<32xf32>
    %807 = vector.multi_reduction <add>, %806, %cst_576 [1] : vector<32x8xf32> to vector<32xf32>
    %808 = vector.shape_cast %807 : vector<32xf32> to vector<32x1xf32>
    %cst_577 = arith.constant 8.000000e+00 : f32
    %809 = vector.broadcast %cst_577 : f32 to vector<32x1xf32>
    %810 = arith.divf %808, %809 : vector<32x1xf32>
    %811 = vector.broadcast %803 : vector<32x1xf32> to vector<32x8xf32>
    %812 = arith.subf %795, %811 : vector<32x8xf32>
    %cst_578 = arith.constant 9.99999974E-6 : f32
    %813 = vector.broadcast %cst_578 : f32 to vector<32x1xf32>
    %814 = arith.addf %810, %813 : vector<32x1xf32>
    %815 = math.rsqrt %814 : vector<32x1xf32>
    %816 = vector.broadcast %815 : vector<32x1xf32> to vector<32x8xf32>
    %817 = arith.mulf %812, %816 : vector<32x8xf32>
    %818 = vector.broadcast %797 : vector<1x8xf32> to vector<32x8xf32>
    %819 = arith.mulf %817, %818 : vector<32x8xf32>
    %820 = vector.broadcast %799 : vector<1x8xf32> to vector<32x8xf32>
    %821 = arith.addf %819, %820 : vector<32x8xf32>
    %822 = arith.truncf %821 : vector<32x8xf32> to vector<32x8xbf16>
    %c1_579 = arith.constant 1 : index
    %c0_580 = arith.constant 0 : index
    %c0_581 = arith.constant 0 : index
    %c0_582 = arith.constant 0 : index
    %823 = vector.load %arg57[%c1_579, %c0_580, %c0_581, %c0_582] : memref<2x2x8x4xbf16, #tpu.memory_space<vmem>>, vector<1x1x8x4xbf16>
    %824 = vector.shape_cast %823 : vector<1x1x8x4xbf16> to vector<8x4xbf16>
    %cst_583 = arith.constant dense<0.000000e+00> : vector<32x4xf32>
    %825 = tpu.matmul %822, %824, %cst_583 {dimension_numbers = #tpu.dot_dimension_numbers<[1], [0], [0], [1], [0, 0, 1, 1], [], []>} : vector<32x8xbf16>, vector<8x4xbf16>, vector<32x4xf32> -> vector<32x4xf32>
    %c1_584 = arith.constant 1 : index
    %c0_585 = arith.constant 0 : index
    %c0_586 = arith.constant 0 : index
    %c0_587 = arith.constant 0 : index
    %826 = vector.load %arg49[%c1_584, %c0_585, %c0_586, %c0_587] : memref<2x2x1x4xf32, #tpu.memory_space<vmem>>, vector<1x1x1x4xf32>
    %827 = vector.shape_cast %826 : vector<1x1x1x4xf32> to vector<1x4xf32>
    %828 = vector.broadcast %827 : vector<1x4xf32> to vector<32x4xf32>
    %829 = arith.addf %825, %828 : vector<32x4xf32>
    %c1_588 = arith.constant 1 : index
    %c0_589 = arith.constant 0 : index
    %c0_590 = arith.constant 0 : index
    %c0_591 = arith.constant 0 : index
    %830 = vector.load %arg55[%c1_588, %c0_589, %c0_590, %c0_591] : memref<2x2x8x4xbf16, #tpu.memory_space<vmem>>, vector<1x1x8x4xbf16>
    %831 = vector.shape_cast %830 : vector<1x1x8x4xbf16> to vector<8x4xbf16>
    %cst_592 = arith.constant dense<0.000000e+00> : vector<32x4xf32>
    %832 = tpu.matmul %822, %831, %cst_592 {dimension_numbers = #tpu.dot_dimension_numbers<[1], [0], [0], [1], [0, 0, 1, 1], [], []>} : vector<32x8xbf16>, vector<8x4xbf16>, vector<32x4xf32> -> vector<32x4xf32>
    %c1_593 = arith.constant 1 : index
    %c0_594 = arith.constant 0 : index
    %c0_595 = arith.constant 0 : index
    %c0_596 = arith.constant 0 : index
    %833 = vector.load %arg47[%c1_593, %c0_594, %c0_595, %c0_596] : memref<2x2x1x4xf32, #tpu.memory_space<vmem>>, vector<1x1x1x4xf32>
    %834 = vector.shape_cast %833 : vector<1x1x1x4xf32> to vector<1x4xf32>
    %835 = vector.broadcast %834 : vector<1x4xf32> to vector<32x4xf32>
    %836 = arith.addf %832, %835 : vector<32x4xf32>
    %c1_597 = arith.constant 1 : index
    %c0_598 = arith.constant 0 : index
    %c0_599 = arith.constant 0 : index
    %c0_600 = arith.constant 0 : index
    %837 = vector.load %arg58[%c1_597, %c0_598, %c0_599, %c0_600] : memref<2x2x8x4xbf16, #tpu.memory_space<vmem>>, vector<1x1x8x4xbf16>
    %838 = vector.shape_cast %837 : vector<1x1x8x4xbf16> to vector<8x4xbf16>
    %cst_601 = arith.constant dense<0.000000e+00> : vector<32x4xf32>
    %839 = tpu.matmul %822, %838, %cst_601 {dimension_numbers = #tpu.dot_dimension_numbers<[1], [0], [0], [1], [0, 0, 1, 1], [], []>} : vector<32x8xbf16>, vector<8x4xbf16>, vector<32x4xf32> -> vector<32x4xf32>
    %c1_602 = arith.constant 1 : index
    %c0_603 = arith.constant 0 : index
    %c0_604 = arith.constant 0 : index
    %c0_605 = arith.constant 0 : index
    %840 = vector.load %arg50[%c1_602, %c0_603, %c0_604, %c0_605] : memref<2x2x1x4xf32, #tpu.memory_space<vmem>>, vector<1x1x1x4xf32>
    %841 = vector.shape_cast %840 : vector<1x1x1x4xf32> to vector<1x4xf32>
    %842 = vector.broadcast %841 : vector<1x4xf32> to vector<32x4xf32>
    %843 = arith.addf %839, %842 : vector<32x4xf32>
    %844 = arith.truncf %829 : vector<32x4xf32> to vector<32x4xbf16>
    %845 = arith.truncf %836 : vector<32x4xf32> to vector<32x4xbf16>
    %cst_606 = arith.constant dense<0.000000e+00> : vector<32x32xf32>
    %846 = tpu.matmul %844, %845, %cst_606 {dimension_numbers = #tpu.dot_dimension_numbers<[1], [1], [0], [0], [0, 0, 1, 0], [], []>} : vector<32x4xbf16>, vector<32x4xbf16>, vector<32x32xf32> -> vector<32x32xf32>
    %cst_607 = arith.constant dense<0xFF800000> : vector<32xf32>
    %847 = vector.multi_reduction <maximumf>, %846, %cst_607 [1] : vector<32x32xf32> to vector<32xf32>
    %848 = vector.shape_cast %847 : vector<32xf32> to vector<32x1xf32>
    %849 = vector.broadcast %848 : vector<32x1xf32> to vector<32x32xf32>
    %850 = arith.subf %846, %849 : vector<32x32xf32>
    %851 = math.exp %850 : vector<32x32xf32>
    %cst_608 = arith.constant dense<0.000000e+00> : vector<32xf32>
    %852 = vector.multi_reduction <add>, %851, %cst_608 [1] : vector<32x32xf32> to vector<32xf32>
    %853 = vector.shape_cast %852 : vector<32xf32> to vector<32x1xf32>
    %854 = tpu.reciprocal %853 {approx = true} : vector<32x1xf32> -> vector<32x1xf32>
    %855 = vector.broadcast %854 : vector<32x1xf32> to vector<32x32xf32>
    %856 = arith.mulf %851, %855 : vector<32x32xf32>
    %857 = arith.truncf %856 : vector<32x32xf32> to vector<32x32xbf16>
    %858 = arith.truncf %843 : vector<32x4xf32> to vector<32x4xbf16>
    %cst_609 = arith.constant dense<0.000000e+00> : vector<32x4xf32>
    %859 = tpu.matmul %857, %858, %cst_609 {dimension_numbers = #tpu.dot_dimension_numbers<[1], [0], [0], [1], [0, 0, 1, 1], [], []>} : vector<32x32xbf16>, vector<32x4xbf16>, vector<32x4xf32> -> vector<32x4xf32>
    %860 = arith.truncf %859 : vector<32x4xf32> to vector<32x4xbf16>
    %c1_610 = arith.constant 1 : index
    %c0_611 = arith.constant 0 : index
    %c0_612 = arith.constant 0 : index
    %c0_613 = arith.constant 0 : index
    %861 = vector.load %arg56[%c1_610, %c0_611, %c0_612, %c0_613] : memref<2x2x4x8xbf16, #tpu.memory_space<vmem>>, vector<1x1x4x8xbf16>
    %862 = vector.shape_cast %861 : vector<1x1x4x8xbf16> to vector<4x8xbf16>
    %cst_614 = arith.constant dense<0.000000e+00> : vector<32x8xf32>
    %863 = tpu.matmul %860, %862, %cst_614 {dimension_numbers = #tpu.dot_dimension_numbers<[1], [0], [0], [1], [0, 0, 1, 1], [], []>} : vector<32x4xbf16>, vector<4x8xbf16>, vector<32x8xf32> -> vector<32x8xf32>
    %c1_615 = arith.constant 1 : index
    %c1_616 = arith.constant 1 : index
    %c0_617 = arith.constant 0 : index
    %c0_618 = arith.constant 0 : index
    %864 = vector.load %arg57[%c1_615, %c1_616, %c0_617, %c0_618] : memref<2x2x8x4xbf16, #tpu.memory_space<vmem>>, vector<1x1x8x4xbf16>
    %865 = vector.shape_cast %864 : vector<1x1x8x4xbf16> to vector<8x4xbf16>
    %cst_619 = arith.constant dense<0.000000e+00> : vector<32x4xf32>
    %866 = tpu.matmul %822, %865, %cst_619 {dimension_numbers = #tpu.dot_dimension_numbers<[1], [0], [0], [1], [0, 0, 1, 1], [], []>} : vector<32x8xbf16>, vector<8x4xbf16>, vector<32x4xf32> -> vector<32x4xf32>
    %c1_620 = arith.constant 1 : index
    %c1_621 = arith.constant 1 : index
    %c0_622 = arith.constant 0 : index
    %c0_623 = arith.constant 0 : index
    %867 = vector.load %arg49[%c1_620, %c1_621, %c0_622, %c0_623] : memref<2x2x1x4xf32, #tpu.memory_space<vmem>>, vector<1x1x1x4xf32>
    %868 = vector.shape_cast %867 : vector<1x1x1x4xf32> to vector<1x4xf32>
    %869 = vector.broadcast %868 : vector<1x4xf32> to vector<32x4xf32>
    %870 = arith.addf %866, %869 : vector<32x4xf32>
    %c1_624 = arith.constant 1 : index
    %c1_625 = arith.constant 1 : index
    %c0_626 = arith.constant 0 : index
    %c0_627 = arith.constant 0 : index
    %871 = vector.load %arg55[%c1_624, %c1_625, %c0_626, %c0_627] : memref<2x2x8x4xbf16, #tpu.memory_space<vmem>>, vector<1x1x8x4xbf16>
    %872 = vector.shape_cast %871 : vector<1x1x8x4xbf16> to vector<8x4xbf16>
    %cst_628 = arith.constant dense<0.000000e+00> : vector<32x4xf32>
    %873 = tpu.matmul %822, %872, %cst_628 {dimension_numbers = #tpu.dot_dimension_numbers<[1], [0], [0], [1], [0, 0, 1, 1], [], []>} : vector<32x8xbf16>, vector<8x4xbf16>, vector<32x4xf32> -> vector<32x4xf32>
    %c1_629 = arith.constant 1 : index
    %c1_630 = arith.constant 1 : index
    %c0_631 = arith.constant 0 : index
    %c0_632 = arith.constant 0 : index
    %874 = vector.load %arg47[%c1_629, %c1_630, %c0_631, %c0_632] : memref<2x2x1x4xf32, #tpu.memory_space<vmem>>, vector<1x1x1x4xf32>
    %875 = vector.shape_cast %874 : vector<1x1x1x4xf32> to vector<1x4xf32>
    %876 = vector.broadcast %875 : vector<1x4xf32> to vector<32x4xf32>
    %877 = arith.addf %873, %876 : vector<32x4xf32>
    %c1_633 = arith.constant 1 : index
    %c1_634 = arith.constant 1 : index
    %c0_635 = arith.constant 0 : index
    %c0_636 = arith.constant 0 : index
    %878 = vector.load %arg58[%c1_633, %c1_634, %c0_635, %c0_636] : memref<2x2x8x4xbf16, #tpu.memory_space<vmem>>, vector<1x1x8x4xbf16>
    %879 = vector.shape_cast %878 : vector<1x1x8x4xbf16> to vector<8x4xbf16>
    %cst_637 = arith.constant dense<0.000000e+00> : vector<32x4xf32>
    %880 = tpu.matmul %822, %879, %cst_637 {dimension_numbers = #tpu.dot_dimension_numbers<[1], [0], [0], [1], [0, 0, 1, 1], [], []>} : vector<32x8xbf16>, vector<8x4xbf16>, vector<32x4xf32> -> vector<32x4xf32>
    %c1_638 = arith.constant 1 : index
    %c1_639 = arith.constant 1 : index
    %c0_640 = arith.constant 0 : index
    %c0_641 = arith.constant 0 : index
    %881 = vector.load %arg50[%c1_638, %c1_639, %c0_640, %c0_641] : memref<2x2x1x4xf32, #tpu.memory_space<vmem>>, vector<1x1x1x4xf32>
    %882 = vector.shape_cast %881 : vector<1x1x1x4xf32> to vector<1x4xf32>
    %883 = vector.broadcast %882 : vector<1x4xf32> to vector<32x4xf32>
    %884 = arith.addf %880, %883 : vector<32x4xf32>
    %885 = arith.truncf %870 : vector<32x4xf32> to vector<32x4xbf16>
    %886 = arith.truncf %877 : vector<32x4xf32> to vector<32x4xbf16>
    %cst_642 = arith.constant dense<0.000000e+00> : vector<32x32xf32>
    %887 = tpu.matmul %885, %886, %cst_642 {dimension_numbers = #tpu.dot_dimension_numbers<[1], [1], [0], [0], [0, 0, 1, 0], [], []>} : vector<32x4xbf16>, vector<32x4xbf16>, vector<32x32xf32> -> vector<32x32xf32>
    %cst_643 = arith.constant dense<0xFF800000> : vector<32xf32>
    %888 = vector.multi_reduction <maximumf>, %887, %cst_643 [1] : vector<32x32xf32> to vector<32xf32>
    %889 = vector.shape_cast %888 : vector<32xf32> to vector<32x1xf32>
    %890 = vector.broadcast %889 : vector<32x1xf32> to vector<32x32xf32>
    %891 = arith.subf %887, %890 : vector<32x32xf32>
    %892 = math.exp %891 : vector<32x32xf32>
    %cst_644 = arith.constant dense<0.000000e+00> : vector<32xf32>
    %893 = vector.multi_reduction <add>, %892, %cst_644 [1] : vector<32x32xf32> to vector<32xf32>
    %894 = vector.shape_cast %893 : vector<32xf32> to vector<32x1xf32>
    %895 = tpu.reciprocal %894 {approx = true} : vector<32x1xf32> -> vector<32x1xf32>
    %896 = vector.broadcast %895 : vector<32x1xf32> to vector<32x32xf32>
    %897 = arith.mulf %892, %896 : vector<32x32xf32>
    %898 = arith.truncf %897 : vector<32x32xf32> to vector<32x32xbf16>
    %899 = arith.truncf %884 : vector<32x4xf32> to vector<32x4xbf16>
    %cst_645 = arith.constant dense<0.000000e+00> : vector<32x4xf32>
    %900 = tpu.matmul %898, %899, %cst_645 {dimension_numbers = #tpu.dot_dimension_numbers<[1], [0], [0], [1], [0, 0, 1, 1], [], []>} : vector<32x32xbf16>, vector<32x4xbf16>, vector<32x4xf32> -> vector<32x4xf32>
    %901 = arith.truncf %900 : vector<32x4xf32> to vector<32x4xbf16>
    %c1_646 = arith.constant 1 : index
    %c1_647 = arith.constant 1 : index
    %c0_648 = arith.constant 0 : index
    %c0_649 = arith.constant 0 : index
    %902 = vector.load %arg56[%c1_646, %c1_647, %c0_648, %c0_649] : memref<2x2x4x8xbf16, #tpu.memory_space<vmem>>, vector<1x1x4x8xbf16>
    %903 = vector.shape_cast %902 : vector<1x1x4x8xbf16> to vector<4x8xbf16>
    %cst_650 = arith.constant dense<0.000000e+00> : vector<32x8xf32>
    %904 = tpu.matmul %901, %903, %cst_650 {dimension_numbers = #tpu.dot_dimension_numbers<[1], [0], [0], [1], [0, 0, 1, 1], [], []>} : vector<32x4xbf16>, vector<4x8xbf16>, vector<32x8xf32> -> vector<32x8xf32>
    %905 = arith.addf %863, %904 : vector<32x8xf32>
    %c1_651 = arith.constant 1 : index
    %c0_652 = arith.constant 0 : index
    %c0_653 = arith.constant 0 : index
    %906 = vector.load %arg48[%c1_651, %c0_652, %c0_653] : memref<2x1x8xf32, #tpu.memory_space<vmem>>, vector<1x1x8xf32>
    %907 = vector.shape_cast %906 : vector<1x1x8xf32> to vector<1x8xf32>
    %908 = vector.broadcast %907 : vector<1x8xf32> to vector<32x8xf32>
    %909 = arith.addf %905, %908 : vector<32x8xf32>
    %910 = arith.addf %821, %909 : vector<32x8xf32>
    %c1_654 = arith.constant 1 : index
    %c0_655 = arith.constant 0 : index
    %c0_656 = arith.constant 0 : index
    %911 = vector.load %arg51[%c1_654, %c0_655, %c0_656] : memref<2x1x8xf32, #tpu.memory_space<vmem>>, vector<1x1x8xf32>
    %912 = vector.shape_cast %911 : vector<1x1x8xf32> to vector<1x8xf32>
    %c1_657 = arith.constant 1 : index
    %c0_658 = arith.constant 0 : index
    %c0_659 = arith.constant 0 : index
    %913 = vector.load %arg45[%c1_657, %c0_658, %c0_659] : memref<2x1x8xf32, #tpu.memory_space<vmem>>, vector<1x1x8xf32>
    %914 = vector.shape_cast %913 : vector<1x1x8xf32> to vector<1x8xf32>
    %cst_660 = arith.constant dense<0.000000e+00> : vector<32xf32>
    %915 = vector.multi_reduction <add>, %910, %cst_660 [1] : vector<32x8xf32> to vector<32xf32>
    %916 = vector.shape_cast %915 : vector<32xf32> to vector<32x1xf32>
    %cst_661 = arith.constant 8.000000e+00 : f32
    %917 = vector.broadcast %cst_661 : f32 to vector<32x1xf32>
    %918 = arith.divf %916, %917 : vector<32x1xf32>
    %919 = vector.broadcast %918 : vector<32x1xf32> to vector<32x8xf32>
    %920 = arith.subf %910, %919 : vector<32x8xf32>
    %921 = arith.mulf %920, %920 : vector<32x8xf32>
    %cst_662 = arith.constant dense<0.000000e+00> : vector<32xf32>
    %922 = vector.multi_reduction <add>, %921, %cst_662 [1] : vector<32x8xf32> to vector<32xf32>
    %923 = vector.shape_cast %922 : vector<32xf32> to vector<32x1xf32>
    %cst_663 = arith.constant 8.000000e+00 : f32
    %924 = vector.broadcast %cst_663 : f32 to vector<32x1xf32>
    %925 = arith.divf %923, %924 : vector<32x1xf32>
    %926 = vector.broadcast %918 : vector<32x1xf32> to vector<32x8xf32>
    %927 = arith.subf %910, %926 : vector<32x8xf32>
    %cst_664 = arith.constant 9.99999974E-6 : f32
    %928 = vector.broadcast %cst_664 : f32 to vector<32x1xf32>
    %929 = arith.addf %925, %928 : vector<32x1xf32>
    %930 = math.rsqrt %929 : vector<32x1xf32>
    %931 = vector.broadcast %930 : vector<32x1xf32> to vector<32x8xf32>
    %932 = arith.mulf %927, %931 : vector<32x8xf32>
    %933 = vector.broadcast %912 : vector<1x8xf32> to vector<32x8xf32>
    %934 = arith.mulf %932, %933 : vector<32x8xf32>
    %935 = vector.broadcast %914 : vector<1x8xf32> to vector<32x8xf32>
    %936 = arith.addf %934, %935 : vector<32x8xf32>
    %937 = arith.truncf %936 : vector<32x8xf32> to vector<32x8xbf16>
    %c1_665 = arith.constant 1 : index
    %c0_666 = arith.constant 0 : index
    %c0_667 = arith.constant 0 : index
    %938 = vector.load %arg53[%c1_665, %c0_666, %c0_667] : memref<2x8x32xbf16, #tpu.memory_space<vmem>>, vector<1x8x32xbf16>
    %939 = vector.shape_cast %938 : vector<1x8x32xbf16> to vector<8x32xbf16>
    %cst_668 = arith.constant dense<0.000000e+00> : vector<32x32xf32>
    %940 = tpu.matmul %937, %939, %cst_668 {dimension_numbers = #tpu.dot_dimension_numbers<[1], [0], [0], [1], [0, 0, 1, 1], [], []>} : vector<32x8xbf16>, vector<8x32xbf16>, vector<32x32xf32> -> vector<32x32xf32>
    %c1_669 = arith.constant 1 : index
    %c0_670 = arith.constant 0 : index
    %c0_671 = arith.constant 0 : index
    %941 = vector.load %arg43[%c1_669, %c0_670, %c0_671] : memref<2x1x32xf32, #tpu.memory_space<vmem>>, vector<1x1x32xf32>
    %942 = vector.shape_cast %941 : vector<1x1x32xf32> to vector<1x32xf32>
    %943 = vector.broadcast %942 : vector<1x32xf32> to vector<32x32xf32>
    %944 = arith.addf %940, %943 : vector<32x32xf32>
    %cst_672 = arith.constant 0.000000e+00 : f32
    %945 = vector.broadcast %cst_672 : f32 to vector<32x32xf32>
    %946 = arith.maximumf %944, %945 : vector<32x32xf32>
    %947 = arith.truncf %946 : vector<32x32xf32> to vector<32x32xbf16>
    %c1_673 = arith.constant 1 : index
    %c0_674 = arith.constant 0 : index
    %c0_675 = arith.constant 0 : index
    %948 = vector.load %arg54[%c1_673, %c0_674, %c0_675] : memref<2x32x8xbf16, #tpu.memory_space<vmem>>, vector<1x32x8xbf16>
    %949 = vector.shape_cast %948 : vector<1x32x8xbf16> to vector<32x8xbf16>
    %cst_676 = arith.constant dense<0.000000e+00> : vector<32x8xf32>
    %950 = tpu.matmul %947, %949, %cst_676 {dimension_numbers = #tpu.dot_dimension_numbers<[1], [0], [0], [1], [0, 0, 1, 1], [], []>} : vector<32x32xbf16>, vector<32x8xbf16>, vector<32x8xf32> -> vector<32x8xf32>
    %c1_677 = arith.constant 1 : index
    %c0_678 = arith.constant 0 : index
    %c0_679 = arith.constant 0 : index
    %951 = vector.load %arg44[%c1_677, %c0_678, %c0_679] : memref<2x1x8xf32, #tpu.memory_space<vmem>>, vector<1x1x8xf32>
    %952 = vector.shape_cast %951 : vector<1x1x8xf32> to vector<1x8xf32>
    %953 = vector.broadcast %952 : vector<1x8xf32> to vector<32x8xf32>
    %954 = arith.addf %950, %953 : vector<32x8xf32>
    %955 = arith.addf %936, %954 : vector<32x8xf32>
    %c1_680 = arith.constant 1 : index
    %c0_681 = arith.constant 0 : index
    %c0_682 = arith.constant 0 : index
    %956 = vector.load %arg52[%c1_680, %c0_681, %c0_682] : memref<2x1x8xf32, #tpu.memory_space<vmem>>, vector<1x1x8xf32>
    %957 = vector.shape_cast %956 : vector<1x1x8xf32> to vector<1x8xf32>
    %c1_683 = arith.constant 1 : index
    %c0_684 = arith.constant 0 : index
    %c0_685 = arith.constant 0 : index
    %958 = vector.load %arg46[%c1_683, %c0_684, %c0_685] : memref<2x1x8xf32, #tpu.memory_space<vmem>>, vector<1x1x8xf32>
    %959 = vector.shape_cast %958 : vector<1x1x8xf32> to vector<1x8xf32>
    %cst_686 = arith.constant dense<0.000000e+00> : vector<32xf32>
    %960 = vector.multi_reduction <add>, %955, %cst_686 [1] : vector<32x8xf32> to vector<32xf32>
    %961 = vector.shape_cast %960 : vector<32xf32> to vector<32x1xf32>
    %cst_687 = arith.constant 8.000000e+00 : f32
    %962 = vector.broadcast %cst_687 : f32 to vector<32x1xf32>
    %963 = arith.divf %961, %962 : vector<32x1xf32>
    %964 = vector.broadcast %963 : vector<32x1xf32> to vector<32x8xf32>
    %965 = arith.subf %955, %964 : vector<32x8xf32>
    %966 = arith.mulf %965, %965 : vector<32x8xf32>
    %cst_688 = arith.constant dense<0.000000e+00> : vector<32xf32>
    %967 = vector.multi_reduction <add>, %966, %cst_688 [1] : vector<32x8xf32> to vector<32xf32>
    %968 = vector.shape_cast %967 : vector<32xf32> to vector<32x1xf32>
    %cst_689 = arith.constant 8.000000e+00 : f32
    %969 = vector.broadcast %cst_689 : f32 to vector<32x1xf32>
    %970 = arith.divf %968, %969 : vector<32x1xf32>
    %971 = vector.broadcast %963 : vector<32x1xf32> to vector<32x8xf32>
    %972 = arith.subf %955, %971 : vector<32x8xf32>
    %cst_690 = arith.constant 9.99999974E-6 : f32
    %973 = vector.broadcast %cst_690 : f32 to vector<32x1xf32>
    %974 = arith.addf %970, %973 : vector<32x1xf32>
    %975 = math.rsqrt %974 : vector<32x1xf32>
    %976 = vector.broadcast %975 : vector<32x1xf32> to vector<32x8xf32>
    %977 = arith.mulf %972, %976 : vector<32x8xf32>
    %978 = vector.broadcast %957 : vector<1x8xf32> to vector<32x8xf32>
    %979 = arith.mulf %977, %978 : vector<32x8xf32>
    %980 = vector.broadcast %959 : vector<1x8xf32> to vector<32x8xf32>
    %981 = arith.addf %979, %980 : vector<32x8xf32>
    %cst_691 = arith.constant dense<0.000000e+00> : vector<8xf32>
    %982 = vector.multi_reduction <add>, %981, %cst_691 [0] : vector<32x8xf32> to vector<8xf32>
    %983 = vector.shape_cast %982 : vector<8xf32> to vector<1x8xf32>
    %cst_692 = arith.constant 3.200000e+01 : f32
    %984 = vector.broadcast %cst_692 : f32 to vector<1x8xf32>
    %985 = arith.divf %983, %984 : vector<1x8xf32>
    %986 = arith.truncf %985 : vector<1x8xf32> to vector<1x8xbf16>
    %c0_693 = arith.constant 0 : index
    %c0_694 = arith.constant 0 : index
    %987 = vector.load %arg60[%c0_693, %c0_694] : memref<8x64xbf16, #tpu.memory_space<vmem>>, vector<8x64xbf16>
    %cst_695 = arith.constant dense<0.000000e+00> : vector<1x64xf32>
    %988 = tpu.matmul %986, %987, %cst_695 {dimension_numbers = #tpu.dot_dimension_numbers<[1], [0], [0], [1], [0, 0, 1, 1], [], []>} : vector<1x8xbf16>, vector<8x64xbf16>, vector<1x64xf32> -> vector<1x64xf32>
    %c0_696 = arith.constant 0 : index
    %c0_697 = arith.constant 0 : index
    %989 = vector.load %arg4[%c0_696, %c0_697] : memref<1x64xf32, #tpu.memory_space<vmem>>, vector<1x64xf32>
    %990 = arith.addf %988, %989 : vector<1x64xf32>
    %991 = math.tanh %990 : vector<1x64xf32>
    %992 = arith.truncf %991 : vector<1x64xf32> to vector<1x64xbf16>
    %c0_698 = arith.constant 0 : index
    %c0_699 = arith.constant 0 : index
    %993 = vector.load %arg59[%c0_698, %c0_699] : memref<64x6xbf16, #tpu.memory_space<vmem>>, vector<64x6xbf16>
    %cst_700 = arith.constant dense<0.000000e+00> : vector<1x6xf32>
    %994 = tpu.matmul %992, %993, %cst_700 {dimension_numbers = #tpu.dot_dimension_numbers<[1], [0], [0], [1], [0, 0, 1, 1], [], []>} : vector<1x64xbf16>, vector<64x6xbf16>, vector<1x6xf32> -> vector<1x6xf32>
    %c0_701 = arith.constant 0 : index
    %c0_702 = arith.constant 0 : index
    %995 = vector.load %arg3[%c0_701, %c0_702] : memref<1x6xf32, #tpu.memory_space<vmem>>, vector<1x6xf32>
    %996 = arith.addf %994, %995 : vector<1x6xf32>
    %c0_703 = arith.constant 0 : index
    %c0_704 = arith.constant 0 : index
    %c0_705 = arith.constant 0 : index
    %997 = vector.load %arg61[%c0_703, %c0_704, %c0_705] : memref<1x1x6xf32, #tpu.memory_space<vmem>>, vector<1x1x6xf32>
    %998 = vector.shape_cast %997 : vector<1x1x6xf32> to vector<1x6xf32>
    %999 = vector.shape_cast %996 : vector<1x6xf32> to vector<1x1x6xf32>
    tpu.vector_store %arg61[%c0_703, %c0_704, %c0_705], %999 {strides = array<i32>} : memref<1x1x6xf32, #tpu.memory_space<vmem>>, vector<1x1x6xf32>,
    return
  }
  func.func @transform_0(%arg0: i32) -> (i32, i32, i32) {
    %c0_i32 = arith.constant 0 : i32
    %c0_i32_0 = arith.constant 0 : i32
    %c0_i32_1 = arith.constant 0 : i32
    return %arg0, %c0_i32, %c0_i32_0 : i32, i32, i32
  }
  func.func @transform_1(%arg0: i32) -> (i32, i32, i32) {
    %c0_i32 = arith.constant 0 : i32
    %c0_i32_0 = arith.constant 0 : i32
    %c0_i32_1 = arith.constant 0 : i32
    return %arg0, %c0_i32, %c0_i32_0 : i32, i32, i32
  }
  func.func @transform_2(%arg0: i32) -> (i32, i32) {
    %c0_i32 = arith.constant 0 : i32
    %c0_i32_0 = arith.constant 0 : i32
    %c0_i32_1 = arith.constant 0 : i32
    return %c0_i32, %c0_i32_0 : i32, i32
  }
  func.func @transform_3(%arg0: i32) -> (i32, i32) {
    %c0_i32 = arith.constant 0 : i32
    %c0_i32_0 = arith.constant 0 : i32
    %c0_i32_1 = arith.constant 0 : i32
    return %c0_i32, %c0_i32_0 : i32, i32
  }
  func.func @transform_4(%arg0: i32) -> (i32, i32, i32) {
    %c0_i32 = arith.constant 0 : i32
    %c0_i32_0 = arith.constant 0 : i32
    %c0_i32_1 = arith.constant 0 : i32
    %c0_i32_2 = arith.constant 0 : i32
    return %c0_i32, %c0_i32_0, %c0_i32_1 : i32, i32, i32
  }
  func.func @transform_5(%arg0: i32) -> (i32, i32, i32) {
    %c0_i32 = arith.constant 0 : i32
    %c0_i32_0 = arith.constant 0 : i32
    %c0_i32_1 = arith.constant 0 : i32
    %c0_i32_2 = arith.constant 0 : i32
    return %c0_i32, %c0_i32_0, %c0_i32_1 : i32, i32, i32
  }
  func.func @transform_6(%arg0: i32) -> (i32, i32, i32) {
    %c0_i32 = arith.constant 0 : i32
    %c0_i32_0 = arith.constant 0 : i32
    %c0_i32_1 = arith.constant 0 : i32
    %c0_i32_2 = arith.constant 0 : i32
    return %c0_i32, %c0_i32_0, %c0_i32_1 : i32, i32, i32
  }
  func.func @transform_7(%arg0: i32) -> (i32, i32, i32) {
    %c0_i32 = arith.constant 0 : i32
    %c0_i32_0 = arith.constant 0 : i32
    %c0_i32_1 = arith.constant 0 : i32
    %c0_i32_2 = arith.constant 0 : i32
    return %c0_i32, %c0_i32_0, %c0_i32_1 : i32, i32, i32
  }
  func.func @transform_8(%arg0: i32) -> (i32, i32, i32, i32) {
    %c0_i32 = arith.constant 0 : i32
    %c0_i32_0 = arith.constant 0 : i32
    %c0_i32_1 = arith.constant 0 : i32
    %c0_i32_2 = arith.constant 0 : i32
    %c0_i32_3 = arith.constant 0 : i32
    return %c0_i32, %c0_i32_0, %c0_i32_1, %c0_i32_2 : i32, i32, i32, i32
  }
  func.func @transform_9(%arg0: i32) -> (i32, i32, i32) {
    %c0_i32 = arith.constant 0 : i32
    %c0_i32_0 = arith.constant 0 : i32
    %c0_i32_1 = arith.constant 0 : i32
    %c0_i32_2 = arith.constant 0 : i32
    return %c0_i32, %c0_i32_0, %c0_i32_1 : i32, i32, i32
  }
  func.func @transform_10(%arg0: i32) -> (i32, i32, i32, i32) {
    %c0_i32 = arith.constant 0 : i32
    %c0_i32_0 = arith.constant 0 : i32
    %c0_i32_1 = arith.constant 0 : i32
    %c0_i32_2 = arith.constant 0 : i32
    %c0_i32_3 = arith.constant 0 : i32
    return %c0_i32, %c0_i32_0, %c0_i32_1, %c0_i32_2 : i32, i32, i32, i32
  }
  func.func @transform_11(%arg0: i32) -> (i32, i32, i32, i32) {
    %c0_i32 = arith.constant 0 : i32
    %c0_i32_0 = arith.constant 0 : i32
    %c0_i32_1 = arith.constant 0 : i32
    %c0_i32_2 = arith.constant 0 : i32
    %c0_i32_3 = arith.constant 0 : i32
    return %c0_i32, %c0_i32_0, %c0_i32_1, %c0_i32_2 : i32, i32, i32, i32
  }
  func.func @transform_12(%arg0: i32) -> (i32, i32, i32) {
    %c0_i32 = arith.constant 0 : i32
    %c0_i32_0 = arith.constant 0 : i32
    %c0_i32_1 = arith.constant 0 : i32
    %c0_i32_2 = arith.constant 0 : i32
    return %c0_i32, %c0_i32_0, %c0_i32_1 : i32, i32, i32
  }
  func.func @transform_13(%arg0: i32) -> (i32, i32, i32) {
    %c0_i32 = arith.constant 0 : i32
    %c0_i32_0 = arith.constant 0 : i32
    %c0_i32_1 = arith.constant 0 : i32
    %c0_i32_2 = arith.constant 0 : i32
    return %c0_i32, %c0_i32_0, %c0_i32_1 : i32, i32, i32
  }
  func.func @transform_14(%arg0: i32) -> (i32, i32, i32) {
    %c0_i32 = arith.constant 0 : i32
    %c0_i32_0 = arith.constant 0 : i32
    %c0_i32_1 = arith.constant 0 : i32
    %c0_i32_2 = arith.constant 0 : i32
    return %c0_i32, %c0_i32_0, %c0_i32_1 : i32, i32, i32
  }
  func.func @transform_15(%arg0: i32) -> (i32, i32, i32) {
    %c0_i32 = arith.constant 0 : i32
    %c0_i32_0 = arith.constant 0 : i32
    %c0_i32_1 = arith.constant 0 : i32
    %c0_i32_2 = arith.constant 0 : i32
    return %c0_i32, %c0_i32_0, %c0_i32_1 : i32, i32, i32
  }
  func.func @transform_16(%arg0: i32) -> (i32, i32, i32, i32) {
    %c0_i32 = arith.constant 0 : i32
    %c0_i32_0 = arith.constant 0 : i32
    %c0_i32_1 = arith.constant 0 : i32
    %c0_i32_2 = arith.constant 0 : i32
    %c0_i32_3 = arith.constant 0 : i32
    return %c0_i32, %c0_i32_0, %c0_i32_1, %c0_i32_2 : i32, i32, i32, i32
  }
  func.func @transform_17(%arg0: i32) -> (i32, i32, i32, i32) {
    %c0_i32 = arith.constant 0 : i32
    %c0_i32_0 = arith.constant 0 : i32
    %c0_i32_1 = arith.constant 0 : i32
    %c0_i32_2 = arith.constant 0 : i32
    %c0_i32_3 = arith.constant 0 : i32
    return %c0_i32, %c0_i32_0, %c0_i32_1, %c0_i32_2 : i32, i32, i32, i32
  }
  func.func @transform_18(%arg0: i32) -> (i32, i32, i32, i32) {
    %c0_i32 = arith.constant 0 : i32
    %c0_i32_0 = arith.constant 0 : i32
    %c0_i32_1 = arith.constant 0 : i32
    %c0_i32_2 = arith.constant 0 : i32
    %c0_i32_3 = arith.constant 0 : i32
    return %c0_i32, %c0_i32_0, %c0_i32_1, %c0_i32_2 : i32, i32, i32, i32
  }
  func.func @transform_19(%arg0: i32) -> (i32, i32, i32, i32) {
    %c0_i32 = arith.constant 0 : i32
    %c0_i32_0 = arith.constant 0 : i32
    %c0_i32_1 = arith.constant 0 : i32
    %c0_i32_2 = arith.constant 0 : i32
    %c0_i32_3 = arith.constant 0 : i32
    return %c0_i32, %c0_i32_0, %c0_i32_1, %c0_i32_2 : i32, i32, i32, i32
  }
  func.func @transform_20(%arg0: i32) -> (i32, i32) {
    %c0_i32 = arith.constant 0 : i32
    %c0_i32_0 = arith.constant 0 : i32
    %c0_i32_1 = arith.constant 0 : i32
    return %c0_i32, %c0_i32_0 : i32, i32
  }
  func.func @transform_21(%arg0: i32) -> (i32, i32, i32) {
    %c0_i32 = arith.constant 0 : i32
    %c0_i32_0 = arith.constant 0 : i32
    %c0_i32_1 = arith.constant 0 : i32
    %c0_i32_2 = arith.constant 0 : i32
    return %c0_i32, %c0_i32_0, %c0_i32_1 : i32, i32, i32
  }
  func.func @transform_22(%arg0: i32) -> (i32, i32, i32) {
    %c0_i32 = arith.constant 0 : i32
    %c0_i32_0 = arith.constant 0 : i32
    %c0_i32_1 = arith.constant 0 : i32
    %c0_i32_2 = arith.constant 0 : i32
    return %c0_i32, %c0_i32_0, %c0_i32_1 : i32, i32, i32
  }
  func.func @transform_23(%arg0: i32) -> (i32, i32, i32) {
    %c0_i32 = arith.constant 0 : i32
    %c0_i32_0 = arith.constant 0 : i32
    %c0_i32_1 = arith.constant 0 : i32
    %c0_i32_2 = arith.constant 0 : i32
    return %c0_i32, %c0_i32_0, %c0_i32_1 : i32, i32, i32
  }
  func.func @transform_24(%arg0: i32) -> (i32, i32, i32) {
    %c0_i32 = arith.constant 0 : i32
    %c0_i32_0 = arith.constant 0 : i32
    %c0_i32_1 = arith.constant 0 : i32
    %c0_i32_2 = arith.constant 0 : i32
    return %c0_i32, %c0_i32_0, %c0_i32_1 : i32, i32, i32
  }
  func.func @transform_25(%arg0: i32) -> (i32, i32, i32, i32) {
    %c0_i32 = arith.constant 0 : i32
    %c0_i32_0 = arith.constant 0 : i32
    %c0_i32_1 = arith.constant 0 : i32
    %c0_i32_2 = arith.constant 0 : i32
    %c0_i32_3 = arith.constant 0 : i32
    return %c0_i32, %c0_i32_0, %c0_i32_1, %c0_i32_2 : i32, i32, i32, i32
  }
  func.func @transform_26(%arg0: i32) -> (i32, i32, i32) {
    %c0_i32 = arith.constant 0 : i32
    %c0_i32_0 = arith.constant 0 : i32
    %c0_i32_1 = arith.constant 0 : i32
    %c0_i32_2 = arith.constant 0 : i32
    return %c0_i32, %c0_i32_0, %c0_i32_1 : i32, i32, i32
  }
  func.func @transform_27(%arg0: i32) -> (i32, i32, i32, i32) {
    %c0_i32 = arith.constant 0 : i32
    %c0_i32_0 = arith.constant 0 : i32
    %c0_i32_1 = arith.constant 0 : i32
    %c0_i32_2 = arith.constant 0 : i32
    %c0_i32_3 = arith.constant 0 : i32
    return %c0_i32, %c0_i32_0, %c0_i32_1, %c0_i32_2 : i32, i32, i32, i32
  }
  func.func @transform_28(%arg0: i32) -> (i32, i32, i32, i32) {
    %c0_i32 = arith.constant 0 : i32
    %c0_i32_0 = arith.constant 0 : i32
    %c0_i32_1 = arith.constant 0 : i32
    %c0_i32_2 = arith.constant 0 : i32
    %c0_i32_3 = arith.constant 0 : i32
    return %c0_i32, %c0_i32_0, %c0_i32_1, %c0_i32_2 : i32, i32, i32, i32
  }
  func.func @transform_29(%arg0: i32) -> (i32, i32, i32) {
    %c0_i32 = arith.constant 0 : i32
    %c0_i32_0 = arith.constant 0 : i32
    %c0_i32_1 = arith.constant 0 : i32
    %c0_i32_2 = arith.constant 0 : i32
    return %c0_i32, %c0_i32_0, %c0_i32_1 : i32, i32, i32
  }
  func.func @transform_30(%arg0: i32) -> (i32, i32, i32) {
    %c0_i32 = arith.constant 0 : i32
    %c0_i32_0 = arith.constant 0 : i32
    %c0_i32_1 = arith.constant 0 : i32
    %c0_i32_2 = arith.constant 0 : i32
    return %c0_i32, %c0_i32_0, %c0_i32_1 : i32, i32, i32
  }
  func.func @transform_31(%arg0: i32) -> (i32, i32, i32) {
    %c0_i32 = arith.constant 0 : i32
    %c0_i32_0 = arith.constant 0 : i32
    %c0_i32_1 = arith.constant 0 : i32
    %c0_i32_2 = arith.constant 0 : i32
    return %c0_i32, %c0_i32_0, %c0_i32_1 : i32, i32, i32
  }
  func.func @transform_32(%arg0: i32) -> (i32, i32, i32) {
    %c0_i32 = arith.constant 0 : i32
    %c0_i32_0 = arith.constant 0 : i32
    %c0_i32_1 = arith.constant 0 : i32
    %c0_i32_2 = arith.constant 0 : i32
    return %c0_i32, %c0_i32_0, %c0_i32_1 : i32, i32, i32
  }
  func.func @transform_33(%arg0: i32) -> (i32, i32, i32, i32) {
    %c0_i32 = arith.constant 0 : i32
    %c0_i32_0 = arith.constant 0 : i32
    %c0_i32_1 = arith.constant 0 : i32
    %c0_i32_2 = arith.constant 0 : i32
    %c0_i32_3 = arith.constant 0 : i32
    return %c0_i32, %c0_i32_0, %c0_i32_1, %c0_i32_2 : i32, i32, i32, i32
  }
  func.func @transform_34(%arg0: i32) -> (i32, i32, i32, i32) {
    %c0_i32 = arith.constant 0 : i32
    %c0_i32_0 = arith.constant 0 : i32
    %c0_i32_1 = arith.constant 0 : i32
    %c0_i32_2 = arith.constant 0 : i32
    %c0_i32_3 = arith.constant 0 : i32
    return %c0_i32, %c0_i32_0, %c0_i32_1, %c0_i32_2 : i32, i32, i32, i32
  }
  func.func @transform_35(%arg0: i32) -> (i32, i32, i32, i32) {
    %c0_i32 = arith.constant 0 : i32
    %c0_i32_0 = arith.constant 0 : i32
    %c0_i32_1 = arith.constant 0 : i32
    %c0_i32_2 = arith.constant 0 : i32
    %c0_i32_3 = arith.constant 0 : i32
    return %c0_i32, %c0_i32_0, %c0_i32_1, %c0_i32_2 : i32, i32, i32, i32
  }
  func.func @transform_36(%arg0: i32) -> (i32, i32, i32, i32) {
    %c0_i32 = arith.constant 0 : i32
    %c0_i32_0 = arith.constant 0 : i32
    %c0_i32_1 = arith.constant 0 : i32
    %c0_i32_2 = arith.constant 0 : i32
    %c0_i32_3 = arith.constant 0 : i32
    return %c0_i32, %c0_i32_0, %c0_i32_1, %c0_i32_2 : i32, i32, i32, i32
  }
  func.func @transform_37(%arg0: i32) -> (i32, i32) {
    %c0_i32 = arith.constant 0 : i32
    %c0_i32_0 = arith.constant 0 : i32
    %c0_i32_1 = arith.constant 0 : i32
    return %c0_i32, %c0_i32_0 : i32, i32
  }
  func.func @transform_38(%arg0: i32) -> (i32, i32) {
    %c0_i32 = arith.constant 0 : i32
    %c0_i32_0 = arith.constant 0 : i32
    %c0_i32_1 = arith.constant 0 : i32
    return %c0_i32, %c0_i32_0 : i32, i32
  }
  func.func @transform_39(%arg0: i32) -> (i32, i32) {
    %c0_i32 = arith.constant 0 : i32
    %c0_i32_0 = arith.constant 0 : i32
    %c0_i32_1 = arith.constant 0 : i32
    return %c0_i32, %c0_i32_0 : i32, i32
  }
  func.func @transform_40(%arg0: i32) -> (i32, i32) {
    %c0_i32 = arith.constant 0 : i32
    %c0_i32_0 = arith.constant 0 : i32
    %c0_i32_1 = arith.constant 0 : i32
    return %c0_i32, %c0_i32_0 : i32, i32
  }
  func.func @transform_41(%arg0: i32) -> (i32, i32) {
    %c0_i32 = arith.constant 0 : i32
    %c0_i32_0 = arith.constant 0 : i32
    %c0_i32_1 = arith.constant 0 : i32
    return %c0_i32, %c0_i32_0 : i32, i32
  }
  func.func @transform_42(%arg0: i32) -> (i32, i32, i32) {
    %c0_i32 = arith.constant 0 : i32
    %c0_i32_0 = arith.constant 0 : i32
    %c0_i32_1 = arith.constant 0 : i32
    %c0_i32_2 = arith.constant 0 : i32
    return %c0_i32, %c0_i32_0, %c0_i32_1 : i32, i32, i32
  }
  func.func @transform_43(%arg0: i32) -> (i32, i32, i32) {
    %c0_i32 = arith.constant 0 : i32
    %c0_i32_0 = arith.constant 0 : i32
    %c0_i32_1 = arith.constant 0 : i32
    %c0_i32_2 = arith.constant 0 : i32
    return %c0_i32, %c0_i32_0, %c0_i32_1 : i32, i32, i32
  }
  func.func @transform_44(%arg0: i32) -> (i32, i32, i32) {
    %c0_i32 = arith.constant 0 : i32
    %c0_i32_0 = arith.constant 0 : i32
    %c0_i32_1 = arith.constant 0 : i32
    %c0_i32_2 = arith.constant 0 : i32
    return %c0_i32, %c0_i32_0, %c0_i32_1 : i32, i32, i32
  }
  func.func @transform_45(%arg0: i32) -> (i32, i32, i32) {
    %c0_i32 = arith.constant 0 : i32
    %c0_i32_0 = arith.constant 0 : i32
    %c0_i32_1 = arith.constant 0 : i32
    %c0_i32_2 = arith.constant 0 : i32
    return %c0_i32, %c0_i32_0, %c0_i32_1 : i32, i32, i32
  }
  func.func @transform_46(%arg0: i32) -> (i32, i32, i32, i32) {
    %c0_i32 = arith.constant 0 : i32
    %c0_i32_0 = arith.constant 0 : i32
    %c0_i32_1 = arith.constant 0 : i32
    %c0_i32_2 = arith.constant 0 : i32
    %c0_i32_3 = arith.constant 0 : i32
    return %c0_i32, %c0_i32_0, %c0_i32_1, %c0_i32_2 : i32, i32, i32, i32
  }
  func.func @transform_47(%arg0: i32) -> (i32, i32, i32) {
    %c0_i32 = arith.constant 0 : i32
    %c0_i32_0 = arith.constant 0 : i32
    %c0_i32_1 = arith.constant 0 : i32
    %c0_i32_2 = arith.constant 0 : i32
    return %c0_i32, %c0_i32_0, %c0_i32_1 : i32, i32, i32
  }
  func.func @transform_48(%arg0: i32) -> (i32, i32, i32, i32) {
    %c0_i32 = arith.constant 0 : i32
    %c0_i32_0 = arith.constant 0 : i32
    %c0_i32_1 = arith.constant 0 : i32
    %c0_i32_2 = arith.constant 0 : i32
    %c0_i32_3 = arith.constant 0 : i32
    return %c0_i32, %c0_i32_0, %c0_i32_1, %c0_i32_2 : i32, i32, i32, i32
  }
  func.func @transform_49(%arg0: i32) -> (i32, i32, i32, i32) {
    %c0_i32 = arith.constant 0 : i32
    %c0_i32_0 = arith.constant 0 : i32
    %c0_i32_1 = arith.constant 0 : i32
    %c0_i32_2 = arith.constant 0 : i32
    %c0_i32_3 = arith.constant 0 : i32
    return %c0_i32, %c0_i32_0, %c0_i32_1, %c0_i32_2 : i32, i32, i32, i32
  }
  func.func @transform_50(%arg0: i32) -> (i32, i32, i32) {
    %c0_i32 = arith.constant 0 : i32
    %c0_i32_0 = arith.constant 0 : i32
    %c0_i32_1 = arith.constant 0 : i32
    %c0_i32_2 = arith.constant 0 : i32
    return %c0_i32, %c0_i32_0, %c0_i32_1 : i32, i32, i32
  }
  func.func @transform_51(%arg0: i32) -> (i32, i32, i32) {
    %c0_i32 = arith.constant 0 : i32
    %c0_i32_0 = arith.constant 0 : i32
    %c0_i32_1 = arith.constant 0 : i32
    %c0_i32_2 = arith.constant 0 : i32
    return %c0_i32, %c0_i32_0, %c0_i32_1 : i32, i32, i32
  }
  func.func @transform_52(%arg0: i32) -> (i32, i32, i32) {
    %c0_i32 = arith.constant 0 : i32
    %c0_i32_0 = arith.constant 0 : i32
    %c0_i32_1 = arith.constant 0 : i32
    %c0_i32_2 = arith.constant 0 : i32
    return %c0_i32, %c0_i32_0, %c0_i32_1 : i32, i32, i32
  }
  func.func @transform_53(%arg0: i32) -> (i32, i32, i32) {
    %c0_i32 = arith.constant 0 : i32
    %c0_i32_0 = arith.constant 0 : i32
    %c0_i32_1 = arith.constant 0 : i32
    %c0_i32_2 = arith.constant 0 : i32
    return %c0_i32, %c0_i32_0, %c0_i32_1 : i32, i32, i32
  }
  func.func @transform_54(%arg0: i32) -> (i32, i32, i32, i32) {
    %c0_i32 = arith.constant 0 : i32
    %c0_i32_0 = arith.constant 0 : i32
    %c0_i32_1 = arith.constant 0 : i32
    %c0_i32_2 = arith.constant 0 : i32
    %c0_i32_3 = arith.constant 0 : i32
    return %c0_i32, %c0_i32_0, %c0_i32_1, %c0_i32_2 : i32, i32, i32, i32
  }
  func.func @transform_55(%arg0: i32) -> (i32, i32, i32, i32) {
    %c0_i32 = arith.constant 0 : i32
    %c0_i32_0 = arith.constant 0 : i32
    %c0_i32_1 = arith.constant 0 : i32
    %c0_i32_2 = arith.constant 0 : i32
    %c0_i32_3 = arith.constant 0 : i32
    return %c0_i32, %c0_i32_0, %c0_i32_1, %c0_i32_2 : i32, i32, i32, i32
  }
  func.func @transform_56(%arg0: i32) -> (i32, i32, i32, i32) {
    %c0_i32 = arith.constant 0 : i32
    %c0_i32_0 = arith.constant 0 : i32
    %c0_i32_1 = arith.constant 0 : i32
    %c0_i32_2 = arith.constant 0 : i32
    %c0_i32_3 = arith.constant 0 : i32
    return %c0_i32, %c0_i32_0, %c0_i32_1, %c0_i32_2 : i32, i32, i32, i32
  }
  func.func @transform_57(%arg0: i32) -> (i32, i32, i32, i32) {
    %c0_i32 = arith.constant 0 : i32
    %c0_i32_0 = arith.constant 0 : i32
    %c0_i32_1 = arith.constant 0 : i32
    %c0_i32_2 = arith.constant 0 : i32
    %c0_i32_3 = arith.constant 0 : i32
    return %c0_i32, %c0_i32_0, %c0_i32_1, %c0_i32_2 : i32, i32, i32, i32
  }
  func.func @transform_58(%arg0: i32) -> (i32, i32) {
    %c0_i32 = arith.constant 0 : i32
    %c0_i32_0 = arith.constant 0 : i32
    %c0_i32_1 = arith.constant 0 : i32
    return %c0_i32, %c0_i32_0 : i32, i32
  }
  func.func @transform_59(%arg0: i32) -> (i32, i32) {
    %c0_i32 = arith.constant 0 : i32
    %c0_i32_0 = arith.constant 0 : i32
    %c0_i32_1 = arith.constant 0 : i32
    return %c0_i32, %c0_i32_0 : i32, i32
  }
  func.func @transform_60(%arg0: i32) -> (i32, i32, i32) {
    %c0_i32 = arith.constant 0 : i32
    %c0_i32_0 = arith.constant 0 : i32
    %c0_i32_1 = arith.constant 0 : i32
    return %arg0, %c0_i32, %c0_i32_0 : i32, i32, i32
  }
}

</mosaic_0001>

<bundles_post_ra>
// kernel: transformer_calib_forward.1
= control target key start
LH: loop header
LB: loop body
LE: loop exit
PB: predicated region body
PF: predicated region fallthrough
CT: control target
= control target key end

     0   :  { %s11311_s6 = smov 1   ;;  %s11312_s10 = smov 2   ;;  %s12816_s0 = inlined_call_operand.smem [shape: u32[61], index: -1, kind: input, shape index: {}] }
   0x1   :  { %s11396_s5 = sld [smem:[%s12816_s0]]   ;;  %s11313_s14 = smov 3  }
   0x2   :  { %s11401_s9 = sld [smem:[%s12816_s0 + %s11311_s6]]   ;;  %s11314_s18 = smov 4  }
   0x3   :  { %s11406_s13 = sld [smem:[%s12816_s0 + %s11312_s10]]   ;;  %s11315_s22 = smov 5  }
   0x4   :  { %s11411_s17 = sld [smem:[%s12816_s0 + %s11313_s14]]   ;;  %s11316_s26 = smov 6  }
   0x5   :  { %s11416_s21 = sld [smem:[%s12816_s0 + %s11314_s18]]   ;;  %s11317_s30 = smov 7  }
   0x6   :  { %s11421_s25 = sld [smem:[%s12816_s0 + %s11315_s22]]   ;;  %s11318_s4 = smov 8  }
   0x7   :  { %12899 = sst [smem:[#allocation31_spill]] %s11396_s5  ;;  %s11319_s10 = smov 9  }
   0x8   :  { %12900 = sst [smem:[#allocation32_spill]] %s11401_s9  ;;  %s11320_s15 = smov 10  }
   0x9   :  { %12901 = sst [smem:[#allocation33_spill]] %s11406_s13  ;;  %s11321_s20 = smov 11  }
   0xa   :  { %12902 = sst [smem:[#allocation34_spill]] %s11411_s17  ;;  %s11323_s1 = smov 13  }
   0xb   :  { %12903 = sst [smem:[#allocation35_spill]] %s11416_s21  ;;  %s11324_s7 = smov 14  }
   0xc   :  { %12904 = sst [smem:[#allocation36_spill]] %s11421_s25  ;;  %s11326_s22 = smov 16  }
   0xd   :  { %s11426_s29 = sld [smem:[%s12816_s0 + %s11316_s26]]   ;;  %s11322_s26 = smov 12  }
   0xe   :  { %s11431_s3 = sld [smem:[%s12816_s0 + %s11317_s30]]   ;;  %s11327_s28 = smov 17  }
   0xf   :  { %s11436_s8 = sld [smem:[%s12816_s0 + %s11318_s4]]  }
  0x10   :  { %s11441_s14 = sld [smem:[%s12816_s0 + %s11319_s10]]  }
  0x11   :  { %s11446_s19 = sld [smem:[%s12816_s0 + %s11320_s15]]   ;;  %s11325_s15 = smov 15  }
  0x12   :  { %s11451_s24 = sld [smem:[%s12816_s0 + %s11321_s20]]  }
  0x13   :  { %12905 = sst [smem:[#allocation37_spill]] %s11426_s29 }
  0x14   :  { %12906 = sst [smem:[#allocation38_spill]] %s11431_s3 }
  0x15   :  { %12907 = sst [smem:[#allocation39_spill]] %s11436_s8 }
  0x16   :  { %12908 = sst [smem:[#allocation40_spill]] %s11441_s14 }
  0x17   :  { %12909 = sst [smem:[#allocation41_spill]] %s11446_s19 }
  0x18   :  { %12910 = sst [smem:[#allocation42_spill]] %s11451_s24 }
  0x19   :  { %s11456_s30 = sld [smem:[%s12816_s0 + %s11322_s26]]  }
  0x1a   :  { %s11461_s6 = sld [smem:[%s12816_s0 + %s11323_s1]]  }
  0x1b   :  { %s11466_s12 = sld [smem:[%s12816_s0 + %s11324_s7]]   ;;  %s11328_s7 = smov 18  }
  0x1c   :  { %s11471_s20 = sld [smem:[%s12816_s0 + %s11325_s15]]   ;;  %s11329_s15 = smov 19  }
  0x1d   :  { %s11476_s27 = sld [smem:[%s12816_s0 + %s11326_s22]]   ;;  %s11330_s22 = smov 20  }
  0x1e   :  { %s11481_s4 = sld [smem:[%s12816_s0 + %s11327_s28]]   ;;  %s11331_s28 = smov 21  }
  0x1f   :  { %12911 = sst [smem:[#allocation43_spill]] %s11456_s30 }
  0x20   :  { %12912 = sst [smem:[#allocation44_spill]] %s11461_s6 }
  0x21   :  { %12913 = sst [smem:[#allocation45_spill]] %s11466_s12 }
  0x22   :  { %12914 = sst [smem:[#allocation46_spill]] %s11471_s20 }
  0x23   :  { %12915 = sst [smem:[#allocation47_spill]] %s11476_s27 }
  0x24   :  { %12916 = sst [smem:[#allocation48_spill]] %s11481_s4 }
  0x25   :  { %s11486_s9 = sld [smem:[%s12816_s0 + %s11328_s7]]   ;;  %s11332_s7 = smov 22  }
  0x26   :  { %s11491_s3 = sld [smem:[%s12816_s0 + %s11329_s15]]   ;;  %s11333_s15 = smov 23  }
  0x27   :  { %s11496_s6 = sld [smem:[%s12816_s0 + %s11330_s22]]   ;;  %s11334_s22 = smov 24  }
  0x28   :  { %s11501_s25 = sld [smem:[%s12816_s0 + %s11331_s28]]   ;;  %s11335_s28 = smov 25  }
  0x29   :  { %s11506_s21 = sld [smem:[%s12816_s0 + %s11332_s7]]   ;;  %s11336_s7 = smov 26  }
  0x2a   :  { %s11511_s29 = sld [smem:[%s12816_s0 + %s11333_s15]]   ;;  %s11337_s15 = smov 27  }
  0x2b   :  { %12917 = sst [smem:[#allocation49_spill]] %s11486_s9 }
  0x2c   :  { %12918 = sst [smem:[#allocation50_spill]] %s11491_s3 }
  0x2d   :  { %12919 = sst [smem:[#allocation51_spill]] %s11496_s6 }
  0x2e   :  { %12920 = sst [smem:[#allocation52_spill]] %s11501_s25 }
  0x2f   :  { %12921 = sst [smem:[#allocation53_spill]] %s11506_s21 }
  0x30   :  { %12922 = sst [smem:[#allocation54_spill]] %s11511_s29 }
  0x31   :  { %s11516_s30 = sld [smem:[%s12816_s0 + %s11334_s22]]   ;;  %s11338_s22 = smov 28  }
  0x32   :  { %s11521_s25 = sld [smem:[%s12816_s0 + %s11335_s28]]   ;;  %s11339_s28 = smov 29  }
  0x33   :  { %s11526_s21 = sld [smem:[%s12816_s0 + %s11336_s7]]   ;;  %s11340_s7 = smov 30  }
  0x34   :  { %s11531_s29 = sld [smem:[%s12816_s0 + %s11337_s15]]   ;;  %s11341_s15 = smov 31  }
  0x37   :  { %12923 = sst [smem:[#allocation55_spill]] %s11516_s30 }
  0x38   :  { %12924 = sst [smem:[#allocation56_spill]] %s11521_s25 }
  0x39   :  { %12925 = sst [smem:[#allocation57_spill]] %s11526_s21 }
  0x3a   :  { %12926 = sst [smem:[#allocation58_spill]] %s11531_s29 }
  0x3b   :  { %s11536_s30 = sld [smem:[%s12816_s0 + %s11338_s22]]   ;;  %s11342_s22 = smov 32  }
  0x3c   :  { %s11541_s25 = sld [smem:[%s12816_s0 + %s11339_s28]]   ;;  %s11343_s28 = smov 33  }
  0x3d   :  { %s11546_s21 = sld [smem:[%s12816_s0 + %s11340_s7]]   ;;  %s11344_s7 = smov 34  }
  0x3e   :  { %s11551_s29 = sld [smem:[%s12816_s0 + %s11341_s15]]   ;;  %s11345_s15 = smov 35  }
  0x3f   :  { %s11566_s20 = sld [smem:[%s12816_s0 + %s11344_s7]]   ;;  %s11348_s7 = smov 38  }
  0x41   :  { %12927 = sst [smem:[#allocation59_spill]] %s11536_s30 }
  0x42   :  { %12928 = sst [smem:[#allocation60_spill]] %s11541_s25 }
  0x43   :  { %12929 = sst [smem:[#allocation61_spill]] %s11546_s21 }
  0x44   :  { %12930 = sst [smem:[#allocation62_spill]] %s11551_s29 }
  0x45   :  { %s11556_s30 = sld [smem:[%s12816_s0 + %s11342_s22]]   ;;  %s11346_s22 = smov 36  }
  0x46   :  { %s11561_s25 = sld [smem:[%s12816_s0 + %s11343_s28]]   ;;  %s11347_s28 = smov 37  }
  0x47   :  { %12933 = sst [smem:[#allocation65_spill]] %s11566_s20 }
  0x48   :  { %s11571_s29 = sld [smem:[%s12816_s0 + %s11345_s15]]   ;;  %s11349_s15 = smov 39  }
  0x49   :  { %s11586_s20 = sld [smem:[%s12816_s0 + %s11348_s7]]   ;;  %s11352_s7 = smov 42  }
  0x4a   :  { %s11606_s14 = sld [smem:[%s12816_s0 + %s11352_s7]]   ;;  %s11356_s7 = smov 46  }
  0x4b   :  { %12931 = sst [smem:[#allocation63_spill]] %s11556_s30 }
  0x4c   :  { %12932 = sst [smem:[#allocation64_spill]] %s11561_s25 }
  0x4d   :  { %s11576_s30 = sld [smem:[%s12816_s0 + %s11346_s22]]   ;;  %s11350_s22 = smov 40  }
  0x4e   :  { %12934 = sst [smem:[#allocation66_spill]] %s11571_s29 }
  0x4f   :  { %s11581_s25 = sld [smem:[%s12816_s0 + %s11347_s28]]   ;;  %s11351_s28 = smov 41  }
  0x50   :  { %12937 = sst [smem:[#allocation69_spill]] %s11586_s20 }
  0x51   :  { %s11591_s29 = sld [smem:[%s12816_s0 + %s11349_s15]]   ;;  %s11353_s15 = smov 43  }
  0x52   :  { %s11601_s12 = sld [smem:[%s12816_s0 + %s11351_s28]]   ;;  %s11355_s28 = smov 45  }
  0x53   :  { %12935 = sst [smem:[#allocation67_spill]] %s11576_s30 }
  0x54   :  { %s11596_s30 = sld [smem:[%s12816_s0 + %s11350_s22]]   ;;  %s11354_s22 = smov 44  }
  0x55   :  { %12936 = sst [smem:[#allocation68_spill]] %s11581_s25 }
  0x56   :  { %12941 = sst [smem:[#allocation73_spill]] %s11606_s14 }
  0x57   :  { %12938 = sst [smem:[#allocation70_spill]] %s11591_s29 }
  0x58   :  { %12940 = sst [smem:[#allocation72_spill]] %s11601_s12 }
  0x59   :  { %s11611_s29 = sld [smem:[%s12816_s0 + %s11353_s15]]   ;;  %s11357_s15 = smov 47  }
  0x5a   :  { %12939 = sst [smem:[#allocation71_spill]] %s11596_s30 }
  0x5b   :  { %s11616_s30 = sld [smem:[%s12816_s0 + %s11354_s22]]   ;;  %s11358_s22 = smov 48  }
  0x5c   :  { %s11621_s4 = sld [smem:[%s12816_s0 + %s11355_s28]]   ;;  %s11359_s28 = smov 49  }
  0x5d   :  { %s11626_s24 = sld [smem:[%s12816_s0 + %s11356_s7]]   ;;  %s11360_s7 = smov 50  }
  0x5e   :  { %s11631_s19 = sld [smem:[%s12816_s0 + %s11357_s15]]   ;;  %s11361_s15 = smov 51  }
  0x5f   :  { %s11636_s8 = sld [smem:[%s12816_s0 + %s11358_s22]]   ;;  %s11362_s22 = smov 52  }
  0x60   :  { %s11641_s3 = sld [smem:[%s12816_s0 + %s11359_s28]]   ;;  %s11363_s28 = smov 53  }
  0x61   :  { %s11651_s27 = sld [smem:[%s12816_s0 + %s11361_s15]]   ;;  %s11365_s15 = smov 55  }
  0x62   :  { %12942 = sst [smem:[#allocation74_spill]] %s11621_s4 }
  0x63   :  { %12943 = sst [smem:[#allocation75_spill]] %s11626_s24 }
  0x64   :  { %12944 = sst [smem:[#allocation76_spill]] %s11631_s19 }
  0x65   :  { %12945 = sst [smem:[#allocation77_spill]] %s11636_s8 }
  0x66   :  { %12946 = sst [smem:[#allocation78_spill]] %s11641_s3 }
  0x67   :  { %s11646_s24 = sld [smem:[%s12816_s0 + %s11360_s7]]   ;;  %s11364_s7 = smov 54  }
  0x68   :  { %s11656_s8 = sld [smem:[%s12816_s0 + %s11362_s22]]   ;;  %s11366_s22 = smov 56  }
  0x69   :  { %s11661_s3 = sld [smem:[%s12816_s0 + %s11363_s28]]   ;;  %s11367_s28 = smov 57  }
  0x6a   :  { %s11666_s12 = sld [smem:[%s12816_s0 + %s11364_s7]]   ;;  %s11368_s7 = smov 58  }
  0x6b   :  { %s11671_s9 = sld [smem:[%s12816_s0 + %s11365_s15]]   ;;  %s11369_s15 = smov 59  }
  0x6d   :  { %12947 = sst [smem:[#allocation79_spill]] %s11646_s24 }
  0x6e   :  { %12948 = sst [smem:[#allocation80_spill]] %s11656_s8 }
  0x6f   :  { %12949 = sst [smem:[#allocation81_spill]] %s11661_s3 }
  0x70   :  { %12950 = sst [smem:[#allocation82_spill]] %s11666_s12 }
  0x71   :  { %12951 = sst [smem:[#allocation83_spill]] %s11671_s9 }
  0x72   :  { %s11676_s8 = sld [smem:[%s12816_s0 + %s11366_s22]]   ;;  %s11370_s22 = smov 60  }
  0x73   :  { %s11681_s3 = sld [smem:[%s12816_s0 + %s11367_s28]]  }
  0x74   :  { %s11686_s12 = sld [smem:[%s12816_s0 + %s11368_s7]]  }
  0x75   :  { %s11691_s9 = sld [smem:[%s12816_s0 + %s11369_s15]]  }
  0x78   :  { %12952 = sst [smem:[#allocation84_spill]] %s11676_s8 }
  0x79   :  { %12953 = sst [smem:[#allocation85_spill]] %s11681_s3 }
  0x7a   :  { %s11696_s8 = sld [smem:[%s12816_s0 + %s11370_s22]]  }
  0x7b   :  { %12954 = sst [smem:[#allocation86_spill]] %s11691_s9 }
  0x7c   :  { %126 = vsyncpa [#allocation3], 0 }
  0x7d   :  { %127 = vsyncpa [#allocation6], 0 }
  0x7e   :  { %128 = vsyncpa [#allocation9], 0 }
  0x7f   :  { %129 = vsyncpa [#allocation12], 0 }
  0x80   :  { %130 = vsyncpa [#allocation15], 0 }
  0x81   :  { %131 = vsyncpa [#allocation18], 0 }
  0x82   :  { %132 = vsyncpa [#allocation21], 0 }
  0x83   :  { %133 = vsyncpa [#allocation4], 0 }
  0x84   :  { %135 = vsyncpa [#allocation4 + $0x1], 0  ;;  %s11698_s28 = smov 0   ;;  %s11700_s1 = smov 0  }
  0x85   :  { %s11702_s2 = smov 0   ;;  %s11704_s7 = smov 0  }
  0x86   :  { %12955 = sst [smem:[#allocation87_spill]] %s11702_s2 }
  0x87 LB: > { %s12957_s3 = sld [smem:[#allocation85_spill]]  ;;  %s11719_s0 = sadd.s32 4294967295, %s11309_s7   ;;  %s11301_s1 = sphi %s11700_s1, %s13071_s1   ;;  %s11297_s28 = sphi %s11698_s28, %s13070_s28   ;;  %s11309_s7 = sphi %s11704_s7, %s13067_s7  }
  0x88   : > { %s12958_s6 = sld [smem:[#allocation51_spill]]  ;;  %s8953_s10 = sadd.s32 4294967294, %s11309_s7  }
  0x89   : > { %s12959_s2 = sld [smem:[#allocation87_spill]]  ;;  %s11723_s11 = sadd.s32 1, %s11309_s7  }
  0x8a   : > { %12960 = sst [smem:[#allocation87_spill]] %s11297_s28  ;;  %s1415_s16 = ssub.s32 %s11309_s7, %s11723_s11 }
  0x8b   : > { %12962 = sst [smem:[#allocation89_spill]] %s11309_s7  ;;  %p1416_p1 = scmp.eq.s32.totalorder %s1415_s16, 0 }
  0x8c   : > { %12963 = sst [smem:[#allocation90_spill]] %s11723_s11  ;;  %p1429_p2 = scmp.eq.s32.totalorder %s11719_s0, 1 }
  0x8d   : > { %p1434_p3 = scmp.ne.s32.totalorder %s11301_s1, %s11297_s28  ;;  %p1435_p4 = scmp.eq.s32.totalorder %s8953_s10, 1 }
  0x8e   : > { %p8954_p7 = scmp.ge.s32.totalorder %s11309_s7, 1  ;;  %p1442_p8 = scmp.lt.s32.totalorder %s11309_s7, 3 }
  0x8f   : > { %12961 = sst [smem:[#allocation88_spill]] %s12959_s2  ;;  %s1418_s15 = sadd.s32 1, %s12959_s2 }
  0x90   : > { %p1428_p0 = scmp.ne.s32.totalorder %s12959_s2, %s11301_s1  ;;  %p11740_p6 = por %p1435_p4, %p1434_p3 }
  0x91   : > { %s11734_s18 = scalar_select %p1416_p1, %s12959_s2, %s1418_s15  }
  0x92   : > { %p11736_p5 = por %p1429_p2, %p1428_p0  ;;  %p12864_p9 = scmp.eq.s32.totalorder %s11719_s0, 0 }
  0x93   : > { %12964 = sst [smem:[#allocation91_spill]] %s11734_s18  ;;  %p11747_p10 = pnand %p8954_p7, %p1442_p8 }
  0x94   : > { %s12965_s22 = scalar_select %p11736_p5, 1, 0 }
  0x95   : > { %s12966_s23 = scalar_select %p11740_p6, 1, 0 }
  0x96   : > { %s12968_s26 = scalar_select %p11747_p10, 1, 0 }
  0x97   : > { %12967 = sst [smem:[#allocation92_spill]] %s12966_s23  ;;  %s11371_s16 = smov [#allocation5]  }
  0x98   : > { %s1466_s10 = sshll.u32 %s11371_s16, 4  ;;  %p10446_p11 = pneg %p11747_p10  ;;  %s1467_s10 = int_to_ptr.vmem [resolvable:$true] %s1466_s10 }
  0x99   : > { %s11372_s15 = smov [#allocation8]   ;;  %s11373_s11 = smov [#allocation11]  }
  0x9a   : > { %s1586_s18 = sshll.u32 %s11372_s15, 4  ;;  %p11755_p12 = pnand %p12864_p9, %p10446_p11  ;;  %s1587_s18 = int_to_ptr.vmem [resolvable:$true] %s1586_s18 }
  0x9b   : > { %s1616_s23 = sshll.u32 %s11373_s11, 4  ;;  %s10920_s16 = scalar_lea.vmem %s1467_s10, 16  ;;  %s1617_s23 = int_to_ptr.vmem [resolvable:$true] %s1616_s23 }
  0x9c   : > { %p11761_p13 = pneg %p11755_p12  ;;  %p10921_p0 = scmp.ne.s32.totalorder %s1467_s10, %s10920_s16 }
  0x9d   : > { %s10927_s15 = scalar_lea.vmem %s1467_s10, 32  ;;  %p10928_p3 = scmp.lt.s32.totalorder %s1467_s10, %s1467_s10 }
  0x9e   : > { %p10923_p1 = pnand %p10921_p0, %p11761_p13  ;;  %p10929_p4 = scmp.lt.s32.totalorder %s10927_s15, %s10920_s16 }
  0xa0   : > { %p10924_p2 = pneg %p10923_p1  ;;  %p10930_p7 = por %p10929_p4, %p10928_p3 }
  0xa2   : > { %p10931_p8 = pnand %p10930_p7, %p10924_p2 }
  0xa4   : > { %10934 = shalt.err (!%p10931_p8)
}
  0xa5   : > { %s12971_s17 = sld [smem:[#allocation34_spill]]  ;;  %s10946_s11 = scalar_lea.vmem %s1587_s18, 16 }
  0xa6   : > { %p10947_p11 = scmp.ne.s32.totalorder %s1587_s18, %s10946_s11  ;;  %s10953_s7 = scalar_lea.vmem %s1587_s18, 32 }
  0xa7   : > { %p10954_p5 = scmp.lt.s32.totalorder %s1587_s18, %s1587_s18  ;;  %p10955_p0 = scmp.lt.s32.totalorder %s10953_s7, %s10946_s11 }
  0xa8   : > { %p10949_p9 = pnand %p10947_p11, %p11761_p13 }
  0xa9   : > { %p10956_p1 = por %p10955_p0, %p10954_p5 }
  0xaa   : > { %p10950_p6 = pneg %p10949_p9 }
  0xab   : > { %10452 = dma.hbm_to_vmem [thread:$0]  (!%p11755_p12), %s12971_s17, 16, %s1467_s10, [#allocation6]  }
  0xac   : > { %p10957_p10 = pnand %p10956_p1, %p10950_p6 }
  0xae   : > { %10960 = shalt.err (!%p10957_p10)
}
  0xaf   : > { %s12972_s25 = sld [smem:[#allocation68_spill]]  ;;  %s10972_s16 = scalar_lea.vmem %s1617_s23, 32 }
  0xb0   : > { %p10973_p2 = scmp.ne.s32.totalorder %s1617_s23, %s10972_s16  ;;  %p10980_p7 = scmp.lt.s32.totalorder %s1617_s23, %s1617_s23 }
  0xb1   : > { %p10981_p8 = scmp.lt.s32.totalorder %s10972_s16, %s10972_s16 }
  0xb2   : > { %p10975_p3 = pnand %p10973_p2, %p11761_p13 }
  0xb3   : > { %p10982_p9 = por %p10981_p8, %p10980_p7 }
  0xb4   : > { %p10976_p4 = pneg %p10975_p3 }
  0xb5   : > { %10458 = dma.hbm_to_vmem [thread:$0]  (!%p11755_p12), %s12972_s25, 16, %s1587_s18, [#allocation9]  }
  0xb6   : > { %p10983_p11 = pnand %p10982_p9, %p10976_p4 }
  0xb8   : > { %10986 = shalt.err (!%p10983_p11)
}
  0xb9   : > { %s11374_s7 = smov 16   ;;  %s12973_s14 = sld [smem:[#allocation73_spill]] }
  0xba   : > { %s11375_s10 = smov 1   ;;  %s11376_s18 = smov [#allocation14]  }
  0xbb   : > { %s1642_s15 = sshll.u32 %s11376_s18, 4  ;;  %s11377_s11 = smov [#allocation17]   ;;  %s1643_s15 = int_to_ptr.vmem [resolvable:$true] %s1642_s15 }
  0xbc   : > { %s1671_s17 = sshll.u32 %s11377_s11, 4  ;;  %s10998_s25 = scalar_lea.vmem %s1643_s15, 32  ;;  %s1672_s17 = int_to_ptr.vmem [resolvable:$true] %s1671_s17 }
  0xbd   : > { %p10999_p5 = scmp.ne.s32.totalorder %s1643_s15, %s10998_s25  ;;  %p11006_p0 = scmp.lt.s32.totalorder %s1643_s15, %s1643_s15 }
  0xbe   : > { %p11007_p1 = scmp.lt.s32.totalorder %s10998_s25, %s10998_s25 }
  0xbf   : > { %10464 = dma.hbm_to_vmem [thread:$0]  (!%p11755_p12), %s12973_s14, 32, %s1617_s23, [#allocation12], %s11374_s7, %s11374_s7, %s11375_s10  }
  0xc0   : > { %p11001_p6 = pnand %p10999_p5, %p11761_p13  ;;  %p11008_p2 = por %p11007_p1, %p11006_p0 }
  0xc2   : > { %p11002_p10 = pneg %p11001_p6 }
  0xc4   : > { %p11009_p3 = pnand %p11008_p2, %p11002_p10 }
  0xc6   : > { %11012 = shalt.err (!%p11009_p3)
}
  0xc7   : > { %10470 = dma.hbm_to_vmem [thread:$0]  (!%p11755_p12), %s11616_s30, 32, %s1643_s15, [#allocation15], %s11374_s7, %s11374_s7, %s11375_s10  }
  0xc8   : > { %s11024_s23 = scalar_lea.vmem %s1672_s17, 32  ;;  %p11032_p9 = scmp.lt.s32.totalorder %s1672_s17, %s1672_s17 }
  0xc9   : > { %p11025_p4 = scmp.ne.s32.totalorder %s1672_s17, %s11024_s23  ;;  %p11033_p11 = scmp.lt.s32.totalorder %s11024_s23, %s11024_s23 }
  0xcb   : > { %p11027_p7 = pnand %p11025_p4, %p11761_p13  ;;  %p11034_p5 = por %p11033_p11, %p11032_p9 }
  0xcd   : > { %p11028_p8 = pneg %p11027_p7 }
  0xcf   : > { %p11035_p6 = pnand %p11034_p5, %p11028_p8 }
  0xd1   : > { %11038 = shalt.err (!%p11035_p6)
}
  0xd2   : > { %s12974_s19 = sld [smem:[#allocation76_spill]]  ;;  %s11378_s25 = smov [#allocation2]  }
  0xd3   : > { %s1455_s16 = sshll.u32 %s11378_s25, 4  ;;  %s11379_s18 = smov [#allocation7]   ;;  %s1456_s16 = int_to_ptr.vmem [resolvable:$true] %s1455_s16 }
  0xd4   : > { %s1554_s15 = sshll.u32 %s11379_s18, 4  ;;  %s11050_s11 = scalar_lea.vmem %s1456_s16, 16  ;;  %s1555_s15 = int_to_ptr.vmem [resolvable:$true] %s1554_s15 }
  0xd5   : > { %p11051_p10 = scmp.ne.s32.totalorder %s1456_s16, %s11050_s11  ;;  %s11057_s23 = scalar_lea.vmem %s1456_s16, 32 }
  0xd6   : > { %p11058_p2 = scmp.lt.s32.totalorder %s1456_s16, %s1456_s16  ;;  %p11059_p3 = scmp.lt.s32.totalorder %s11057_s23, %s11050_s11 }
  0xd7   : > { %p11053_p0 = pnand %p11051_p10, %p11761_p13 }
  0xd8   : > { %10476 = dma.hbm_to_vmem [thread:$0]  (!%p11755_p12), %s12974_s19, 32, %s1672_s17, [#allocation18], %s11374_s7, %s11374_s7, %s11375_s10  }
  0xd9   : > { %p11054_p1 = pneg %p11053_p0  ;;  %p11060_p4 = por %p11059_p3, %p11058_p2 }
  0xdb   : > { %p11061_p7 = pnand %p11060_p4, %p11054_p1 }
  0xdd   : > { %11064 = shalt.err (!%p11061_p7)
}
  0xde   : > { %s12975_s13 = sld [smem:[#allocation33_spill]]  ;;  %s11076_s17 = scalar_lea.vmem %s1555_s15, 32 }
  0xdf   : > { %p11077_p8 = scmp.ne.s32.totalorder %s1555_s15, %s11076_s17  ;;  %p11084_p5 = scmp.lt.s32.totalorder %s1555_s15, %s1555_s15 }
  0xe0   : > { %p11085_p6 = scmp.lt.s32.totalorder %s11076_s17, %s11076_s17 }
  0xe1   : > { %p11079_p9 = pnand %p11077_p8, %p11761_p13 }
  0xe2   : > { %p11086_p10 = por %p11085_p6, %p11084_p5 }
  0xe3   : > { %p11080_p11 = pneg %p11079_p9 }
  0xe4   : > { %10449 = dma.hbm_to_vmem [thread:$0]  (!%p11755_p12), %s12975_s13, 16, %s1456_s16, [#allocation3]  }
  0xe5   : > { %p11087_p0 = pnand %p11086_p10, %p11080_p11 }
  0xe7   : > { %11090 = shalt.err (!%p11087_p0)
}
  0xe8   : > { %s12976_s21 = sld [smem:[#allocation61_spill]]  ;;  %s11380_s25 = smov [#allocation10]  }
  0xe9   : > { %s1597_s16 = sshll.u32 %s11380_s25, 4  ;;  %s11381_s18 = smov [#allocation13]   ;;  %s1598_s16 = int_to_ptr.vmem [resolvable:$true] %s1597_s16 }
  0xea   : > { %s1629_s11 = sshll.u32 %s11381_s18, 4  ;;  %s11102_s23 = scalar_lea.vmem %s1598_s16, 32  ;;  %s1630_s11 = int_to_ptr.vmem [resolvable:$true] %s1629_s11 }
  0xeb   : > { %p11103_p1 = scmp.ne.s32.totalorder %s1598_s16, %s11102_s23  ;;  %p11110_p4 = scmp.lt.s32.totalorder %s1598_s16, %s1598_s16 }
  0xec   : > { %p11111_p7 = scmp.lt.s32.totalorder %s11102_s23, %s11102_s23 }
  0xed   : > { %p11105_p2 = pnand %p11103_p1, %p11761_p13 }
  0xee   : > { %10455 = dma.hbm_to_vmem [thread:$0]  (!%p11755_p12), %s12976_s21, 32, %s1555_s15, [#allocation6], %s11374_s7, %s11374_s7, %s11375_s10  }
  0xef   : > { %p11106_p3 = pneg %p11105_p2  ;;  %p11112_p8 = por %p11111_p7, %p11110_p4 }
  0xf1   : > { %p11113_p9 = pnand %p11112_p8, %p11106_p3 }
  0xf3   : > { %11116 = shalt.err (!%p11113_p9)
}
  0xf4   : > { %s12977_s20 = sld [smem:[#allocation69_spill]]  ;;  %s11128_s15 = scalar_lea.vmem %s1630_s11, 32 }
  0xf5   : > { %p11129_p11 = scmp.ne.s32.totalorder %s1630_s11, %s11128_s15  ;;  %p11136_p10 = scmp.lt.s32.totalorder %s1630_s11, %s1630_s11 }
  0xf6   : > { %p11137_p0 = scmp.lt.s32.totalorder %s11128_s15, %s11128_s15 }
  0xf7   : > { %p11131_p5 = pnand %p11129_p11, %p11761_p13 }
  0xf8   : > { %p11138_p1 = por %p11137_p0, %p11136_p10 }
  0xf9   : > { %p11132_p6 = pneg %p11131_p5 }
  0xfa   : > { %10461 = dma.hbm_to_vmem [thread:$0]  (!%p11755_p12), %s12977_s20, 32, %s1598_s16, [#allocation9]  }
  0xfb   : > { %p11139_p2 = pnand %p11138_p1, %p11132_p6 }
  0xfd   : > { %11142 = shalt.err (!%p11139_p2)
}
  0xfe   : > { %10467 = dma.hbm_to_vmem [thread:$0]  (!%p11755_p12), %s11611_s29, 32, %s1630_s11, [#allocation12], %s11374_s7, %s11374_s7, %s11375_s10  }
  0xff   : > { %s11382_s17 = smov [#allocation16]   ;;  %s11383_s16 = smov [#allocation19]  }
 0x100   : > { %s1655_s25 = sshll.u32 %s11382_s17, 4  ;;  %s1690_s18 = sshll.u32 %s11383_s16, 4  ;;  %s1656_s25 = int_to_ptr.vmem [resolvable:$true] %s1655_s25  ;;  %s1691_s18 = int_to_ptr.vmem [resolvable:$true] %s1690_s18 }
 0x101   : > { %s11154_s23 = scalar_lea.vmem %s1656_s25, 32  ;;  %p11162_p8 = scmp.lt.s32.totalorder %s1656_s25, %s1656_s25 }
 0x102   : > { %p11155_p3 = scmp.ne.s32.totalorder %s1656_s25, %s11154_s23  ;;  %p11163_p9 = scmp.lt.s32.totalorder %s11154_s23, %s11154_s23 }
 0x104   : > { %p11157_p4 = pnand %p11155_p3, %p11761_p13  ;;  %p11164_p11 = por %p11163_p9, %p11162_p8 }
 0x106   : > { %p11158_p7 = pneg %p11157_p4 }
 0x108   : > { %p11165_p5 = pnand %p11164_p11, %p11158_p7 }
 0x10a   : > { %11168 = shalt.err (!%p11165_p5)
}
 0x10b   : > { %s12978_s4 = sld [smem:[#allocation74_spill]]  ;;  %s11180_s11 = scalar_lea.vmem %s1691_s18, 32 }
 0x10c   : > { %p11181_p6 = scmp.ne.s32.totalorder %s1691_s18, %s11180_s11  ;;  %p11188_p1 = scmp.lt.s32.totalorder %s1691_s18, %s1691_s18 }
 0x10d   : > { %p11189_p2 = scmp.lt.s32.totalorder %s11180_s11, %s11180_s11 }
 0x10e   : > { %p11183_p10 = pnand %p11181_p6, %p11761_p13 }
 0x10f   : > { %p11190_p3 = por %p11189_p2, %p11188_p1 }
 0x110   : > { %p11184_p0 = pneg %p11183_p10 }
 0x111   : > { %10473 = dma.hbm_to_vmem [thread:$0]  (!%p11755_p12), %s12978_s4, 32, %s1656_s25, [#allocation15], %s11374_s7, %s11374_s7, %s11375_s10  }
 0x112   : > { %p11191_p4 = pnand %p11190_p3, %p11184_p0 }
 0x114   : > { %11194 = shalt.err (!%p11191_p4)
}
 0x115   : > { %s12979_s24 = sld [smem:[#allocation79_spill]]  ;;  %s11384_s15 = smov [#allocation20]  }
 0x116   : > { %s1703_s17 = sshll.u32 %s11384_s15, 4  ;;  %s1704_s17 = int_to_ptr.vmem [resolvable:$true] %s1703_s17 }
 0x117   : > { %s11206_s25 = scalar_lea.vmem %s1704_s17, 32  ;;  %p11214_p11 = scmp.lt.s32.totalorder %s1704_s17, %s1704_s17 }
 0x118   : > { %p11207_p7 = scmp.ne.s32.totalorder %s1704_s17, %s11206_s25  ;;  %p11215_p5 = scmp.lt.s32.totalorder %s11206_s25, %s11206_s25 }
 0x11a   : > { %p11209_p8 = pnand %p11207_p7, %p11761_p13  ;;  %p11216_p6 = por %p11215_p5, %p11214_p11 }
 0x11b   : > { %10479 = dma.hbm_to_vmem [thread:$0]  (!%p11755_p12), %s12979_s24, 32, %s1691_s18, [#allocation18], %s11374_s7, %s11374_s7, %s11375_s10  }
 0x11c   : > { %p11210_p9 = pneg %p11209_p8 }
 0x11e   : > { %p11217_p10 = pnand %p11216_p6, %p11210_p9 }
 0x120   : > { %11220 = shalt.err (!%p11217_p10)
}
 0x121   : > { %10482 = dma.hbm_to_vmem [thread:$0]  (!%p11755_p12), %s11651_s27, 32, %s1704_s17, [#allocation21], %s11374_s7, %s11374_s7, %s11375_s10  }
 0x122   : > { %p12980_p0 = scmp.ne.s32.totalorder %s12968_s26, 0 }
 0x123   : > { %p12981_p1 = scmp.eq.s32.totalorder (!%p12980_p0), %s11719_s0, 0 }
 0x124   : > { %1759 = sbr.rel (%p12980_p0) target bundleno = 18212 (0x4724), region = 260 }
 0x129   : > { %11264 = dma.done.wait (%p12981_p1), [#allocation3], 16   ;;  %p12982_p13 = pmov %p12981_p1 }
 0x12a   : > { %p12983_p2 = pmov %p12981_p1 }
 0x12b   : > { %11266 = vsyncadd (%p12982_p13), [#allocation3], 4294967280 }
 0x12c   : > { %11268 = dma.done.wait (%p12983_p2), [#allocation6], 48   ;;  %p12984_p3 = pmov %p12981_p1 }
 0x12d   : > { %p12985_p4 = pmov %p12981_p1 }
 0x12e   : > { %11270 = vsyncadd (%p12984_p3), [#allocation6], 4294967248 }
 0x12f   : > { %11272 = dma.done.wait (%p12985_p4), [#allocation9], 48   ;;  %p12986_p12 = pmov %p12981_p1 }
 0x130   : > { %p12987_p7 = pmov %p12981_p1 }
 0x131   : > { %11274 = vsyncadd (%p12986_p12), [#allocation9], 4294967248 }
 0x132   : > { %11276 = dma.done.wait (%p12987_p7), [#allocation12], 64   ;;  %p12988_p8 = pmov %p12981_p1 }
 0x133   : > { %p12989_p9 = pmov %p12981_p1 }
 0x134   : > { %11278 = vsyncadd (%p12988_p8), [#allocation12], 4294967232 }
 0x135   : > { %11280 = dma.done.wait (%p12989_p9), [#allocation15], 64   ;;  %p12990_p11 = pmov %p12981_p1 }
 0x136   : > { %p12991_p5 = pmov %p12981_p1 }
 0x137   : > { %11282 = vsyncadd (%p12990_p11), [#allocation15], 4294967232 }
 0x138   : > { %11284 = dma.done.wait (%p12991_p5), [#allocation18], 64   ;;  %p12992_p6 = pmov %p12981_p1 }
 0x139   : > { %p12993_p10 = pmov %p12981_p1 }
 0x13a   : > { %11286 = vsyncadd (%p12992_p6), [#allocation18], 4294967232 }
 0x13b   : > { %11288 = dma.done.wait (%p12993_p10), [#allocation21], 32   ;;  %p12994_p0 = pmov %p12981_p1 }
 0x13c   : > { %s12995_s5 = sld [smem:[#allocation31_spill]]  ;;  %p1945_p1 = scmp.lt.s32.totalorder %s11719_s0, 1  ;;  %v11385_v0 = vmov 0.0   ;;  %vm11386_vm0 = vmmov 0   ;;  %v10620_v1 = vld [vmem:[%s12958_s6 + $0x10] sm:$0xff]   ;;  %v10621_v2 = vld [vmem:[%s12958_s6 + $0x8] sm:$0xff]  }
 0x13d   : > { %11290 = vsyncadd (%p12994_p0), [#allocation21], 4294967264  ;;  %9716 = vmatprep.subr.bf16.mxu0 %v11385_v0  ;;  %9722 = vmatprep.mubr.msk.bf16.mxu0 %vm11386_vm0, %v11385_v0  ;;  %s12996_s26 = sld [smem:[#allocation49_spill]]  ;;  %v10622_v3 = vld [vmem:[%s12958_s6] sm:$0xff]   ;;  %vm1985_vm1 = vcmask 392192   ;;  %vm2054_vm2 = vcmask 261120  }
 0x13e   : > { %s11884_s28 = scalar_select %p1945_p1, %s11719_s0, 1  ;;  %9726 = vmatprep.subr.bf16.mxu1 %v11385_v0  ;;  %9730 = vmatprep.mubr.msk.bf16.mxu1 %vm11386_vm0, %v11385_v0  ;;  %vm2229_vm3 = vcmask 130048   ;;  %vm2933_vm4 = vcmask 523264   ;;  %vm4045_vm5 = vcmask 1041408   ;;  %vm4041_vm6 = vcmask 31744  }
 0x13f   : > { %9717 = vmatpush3.bf16.msra.mxu0 %v10620_v1  ;;  %s12997_s10 = sld [smem:[#allocation72_spill]]  ;;  %vm6247_vm7 = vcmask 1043456   ;;  %vm6240_vm8 = vcmask 64512   ;;  %vm8694_vm9 = vcmask 40960   ;;  %p13062_p2 = scmp.ne.s32.totalorder %s12965_s22, 0 }
 0x140   : > { %s12868_s2 = sshll.u32 %s11884_s28, 4  ;;  %9718 = vmatprep.subr.bf16.mxu0 %v11385_v0  ;;  %s12998_s16 = sld [smem:[#allocation47_spill]] }
 0x141   : > { %s12999_s18 = sld [smem:[#allocation50_spill]] }
 0x142   : > { %s1949_s7 = scalar_lea.vmem %s12995_s5, %s12868_s2  ;;  %s13000_s23 = sld [smem:[#allocation39_spill]] }
 0x143   : > { %v1956_v4 = vld [vmem:[%s1949_s7] sm:$0xff]  ;;  %v1957_v5 = vld [vmem:[%s1949_s7 + $0x8] sm:$0xff]  ;;  %9719 = vmatpush3.bf16.msra.mxu0 %v10621_v2  ;;  %s13001_s11 = sld [smem:[#allocation41_spill]]  ;;  %v10629_v45 = vld [vmem:[%s12996_s26 + $0x18] sm:$0xff]  }
 0x144   : > { %9720 = vmatprep.subr.bf16.mxu0 %v11385_v0  ;;  %v1958_v6 = vpack.c.bf16 %v1957_v5, %v1956_v4  ;;  %v10623_v7 = vld [vmem:[%s12996_s26 + $0x8] sm:$0xff]   ;;  %v10624_v8 = vld [vmem:[%s12996_s26] sm:$0xff]   ;;  %s13002_s15 = sld [smem:[#allocation42_spill]]  ;;  %v10630_v48 = vld [vmem:[%s12996_s26 + $0x10] sm:$0xff]  }
 0x145   : > { %9727 = vmatpush3.bf16.msra.mxu1 %v10623_v7  ;;  %v1965_v10 = vld [vmem:[%s12997_s10] sm:$0xff]  ;;  %v1966_v12 = vld [vmem:[%s12997_s10 + $0x8] sm:$0xff]  ;;  %s13003_s17 = sld [smem:[#allocation48_spill]] }
 0x146   : > { %9728 = vmatprep.subr.bf16.mxu1 %v11385_v0  ;;  %v10625_v17 = vld [vmem:[%s12998_s16 + $0x8] sm:$0xff]   ;;  %v10626_v19 = vld [vmem:[%s12998_s16] sm:$0xff]   ;;  %s13004_s25 = sld [smem:[#allocation40_spill]] }
 0x147   : > { %9721 = vmatpush3.bf16.msra.mxu0 %v10622_v3  ;;  %v10627_v20 = vld [vmem:[%s12999_s18 + $0x8] sm:$0xff]   ;;  %v10628_v21 = vld [vmem:[%s12999_s18] sm:$0xff]   ;;  %v10631_v49 = vld [vmem:[%s12999_s18 + $0x18] sm:$0xff]   ;;  %s13005_s7 = sld [smem:[#allocation45_spill]] }
 0x148   : > { %9756 = vmatprep.subr.bf16.mxu0 %v11385_v0  ;;  %v8993_v27 = vld [vmem:[%s13000_s23] ss:$0 sm:$0xff]  ;;  %v10632_v50 = vld [vmem:[%s12999_s18 + $0x10] sm:$0xff]   ;;  %s13007_s4 = sld [smem:[#allocation46_spill]] }
 0x149   : > { %9729 = vmatpush3.bf16.msra.mxu1 %v10624_v8  ;;  %v8989_v36 = vld [vmem:[%s13001_s11] ss:$0 sm:$0xff]  ;;  %v9008_v58 = vld [vmem:[%s13001_s11 + $0x1] ss:$0 sm:$0xff]  ;;  %s13008_s5 = sld [smem:[#allocation43_spill]] }
 0x14a   : > { %9723 = vmatmul.mubr.msk.bf16.vlgmr.msra.gmra.mxu0 %vm1985_vm1, %v1958_v6  ;;  %9734 = vmatprep.subr.bf16.mxu1 %v11385_v0  ;;  %v8997_v37 = vld [vmem:[%s13002_s15] ss:$0 sm:$0xff]  ;;  %v9026_v3 = vld [vmem:[%s13002_s15 + $0x1] ss:$0 sm:$0xff]  ;;  %s13009_s6 = sld [smem:[#allocation37_spill]] }
 0x14b   : > { %9758 = vmatprep.mubr.msk.bf16.mxu0 %vm11386_vm0, %v11385_v0  ;;  %s13012_s13 = sld [smem:[#allocation36_spill]] }
 0x14c   : > { %s13015_s19 = sld [smem:[#allocation38_spill]] }
 0x14d   : > { %s13006_s2 = smov %s13005_s7  ;;  %s13035_s20 = sld [smem:[#allocation60_spill]] }
 0x14e   : > { %s13036_s21 = sld [smem:[#allocation54_spill]] }
 0x14f   : > { %s13061_s9 = sld [smem:[#allocation86_spill]] }
 0x20a   : > { %v2023_v9 = vpop.f32.mrf.mxu0 }
 0x20b   : > { %v11907_v14 = vadd.f32 %v2023_v9, %v1965_v10 }
 0x20c   : > { %v9724_v11 = vpop.f32.mrf.mxu0 }
 0x20e   : > { %v2026_v13 = vpop.f32.mrf.mxu0 }
 0x20f   : > { %v11909_v15 = vadd.f32 %v2026_v13, %v1966_v12 }
 0x210   : > { %v9725_v16 = vpop.f32.mrf.mxu0 }
 0x211   : > { %v11914_v18 = vpack.c.bf16 %v11909_v15, %v11907_v14 }
 0x213   : > { %9731 = vmatmul.mubr.msk.bf16.vlgmr.msra.gmra.mxu1 %vm2054_vm2, %v11914_v18 }
 0x214   : > { %9735 = vmatpush3.bf16.msra.mxu1 %v10625_v17  ;;  %9738 = vmatprep.mubr.msk.bf16.mxu1 %vm11386_vm0, %v11385_v0 }
 0x215   : > { %9736 = vmatprep.subr.bf16.mxu1 %v11385_v0 }
 0x218   : > { %9737 = vmatpush3.bf16.msra.mxu1 %v10626_v19 }
 0x219   : > { %9742 = vmatprep.subr.bf16.mxu1 %v11385_v0 }
 0x21b   : > { %9739 = vmatmul.mubr.msk.bf16.vlgmr.msra.gmra.mxu1 %vm2054_vm2, %v11914_v18 }
 0x21c   : > { %9743 = vmatpush3.bf16.msra.mxu1 %v10627_v20  ;;  %9746 = vmatprep.mubr.msk.bf16.mxu1 %vm11386_vm0, %v11385_v0 }
 0x21d   : > { %9744 = vmatprep.subr.bf16.mxu1 %v11385_v0 }
 0x220   : > { %9745 = vmatpush3.bf16.msra.mxu1 %v10628_v21 }
 0x221   : > { %9750 = vmatprep.subr.bf16.mxu1 %v11385_v0 }
 0x223   : > { %9747 = vmatmul.mubr.msk.bf16.vlgmr.msra.gmra.mxu1 %vm2054_vm2, %v11914_v18 }
 0x224   : > { %9752 = vmatprep.mubr.msk.bf16.mxu1 %vm11386_vm0, %v11385_v0 }
 0x2d3   : > { %v2092_v22 = vpop.f32.mrf.mxu1 }
 0x2d4   : > { %v2093_v41 = vadd.f32 %v8989_v36, %v2092_v22 }
 0x2d5   : > { %v9732_v23 = vpop.f32.mrf.mxu1 }
 0x2d7   : > { %v2095_v24 = vpop.f32.mrf.mxu1 }
 0x2d8   : > { %v2096_v39 = vadd.f32 %v8989_v36, %v2095_v24 }
 0x2d9   : > { %v9733_v25 = vpop.f32.mrf.mxu1 }
 0x2da   : > { %v2227_v46 = vpack.c.bf16 %v2096_v39, %v2093_v41 }
 0x2db   : > { %v2156_v26 = vpop.f32.mrf.mxu1 }
 0x2dc   : > { %v2157_v30 = vadd.f32 %v8993_v27, %v2156_v26 }
 0x2dd   : > { %v9740_v28 = vpop.f32.mrf.mxu1 }
 0x2df   : > { %v2159_v29 = vpop.f32.mrf.mxu1 }
 0x2e0   : > { %v2160_v31 = vadd.f32 %v8993_v27, %v2159_v29  ;;  %v10633_v29 = vld [vmem:[%s12998_s16 + $0x18] sm:$0xff]  }
 0x2e1   : > { %v9741_v32 = vpop.f32.mrf.mxu1 }
 0x2e2   : > { %v2228_v33 = vpack.c.bf16 %v2160_v31, %v2157_v30  ;;  %v10634_v31 = vld [vmem:[%s12998_s16 + $0x10] sm:$0xff]  }
 0x2e3   : > { %v2220_v34 = vpop.f32.mrf.mxu1 }
 0x2e4   : > { %v2234_v35 = vsel %vm2229_vm3, %v2228_v33, 0  ;;  %v2221_v42 = vadd.f32 %v8997_v37, %v2220_v34 }
 0x2e5   : > { %v9748_v38 = vpop.f32.mrf.mxu1  ;;  %9751 = vmatpush3.bf16.xpose.msra.mxu1 %v2234_v35 }
 0x2e6   : > { %9762 = vmatprep.subr.bf16.mxu1 %v11385_v0  ;;  %v9017_v38 = vld [vmem:[%s13000_s23 + $0x1] ss:$0 sm:$0xff] }
 0x2e7   : > { %v2223_v40 = vpop.f32.mrf.mxu1 }
 0x2e8   : > { %v2224_v43 = vadd.f32 %v8997_v37, %v2223_v40 }
 0x2e9   : > { %v9749_v44 = vpop.f32.mrf.mxu1 }
 0x2ea   : > { %v2300_v47 = vpack.c.bf16 %v2224_v43, %v2221_v42 }
 0x2ec   : > { %9753 = vmatmul.mubr.msk.bf16.vlgmr.msra.gmra.mxu1 %vm2229_vm3, %v2227_v46  ;;  %9757 = vmatpush3.bf16.msra.mxu0 %v2300_v47 }
 0x2ed   : > { %9763 = vmatpush3.bf16.msra.mxu1 %v10629_v45  ;;  %9766 = vmatprep.mubr.msk.bf16.mxu1 %vm11386_vm0, %v11385_v0 }
 0x2ee   : > { %9764 = vmatprep.subr.bf16.mxu1 %v11385_v0  ;;  %9770 = vmatprep.subr.bf16.mxu0 %v11385_v0 }
 0x2f1   : > { %9765 = vmatpush3.bf16.msra.mxu1 %v10630_v48 }
 0x2f2   : > { %9778 = vmatprep.subr.bf16.mxu1 %v11385_v0 }
 0x2f4   : > { %9767 = vmatmul.mubr.msk.bf16.vlgmr.msra.gmra.mxu1 %vm2054_vm2, %v11914_v18 }
 0x2f5   : > { %9779 = vmatpush3.bf16.msra.mxu1 %v10631_v49  ;;  %9782 = vmatprep.mubr.msk.bf16.mxu1 %vm11386_vm0, %v11385_v0 }
 0x2f6   : > { %9780 = vmatprep.subr.bf16.mxu1 %v11385_v0 }
 0x2f9   : > { %9781 = vmatpush3.bf16.msra.mxu1 %v10632_v50 }
 0x2fa   : > { %9792 = vmatprep.subr.bf16.mxu1 %v11385_v0 }
 0x2fc   : > { %9783 = vmatmul.mubr.msk.bf16.vlgmr.msra.gmra.mxu1 %vm2054_vm2, %v11914_v18 }
 0x2fd   : > { %9794 = vmatprep.mubr.msk.bf16.mxu1 %vm11386_vm0, %v11385_v0 }
 0x3ac   : > { %v2270_v51 = vpop.f32.mrf.mxu1 }
 0x3ad   : > { %v2277_v52 = vsel %vm2229_vm3, %v2270_v51, -inf }
 0x3ae   : > { %2278 = vmax.xlane.f32.xlu0 %v2277_v52  ;;  %v9754_v53 = vpop.f32.mrf.mxu1 }
 0x3b0   : > { %v2273_v54 = vpop.f32.mrf.mxu1 }
 0x3b1   : > { %v2280_v55 = vsel %vm2229_vm3, %v2273_v54, -inf }
 0x3b2   : > { %2281 = vmax.xlane.f32.xlu0 %v2280_v55  ;;  %v9755_v56 = vpop.f32.mrf.mxu1 }
 0x3b4   : > { %v2407_v57 = vpop.f32.mrf.mxu1 }
 0x3b5   : > { %v11963_v61 = vadd.f32 %v9008_v58, %v2407_v57 }
 0x3b6   : > { %v9768_v59 = vpop.f32.mrf.mxu1 }
 0x3b8   : > { %v2410_v60 = vpop.f32.mrf.mxu1 }
 0x3b9   : > { %v11965_v62 = vadd.f32 %v9008_v58, %v2410_v60 }
 0x3ba   : > { %v9769_v63 = vpop.f32.mrf.mxu1 }
 0x3bb   : > { %v2546_v1 = vpack.c.bf16 %v11965_v62, %v11963_v61 }
 0x3bc   : > { %v2539_v2 = vpop.f32.mrf.mxu1 }
 0x3bd   : > { %v2540_v6 = vadd.f32 %v9026_v3, %v2539_v2 }
 0x3be   : > { %v9784_v4 = vpop.f32.mrf.mxu1 }
 0x3bf   : > { %v10635_v4 = vld [vmem:[%s13003_s17] sm:$0xff]  }
 0x3c0   : > { %v2542_v5 = vpop.f32.mrf.mxu1 }
 0x3c1   : > { %v2543_v7 = vadd.f32 %v9026_v3, %v2542_v5 }
 0x3c2   : > { %v9785_v8 = vpop.f32.mrf.mxu1 }
 0x3c3   : > { %v2618_v9 = vpack.c.bf16 %v2543_v7, %v2540_v6  ;;  %v10636_v6 = vld [vmem:[%s13003_s17 + $0x8] sm:$0xff]  }
 0x3c5   : > { %9793 = vmatpush3.bf16.msra.mxu1 %v2618_v9 }
 0x3c6   : > { %9804 = vmatprep.subr.bf16.mxu1 %v11385_v0 }
 0x437   : > { %v2279_v10 = vpop.xlane.xlu0 %2278 }
 0x438   : > { %v2283_v11 = vsub.f32 %v2270_v51, %v2279_v10 }
 0x43a   : > { %v2285_v12 = vmul.f32 1.442695, %v2283_v11 }
 0x43b   : > { %v2282_v13 = vpop.xlane.xlu0 %2281 }
 0x43c   : > { %10715 = vpow2.f32 %v2285_v12  ;;  %v2284_v16 = vsub.f32 %v2273_v54, %v2282_v13 }
 0x43e   : > { %v2287_v17 = vmul.f32 1.442695, %v2284_v16 }
 0x440   : > { %10717 = vpow2.f32 %v2287_v17 }
 0x449   : > { %v10716_v19 = vpop.eup %10715 }
 0x44a   : > { %v2289_v20 = vsel %vm2229_vm3, %v10716_v19, 0.0 }
 0x44b   : > { %2290 = vadd.xlane.f32.xlu1 %v2289_v20  ;;  %v9038_v20 = vld [vmem:[%s13004_s25] ss:$0 sm:$0xff] }
 0x44d   : > { %v10718_v21 = vpop.eup %10717 }
 0x44e   : > { %v2292_v22 = vsel %vm2229_vm3, %v10718_v21, 0.0 }
 0x44f   : > { %2293 = vadd.xlane.f32.xlu1 %v2292_v22 }
 0x4d4   : > { %v2291_v23 = vpop.xlane.xlu1 %2290 }
 0x4d5   : > { %10719 = vrcp.f32 %v2291_v23 }
 0x4d8   : > { %v2294_v24 = vpop.xlane.xlu1 %2293 }
 0x4d9   : > { %10721 = vrcp.f32 %v2294_v24 }
 0x4e2   : > { %v10720_v25 = vpop.eup %10719 }
 0x4e3   : > { %v2297_v27 = vmul.f32 %v10720_v25, %v10716_v19 }
 0x4e6   : > { %v10722_v26 = vpop.eup %10721 }
 0x4e7   : > { %v2298_v28 = vmul.f32 %v10722_v26, %v10718_v21 }
 0x4e9   : > { %v2299_v30 = vpack.c.bf16 %v2298_v28, %v2297_v27 }
 0x4eb   : > { %9759 = vmatmul.mubr.msk.bf16.vlgmr.msra.gmra.mxu0 %vm2229_vm3, %v2299_v30 }
 0x4ec   : > { %9771 = vmatpush3.bf16.msra.mxu0 %v10633_v29  ;;  %9774 = vmatprep.mubr.msk.bf16.mxu0 %vm11386_vm0, %v11385_v0 }
 0x4ed   : > { %9772 = vmatprep.subr.bf16.mxu0 %v11385_v0 }
 0x4f0   : > { %9773 = vmatpush3.bf16.msra.mxu0 %v10634_v31 }
 0x4f1   : > { %9786 = vmatprep.subr.bf16.mxu0 %v11385_v0 }
 0x4f3   : > { %9775 = vmatmul.mubr.msk.bf16.vlgmr.msra.gmra.mxu0 %vm2054_vm2, %v11914_v18 }
 0x4f4   : > { %9788 = vmatprep.mubr.msk.bf16.mxu0 %vm11386_vm0, %v11385_v0 }
 0x5ab   : > { %v2338_v32 = vpop.f32.mrf.mxu0 }
 0x5ad   : > { %v9760_v33 = vpop.f32.mrf.mxu0 }
 0x5af   : > { %v2341_v34 = vpop.f32.mrf.mxu0 }
 0x5b0   : > { %v2345_v35 = vpack.c.bf16 %v2341_v34, %v2338_v32 }
 0x5b1   : > { %v9761_v36 = vpop.f32.mrf.mxu0 }
 0x5b3   : > { %v2473_v37 = vpop.f32.mrf.mxu0 }
 0x5b4   : > { %v2474_v41 = vadd.f32 %v9017_v38, %v2473_v37 }
 0x5b5   : > { %v9776_v39 = vpop.f32.mrf.mxu0 }
 0x5b7   : > { %v2476_v40 = vpop.f32.mrf.mxu0 }
 0x5b8   : > { %v2477_v42 = vadd.f32 %v9017_v38, %v2476_v40 }
 0x5b9   : > { %v9777_v43 = vpop.f32.mrf.mxu0 }
 0x5ba   : > { %v2547_v44 = vpack.c.bf16 %v2477_v42, %v2474_v41  ;;  %v10638_v41 = vld [vmem:[%s13006_s2] sm:$0xff]   ;;  %v10639_v42 = vld [vmem:[%s13007_s4 + $0x18] sm:$0xff]  }
 0x5bc   : > { %v2552_v45 = vsel %vm2229_vm3, %v2547_v44, 0 }
 0x5bd   : > { %9787 = vmatpush3.bf16.xpose.msra.mxu0 %v2552_v45 }
 0x5be   : > { %9798 = vmatprep.subr.bf16.mxu0 %v11385_v0 }
 0x5c4   : > { %9789 = vmatmul.mubr.msk.bf16.vlgmr.msra.gmra.mxu0 %vm2229_vm3, %v2546_v1 }
 0x5c5   : > { %9800 = vmatprep.mubr.msk.bf16.mxu0 %vm11386_vm0, %v11385_v0  ;;  %9799 = vmatpush3.bf16.msra.mxu0 %v10636_v6 }
 0x5c6   : > { %9810 = vmatprep.subr.bf16.mxu0 %v11385_v0 }
 0x684   : > { %v2588_v18 = vpop.f32.mrf.mxu0 }
 0x685   : > { %v2595_v46 = vsel %vm2229_vm3, %v2588_v18, -inf }
 0x686   : > { %2596 = vmax.xlane.f32.xlu0 %v2595_v46  ;;  %v9790_v47 = vpop.f32.mrf.mxu0 }
 0x688   : > { %v2591_v48 = vpop.f32.mrf.mxu0 }
 0x689   : > { %v2598_v49 = vsel %vm2229_vm3, %v2591_v48, -inf }
 0x68a   : > { %2599 = vmax.xlane.f32.xlu1 %v2598_v49  ;;  %v9791_v50 = vpop.f32.mrf.mxu0 }
 0x68b   : > { %v9039_v50 = vld [vmem:[%s13008_s5] ss:$0 sm:$0xff] }
 0x70f   : > { %v2597_v51 = vpop.xlane.xlu0 %2596 }
 0x710   : > { %v2601_v52 = vsub.f32 %v2588_v18, %v2597_v51 }
 0x712   : > { %v2603_v53 = vmul.f32 1.442695, %v2601_v52 }
 0x713   : > { %v2600_v54 = vpop.xlane.xlu1 %2599 }
 0x714   : > { %10723 = vpow2.f32 %v2603_v53  ;;  %v2602_v55 = vsub.f32 %v2591_v48, %v2600_v54  ;;  %v9040_v54 = vld [vmem:[%s13009_s6] ss:$0 sm:$0xff] }
 0x716   : > { %v2605_v56 = vmul.f32 1.442695, %v2602_v55 }
 0x718   : > { %10725 = vpow2.f32 %v2605_v56 }
 0x721   : > { %v10724_v57 = vpop.eup %10723 }
 0x722   : > { %v2607_v58 = vsel %vm2229_vm3, %v10724_v57, 0.0 }
 0x723   : > { %2608 = vadd.xlane.f32.xlu0 %v2607_v58 }
 0x725   : > { %v10726_v59 = vpop.eup %10725 }
 0x726   : > { %v2610_v60 = vsel %vm2229_vm3, %v10726_v59, 0.0 }
 0x727   : > { %2611 = vadd.xlane.f32.xlu1 %v2610_v60  ;;  %v10641_v60 = vld [vmem:[%s13007_s4 + $0x8] sm:$0xff]  }
 0x7ac   : > { %v2609_v61 = vpop.xlane.xlu0 %2608 }
 0x7ad   : > { %10727 = vrcp.f32 %v2609_v61  ;;  %v10642_v61 = vld [vmem:[%s13007_s4] sm:$0xff]  }
 0x7b0   : > { %v2612_v62 = vpop.xlane.xlu1 %2611 }
 0x7b1   : > { %10729 = vrcp.f32 %v2612_v62 }
 0x7ba   : > { %v10728_v63 = vpop.eup %10727 }
 0x7bb   : > { %v2615_v2 = vmul.f32 %v10728_v63, %v10724_v57 }
 0x7be   : > { %v10730_v1 = vpop.eup %10729 }
 0x7bf   : > { %v2616_v3 = vmul.f32 %v10730_v1, %v10726_v59  ;;  %v10640_v59 = vld [vmem:[%s13007_s4 + $0x10] sm:$0xff]  }
 0x7c1   : > { %v2617_v5 = vpack.c.bf16 %v2616_v3, %v2615_v2 }
 0x7c3   : > { %9795 = vmatmul.mubr.msk.bf16.vlgmr.msra.gmra.mxu1 %vm2229_vm3, %v2617_v5 }
 0x7c4   : > { %9805 = vmatpush3.bf16.msra.mxu1 %v10635_v4  ;;  %9806 = vmatprep.mubr.msk.bf16.mxu1 %vm11386_vm0, %v11385_v0 }
 0x7c5   : > { %9818 = vmatprep.subr.bf16.mxu1 %v11385_v0 }
 0x7cb   : > { %9807 = vmatmul.mubr.msk.bf16.vlgmr.msra.gmra.mxu1 %vm2229_vm3, %v2345_v35 }
 0x7cc   : > { %9826 = vmatprep.mubr.msk.bf16.mxu1 %vm11386_vm0, %v11385_v0  ;;  %9819 = vmatpush3.bf16.msra.mxu1 %v10639_v42 }
 0x7cd   : > { %9820 = vmatprep.subr.bf16.mxu1 %v11385_v0 }
 0x7d0   : > { %9821 = vmatpush3.bf16.msra.mxu1 %v10640_v59 }
 0x7d1   : > { %9822 = vmatprep.subr.bf16.mxu1 %v11385_v0 }
 0x7d4   : > { %9823 = vmatpush3.bf16.msra.mxu1 %v10641_v60 }
 0x7d5   : > { %9824 = vmatprep.subr.bf16.mxu1 %v11385_v0 }
 0x7d8   : > { %9825 = vmatpush3.bf16.msra.mxu1 %v10642_v61 }
 0x7d9   : > { %9846 = vmatprep.subr.bf16.mxu1 %v11385_v0 }
 0x883   : > { %v2656_v7 = vpop.f32.mrf.mxu1 }
 0x885   : > { %v9796_v8 = vpop.f32.mrf.mxu1 }
 0x887   : > { %v2659_v9 = vpop.f32.mrf.mxu1 }
 0x888   : > { %v2663_v10 = vpack.c.bf16 %v2659_v9, %v2656_v7  ;;  %v9045_v9 = vld [vmem:[%s13012_s13] ss:$0 sm:$0xff] }
 0x889   : > { %v9797_v11 = vpop.f32.mrf.mxu1 }
 0x88a   : > { %9801 = vmatmul.mubr.msk.bf16.vlgmr.msra.gmra.mxu0 %vm2229_vm3, %v2663_v10 }
 0x88b   : > { %v2760_v12 = vpop.f32.mrf.mxu1  ;;  %9814 = vmatprep.mubr.msk.bf16.mxu0 %vm11386_vm0, %v11385_v0 }
 0x88d   : > { %v9808_v13 = vpop.f32.mrf.mxu1 }
 0x88f   : > { %v2763_v16 = vpop.f32.mrf.mxu1 }
 0x891   : > { %v9809_v17 = vpop.f32.mrf.mxu1 }
 0x94a   : > { %v2710_v19 = vpop.f32.mrf.mxu0 }
 0x94b   : > { %v2761_v21 = vadd.f32 %v2760_v12, %v2710_v19 }
 0x94c   : > { %v9802_v22 = vpop.f32.mrf.mxu0 }
 0x94d   : > { %v2774_v23 = vadd.f32 %v9038_v20, %v2761_v21 }
 0x94e   : > { %v2713_v24 = vpop.f32.mrf.mxu0 }
 0x94f   : > { %v2764_v25 = vadd.f32 %v2763_v16, %v2713_v24  ;;  %v2776_v26 = vadd.f32 %v2774_v23, %v11907_v14 }
 0x950   : > { %v9803_v27 = vpop.f32.mrf.mxu0 }
 0x951   : > { %v2775_v28 = vadd.f32 %v9038_v20, %v2764_v25  ;;  %v2780_v29 = vsel %vm2054_vm2, %v2776_v26, 0.0 }
 0x952   : > { %2781 = vadd.xlane.f32.xlu0 %v2780_v29 }
 0x953   : > { %v2777_v30 = vadd.f32 %v2775_v28, %v11909_v15  ;;  %v10637_v15 = vld [vmem:[%s13005_s7 + $0x8] sm:$0xff]   ;;  %s13010_s7 = sld [smem:[#allocation35_spill]] }
 0x954   : > { %9811 = vmatpush3.bf16.msra.mxu0 %v10637_v15 }
 0x955   : > { %v2783_v31 = vsel %vm2054_vm2, %v2777_v30, 0.0  ;;  %9812 = vmatprep.subr.bf16.mxu0 %v11385_v0 }
 0x956   : > { %2784 = vadd.xlane.f32.xlu1 %v2783_v31 }
 0x958   : > { %9813 = vmatpush3.bf16.msra.mxu0 %v10638_v41 }
 0x959   : > { %9830 = vmatprep.subr.bf16.mxu0 %v11385_v0  ;;  %s13011_s10 = smov %s13010_s7  ;;  %v9041_v62 = vld [vmem:[%s13010_s7] ss:$0 sm:$0xff]  ;;  %s13013_s7 = sld [smem:[#allocation44_spill]] }
 0x95f   : > { %s13014_s14 = smov %s13013_s7 }
 0x9db   : > { %v2782_v32 = vpop.xlane.xlu0 %2781 }
 0x9dc   : > { %v2787_v33 = vmul.f32 0.03125, %v2782_v32 }
 0x9de   : > { %v2789_v34 = vsub.f32 %v2776_v26, %v2787_v33  ;;  %v10643_v33 = vld [vmem:[%s12996_s26 + $0x28] sm:$0xff]  }
 0x9df   : > { %v2785_v35 = vpop.xlane.xlu1 %2784 }
 0x9e0   : > { %v2788_v36 = vmul.f32 0.03125, %v2785_v35  ;;  %v2791_v37 = vmul.f32 %v2789_v34, %v2789_v34  ;;  %v10645_v35 = vld [vmem:[%s12996_s26 + $0x20] sm:$0xff]  }
 0x9e2   : > { %v2790_v14 = vsub.f32 %v2777_v30, %v2788_v36  ;;  %v2793_v38 = vsel %vm2054_vm2, %v2791_v37, 0.0  ;;  %v10646_v36 = vld [vmem:[%s12999_s18 + $0x20] sm:$0xff]  }
 0x9e3   : > { %2794 = vadd.xlane.f32.xlu0 %v2793_v38 }
 0x9e4   : > { %v2792_v39 = vmul.f32 %v2790_v14, %v2790_v14 }
 0x9e6   : > { %v2796_v40 = vsel %vm2054_vm2, %v2792_v39, 0.0 }
 0x9e7   : > { %2797 = vadd.xlane.f32.xlu1 %v2796_v40 }
 0xa6c   : > { %v2795_v43 = vpop.xlane.xlu0 %2794 }
 0xa6d   : > { %v2799_v44 = vmul.f32 0.03125, %v2795_v43  ;;  %v9051_v43 = vld [vmem:[%s13013_s7] ss:$0 sm:$0xff]  ;;  %s13016_s7 = sld [smem:[#allocation32_spill]] }
 0xa6f   : > { %v2801_v45 = vadd.f32 1e-05, %v2799_v44 }
 0xa70   : > { %v2798_v18 = vpop.xlane.xlu1 %2797 }
 0xa71   : > { %10731 = vrsqrt.f32 %v2801_v45  ;;  %v2800_v46 = vmul.f32 0.03125, %v2798_v18 }
 0xa73   : > { %v2802_v47 = vadd.f32 1e-05, %v2800_v46  ;;  %v9052_v46 = vld [vmem:[%s13015_s19] ss:$0 sm:$0xff] }
 0xa75   : > { %10733 = vrsqrt.f32 %v2802_v47 }
 0xa7e   : > { %v10732_v48 = vpop.eup %10731 }
 0xa7f   : > { %v2805_v49 = vmul.f32 %v10732_v48, %v2789_v34  ;;  %v10644_v34 = vld [vmem:[%s12999_s18 + $0x28] sm:$0xff]  }
 0xa81   : > { %v2813_v53 = vmul.f32 %v9039_v50, %v2805_v49 }
 0xa82   : > { %v10734_v51 = vpop.eup %10733 }
 0xa83   : > { %v2806_v52 = vmul.f32 %v10734_v51, %v2790_v14  ;;  %v2821_v56 = vadd.f32 %v9040_v54, %v2813_v53 }
 0xa85   : > { %v2814_v55 = vmul.f32 %v9039_v50, %v2806_v52  ;;  %v10647_v50 = vld [vmem:[%s12998_s16 + $0x28] sm:$0xff]   ;;  %v10648_v52 = vld [vmem:[%s12998_s16 + $0x20] sm:$0xff]  }
 0xa87   : > { %v2822_v57 = vadd.f32 %v9040_v54, %v2814_v55  ;;  %v9076_v55 = vld [vmem:[%s13002_s15 + $0x2] ss:$0 sm:$0xff] }
 0xa89   : > { %v2823_v58 = vpack.c.bf16 %v2822_v57, %v2821_v56 }
 0xa8b   : > { %9815 = vmatmul.mubr.msk.bf16.vlgmr.msra.gmra.mxu0 %vm2054_vm2, %v2823_v58 }
 0xa8c   : > { %9834 = vmatprep.mubr.msk.bf16.mxu0 %vm11386_vm0, %v11385_v0  ;;  %9831 = vmatpush3.bf16.msra.mxu0 %v10643_v33 }
 0xa8d   : > { %9832 = vmatprep.subr.bf16.mxu0 %v11385_v0 }
 0xa90   : > { %9833 = vmatpush3.bf16.msra.mxu0 %v10645_v35 }
 0xa91   : > { %9838 = vmatprep.subr.bf16.mxu0 %v11385_v0 }
 0xb4b   : > { %v2884_v63 = vpop.f32.mrf.mxu0 }
 0xb4c   : > { %v2885_v2 = vadd.f32 %v9041_v62, %v2884_v63 }
 0xb4d   : > { %v9816_v1 = vpop.f32.mrf.mxu0 }
 0xb4e   : > { %v2891_v6 = vmax.f32 %v2885_v2, 0.0 }
 0xb4f   : > { %v2887_v3 = vpop.f32.mrf.mxu0 }
 0xb50   : > { %v2888_v4 = vadd.f32 %v9041_v62, %v2887_v3  ;;  %v9067_v3 = vld [vmem:[%s13000_s23 + $0x2] ss:$0 sm:$0xff] }
 0xb51   : > { %v9817_v5 = vpop.f32.mrf.mxu0 }
 0xb52   : > { %v2892_v7 = vmax.f32 %v2888_v4, 0.0 }
 0xb54   : > { %v2893_v8 = vpack.c.bf16 %v2892_v7, %v2891_v6 }
 0xb56   : > { %9827 = vmatmul.mubr.msk.bf16.vlgmr.msra.gmra.mxu1 %vm2933_vm4, %v2893_v8 }
 0xb57   : > { %9850 = vmatprep.mubr.msk.bf16.mxu1 %vm11386_vm0, %v11385_v0  ;;  %9847 = vmatpush3.bf16.msra.mxu1 %v10644_v34 }
 0xb58   : > { %9848 = vmatprep.subr.bf16.mxu1 %v11385_v0 }
 0xb5b   : > { %9849 = vmatpush3.bf16.msra.mxu1 %v10646_v36 }
 0xb5c   : > { %9860 = vmatprep.subr.bf16.mxu1 %v11385_v0 }
 0xc16   : > { %v2971_v10 = vpop.f32.mrf.mxu1 }
 0xc17   : > { %v2972_v11 = vadd.f32 %v9045_v9, %v2971_v10 }
 0xc18   : > { %v9828_v12 = vpop.f32.mrf.mxu1 }
 0xc19   : > { %v2978_v13 = vadd.f32 %v2972_v11, %v2821_v56  ;;  %v9058_v11 = vld [vmem:[%s13001_s11 + $0x2] ss:$0 sm:$0xff] }
 0xc1a   : > { %v2974_v16 = vpop.f32.mrf.mxu1 }
 0xc1b   : > { %v2975_v17 = vadd.f32 %v9045_v9, %v2974_v16  ;;  %v2982_v19 = vsel %vm2054_vm2, %v2978_v13, 0.0  ;;  %v10649_v16 = vld [vmem:[%s12996_s26 + $0x38] sm:$0xff]  }
 0xc1c   : > { %2983 = vadd.xlane.f32.xlu0 %v2982_v19  ;;  %v9829_v20 = vpop.f32.mrf.mxu1  ;;  %v10650_v19 = vld [vmem:[%s12996_s26 + $0x30] sm:$0xff]  }
 0xc1d   : > { %v2979_v21 = vadd.f32 %v2975_v17, %v2822_v57  ;;  %v10651_v20 = vld [vmem:[%s12999_s18 + $0x38] sm:$0xff]  }
 0xc1f   : > { %v2985_v22 = vsel %vm2054_vm2, %v2979_v21, 0.0 }
 0xc20   : > { %2986 = vadd.xlane.f32.xlu1 %v2985_v22 }
 0xca5   : > { %v2984_v23 = vpop.xlane.xlu0 %2983 }
 0xca6   : > { %v2988_v24 = vmul.f32 0.03125, %v2984_v23 }
 0xca8   : > { %v2990_v25 = vsub.f32 %v2978_v13, %v2988_v24 }
 0xca9   : > { %v2987_v26 = vpop.xlane.xlu1 %2986 }
 0xcaa   : > { %v2989_v27 = vmul.f32 0.03125, %v2987_v26  ;;  %v2992_v28 = vmul.f32 %v2990_v25, %v2990_v25 }
 0xcac   : > { %v2991_v29 = vsub.f32 %v2979_v21, %v2989_v27  ;;  %v2994_v30 = vsel %vm2054_vm2, %v2992_v28, 0.0  ;;  %v10652_v21 = vld [vmem:[%s12999_s18 + $0x30] sm:$0xff]  }
 0xcad   : > { %2995 = vadd.xlane.f32.xlu0 %v2994_v30 }
 0xcae   : > { %v2993_v31 = vmul.f32 %v2991_v29, %v2991_v29 }
 0xcb0   : > { %v2997_v32 = vsel %vm2054_vm2, %v2993_v31, 0.0 }
 0xcb1   : > { %2998 = vadd.xlane.f32.xlu1 %v2997_v32 }
 0xd36   : > { %v2996_v37 = vpop.xlane.xlu0 %2995 }
 0xd37   : > { %v3000_v14 = vmul.f32 0.03125, %v2996_v37  ;;  %v9107_v37 = vld [vmem:[%s13002_s15 + $0x3] ss:$0 sm:$0xff] }
 0xd39   : > { %v3002_v38 = vadd.f32 1e-05, %v3000_v14 }
 0xd3a   : > { %v2999_v39 = vpop.xlane.xlu1 %2998 }
 0xd3b   : > { %10735 = vrsqrt.f32 %v3002_v38  ;;  %v3001_v40 = vmul.f32 0.03125, %v2999_v39 }
 0xd3d   : > { %v3003_v15 = vadd.f32 1e-05, %v3001_v40 }
 0xd3f   : > { %10737 = vrsqrt.f32 %v3003_v15 }
 0xd48   : > { %v10736_v41 = vpop.eup %10735 }
 0xd49   : > { %v3006_v42 = vmul.f32 %v10736_v41, %v2990_v25 }
 0xd4b   : > { %v3014_v45 = vmul.f32 %v9051_v43, %v3006_v42 }
 0xd4c   : > { %v10738_v44 = vpop.eup %10737 }
 0xd4d   : > { %v3007_v18 = vmul.f32 %v10738_v44, %v2991_v29  ;;  %v12050_v48 = vadd.f32 %v9052_v46, %v3014_v45  ;;  %v9089_v29 = vld [vmem:[%s13001_s11 + $0x3] ss:$0 sm:$0xff] }
 0xd4f   : > { %v3015_v47 = vmul.f32 %v9051_v43, %v3007_v18 }
 0xd51   : > { %v12052_v49 = vadd.f32 %v9052_v46, %v3015_v47 }
 0xd53   : > { %v12057_v51 = vpack.c.bf16 %v12052_v49, %v12050_v48 }
 0xd55   : > { %9835 = vmatmul.mubr.msk.bf16.vlgmr.msra.gmra.mxu0 %vm2054_vm2, %v12057_v51  ;;  %9851 = vmatmul.mubr.msk.bf16.vlgmr.msra.gmra.mxu1 %vm2054_vm2, %v12057_v51 }
 0xd56   : > { %9839 = vmatpush3.bf16.msra.mxu0 %v10647_v50  ;;  %9842 = vmatprep.mubr.msk.bf16.mxu0 %vm11386_vm0, %v11385_v0 }
 0xd57   : > { %9840 = vmatprep.subr.bf16.mxu0 %v11385_v0  ;;  %9862 = vmatprep.mubr.msk.bf16.mxu1 %vm11386_vm0, %v11385_v0 }
 0xd5a   : > { %9841 = vmatpush3.bf16.msra.mxu0 %v10648_v52 }
 0xd5b   : > { %9854 = vmatprep.subr.bf16.mxu0 %v11385_v0 }
 0xd5d   : > { %9843 = vmatmul.mubr.msk.bf16.vlgmr.msra.gmra.mxu0 %vm2054_vm2, %v12057_v51 }
 0xd5e   : > { %9856 = vmatprep.mubr.msk.bf16.mxu0 %vm11386_vm0, %v11385_v0 }
 0xe15   : > { %v3087_v53 = vpop.f32.mrf.mxu0  ;;  %v3219_v54 = vpop.f32.mrf.mxu1 }
 0xe16   : > { %v3220_v60 = vadd.f32 %v9076_v55, %v3219_v54  ;;  %v3088_v13 = vadd.f32 %v9058_v11, %v3087_v53 }
 0xe17   : > { %v9836_v56 = vpop.f32.mrf.mxu0  ;;  %v9852_v57 = vpop.f32.mrf.mxu1 }
 0xe19   : > { %v3090_v58 = vpop.f32.mrf.mxu0  ;;  %v3222_v59 = vpop.f32.mrf.mxu1 }
 0xe1a   : > { %v3223_v61 = vadd.f32 %v9076_v55, %v3222_v59  ;;  %v3091_v12 = vadd.f32 %v9058_v11, %v3090_v58 }
 0xe1b   : > { %v9837_v62 = vpop.f32.mrf.mxu0  ;;  %v9853_v63 = vpop.f32.mrf.mxu1 }
 0xe1c   : > { %v3298_v1 = vpack.c.bf16 %v3223_v61, %v3220_v60  ;;  %v3226_v17 = vpack.c.bf16 %v3091_v12, %v3088_v13  ;;  %v10653_v60 = vld [vmem:[%s12998_s16 + $0x38] sm:$0xff]   ;;  %v10654_v62 = vld [vmem:[%s12998_s16 + $0x30] sm:$0xff]  }
 0xe1d   : > { %v3153_v2 = vpop.f32.mrf.mxu0 }
 0xe1e   : > { %9861 = vmatpush3.bf16.msra.mxu1 %v3298_v1  ;;  %v3154_v6 = vadd.f32 %v9067_v3, %v3153_v2 }
 0xe1f   : > { %v9844_v4 = vpop.f32.mrf.mxu0  ;;  %9874 = vmatprep.subr.bf16.mxu1 %v11385_v0 }
 0xe21   : > { %v3156_v5 = vpop.f32.mrf.mxu0 }
 0xe22   : > { %v3157_v7 = vadd.f32 %v9067_v3, %v3156_v5 }
 0xe23   : > { %v9845_v8 = vpop.f32.mrf.mxu0 }
 0xe24   : > { %v3227_v9 = vpack.c.bf16 %v3157_v7, %v3154_v6  ;;  %v9098_v6 = vld [vmem:[%s13000_s23 + $0x3] ss:$0 sm:$0xff] }
 0xe26   : > { %v3232_v10 = vsel %vm2229_vm3, %v3227_v9, 0 }
 0xe27   : > { %9855 = vmatpush3.bf16.xpose.msra.mxu0 %v3232_v10 }
 0xe28   : > { %9866 = vmatprep.subr.bf16.mxu0 %v11385_v0 }
 0xe2e   : > { %9857 = vmatmul.mubr.msk.bf16.vlgmr.msra.gmra.mxu0 %vm2229_vm3, %v3226_v17 }
 0xe2f   : > { %9867 = vmatpush3.bf16.msra.mxu0 %v10649_v16  ;;  %9870 = vmatprep.mubr.msk.bf16.mxu0 %vm11386_vm0, %v11385_v0 }
 0xe30   : > { %9868 = vmatprep.subr.bf16.mxu0 %v11385_v0 }
 0xe33   : > { %9869 = vmatpush3.bf16.msra.mxu0 %v10650_v19 }
 0xe34   : > { %9882 = vmatprep.subr.bf16.mxu0 %v11385_v0 }
 0xe36   : > { %9871 = vmatmul.mubr.msk.bf16.vlgmr.msra.gmra.mxu0 %vm2054_vm2, %v12057_v51 }
 0xe37   : > { %9883 = vmatpush3.bf16.msra.mxu0 %v10651_v20  ;;  %9886 = vmatprep.mubr.msk.bf16.mxu0 %vm11386_vm0, %v11385_v0 }
 0xe38   : > { %9884 = vmatprep.subr.bf16.mxu0 %v11385_v0 }
 0xe3b   : > { %9885 = vmatpush3.bf16.msra.mxu0 %v10652_v21 }
 0xe3c   : > { %9896 = vmatprep.subr.bf16.mxu0 %v11385_v0 }
 0xe3e   : > { %9887 = vmatmul.mubr.msk.bf16.vlgmr.msra.gmra.mxu0 %vm2054_vm2, %v12057_v51 }
 0xe3f   : > { %9898 = vmatprep.mubr.msk.bf16.mxu0 %vm11386_vm0, %v11385_v0 }
 0xeee   : > { %v3268_v22 = vpop.f32.mrf.mxu0 }
 0xeef   : > { %v3275_v23 = vsel %vm2229_vm3, %v3268_v22, -inf }
 0xef0   : > { %3276 = vmax.xlane.f32.xlu0 %v3275_v23  ;;  %v9858_v24 = vpop.f32.mrf.mxu0 }
 0xef2   : > { %v3271_v25 = vpop.f32.mrf.mxu0 }
 0xef3   : > { %v3278_v26 = vsel %vm2229_vm3, %v3271_v25, -inf }
 0xef4   : > { %3279 = vmax.xlane.f32.xlu1 %v3278_v26  ;;  %v9859_v27 = vpop.f32.mrf.mxu0 }
 0xef6   : > { %v3406_v28 = vpop.f32.mrf.mxu0 }
 0xef7   : > { %v12102_v32 = vadd.f32 %v9089_v29, %v3406_v28 }
 0xef8   : > { %v9872_v30 = vpop.f32.mrf.mxu0 }
 0xefa   : > { %v3409_v31 = vpop.f32.mrf.mxu0 }
 0xefb   : > { %v12104_v33 = vadd.f32 %v9089_v29, %v3409_v31 }
 0xefc   : > { %v9873_v34 = vpop.f32.mrf.mxu0 }
 0xefd   : > { %v3545_v35 = vpack.c.bf16 %v12104_v33, %v12102_v32 }
 0xefe   : > { %v3538_v36 = vpop.f32.mrf.mxu0 }
 0xeff   : > { %v3539_v39 = vadd.f32 %v9107_v37, %v3538_v36 }
 0xf00   : > { %v9888_v14 = vpop.f32.mrf.mxu0 }
 0xf01   : > { %v10655_v14 = vld [vmem:[%s13003_s17 + $0x10] sm:$0xff]  }
 0xf02   : > { %v3541_v38 = vpop.f32.mrf.mxu0 }
 0xf03   : > { %v3542_v40 = vadd.f32 %v9107_v37, %v3541_v38 }
 0xf04   : > { %v9889_v15 = vpop.f32.mrf.mxu0 }
 0xf05   : > { %v3617_v41 = vpack.c.bf16 %v3542_v40, %v3539_v39  ;;  %v10656_v39 = vld [vmem:[%s13003_s17 + $0x18] sm:$0xff]  }
 0xf07   : > { %9897 = vmatpush3.bf16.msra.mxu0 %v3617_v41 }
 0xf08   : > { %9908 = vmatprep.subr.bf16.mxu0 %v11385_v0 }
 0xf79   : > { %v3277_v42 = vpop.xlane.xlu0 %3276 }
 0xf7a   : > { %v3281_v43 = vsub.f32 %v3268_v22, %v3277_v42 }
 0xf7c   : > { %v3283_v44 = vmul.f32 1.442695, %v3281_v43 }
 0xf7d   : > { %v3280_v45 = vpop.xlane.xlu1 %3279 }
 0xf7e   : > { %10739 = vpow2.f32 %v3283_v44  ;;  %v3282_v18 = vsub.f32 %v3271_v25, %v3280_v45 }
 0xf80   : > { %v3285_v46 = vmul.f32 1.442695, %v3282_v18 }
 0xf82   : > { %10741 = vpow2.f32 %v3285_v46 }
 0xf8b   : > { %v10740_v47 = vpop.eup %10739 }
 0xf8c   : > { %v3287_v50 = vsel %vm2229_vm3, %v10740_v47, 0.0 }
 0xf8d   : > { %3288 = vadd.xlane.f32.xlu0 %v3287_v50  ;;  %v9120_v50 = vld [vmem:[%s13004_s25 + $0x1] ss:$0 sm:$0xff] }
 0xf8f   : > { %v10742_v52 = vpop.eup %10741 }
 0xf90   : > { %v3290_v53 = vsel %vm2229_vm3, %v10742_v52, 0.0 }
 0xf91   : > { %3291 = vadd.xlane.f32.xlu1 %v3290_v53 }
0x1016   : > { %v3289_v54 = vpop.xlane.xlu0 %3288 }
0x1017   : > { %10743 = vrcp.f32 %v3289_v54 }
0x101a   : > { %v3292_v55 = vpop.xlane.xlu1 %3291 }
0x101b   : > { %10745 = vrcp.f32 %v3292_v55 }
0x1024   : > { %v10744_v56 = vpop.eup %10743 }
0x1025   : > { %v3295_v58 = vmul.f32 %v10744_v56, %v10740_v47 }
0x1028   : > { %v10746_v57 = vpop.eup %10745 }
0x1029   : > { %v3296_v59 = vmul.f32 %v10746_v57, %v10742_v52 }
0x102b   : > { %v3297_v61 = vpack.c.bf16 %v3296_v59, %v3295_v58 }
0x102d   : > { %9863 = vmatmul.mubr.msk.bf16.vlgmr.msra.gmra.mxu1 %vm2229_vm3, %v3297_v61 }
0x102e   : > { %9875 = vmatpush3.bf16.msra.mxu1 %v10653_v60  ;;  %9878 = vmatprep.mubr.msk.bf16.mxu1 %vm11386_vm0, %v11385_v0 }
0x102f   : > { %9876 = vmatprep.subr.bf16.mxu1 %v11385_v0 }
0x1032   : > { %9877 = vmatpush3.bf16.msra.mxu1 %v10654_v62 }
0x1033   : > { %9890 = vmatprep.subr.bf16.mxu1 %v11385_v0 }
0x1035   : > { %9879 = vmatmul.mubr.msk.bf16.vlgmr.msra.gmra.mxu1 %vm2054_vm2, %v12057_v51 }
0x1036   : > { %9892 = vmatprep.mubr.msk.bf16.mxu1 %vm11386_vm0, %v11385_v0 }
0x10ed   : > { %v3336_v63 = vpop.f32.mrf.mxu1 }
0x10ef   : > { %v9864_v1 = vpop.f32.mrf.mxu1 }
0x10f1   : > { %v3339_v2 = vpop.f32.mrf.mxu1 }
0x10f2   : > { %v3343_v3 = vpack.c.bf16 %v3339_v2, %v3336_v63 }
0x10f3   : > { %v9865_v4 = vpop.f32.mrf.mxu1 }
0x10f5   : > { %v3472_v5 = vpop.f32.mrf.mxu1 }
0x10f6   : > { %v3473_v9 = vadd.f32 %v9098_v6, %v3472_v5 }
0x10f7   : > { %v9880_v7 = vpop.f32.mrf.mxu1 }
0x10f9   : > { %v3475_v8 = vpop.f32.mrf.mxu1 }
0x10fa   : > { %v3476_v10 = vadd.f32 %v9098_v6, %v3475_v8 }
0x10fb   : > { %v9881_v11 = vpop.f32.mrf.mxu1 }
0x10fc   : > { %v3546_v12 = vpack.c.bf16 %v3476_v10, %v3473_v9  ;;  %v10658_v9 = vld [vmem:[%s13006_s2 + $0x10] sm:$0xff]   ;;  %v10659_v10 = vld [vmem:[%s13007_s4 + $0x38] sm:$0xff]  }
0x10fe   : > { %v3551_v13 = vsel %vm2229_vm3, %v3546_v12, 0 }
0x10ff   : > { %9891 = vmatpush3.bf16.xpose.msra.mxu1 %v3551_v13 }
0x1100   : > { %9902 = vmatprep.subr.bf16.mxu1 %v11385_v0 }
0x1106   : > { %9893 = vmatmul.mubr.msk.bf16.vlgmr.msra.gmra.mxu1 %vm2229_vm3, %v3545_v35 }
0x1107   : > { %9904 = vmatprep.mubr.msk.bf16.mxu1 %vm11386_vm0, %v11385_v0  ;;  %9903 = vmatpush3.bf16.msra.mxu1 %v10656_v39  ;;  %v9130_v39 = vld [vmem:[%s13011_s10 + $0x1] ss:$0 sm:$0xff]  ;;  %s13026_s10 = sld [smem:[#allocation58_spill]] }
0x1108   : > { %9914 = vmatprep.subr.bf16.mxu1 %v11385_v0 }
0x11c6   : > { %v3587_v51 = vpop.f32.mrf.mxu1 }
0x11c7   : > { %v3594_v16 = vsel %vm2229_vm3, %v3587_v51, -inf }
0x11c8   : > { %3595 = vmax.xlane.f32.xlu0 %v3594_v16  ;;  %v9894_v17 = vpop.f32.mrf.mxu1 }
0x11ca   : > { %v3590_v19 = vpop.f32.mrf.mxu1 }
0x11cb   : > { %v3597_v20 = vsel %vm2229_vm3, %v3590_v19, -inf }
0x11cc   : > { %3598 = vmax.xlane.f32.xlu1 %v3597_v20  ;;  %v9895_v21 = vpop.f32.mrf.mxu1 }
0x11cd   : > { %v9123_v21 = vld [vmem:[%s13008_s5 + $0x1] ss:$0 sm:$0xff]  ;;  %s13018_s5 = sld [smem:[#allocation66_spill]] }
0x1251   : > { %v3596_v22 = vpop.xlane.xlu0 %3595 }
0x1252   : > { %v3600_v23 = vsub.f32 %v3587_v51, %v3596_v22 }
0x1254   : > { %v3602_v24 = vmul.f32 1.442695, %v3600_v23 }
0x1255   : > { %v3599_v25 = vpop.xlane.xlu1 %3598 }
0x1256   : > { %10747 = vpow2.f32 %v3602_v24  ;;  %v3601_v26 = vsub.f32 %v3590_v19, %v3599_v25  ;;  %v9124_v25 = vld [vmem:[%s13009_s6 + $0x1] ss:$0 sm:$0xff] }
0x1258   : > { %v3604_v27 = vmul.f32 1.442695, %v3601_v26 }
0x125a   : > { %10749 = vpow2.f32 %v3604_v27  ;;  %v4033_v27 = vld [vmem:[#allocation10] sm:$0x3] }
0x1263   : > { %v10748_v28 = vpop.eup %10747 }
0x1264   : > { %v3606_v29 = vsel %vm2229_vm3, %v10748_v28, 0.0 }
0x1265   : > { %3607 = vadd.xlane.f32.xlu0 %v3606_v29 }
0x1267   : > { %v10750_v30 = vpop.eup %10749 }
0x1268   : > { %v3609_v31 = vsel %vm2229_vm3, %v10750_v30, 0.0 }
0x1269   : > { %3610 = vadd.xlane.f32.xlu1 %v3609_v31  ;;  %v4047_v31 = vsel %vm4045_vm5, %v4033_v27, 0  ;;  %v10669_v27 = vld [vmem:[%s13018_s5 + $0x18] sm:$0xff]  }
0x12ee   : > { %v3608_v32 = vpop.xlane.xlu0 %3607 }
0x12ef   : > { %10751 = vrcp.f32 %v3608_v32 }
0x12f2   : > { %v3611_v33 = vpop.xlane.xlu1 %3610 }
0x12f3   : > { %10753 = vrcp.f32 %v3611_v33 }
0x12fc   : > { %v10752_v34 = vpop.eup %10751 }
0x12fd   : > { %v3614_v36 = vmul.f32 %v10752_v34, %v10748_v28 }
0x1300   : > { %v10754_v35 = vpop.eup %10753 }
0x1301   : > { %v3615_v37 = vmul.f32 %v10754_v35, %v10750_v30  ;;  %v10660_v35 = vld [vmem:[%s13007_s4 + $0x30] sm:$0xff]  }
0x1303   : > { %v3616_v38 = vpack.c.bf16 %v3615_v37, %v3614_v36  ;;  %v10661_v36 = vld [vmem:[%s13007_s4 + $0x28] sm:$0xff]   ;;  %v10662_v37 = vld [vmem:[%s13007_s4 + $0x20] sm:$0xff]  }
0x1305   : > { %9899 = vmatmul.mubr.msk.bf16.vlgmr.msra.gmra.mxu0 %vm2229_vm3, %v3616_v38  ;;  %v10665_v38 = vld [vmem:[%s13018_s5] sm:$0xff]  }
0x1306   : > { %9909 = vmatpush3.bf16.msra.mxu0 %v10655_v14  ;;  %9910 = vmatprep.mubr.msk.bf16.mxu0 %vm11386_vm0, %v11385_v0  ;;  %v10663_v14 = vld [vmem:[%s13018_s5 + $0x8] sm:$0xff]  }
0x1307   : > { %9922 = vmatprep.subr.bf16.mxu0 %v11385_v0 }
0x130d   : > { %9911 = vmatmul.mubr.msk.bf16.vlgmr.msra.gmra.mxu0 %vm2229_vm3, %v3343_v3 }
0x130e   : > { %9930 = vmatprep.mubr.msk.bf16.mxu0 %vm11386_vm0, %v11385_v0  ;;  %9923 = vmatpush3.bf16.msra.mxu0 %v10659_v10 }
0x130f   : > { %9924 = vmatprep.subr.bf16.mxu0 %v11385_v0 }
0x1312   : > { %9925 = vmatpush3.bf16.msra.mxu0 %v10660_v35 }
0x1313   : > { %9926 = vmatprep.subr.bf16.mxu0 %v11385_v0 }
0x1316   : > { %9927 = vmatpush3.bf16.msra.mxu0 %v10661_v36 }
0x1317   : > { %9928 = vmatprep.subr.bf16.mxu0 %v11385_v0 }
0x131a   : > { %9929 = vmatpush3.bf16.msra.mxu0 %v10662_v37 }
0x131b   : > { %9948 = vmatprep.subr.bf16.mxu0 %v11385_v0 }
0x13c5   : > { %v3655_v40 = vpop.f32.mrf.mxu0 }
0x13c7   : > { %v9900_v15 = vpop.f32.mrf.mxu0 }
0x13c9   : > { %v3658_v41 = vpop.f32.mrf.mxu0 }
0x13ca   : > { %v3662_v42 = vpack.c.bf16 %v3658_v41, %v3655_v40 }
0x13cb   : > { %v9901_v43 = vpop.f32.mrf.mxu0 }
0x13cc   : > { %9905 = vmatmul.mubr.msk.bf16.vlgmr.msra.gmra.mxu1 %vm2229_vm3, %v3662_v42 }
0x13cd   : > { %v3759_v44 = vpop.f32.mrf.mxu0  ;;  %9918 = vmatprep.mubr.msk.bf16.mxu1 %vm11386_vm0, %v11385_v0 }
0x13cf   : > { %v9912_v45 = vpop.f32.mrf.mxu0 }
0x13d1   : > { %v3762_v18 = vpop.f32.mrf.mxu0 }
0x13d3   : > { %v9913_v46 = vpop.f32.mrf.mxu0 }
0x148c   : > { %v3709_v47 = vpop.f32.mrf.mxu1 }
0x148d   : > { %v3760_v52 = vadd.f32 %v3759_v44, %v3709_v47 }
0x148e   : > { %v9906_v53 = vpop.f32.mrf.mxu1 }
0x148f   : > { %v3774_v54 = vadd.f32 %v9120_v50, %v3760_v52  ;;  %v9153_v52 = vld [vmem:[#allocation8] ss:$0 sm:$0xff] }
0x1490   : > { %v3712_v55 = vpop.f32.mrf.mxu1 }
0x1491   : > { %v3763_v56 = vadd.f32 %v3762_v18, %v3712_v55  ;;  %v3776_v57 = vadd.f32 %v3774_v54, %v12050_v48 }
0x1492   : > { %v9907_v58 = vpop.f32.mrf.mxu1 }
0x1493   : > { %v3775_v59 = vadd.f32 %v9120_v50, %v3763_v56  ;;  %v3782_v60 = vsel %vm2054_vm2, %v3776_v57, 0.0 }
0x1494   : > { %3783 = vadd.xlane.f32.xlu0 %v3782_v60 }
0x1495   : > { %v3777_v61 = vadd.f32 %v3775_v59, %v12052_v49  ;;  %v10657_v49 = vld [vmem:[%s13006_s2 + $0x18] sm:$0xff]   ;;  %s13017_s2 = sshll.u32 %s11884_s28, 4  ;;  %s13019_s28 = sld [smem:[#allocation64_spill]] }
0x1496   : > { %9915 = vmatpush3.bf16.msra.mxu1 %v10657_v49  ;;  %s1954_s11 = scalar_lea.vmem %s13016_s7, %s13017_s2  ;;  %s13022_s7 = sld [smem:[#allocation56_spill]] }
0x1497   : > { %v3785_v62 = vsel %vm2054_vm2, %v3777_v61, 0.0  ;;  %9916 = vmatprep.subr.bf16.mxu1 %v11385_v0  ;;  %v4030_v32 = vld [vmem:[%s1954_s11] sm:$0xff]  ;;  %v4031_v33 = vld [vmem:[%s1954_s11 + $0x8] sm:$0xff]  ;;  %s13021_s11 = sld [smem:[#allocation67_spill]] }
0x1498   : > { %3786 = vadd.xlane.f32.xlu1 %v3785_v62  ;;  %v4032_v34 = vpack.c.bf16 %v4031_v33, %v4030_v32 }
0x149a   : > { %9917 = vmatpush3.bf16.msra.mxu1 %v10658_v9 }
0x149b   : > { %9934 = vmatprep.subr.bf16.mxu1 %v11385_v0  ;;  %s13020_s2 = smov %s13019_s28  ;;  %v10664_v47 = vld [vmem:[%s13019_s28 + $0x8] sm:$0xff]   ;;  %s13024_s28 = sld [smem:[#allocation59_spill]] }
0x149c   : > { %v10666_v55 = vld [vmem:[%s13020_s2] sm:$0xff]   ;;  %s13023_s4 = smov %s13022_s7 }
0x149d   : > { %v10667_v59 = vld [vmem:[%s13021_s11 + $0x8] sm:$0xff]   ;;  %v10671_v32 = vld [vmem:[%s13021_s11 + $0x18] sm:$0xff]   ;;  %v10672_v33 = vld [vmem:[%s13021_s11 + $0x10] sm:$0xff]  }
0x14a1   : > { %s13025_s6 = smov %s13024_s28 }
0x151d   : > { %v3784_v63 = vpop.xlane.xlu0 %3783 }
0x151e   : > { %v3788_v1 = vmul.f32 0.03125, %v3784_v63 }
0x1520   : > { %v3790_v2 = vsub.f32 %v3776_v57, %v3788_v1 }
0x1521   : > { %v3787_v3 = vpop.xlane.xlu1 %3786 }
0x1522   : > { %v3789_v4 = vmul.f32 0.03125, %v3787_v3  ;;  %v3792_v5 = vmul.f32 %v3790_v2, %v3790_v2 }
0x1524   : > { %v3791_v48 = vsub.f32 %v3777_v61, %v3789_v4  ;;  %v3794_v6 = vsel %vm2054_vm2, %v3792_v5, 0.0  ;;  %v10668_v61 = vld [vmem:[%s13021_s11] sm:$0xff]  }
0x1525   : > { %3795 = vadd.xlane.f32.xlu0 %v3794_v6 }
0x1526   : > { %v3793_v7 = vmul.f32 %v3791_v48, %v3791_v48 }
0x1528   : > { %v3797_v8 = vsel %vm2054_vm2, %v3793_v7, 0.0 }
0x1529   : > { %3798 = vadd.xlane.f32.xlu1 %v3797_v8 }
0x15ae   : > { %v3796_v11 = vpop.xlane.xlu0 %3795 }
0x15af   : > { %v3800_v12 = vmul.f32 0.03125, %v3796_v11 }
0x15b1   : > { %v3802_v13 = vadd.f32 1e-05, %v3800_v12 }
0x15b2   : > { %v3799_v51 = vpop.xlane.xlu1 %3798 }
0x15b3   : > { %10755 = vrsqrt.f32 %v3802_v13  ;;  %v3801_v16 = vmul.f32 0.03125, %v3799_v51  ;;  %v9163_v51 = vld [vmem:[%s13024_s28] ss:$0 sm:$0xff]  ;;  %s13029_s28 = sld [smem:[#allocation57_spill]] }
0x15b5   : > { %v3803_v17 = vadd.f32 1e-05, %v3801_v16 }
0x15b7   : > { %10757 = vrsqrt.f32 %v3803_v17 }
0x15b9   : > { %s13030_s16 = smov %s13029_s28 }
0x15c0   : > { %v10756_v19 = vpop.eup %10755 }
0x15c1   : > { %v3806_v20 = vmul.f32 %v10756_v19, %v3790_v2  ;;  %v9155_v19 = vld [vmem:[%s13026_s10] ss:$0 sm:$0xff] }
0x15c3   : > { %v3814_v24 = vmul.f32 %v9123_v21, %v3806_v20 }
0x15c4   : > { %v10758_v22 = vpop.eup %10757 }
0x15c5   : > { %v3807_v23 = vmul.f32 %v10758_v22, %v3791_v48  ;;  %v12161_v28 = vadd.f32 %v9124_v25, %v3814_v24  ;;  %v9159_v48 = vld [vmem:[%s13022_s7] ss:$0 sm:$0xff]  ;;  %s13027_s7 = sld [smem:[#allocation65_spill]] }
0x15c7   : > { %v3815_v26 = vmul.f32 %v9123_v21, %v3807_v23 }
0x15c9   : > { %v12163_v29 = vadd.f32 %v9124_v25, %v3815_v26 }
0x15cb   : > { %v3824_v30 = vpack.c.bf16 %v12163_v29, %v12161_v28  ;;  %s13028_s15 = smov %s13027_s7 }
0x15cd   : > { %9919 = vmatmul.mubr.msk.bf16.vlgmr.msra.gmra.mxu1 %vm2054_vm2, %v3824_v30 }
0x15ce   : > { %9935 = vmatpush3.bf16.msra.mxu1 %v4047_v31  ;;  %9936 = vmatprep.mubr.msk.bf16.mxu1 %vm11386_vm0, %v11385_v0  ;;  %v10670_v31 = vld [vmem:[%s13018_s5 + $0x10] sm:$0xff]  }
0x15cf   : > { %9940 = vmatprep.subr.bf16.mxu1 %v11385_v0 }
0x15d5   : > { %9937 = vmatmul.mubr.msk.bf16.vlgmr.msra.gmra.mxu1 %vm4041_vm6, %v4032_v34 }
0x15d6   : > { %9944 = vmatprep.mubr.msk.bf16.mxu1 %vm11386_vm0, %v11385_v0  ;;  %9941 = vmatpush3.bf16.msra.mxu1 %v10663_v14 }
0x15d7   : > { %9942 = vmatprep.subr.bf16.mxu1 %v11385_v0 }
0x15da   : > { %9943 = vmatpush3.bf16.msra.mxu1 %v10665_v38 }
0x15db   : > { %9956 = vmatprep.subr.bf16.mxu1 %v11385_v0 }
0x168d   : > { %v3887_v40 = vpop.f32.mrf.mxu1 }
0x168e   : > { %v3888_v41 = vadd.f32 %v9130_v39, %v3887_v40  ;;  %v9174_v40 = vld [vmem:[%s13026_s10 + $0x1] ss:$0 sm:$0xff] }
0x168f   : > { %v9920_v15 = vpop.f32.mrf.mxu1 }
0x1690   : > { %v3894_v45 = vmax.f32 %v3888_v41, 0.0 }
0x1691   : > { %v3890_v42 = vpop.f32.mrf.mxu1 }
0x1692   : > { %v3891_v43 = vadd.f32 %v9130_v39, %v3890_v42 }
0x1693   : > { %v9921_v44 = vpop.f32.mrf.mxu1 }
0x1694   : > { %v3895_v18 = vmax.f32 %v3891_v43, 0.0 }
0x1695   : > { %v4083_v46 = vpop.f32.mrf.mxu1 }
0x1696   : > { %v3896_v50 = vpack.c.bf16 %v3895_v18, %v3894_v45  ;;  %v12194_v56 = vadd.f32 %v9153_v52, %v4083_v46  ;;  %v9192_v46 = vld [vmem:[%s13025_s6 + $0x1] ss:$0 sm:$0xff] }
0x1697   : > { %v9938_v53 = vpop.f32.mrf.mxu1 }
0x1698   : > { %9931 = vmatmul.mubr.msk.bf16.vlgmr.msra.gmra.mxu0 %vm2933_vm4, %v3896_v50 }
0x1699   : > { %v4086_v54 = vpop.f32.mrf.mxu1  ;;  %9949 = vmatpush3.bf16.msra.mxu0 %v10664_v47  ;;  %9952 = vmatprep.mubr.msk.bf16.mxu0 %vm11386_vm0, %v11385_v0 }
0x169a   : > { %v12196_v57 = vadd.f32 %v9153_v52, %v4086_v54  ;;  %9950 = vmatprep.subr.bf16.mxu0 %v11385_v0 }
0x169b   : > { %v9939_v58 = vpop.f32.mrf.mxu1 }
0x169c   : > { %v12202_v60 = vpack.c.bf16 %v12196_v57, %v12194_v56 }
0x169d   : > { %9951 = vmatpush3.bf16.msra.mxu0 %v10666_v55 }
0x169e   : > { %9945 = vmatmul.mubr.msk.bf16.vlgmr.msra.gmra.mxu1 %vm2054_vm2, %v12202_v60  ;;  %9964 = vmatprep.subr.bf16.mxu0 %v11385_v0 }
0x169f   : > { %9957 = vmatpush3.bf16.msra.mxu1 %v10667_v59  ;;  %9960 = vmatprep.mubr.msk.bf16.mxu1 %vm11386_vm0, %v11385_v0 }
0x16a0   : > { %9953 = vmatmul.mubr.msk.bf16.vlgmr.msra.gmra.mxu0 %vm2054_vm2, %v12202_v60  ;;  %9958 = vmatprep.subr.bf16.mxu1 %v11385_v0 }
0x16a1   : > { %9966 = vmatprep.mubr.msk.bf16.mxu0 %vm11386_vm0, %v11385_v0 }
0x16a3   : > { %9959 = vmatpush3.bf16.msra.mxu1 %v10668_v61 }
0x16a4   : > { %9970 = vmatprep.subr.bf16.mxu1 %v11385_v0 }
0x16a6   : > { %9961 = vmatmul.mubr.msk.bf16.vlgmr.msra.gmra.mxu1 %vm2054_vm2, %v12202_v60 }
0x16a7   : > { %9972 = vmatprep.mubr.msk.bf16.mxu1 %vm11386_vm0, %v11385_v0 }
0x1758   : > { %v12220_v62 = vpop.f32.mrf.mxu0 }
0x175a   : > { %v9932_v63 = vpop.f32.mrf.mxu0 }
0x175c   : > { %v12222_v1 = vpop.f32.mrf.mxu0 }
0x175e   : > { %v9933_v2 = vpop.f32.mrf.mxu0  ;;  %v4151_v3 = vpop.f32.mrf.mxu1 }
0x175f   : > { %v4152_v25 = vadd.f32 %v9155_v19, %v4151_v3 }
0x1760   : > { %v9946_v4 = vpop.f32.mrf.mxu1  ;;  %v4215_v5 = vpop.f32.mrf.mxu0 }
0x1761   : > { %v4216_v9 = vadd.f32 %v9159_v48, %v4215_v5 }
0x1762   : > { %v4154_v6 = vpop.f32.mrf.mxu1  ;;  %v9954_v7 = vpop.f32.mrf.mxu0 }
0x1763   : > { %v4155_v21 = vadd.f32 %v9155_v19, %v4154_v6 }
0x1764   : > { %v9947_v8 = vpop.f32.mrf.mxu1  ;;  %v4218_v49 = vpop.f32.mrf.mxu0 }
0x1765   : > { %v4219_v10 = vadd.f32 %v9159_v48, %v4218_v49  ;;  %v4286_v30 = vpack.c.bf16 %v4155_v21, %v4152_v25 }
0x1766   : > { %v9955_v11 = vpop.f32.mrf.mxu0  ;;  %v4279_v12 = vpop.f32.mrf.mxu1 }
0x1767   : > { %v4287_v13 = vpack.c.bf16 %v4219_v10, %v4216_v9  ;;  %v4280_v22 = vadd.f32 %v9163_v51, %v4279_v12  ;;  %v10673_v12 = vld [vmem:[%s13020_s2 + $0x18] sm:$0xff]  }
0x1768   : > { %v9962_v16 = vpop.f32.mrf.mxu1 }
0x1769   : > { %v4292_v17 = vsel %vm2229_vm3, %v4287_v13, 0 }
0x176a   : > { %v4282_v20 = vpop.f32.mrf.mxu1  ;;  %9965 = vmatpush3.bf16.xpose.msra.mxu0 %v4292_v17 }
0x176b   : > { %v4283_v23 = vadd.f32 %v9163_v51, %v4282_v20  ;;  %9976 = vmatprep.subr.bf16.mxu0 %v11385_v0  ;;  %v10674_v51 = vld [vmem:[%s13020_s2 + $0x10] sm:$0xff]  }
0x176c   : > { %v9963_v24 = vpop.f32.mrf.mxu1 }
0x176d   : > { %v4358_v26 = vpack.c.bf16 %v4283_v23, %v4280_v22  ;;  %v9183_v23 = vld [vmem:[%s13023_s4 + $0x1] ss:$0 sm:$0xff] }
0x176f   : > { %9971 = vmatpush3.bf16.msra.mxu1 %v4358_v26 }
0x1770   : > { %9984 = vmatprep.subr.bf16.mxu1 %v11385_v0 }
0x1771   : > { %9967 = vmatmul.mubr.msk.bf16.vlgmr.msra.gmra.mxu0 %vm2229_vm3, %v4286_v30 }
0x1772   : > { %9977 = vmatpush3.bf16.msra.mxu0 %v10669_v27  ;;  %9980 = vmatprep.mubr.msk.bf16.mxu0 %vm11386_vm0, %v11385_v0 }
0x1773   : > { %9978 = vmatprep.subr.bf16.mxu0 %v11385_v0 }
0x1776   : > { %9979 = vmatpush3.bf16.msra.mxu0 %v10670_v31 }
0x1777   : > { %9992 = vmatprep.subr.bf16.mxu0 %v11385_v0 }
0x1779   : > { %9981 = vmatmul.mubr.msk.bf16.vlgmr.msra.gmra.mxu0 %vm2054_vm2, %v12202_v60 }
0x177a   : > { %9993 = vmatpush3.bf16.msra.mxu0 %v10671_v32  ;;  %9996 = vmatprep.mubr.msk.bf16.mxu0 %vm11386_vm0, %v11385_v0 }
0x177b   : > { %9994 = vmatprep.subr.bf16.mxu0 %v11385_v0 }
0x177e   : > { %9995 = vmatpush3.bf16.msra.mxu0 %v10672_v33 }
0x177f   : > { %10006 = vmatprep.subr.bf16.mxu0 %v11385_v0 }
0x1781   : > { %9997 = vmatmul.mubr.msk.bf16.vlgmr.msra.gmra.mxu0 %vm2054_vm2, %v12202_v60 }
0x1782   : > { %10008 = vmatprep.mubr.msk.bf16.mxu0 %vm11386_vm0, %v11385_v0 }
0x1831   : > { %v4328_v34 = vpop.f32.mrf.mxu0 }
0x1832   : > { %v4335_v35 = vsel %vm2229_vm3, %v4328_v34, -inf }
0x1833   : > { %4336 = vmax.xlane.f32.xlu0 %v4335_v35  ;;  %v9968_v36 = vpop.f32.mrf.mxu0 }
0x1835   : > { %v4331_v37 = vpop.f32.mrf.mxu0 }
0x1836   : > { %v4338_v14 = vsel %vm2229_vm3, %v4331_v37, -inf }
0x1837   : > { %4339 = vmax.xlane.f32.xlu1 %v4338_v14  ;;  %v9969_v38 = vpop.f32.mrf.mxu0 }
0x1839   : > { %v4465_v39 = vpop.f32.mrf.mxu0 }
0x183a   : > { %v12252_v42 = vadd.f32 %v9174_v40, %v4465_v39 }
0x183b   : > { %v9982_v15 = vpop.f32.mrf.mxu0 }
0x183d   : > { %v4468_v41 = vpop.f32.mrf.mxu0 }
0x183e   : > { %v12254_v43 = vadd.f32 %v9174_v40, %v4468_v41 }
0x183f   : > { %v9983_v44 = vpop.f32.mrf.mxu0 }
0x1840   : > { %v4604_v45 = vpack.c.bf16 %v12254_v43, %v12252_v42 }
0x1841   : > { %v4597_v18 = vpop.f32.mrf.mxu0 }
0x1842   : > { %v4598_v52 = vadd.f32 %v9192_v46, %v4597_v18 }
0x1843   : > { %v9998_v47 = vpop.f32.mrf.mxu0 }
0x1845   : > { %v4600_v50 = vpop.f32.mrf.mxu0 }
0x1846   : > { %v4601_v53 = vadd.f32 %v9192_v46, %v4600_v50 }
0x1847   : > { %v9999_v54 = vpop.f32.mrf.mxu0 }
0x1848   : > { %v4676_v55 = vpack.c.bf16 %v4601_v53, %v4598_v52  ;;  %v10675_v54 = vld [vmem:[%s13027_s7] sm:$0xff]   ;;  %s13031_s7 = sld [smem:[#allocation62_spill]] }
0x184a   : > { %10007 = vmatpush3.bf16.msra.mxu0 %v4676_v55 }
0x184b   : > { %10018 = vmatprep.subr.bf16.mxu0 %v11385_v0 }
0x184e   : > { %s13032_s17 = smov %s13031_s7 }
0x18bc   : > { %v4337_v58 = vpop.xlane.xlu0 %4336 }
0x18bd   : > { %v4341_v59 = vsub.f32 %v4328_v34, %v4337_v58  ;;  %v10676_v58 = vld [vmem:[%s13028_s15 + $0x8] sm:$0xff]  }
0x18bf   : > { %v4343_v61 = vmul.f32 1.442695, %v4341_v59 }
0x18c0   : > { %v4340_v63 = vpop.xlane.xlu1 %4339 }
0x18c1   : > { %10759 = vpow2.f32 %v4343_v61  ;;  %v4342_v2 = vsub.f32 %v4331_v37, %v4340_v63 }
0x18c3   : > { %v4345_v3 = vmul.f32 1.442695, %v4342_v2 }
0x18c5   : > { %10761 = vpow2.f32 %v4345_v3 }
0x18ce   : > { %v10760_v4 = vpop.eup %10759 }
0x18cf   : > { %v4347_v5 = vsel %vm2229_vm3, %v10760_v4, 0.0 }
0x18d0   : > { %4348 = vadd.xlane.f32.xlu0 %v4347_v5 }
0x18d2   : > { %v10762_v48 = vpop.eup %10761 }
0x18d3   : > { %v4350_v6 = vsel %vm2229_vm3, %v10762_v48, 0.0 }
0x18d4   : > { %4351 = vadd.xlane.f32.xlu1 %v4350_v6 }
0x1959   : > { %v4349_v7 = vpop.xlane.xlu0 %4348 }
0x195a   : > { %10763 = vrcp.f32 %v4349_v7 }
0x195d   : > { %v4352_v8 = vpop.xlane.xlu1 %4351 }
0x195e   : > { %10765 = vrcp.f32 %v4352_v8  ;;  %v9204_v8 = vld [vmem:[%s13029_s28] ss:$0 sm:$0xff]  ;;  %s13033_s28 = sld [smem:[#allocation63_spill]] }
0x1964   : > { %s13034_s18 = smov %s13033_s28 }
0x1967   : > { %v10764_v49 = vpop.eup %10763 }
0x1968   : > { %v4355_v10 = vmul.f32 %v10764_v49, %v10760_v4 }
0x196b   : > { %v10766_v9 = vpop.eup %10765 }
0x196c   : > { %v4356_v11 = vmul.f32 %v10766_v9, %v10762_v48 }
0x196e   : > { %v4357_v13 = vpack.c.bf16 %v4356_v11, %v4355_v10 }
0x1970   : > { %9973 = vmatmul.mubr.msk.bf16.vlgmr.msra.gmra.mxu1 %vm2229_vm3, %v4357_v13 }
0x1971   : > { %9985 = vmatpush3.bf16.msra.mxu1 %v10673_v12  ;;  %9988 = vmatprep.mubr.msk.bf16.mxu1 %vm11386_vm0, %v11385_v0 }
0x1972   : > { %9986 = vmatprep.subr.bf16.mxu1 %v11385_v0 }
0x1975   : > { %9987 = vmatpush3.bf16.msra.mxu1 %v10674_v51 }
0x1976   : > { %10000 = vmatprep.subr.bf16.mxu1 %v11385_v0 }
0x1978   : > { %9989 = vmatmul.mubr.msk.bf16.vlgmr.msra.gmra.mxu1 %vm2054_vm2, %v12202_v60 }
0x1979   : > { %10002 = vmatprep.mubr.msk.bf16.mxu1 %vm11386_vm0, %v11385_v0 }
0x1a30   : > { %v4396_v16 = vpop.f32.mrf.mxu1 }
0x1a32   : > { %v9974_v17 = vpop.f32.mrf.mxu1 }
0x1a34   : > { %v4399_v19 = vpop.f32.mrf.mxu1 }
0x1a35   : > { %v4403_v20 = vpack.c.bf16 %v4399_v19, %v4396_v16 }
0x1a36   : > { %v9975_v21 = vpop.f32.mrf.mxu1 }
0x1a38   : > { %v4531_v22 = vpop.f32.mrf.mxu1 }
0x1a39   : > { %v4532_v26 = vadd.f32 %v9183_v23, %v4531_v22 }
0x1a3a   : > { %v9990_v24 = vpop.f32.mrf.mxu1 }
0x1a3c   : > { %v4534_v25 = vpop.f32.mrf.mxu1 }
0x1a3d   : > { %v4535_v27 = vadd.f32 %v9183_v23, %v4534_v25 }
0x1a3e   : > { %v9991_v30 = vpop.f32.mrf.mxu1 }
0x1a3f   : > { %v4605_v31 = vpack.c.bf16 %v4535_v27, %v4532_v26 }
0x1a41   : > { %v4610_v32 = vsel %vm2229_vm3, %v4605_v31, 0 }
0x1a42   : > { %10001 = vmatpush3.bf16.xpose.msra.mxu1 %v4610_v32  ;;  %v10678_v32 = vld [vmem:[%s13032_s17] sm:$0xff]  }
0x1a43   : > { %10012 = vmatprep.subr.bf16.mxu1 %v11385_v0 }
0x1a49   : > { %10003 = vmatmul.mubr.msk.bf16.vlgmr.msra.gmra.mxu1 %vm2229_vm3, %v4604_v45 }
0x1a4a   : > { %10014 = vmatprep.mubr.msk.bf16.mxu1 %vm11386_vm0, %v11385_v0  ;;  %10013 = vmatpush3.bf16.msra.mxu1 %v10676_v58 }
0x1a4b   : > { %10024 = vmatprep.subr.bf16.mxu1 %v11385_v0 }
0x1b09   : > { %v4646_v60 = vpop.f32.mrf.mxu1 }
0x1b0a   : > { %v4653_v33 = vsel %vm2229_vm3, %v4646_v60, -inf }
0x1b0b   : > { %4654 = vmax.xlane.f32.xlu0 %v4653_v33  ;;  %v10004_v34 = vpop.f32.mrf.mxu1 }
0x1b0d   : > { %v4649_v35 = vpop.f32.mrf.mxu1 }
0x1b0e   : > { %v4656_v36 = vsel %vm2229_vm3, %v4649_v35, -inf }
0x1b0f   : > { %4657 = vmax.xlane.f32.xlu1 %v4656_v36  ;;  %v10005_v37 = vpop.f32.mrf.mxu1 }
0x1b94   : > { %v4655_v14 = vpop.xlane.xlu0 %4654 }
0x1b95   : > { %v4659_v38 = vsub.f32 %v4646_v60, %v4655_v14  ;;  %v10679_v60 = vld [vmem:[%s13033_s28 + $0x18] sm:$0xff]   ;;  %s13039_s28 = sld [smem:[#allocation53_spill]] }
0x1b97   : > { %v4661_v39 = vmul.f32 1.442695, %v4659_v38 }
0x1b98   : > { %v4658_v40 = vpop.xlane.xlu1 %4657 }
0x1b99   : > { %10767 = vpow2.f32 %v4661_v39  ;;  %v4660_v15 = vsub.f32 %v4649_v35, %v4658_v40  ;;  %v9205_v40 = vld [vmem:[%s13035_s20] ss:$0 sm:$0xff] }
0x1b9b   : > { %v4663_v41 = vmul.f32 1.442695, %v4660_v15  ;;  %s13040_s24 = smov %s13039_s28 }
0x1b9d   : > { %10769 = vpow2.f32 %v4663_v41 }
0x1ba6   : > { %v10768_v42 = vpop.eup %10767 }
0x1ba7   : > { %v4665_v43 = vsel %vm2229_vm3, %v10768_v42, 0.0 }
0x1ba8   : > { %4666 = vadd.xlane.f32.xlu0 %v4665_v43  ;;  %v9206_v43 = vld [vmem:[%s13036_s21] ss:$0 sm:$0xff] }
0x1baa   : > { %v10770_v44 = vpop.eup %10769 }
0x1bab   : > { %v4668_v45 = vsel %vm2229_vm3, %v10770_v44, 0.0 }
0x1bac   : > { %4669 = vadd.xlane.f32.xlu1 %v4668_v45 }
0x1c31   : > { %v4667_v18 = vpop.xlane.xlu0 %4666 }
0x1c32   : > { %10771 = vrcp.f32 %v4667_v18 }
0x1c35   : > { %v4670_v46 = vpop.xlane.xlu1 %4669 }
0x1c36   : > { %10773 = vrcp.f32 %v4670_v46 }
0x1c3f   : > { %v10772_v47 = vpop.eup %10771 }
0x1c40   : > { %v4673_v52 = vmul.f32 %v10772_v47, %v10768_v42  ;;  %v10680_v47 = vld [vmem:[%s13034_s18 + $0x10] sm:$0xff]  }
0x1c43   : > { %v10774_v50 = vpop.eup %10773 }
0x1c44   : > { %v4674_v53 = vmul.f32 %v10774_v50, %v10770_v44  ;;  %v10681_v50 = vld [vmem:[%s13034_s18 + $0x8] sm:$0xff]  }
0x1c46   : > { %v4675_v55 = vpack.c.bf16 %v4674_v53, %v4673_v52  ;;  %v10682_v52 = vld [vmem:[%s13034_s18] sm:$0xff]  }
0x1c48   : > { %10009 = vmatmul.mubr.msk.bf16.vlgmr.msra.gmra.mxu0 %vm2229_vm3, %v4675_v55 }
0x1c49   : > { %10019 = vmatpush3.bf16.msra.mxu0 %v10675_v54  ;;  %10020 = vmatprep.mubr.msk.bf16.mxu0 %vm11386_vm0, %v11385_v0 }
0x1c4a   : > { %10032 = vmatprep.subr.bf16.mxu0 %v11385_v0 }
0x1c50   : > { %10021 = vmatmul.mubr.msk.bf16.vlgmr.msra.gmra.mxu0 %vm2229_vm3, %v4403_v20 }
0x1c51   : > { %10040 = vmatprep.mubr.msk.bf16.mxu0 %vm11386_vm0, %v11385_v0  ;;  %10033 = vmatpush3.bf16.msra.mxu0 %v10679_v60 }
0x1c52   : > { %10034 = vmatprep.subr.bf16.mxu0 %v11385_v0 }
0x1c55   : > { %10035 = vmatpush3.bf16.msra.mxu0 %v10680_v47  ;;  %v9242_v47 = vld [vmem:[%s13025_s6 + $0x2] ss:$0 sm:$0xff] }
0x1c56   : > { %10036 = vmatprep.subr.bf16.mxu0 %v11385_v0 }
0x1c59   : > { %10037 = vmatpush3.bf16.msra.mxu0 %v10681_v50 }
0x1c5a   : > { %10038 = vmatprep.subr.bf16.mxu0 %v11385_v0 }
0x1c5d   : > { %10039 = vmatpush3.bf16.msra.mxu0 %v10682_v52 }
0x1c5e   : > { %10060 = vmatprep.subr.bf16.mxu0 %v11385_v0 }
0x1d08   : > { %v4714_v59 = vpop.f32.mrf.mxu0 }
0x1d0a   : > { %v10010_v61 = vpop.f32.mrf.mxu0 }
0x1d0c   : > { %v4717_v63 = vpop.f32.mrf.mxu0 }
0x1d0d   : > { %v4721_v2 = vpack.c.bf16 %v4717_v63, %v4714_v59 }
0x1d0e   : > { %v10011_v3 = vpop.f32.mrf.mxu0 }
0x1d0f   : > { %10015 = vmatmul.mubr.msk.bf16.vlgmr.msra.gmra.mxu1 %vm2229_vm3, %v4721_v2 }
0x1d10   : > { %v4818_v4 = vpop.f32.mrf.mxu0  ;;  %10028 = vmatprep.mubr.msk.bf16.mxu1 %vm11386_vm0, %v11385_v0 }
0x1d12   : > { %v10022_v5 = vpop.f32.mrf.mxu0 }
0x1d13   : > { %v9211_v5 = vld [vmem:[%s13039_s28] ss:$0 sm:$0xff]  ;;  %s13043_s28 = sld [smem:[#allocation71_spill]] }
0x1d14   : > { %v4821_v48 = vpop.f32.mrf.mxu0 }
0x1d16   : > { %v10023_v6 = vpop.f32.mrf.mxu0 }
0x1dcf   : > { %v4768_v7 = vpop.f32.mrf.mxu1 }
0x1dd0   : > { %v4819_v49 = vadd.f32 %v4818_v4, %v4768_v7 }
0x1dd1   : > { %v10016_v9 = vpop.f32.mrf.mxu1 }
0x1dd2   : > { %v4832_v10 = vadd.f32 %v9204_v8, %v4819_v49 }
0x1dd3   : > { %v4771_v11 = vpop.f32.mrf.mxu1 }
0x1dd4   : > { %v4822_v12 = vadd.f32 %v4821_v48, %v4771_v11  ;;  %v4834_v13 = vadd.f32 %v4832_v10, %v12194_v56 }
0x1dd5   : > { %v10017_v51 = vpop.f32.mrf.mxu1 }
0x1dd6   : > { %v4833_v16 = vadd.f32 %v9204_v8, %v4822_v12  ;;  %v4838_v17 = vsel %vm2054_vm2, %v4834_v13, 0.0 }
0x1dd7   : > { %4839 = vadd.xlane.f32.xlu0 %v4838_v17 }
0x1dd8   : > { %v4835_v19 = vadd.f32 %v4833_v16, %v12196_v57  ;;  %v10677_v57 = vld [vmem:[%s13031_s7 + $0x8] sm:$0xff]   ;;  %s13037_s7 = sld [smem:[#allocation52_spill]] }
0x1dd9   : > { %10025 = vmatpush3.bf16.msra.mxu1 %v10677_v57 }
0x1dda   : > { %v4841_v20 = vsel %vm2054_vm2, %v4835_v19, 0.0  ;;  %10026 = vmatprep.subr.bf16.mxu1 %v11385_v0 }
0x1ddb   : > { %4842 = vadd.xlane.f32.xlu1 %v4841_v20 }
0x1ddd   : > { %10027 = vmatpush3.bf16.msra.mxu1 %v10678_v32 }
0x1dde   : > { %10044 = vmatprep.subr.bf16.mxu1 %v11385_v0  ;;  %s13038_s23 = smov %s13037_s7  ;;  %v9207_v53 = vld [vmem:[%s13037_s7] ss:$0 sm:$0xff]  ;;  %s13041_s7 = sld [smem:[#allocation55_spill]] }
0x1de4   : > { %s13042_s25 = smov %s13041_s7 }
0x1e60   : > { %v4840_v21 = vpop.xlane.xlu0 %4839 }
0x1e61   : > { %v4844_v22 = vmul.f32 0.03125, %v4840_v21 }
0x1e63   : > { %v4846_v23 = vsub.f32 %v4834_v13, %v4844_v22 }
0x1e64   : > { %v4843_v24 = vpop.xlane.xlu1 %4842 }
0x1e65   : > { %v4845_v25 = vmul.f32 0.03125, %v4843_v24  ;;  %v4848_v26 = vmul.f32 %v4846_v23, %v4846_v23 }
0x1e67   : > { %v4847_v56 = vsub.f32 %v4835_v19, %v4845_v25  ;;  %v4850_v27 = vsel %vm2054_vm2, %v4848_v26, 0.0  ;;  %v10683_v26 = vld [vmem:[%s13018_s5 + $0x28] sm:$0xff]  }
0x1e68   : > { %4851 = vadd.xlane.f32.xlu0 %v4850_v27  ;;  %v10685_v27 = vld [vmem:[%s13018_s5 + $0x20] sm:$0xff]  }
0x1e69   : > { %v4849_v30 = vmul.f32 %v4847_v56, %v4847_v56 }
0x1e6b   : > { %v4853_v31 = vsel %vm2054_vm2, %v4849_v30, 0.0  ;;  %v10686_v30 = vld [vmem:[%s13021_s11 + $0x20] sm:$0xff]  }
0x1e6c   : > { %4854 = vadd.xlane.f32.xlu1 %v4853_v31 }
0x1ef1   : > { %v4852_v33 = vpop.xlane.xlu0 %4851 }
0x1ef2   : > { %v4856_v34 = vmul.f32 0.03125, %v4852_v33 }
0x1ef4   : > { %v4858_v35 = vadd.f32 1e-05, %v4856_v34 }
0x1ef5   : > { %v4855_v36 = vpop.xlane.xlu1 %4854 }
0x1ef6   : > { %10775 = vrsqrt.f32 %v4858_v35  ;;  %v4857_v37 = vmul.f32 0.03125, %v4855_v36 }
0x1ef8   : > { %v4859_v14 = vadd.f32 1e-05, %v4857_v37  ;;  %v9217_v37 = vld [vmem:[#allocation7] ss:$0 sm:$0xff] }
0x1efa   : > { %10777 = vrsqrt.f32 %v4859_v14 }
0x1f03   : > { %v10776_v38 = vpop.eup %10775 }
0x1f04   : > { %v4862_v39 = vmul.f32 %v10776_v38, %v4846_v23 }
0x1f06   : > { %v4870_v42 = vmul.f32 %v9205_v40, %v4862_v39 }
0x1f07   : > { %v10778_v15 = vpop.eup %10777 }
0x1f08   : > { %v4863_v41 = vmul.f32 %v10778_v15, %v4847_v56  ;;  %v4878_v45 = vadd.f32 %v9206_v43, %v4870_v42  ;;  %v10684_v56 = vld [vmem:[%s13021_s11 + $0x28] sm:$0xff]  }
0x1f0a   : > { %v4871_v44 = vmul.f32 %v9205_v40, %v4863_v41  ;;  %v9218_v40 = vld [vmem:[%s13041_s7] ss:$0 sm:$0xff]  ;;  %s13045_s7 = sld [smem:[#allocation70_spill]] }
0x1f0c   : > { %v4879_v18 = vadd.f32 %v9206_v43, %v4871_v44  ;;  %v10687_v43 = vld [vmem:[%s13020_s2 + $0x28] sm:$0xff]  }
0x1f0e   : > { %v4880_v46 = vpack.c.bf16 %v4879_v18, %v4878_v45 }
0x1f10   : > { %10029 = vmatmul.mubr.msk.bf16.vlgmr.msra.gmra.mxu1 %vm2054_vm2, %v4880_v46 }
0x1f11   : > { %10048 = vmatprep.mubr.msk.bf16.mxu1 %vm11386_vm0, %v11385_v0  ;;  %10045 = vmatpush3.bf16.msra.mxu1 %v10683_v26  ;;  %v9255_v26 = vld [vmem:[%s13026_s10 + $0x3] ss:$0 sm:$0xff] }
0x1f12   : > { %10046 = vmatprep.subr.bf16.mxu1 %v11385_v0 }
0x1f15   : > { %10047 = vmatpush3.bf16.msra.mxu1 %v10685_v27 }
0x1f16   : > { %10052 = vmatprep.subr.bf16.mxu1 %v11385_v0 }
0x1fd0   : > { %v4941_v54 = vpop.f32.mrf.mxu1 }
0x1fd1   : > { %v4942_v58 = vadd.f32 %v9207_v53, %v4941_v54 }
0x1fd2   : > { %v10030_v55 = vpop.f32.mrf.mxu1 }
0x1fd3   : > { %v4948_v2 = vmax.f32 %v4942_v58, 0.0 }
0x1fd4   : > { %v4944_v59 = vpop.f32.mrf.mxu1 }
0x1fd5   : > { %v4945_v61 = vadd.f32 %v9207_v53, %v4944_v59 }
0x1fd6   : > { %v10031_v63 = vpop.f32.mrf.mxu1 }
0x1fd7   : > { %v4949_v3 = vmax.f32 %v4945_v61, 0.0 }
0x1fd9   : > { %v4950_v4 = vpack.c.bf16 %v4949_v3, %v4948_v2  ;;  %v9233_v3 = vld [vmem:[%s13023_s4 + $0x2] ss:$0 sm:$0xff] }
0x1fdb   : > { %10041 = vmatmul.mubr.msk.bf16.vlgmr.msra.gmra.mxu0 %vm2933_vm4, %v4950_v4 }
0x1fdc   : > { %10064 = vmatprep.mubr.msk.bf16.mxu0 %vm11386_vm0, %v11385_v0  ;;  %10061 = vmatpush3.bf16.msra.mxu0 %v10684_v56 }
0x1fdd   : > { %10062 = vmatprep.subr.bf16.mxu0 %v11385_v0 }
0x1fe0   : > { %10063 = vmatpush3.bf16.msra.mxu0 %v10686_v30 }
0x1fe1   : > { %10074 = vmatprep.subr.bf16.mxu0 %v11385_v0 }
0x209b   : > { %v5027_v48 = vpop.f32.mrf.mxu0 }
0x209c   : > { %v5028_v6 = vadd.f32 %v9211_v5, %v5027_v48 }
0x209d   : > { %v10042_v7 = vpop.f32.mrf.mxu0 }
0x209e   : > { %v5034_v8 = vadd.f32 %v5028_v6, %v4878_v45  ;;  %v10688_v45 = vld [vmem:[%s13020_s2 + $0x20] sm:$0xff]  }
0x209f   : > { %v5030_v49 = vpop.f32.mrf.mxu0 }
0x20a0   : > { %v5031_v9 = vadd.f32 %v9211_v5, %v5030_v49  ;;  %v5038_v10 = vsel %vm2054_vm2, %v5034_v8, 0.0 }
0x20a1   : > { %5039 = vadd.xlane.f32.xlu0 %v5038_v10  ;;  %v10043_v11 = vpop.f32.mrf.mxu0 }
0x20a2   : > { %v5035_v12 = vadd.f32 %v5031_v9, %v4879_v18  ;;  %v9224_v9 = vld [vmem:[%s13026_s10 + $0x2] ss:$0 sm:$0xff]  ;;  %s13054_s10 = sld [smem:[#allocation78_spill]] }
0x20a4   : > { %v5041_v13 = vsel %vm2054_vm2, %v5035_v12, 0.0 }
0x20a5   : > { %5042 = vadd.xlane.f32.xlu1 %v5041_v13 }
0x212a   : > { %v5040_v51 = vpop.xlane.xlu0 %5039 }
0x212b   : > { %v5044_v16 = vmul.f32 0.03125, %v5040_v51  ;;  %v10690_v51 = vld [vmem:[%s13018_s5 + $0x30] sm:$0xff]  }
0x212d   : > { %v5046_v17 = vsub.f32 %v5034_v8, %v5044_v16  ;;  %v10691_v16 = vld [vmem:[%s13021_s11 + $0x38] sm:$0xff]  }
0x212e   : > { %v5043_v19 = vpop.xlane.xlu1 %5042 }
0x212f   : > { %v5045_v20 = vmul.f32 0.03125, %v5043_v19  ;;  %v5048_v21 = vmul.f32 %v5046_v17, %v5046_v17 }
0x2131   : > { %v5047_v22 = vsub.f32 %v5035_v12, %v5045_v20  ;;  %v5050_v23 = vsel %vm2054_vm2, %v5048_v21, 0.0  ;;  %v10689_v12 = vld [vmem:[%s13018_s5 + $0x38] sm:$0xff]   ;;  %s13049_s5 = sld [smem:[#allocation84_spill]] }
0x2132   : > { %5051 = vadd.xlane.f32.xlu0 %v5050_v23 }
0x2133   : > { %v5049_v24 = vmul.f32 %v5047_v22, %v5047_v22 }
0x2135   : > { %v5053_v25 = vsel %vm2054_vm2, %v5049_v24, 0.0 }
0x2136   : > { %5054 = vadd.xlane.f32.xlu1 %v5053_v25 }
0x21bb   : > { %v5052_v31 = vpop.xlane.xlu0 %5051 }
0x21bc   : > { %v5056_v57 = vmul.f32 0.03125, %v5052_v31 }
0x21be   : > { %v5058_v32 = vadd.f32 1e-05, %v5056_v57 }
0x21bf   : > { %v5055_v60 = vpop.xlane.xlu1 %5054 }
0x21c0   : > { %10779 = vrsqrt.f32 %v5058_v32  ;;  %v5057_v33 = vmul.f32 0.03125, %v5055_v60 }
0x21c2   : > { %v5059_v34 = vadd.f32 1e-05, %v5057_v33  ;;  %v9273_v33 = vld [vmem:[%s13025_s6 + $0x3] ss:$0 sm:$0xff] }
0x21c4   : > { %10781 = vrsqrt.f32 %v5059_v34 }
0x21cd   : > { %v10780_v35 = vpop.eup %10779 }
0x21ce   : > { %v5062_v36 = vmul.f32 %v10780_v35, %v5046_v17  ;;  %v10692_v17 = vld [vmem:[%s13021_s11 + $0x30] sm:$0xff]  }
0x21d0   : > { %v5070_v38 = vmul.f32 %v9217_v37, %v5062_v36 }
0x21d1   : > { %v10782_v14 = vpop.eup %10781 }
0x21d2   : > { %v5063_v39 = vmul.f32 %v10782_v14, %v5047_v22  ;;  %v12338_v41 = vadd.f32 %v9218_v40, %v5070_v38 }
0x21d4   : > { %v5071_v15 = vmul.f32 %v9217_v37, %v5063_v39 }
0x21d6   : > { %v12340_v42 = vadd.f32 %v9218_v40, %v5071_v15 }
0x21d8   : > { %v12345_v44 = vpack.c.bf16 %v12340_v42, %v12338_v41 }
0x21da   : > { %10049 = vmatmul.mubr.msk.bf16.vlgmr.msra.gmra.mxu1 %vm2054_vm2, %v12345_v44  ;;  %10065 = vmatmul.mubr.msk.bf16.vlgmr.msra.gmra.mxu0 %vm2054_vm2, %v12345_v44 }
0x21db   : > { %10053 = vmatpush3.bf16.msra.mxu1 %v10687_v43  ;;  %10056 = vmatprep.mubr.msk.bf16.mxu1 %vm11386_vm0, %v11385_v0 }
0x21dc   : > { %10054 = vmatprep.subr.bf16.mxu1 %v11385_v0  ;;  %10076 = vmatprep.mubr.msk.bf16.mxu0 %vm11386_vm0, %v11385_v0 }
0x21df   : > { %10055 = vmatpush3.bf16.msra.mxu1 %v10688_v45 }
0x21e0   : > { %10068 = vmatprep.subr.bf16.mxu1 %v11385_v0 }
0x21e2   : > { %10057 = vmatmul.mubr.msk.bf16.vlgmr.msra.gmra.mxu1 %vm2054_vm2, %v12345_v44 }
0x21e3   : > { %10070 = vmatprep.mubr.msk.bf16.mxu1 %vm11386_vm0, %v11385_v0 }
0x229a   : > { %v5143_v18 = vpop.f32.mrf.mxu1  ;;  %v5275_v46 = vpop.f32.mrf.mxu0 }
0x229b   : > { %v5276_v55 = vadd.f32 %v9242_v47, %v5275_v46  ;;  %v5144_v11 = vadd.f32 %v9224_v9, %v5143_v18 }
0x229c   : > { %v10050_v50 = vpop.f32.mrf.mxu1  ;;  %v10066_v52 = vpop.f32.mrf.mxu0 }
0x229e   : > { %v5146_v53 = vpop.f32.mrf.mxu1  ;;  %v5278_v54 = vpop.f32.mrf.mxu0 }
0x229f   : > { %v5279_v58 = vadd.f32 %v9242_v47, %v5278_v54  ;;  %v5147_v10 = vadd.f32 %v9224_v9, %v5146_v53 }
0x22a0   : > { %v10051_v59 = vpop.f32.mrf.mxu1  ;;  %v10067_v61 = vpop.f32.mrf.mxu0 }
0x22a1   : > { %v5354_v63 = vpack.c.bf16 %v5279_v58, %v5276_v55  ;;  %v5282_v13 = vpack.c.bf16 %v5147_v10, %v5144_v11 }
0x22a2   : > { %v5209_v2 = vpop.f32.mrf.mxu1 }
0x22a3   : > { %10075 = vmatpush3.bf16.msra.mxu0 %v5354_v63  ;;  %v5210_v48 = vadd.f32 %v9233_v3, %v5209_v2  ;;  %v10693_v63 = vld [vmem:[%s13020_s2 + $0x38] sm:$0xff]  }
0x22a4   : > { %v10058_v4 = vpop.f32.mrf.mxu1  ;;  %10088 = vmatprep.subr.bf16.mxu0 %v11385_v0 }
0x22a6   : > { %v5212_v5 = vpop.f32.mrf.mxu1 }
0x22a7   : > { %v5213_v6 = vadd.f32 %v9233_v3, %v5212_v5  ;;  %v10694_v3 = vld [vmem:[%s13020_s2 + $0x30] sm:$0xff]   ;;  %s13044_s2 = smov %s13043_s28 }
0x22a8   : > { %v10059_v7 = vpop.f32.mrf.mxu1 }
0x22a9   : > { %v5283_v8 = vpack.c.bf16 %v5213_v6, %v5210_v48 }
0x22ab   : > { %v5288_v49 = vsel %vm2229_vm3, %v5283_v8, 0 }
0x22ac   : > { %10069 = vmatpush3.bf16.xpose.msra.mxu1 %v5288_v49  ;;  %v9264_v49 = vld [vmem:[%s13023_s4 + $0x3] ss:$0 sm:$0xff]  ;;  %s13046_s4 = smov %s13045_s7 }
0x22ad   : > { %10080 = vmatprep.subr.bf16.mxu1 %v11385_v0 }
0x22b3   : > { %10071 = vmatmul.mubr.msk.bf16.vlgmr.msra.gmra.mxu1 %vm2229_vm3, %v5282_v13 }
0x22b4   : > { %10081 = vmatpush3.bf16.msra.mxu1 %v10689_v12  ;;  %10084 = vmatprep.mubr.msk.bf16.mxu1 %vm11386_vm0, %v11385_v0 }
0x22b5   : > { %10082 = vmatprep.subr.bf16.mxu1 %v11385_v0 }
0x22b8   : > { %10083 = vmatpush3.bf16.msra.mxu1 %v10690_v51 }
0x22b9   : > { %10096 = vmatprep.subr.bf16.mxu1 %v11385_v0 }
0x22bb   : > { %10085 = vmatmul.mubr.msk.bf16.vlgmr.msra.gmra.mxu1 %vm2054_vm2, %v12345_v44 }
0x22bc   : > { %10097 = vmatpush3.bf16.msra.mxu1 %v10691_v16  ;;  %10100 = vmatprep.mubr.msk.bf16.mxu1 %vm11386_vm0, %v11385_v0 }
0x22bd   : > { %10098 = vmatprep.subr.bf16.mxu1 %v11385_v0 }
0x22c0   : > { %10099 = vmatpush3.bf16.msra.mxu1 %v10692_v17 }
0x22c1   : > { %10110 = vmatprep.subr.bf16.mxu1 %v11385_v0 }
0x22c3   : > { %10101 = vmatmul.mubr.msk.bf16.vlgmr.msra.gmra.mxu1 %vm2054_vm2, %v12345_v44 }
0x22c4   : > { %10112 = vmatprep.mubr.msk.bf16.mxu1 %vm11386_vm0, %v11385_v0 }
0x2373   : > { %v5324_v19 = vpop.f32.mrf.mxu1 }
0x2374   : > { %v5331_v20 = vsel %vm2229_vm3, %v5324_v19, -inf }
0x2375   : > { %5332 = vmax.xlane.f32.xlu0 %v5331_v20  ;;  %v10072_v21 = vpop.f32.mrf.mxu1 }
0x2377   : > { %v5327_v22 = vpop.f32.mrf.mxu1 }
0x2378   : > { %v5334_v23 = vsel %vm2229_vm3, %v5327_v22, -inf }
0x2379   : > { %5335 = vmax.xlane.f32.xlu1 %v5334_v23  ;;  %v10073_v24 = vpop.f32.mrf.mxu1 }
0x237b   : > { %v5462_v25 = vpop.f32.mrf.mxu1 }
0x237c   : > { %v12390_v30 = vadd.f32 %v9255_v26, %v5462_v25 }
0x237d   : > { %v10086_v56 = vpop.f32.mrf.mxu1 }
0x237f   : > { %v5465_v27 = vpop.f32.mrf.mxu1 }
0x2380   : > { %v12392_v31 = vadd.f32 %v9255_v26, %v5465_v27 }
0x2381   : > { %v10087_v57 = vpop.f32.mrf.mxu1 }
0x2382   : > { %v5601_v32 = vpack.c.bf16 %v12392_v31, %v12390_v30 }
0x2383   : > { %v5594_v60 = vpop.f32.mrf.mxu1 }
0x2384   : > { %v5595_v36 = vadd.f32 %v9273_v33, %v5594_v60 }
0x2385   : > { %v10102_v34 = vpop.f32.mrf.mxu1 }
0x2387   : > { %v5597_v35 = vpop.f32.mrf.mxu1 }
0x2388   : > { %v5598_v37 = vadd.f32 %v9273_v33, %v5597_v35 }
0x2389   : > { %v10103_v14 = vpop.f32.mrf.mxu1 }
0x238a   : > { %v5673_v38 = vpack.c.bf16 %v5598_v37, %v5595_v36  ;;  %v10695_v14 = vld [vmem:[%s13028_s15 + $0x10] sm:$0xff]  }
0x238c   : > { %10111 = vmatpush3.bf16.msra.mxu1 %v5673_v38 }
0x238d   : > { %10122 = vmatprep.subr.bf16.mxu1 %v11385_v0 }
0x23fe   : > { %v5333_v39 = vpop.xlane.xlu0 %5332 }
0x23ff   : > { %v5337_v40 = vsub.f32 %v5324_v19, %v5333_v39  ;;  %v10696_v39 = vld [vmem:[%s13028_s15 + $0x18] sm:$0xff]  }
0x2401   : > { %v5339_v15 = vmul.f32 1.442695, %v5337_v40 }
0x2402   : > { %v5336_v43 = vpop.xlane.xlu1 %5335 }
0x2403   : > { %10783 = vpow2.f32 %v5339_v15  ;;  %v5338_v45 = vsub.f32 %v5327_v22, %v5336_v43 }
0x2405   : > { %v5341_v18 = vmul.f32 1.442695, %v5338_v45 }
0x2407   : > { %10785 = vpow2.f32 %v5341_v18 }
0x2410   : > { %v10784_v46 = vpop.eup %10783 }
0x2411   : > { %v5343_v47 = vsel %vm2229_vm3, %v10784_v46, 0.0 }
0x2412   : > { %5344 = vadd.xlane.f32.xlu0 %v5343_v47 }
0x2414   : > { %v10786_v50 = vpop.eup %10785 }
0x2415   : > { %v5346_v52 = vsel %vm2229_vm3, %v10786_v50, 0.0 }
0x2416   : > { %5347 = vadd.xlane.f32.xlu1 %v5346_v52 }
0x249b   : > { %v5345_v53 = vpop.xlane.xlu0 %5344 }
0x249c   : > { %10787 = vrcp.f32 %v5345_v53 }
0x249f   : > { %v5348_v54 = vpop.xlane.xlu1 %5347 }
0x24a0   : > { %10789 = vrcp.f32 %v5348_v54  ;;  %v9286_v54 = vld [vmem:[%s13030_s16 + $0x1] ss:$0 sm:$0xff] }
0x24a9   : > { %v10788_v55 = vpop.eup %10787 }
0x24aa   : > { %v5351_v59 = vmul.f32 %v10788_v55, %v10784_v46 }
0x24ad   : > { %v10790_v58 = vpop.eup %10789 }
0x24ae   : > { %v5352_v61 = vmul.f32 %v10790_v58, %v10786_v50 }
0x24b0   : > { %v5353_v2 = vpack.c.bf16 %v5352_v61, %v5351_v59 }
0x24b2   : > { %10077 = vmatmul.mubr.msk.bf16.vlgmr.msra.gmra.mxu0 %vm2229_vm3, %v5353_v2 }
0x24b3   : > { %10089 = vmatpush3.bf16.msra.mxu0 %v10693_v63  ;;  %10092 = vmatprep.mubr.msk.bf16.mxu0 %vm11386_vm0, %v11385_v0 }
0x24b4   : > { %10090 = vmatprep.subr.bf16.mxu0 %v11385_v0 }
0x24b7   : > { %10091 = vmatpush3.bf16.msra.mxu0 %v10694_v3 }
0x24b8   : > { %10104 = vmatprep.subr.bf16.mxu0 %v11385_v0 }
0x24ba   : > { %10093 = vmatmul.mubr.msk.bf16.vlgmr.msra.gmra.mxu0 %vm2054_vm2, %v12345_v44 }
0x24bb   : > { %10106 = vmatprep.mubr.msk.bf16.mxu0 %vm11386_vm0, %v11385_v0 }
0x2572   : > { %v5392_v4 = vpop.f32.mrf.mxu0 }
0x2574   : > { %v10078_v5 = vpop.f32.mrf.mxu0 }
0x2576   : > { %v5395_v48 = vpop.f32.mrf.mxu0 }
0x2577   : > { %v5399_v6 = vpack.c.bf16 %v5395_v48, %v5392_v4 }
0x2578   : > { %v10079_v7 = vpop.f32.mrf.mxu0 }
0x2579   : > { %v9143_v7 = vld [vmem:[%s13012_s13 + $0x1] ss:$0 sm:$0xff] }
0x257a   : > { %v5528_v8 = vpop.f32.mrf.mxu0 }
0x257b   : > { %v5529_v11 = vadd.f32 %v9264_v49, %v5528_v8 }
0x257c   : > { %v10094_v9 = vpop.f32.mrf.mxu0 }
0x257d   : > { %v3976_v9 = vadd.f32 %v9143_v7, %v12220_v62 }
0x257e   : > { %v5531_v10 = vpop.f32.mrf.mxu0 }
0x257f   : > { %v5532_v12 = vadd.f32 %v9264_v49, %v5531_v10 }
0x2580   : > { %v10095_v13 = vpop.f32.mrf.mxu0 }
0x2581   : > { %v5602_v51 = vpack.c.bf16 %v5532_v12, %v5529_v11  ;;  %v3979_v13 = vadd.f32 %v9143_v7, %v12222_v1 }
0x2583   : > { %v5607_v16 = vsel %vm2229_vm3, %v5602_v51, 0 }
0x2584   : > { %10105 = vmatpush3.bf16.xpose.msra.mxu0 %v5607_v16 }
0x2585   : > { %10116 = vmatprep.subr.bf16.mxu0 %v11385_v0 }
0x258b   : > { %10107 = vmatmul.mubr.msk.bf16.vlgmr.msra.gmra.mxu0 %vm2229_vm3, %v5601_v32 }
0x258c   : > { %10118 = vmatprep.mubr.msk.bf16.mxu0 %vm11386_vm0, %v11385_v0  ;;  %10117 = vmatpush3.bf16.msra.mxu0 %v10696_v39  ;;  %v9296_v39 = vld [vmem:[%s13038_s23 + $0x1] ss:$0 sm:$0xff] }
0x258d   : > { %10128 = vmatprep.subr.bf16.mxu0 %v11385_v0 }
0x264b   : > { %v5643_v44 = vpop.f32.mrf.mxu0 }
0x264c   : > { %v5650_v17 = vsel %vm2229_vm3, %v5643_v44, -inf }
0x264d   : > { %5651 = vmax.xlane.f32.xlu0 %v5650_v17  ;;  %v10108_v19 = vpop.f32.mrf.mxu0 }
0x264e   : > { %v12447_v19 = vadd.f32 %v3979_v13, %v12163_v29 }
0x264f   : > { %v5646_v20 = vpop.f32.mrf.mxu0 }
0x2650   : > { %v5653_v21 = vsel %vm2229_vm3, %v5646_v20, -inf  ;;  %v3991_v1 = vsel %vm2054_vm2, %v12447_v19, 0.0 }
0x2651   : > { %5654 = vmax.xlane.f32.xlu1 %v5653_v21  ;;  %v10109_v22 = vpop.f32.mrf.mxu0  ;;  %v10698_v21 = vld [vmem:[%s13032_s17 + $0x10] sm:$0xff]  }
0x26d6   : > { %v5652_v23 = vpop.xlane.xlu0 %5651 }
0x26d7   : > { %v5656_v24 = vsub.f32 %v5643_v44, %v5652_v23 }
0x26d9   : > { %v5658_v25 = vmul.f32 1.442695, %v5656_v24 }
0x26da   : > { %v5655_v26 = vpop.xlane.xlu1 %5654 }
0x26db   : > { %10791 = vpow2.f32 %v5658_v25  ;;  %v5657_v56 = vsub.f32 %v5646_v20, %v5655_v26  ;;  %v10697_v20 = vld [vmem:[%s13032_s17 + $0x18] sm:$0xff]  }
0x26dd   : > { %v5660_v27 = vmul.f32 1.442695, %v5657_v56 }
0x26df   : > { %10793 = vpow2.f32 %v5660_v27 }
0x26e8   : > { %v10792_v30 = vpop.eup %10791 }
0x26e9   : > { %v5662_v31 = vsel %vm2229_vm3, %v10792_v30, 0.0 }
0x26ea   : > { %5663 = vadd.xlane.f32.xlu0 %v5662_v31 }
0x26ec   : > { %v10794_v57 = vpop.eup %10793 }
0x26ed   : > { %v5665_v32 = vsel %vm2229_vm3, %v10794_v57, 0.0 }
0x26ee   : > { %5666 = vadd.xlane.f32.xlu1 %v5665_v32 }
0x2773   : > { %v5664_v60 = vpop.xlane.xlu0 %5663 }
0x2774   : > { %10795 = vrcp.f32 %v5664_v60  ;;  %v9290_v60 = vld [vmem:[%s13036_s21 + $0x1] ss:$0 sm:$0xff] }
0x2777   : > { %v5667_v33 = vpop.xlane.xlu1 %5666 }
0x2778   : > { %10797 = vrcp.f32 %v5667_v33 }
0x2781   : > { %v10796_v34 = vpop.eup %10795 }
0x2782   : > { %v5670_v36 = vmul.f32 %v10796_v34, %v10792_v30  ;;  %v9289_v30 = vld [vmem:[%s13035_s20 + $0x1] ss:$0 sm:$0xff] }
0x2785   : > { %v10798_v35 = vpop.eup %10797 }
0x2786   : > { %v5671_v37 = vmul.f32 %v10798_v35, %v10794_v57 }
0x2788   : > { %v5672_v38 = vpack.c.bf16 %v5671_v37, %v5670_v36  ;;  %v10700_v37 = vld [vmem:[%s13034_s18 + $0x30] sm:$0xff]  }
0x278a   : > { %10113 = vmatmul.mubr.msk.bf16.vlgmr.msra.gmra.mxu1 %vm2229_vm3, %v5672_v38  ;;  %v10702_v38 = vld [vmem:[%s13034_s18 + $0x20] sm:$0xff]  }
0x278b   : > { %10123 = vmatpush3.bf16.msra.mxu1 %v10695_v14  ;;  %10124 = vmatprep.mubr.msk.bf16.mxu1 %vm11386_vm0, %v11385_v0  ;;  %v10701_v14 = vld [vmem:[%s13034_s18 + $0x28] sm:$0xff]  }
0x278c   : > { %10136 = vmatprep.subr.bf16.mxu1 %v11385_v0 }
0x2792   : > { %10125 = vmatmul.mubr.msk.bf16.vlgmr.msra.gmra.mxu1 %vm2229_vm3, %v5399_v6 }
0x2793   : > { %10144 = vmatprep.mubr.msk.bf16.mxu1 %vm11386_vm0, %v11385_v0 }
0x284a   : > { %v5711_v40 = vpop.f32.mrf.mxu1 }
0x284c   : > { %v10114_v15 = vpop.f32.mrf.mxu1 }
0x284e   : > { %v5714_v43 = vpop.f32.mrf.mxu1 }
0x284f   : > { %v5718_v45 = vpack.c.bf16 %v5714_v43, %v5711_v40 }
0x2850   : > { %v10115_v18 = vpop.f32.mrf.mxu1 }
0x2851   : > { %10119 = vmatmul.mubr.msk.bf16.vlgmr.msra.gmra.mxu0 %vm2229_vm3, %v5718_v45 }
0x2852   : > { %v5815_v46 = vpop.f32.mrf.mxu1  ;;  %10132 = vmatprep.mubr.msk.bf16.mxu0 %vm11386_vm0, %v11385_v0  ;;  %10129 = vmatpush3.bf16.msra.mxu0 %v10697_v20 }
0x2853   : > { %10130 = vmatprep.subr.bf16.mxu0 %v11385_v0 }
0x2854   : > { %v10126_v47 = vpop.f32.mrf.mxu1 }
0x2856   : > { %v5818_v50 = vpop.f32.mrf.mxu1  ;;  %10131 = vmatpush3.bf16.msra.mxu0 %v10698_v21 }
0x2858   : > { %v10127_v52 = vpop.f32.mrf.mxu1 }
0x2911   : > { %v5765_v53 = vpop.f32.mrf.mxu0 }
0x2912   : > { %v5816_v55 = vadd.f32 %v5815_v46, %v5765_v53 }
0x2913   : > { %v10120_v58 = vpop.f32.mrf.mxu0 }
0x2914   : > { %v5830_v59 = vadd.f32 %v9286_v54, %v5816_v55  ;;  %v9309_v58 = vld [vmem:[%s13040_s24 + $0x1] ss:$0 sm:$0xff] }
0x2915   : > { %v5768_v61 = vpop.f32.mrf.mxu0 }
0x2916   : > { %v5819_v63 = vadd.f32 %v5818_v50, %v5768_v61  ;;  %v5832_v2 = vadd.f32 %v5830_v59, %v12338_v41 }
0x2917   : > { %v10121_v3 = vpop.f32.mrf.mxu0 }
0x2918   : > { %v5831_v4 = vadd.f32 %v9286_v54, %v5819_v63  ;;  %v5838_v5 = vsel %vm2054_vm2, %v5832_v2, 0.0 }
0x2919   : > { %5839 = vadd.xlane.f32.xlu0 %v5838_v5 }
0x291a   : > { %v5833_v48 = vadd.f32 %v5831_v4, %v12340_v42  ;;  %v3982_v42 = vadd.f32 %v3976_v9, %v12161_v28  ;;  %v10699_v28 = vld [vmem:[%s13034_s18 + $0x38] sm:$0xff]  }
0x291b   : > { %10137 = vmatpush3.bf16.msra.mxu1 %v10699_v28 }
0x291c   : > { %v5841_v6 = vsel %vm2054_vm2, %v5833_v48, 0.0  ;;  %v3988_v17 = vsel %vm2054_vm2, %v3982_v42, 0.0  ;;  %10138 = vmatprep.subr.bf16.mxu1 %v11385_v0 }
0x291d   : > { %5842 = vadd.xlane.f32.xlu1 %v5841_v6 }
0x291f   : > { %10139 = vmatpush3.bf16.msra.mxu1 %v10700_v37 }
0x2920   : > { %10140 = vmatprep.subr.bf16.mxu1 %v11385_v0 }
0x2923   : > { %10141 = vmatpush3.bf16.msra.mxu1 %v10701_v14 }
0x2924   : > { %10142 = vmatprep.subr.bf16.mxu1 %v11385_v0 }
0x2927   : > { %10143 = vmatpush3.bf16.msra.mxu1 %v10702_v38 }
0x29a2   : > { %v5840_v8 = vpop.xlane.xlu0 %5839 }
0x29a3   : > { %v5844_v49 = vmul.f32 0.03125, %v5840_v8 }
0x29a5   : > { %v5846_v10 = vsub.f32 %v5832_v2, %v5844_v49 }
0x29a6   : > { %v5843_v11 = vpop.xlane.xlu1 %5842 }
0x29a7   : > { %v5845_v12 = vmul.f32 0.03125, %v5843_v11  ;;  %v5848_v41 = vmul.f32 %v5846_v10, %v5846_v10 }
0x29a9   : > { %v5847_v51 = vsub.f32 %v5833_v48, %v5845_v12  ;;  %v5850_v16 = vsel %vm2054_vm2, %v5848_v41, 0.0 }
0x29aa   : > { %5851 = vadd.xlane.f32.xlu0 %v5850_v16 }
0x29ab   : > { %v5849_v44 = vmul.f32 %v5847_v51, %v5847_v51 }
0x29ad   : > { %v5853_v62 = vsel %vm2054_vm2, %v5849_v44, 0.0 }
0x29ae   : > { %3989 = vadd.xlane.f32.xlu0 %v3988_v17  ;;  %5854 = vadd.xlane.f32.xlu1 %v5853_v62 }
0x29b2   : > { %3992 = vadd.xlane.f32.xlu1 %v3991_v1 }
0x2a33   : > { %v5852_v29 = vpop.xlane.xlu0 %5851 }
0x2a34   : > { %v5856_v22 = vmul.f32 0.03125, %v5852_v29 }
0x2a36   : > { %v5858_v23 = vadd.f32 1e-05, %v5856_v22 }
0x2a37   : > { %v5855_v24 = vpop.xlane.xlu1 %5854  ;;  %v3990_v53 = vpop.xlane.xlu0 %3989 }
0x2a38   : > { %10799 = vrsqrt.f32 %v5858_v23  ;;  %v5857_v25 = vmul.f32 0.03125, %v5855_v24  ;;  %v3994_v54 = vmul.f32 0.03125, %v3990_v53 }
0x2a3a   : > { %v5859_v26 = vadd.f32 1e-05, %v5857_v25  ;;  %v3996_v61 = vsub.f32 %v3982_v42, %v3994_v54 }
0x2a3b   : > { %v3993_v55 = vpop.xlane.xlu1 %3992 }
0x2a3c   : > { %10801 = vrsqrt.f32 %v5859_v26  ;;  %v3995_v63 = vmul.f32 0.03125, %v3993_v55  ;;  %v3998_v8 = vmul.f32 %v3996_v61, %v3996_v61 }
0x2a3e   : > { %v3997_v48 = vsub.f32 %v12447_v19, %v3995_v63 }
0x2a40   : > { %v3999_v12 = vmul.f32 %v3997_v48, %v3997_v48 }
0x2a42   : > { %v4003_v41 = vsel %vm2054_vm2, %v3999_v12, 0.0 }
0x2a45   : > { %v10800_v56 = vpop.eup %10799 }
0x2a46   : > { %v5862_v27 = vmul.f32 %v10800_v56, %v5846_v10  ;;  %v4000_v10 = vsel %vm2054_vm2, %v3998_v8, 0.0  ;;  %v9151_v56 = vld [vmem:[%s13014_s14 + $0x1] ss:$0 sm:$0xff] }
0x2a47   : > { %v6232_v8 = vld [vmem:[%s13049_s5] sm:$0xf] }
0x2a48   : > { %v5870_v32 = vmul.f32 %v9289_v30, %v5862_v27  ;;  %10370 = vmatprep.subr.msk.bf16.mxu1 %vm6247_vm7, %v6232_v8 }
0x2a49   : > { %v10802_v31 = vpop.eup %10801 }
0x2a4a   : > { %v5863_v57 = vmul.f32 %v10802_v31, %v5847_v51  ;;  %v5878_v34 = vadd.f32 %v9290_v60, %v5870_v32 }
0x2a4c   : > { %v5871_v33 = vmul.f32 %v9289_v30, %v5863_v57  ;;  %v9152_v57 = vld [vmem:[%s13015_s19 + $0x1] ss:$0 sm:$0xff] }
0x2a4e   : > { %v5879_v35 = vadd.f32 %v9290_v60, %v5871_v33 }
0x2a50   : > { %v5880_v36 = vpack.c.bf16 %v5879_v35, %v5878_v34 }
0x2a52   : > { %10133 = vmatmul.mubr.msk.bf16.vlgmr.msra.gmra.mxu0 %vm2054_vm2, %v5880_v36  ;;  %v10704_v36 = vld [vmem:[%s13044_s2] sm:$0xff]  }
0x2b12   : > { %v5943_v40 = vpop.f32.mrf.mxu0 }
0x2b13   : > { %v5944_v43 = vadd.f32 %v9296_v39, %v5943_v40 }
0x2b14   : > { %v10134_v15 = vpop.f32.mrf.mxu0 }
0x2b15   : > { %v5950_v47 = vmax.f32 %v5944_v43, 0.0 }
0x2b16   : > { %v5946_v45 = vpop.f32.mrf.mxu0 }
0x2b17   : > { %v5947_v18 = vadd.f32 %v9296_v39, %v5946_v45 }
0x2b18   : > { %v10135_v46 = vpop.f32.mrf.mxu0 }
0x2b19   : > { %v5951_v50 = vmax.f32 %v5947_v18, 0.0  ;;  %v9316_v18 = vld [vmem:[#allocation7 + $0x1] ss:$0 sm:$0xff] }
0x2b1b   : > { %v5952_v52 = vpack.c.bf16 %v5951_v50, %v5950_v47 }
0x2b1d   : > { %10145 = vmatmul.mubr.msk.bf16.vlgmr.msra.gmra.mxu1 %vm2933_vm4, %v5952_v52  ;;  %v9317_v52 = vld [vmem:[%s13042_s25 + $0x1] ss:$0 sm:$0xff] }
0x2bdd   : > { %v6031_v59 = vpop.f32.mrf.mxu1 }
0x2bde   : > { %v6032_v2 = vadd.f32 %v9309_v58, %v6031_v59  ;;  %v10705_v59 = vld [vmem:[%s13045_s7] sm:$0xff]   ;;  %s13050_s7 = sld [smem:[#allocation75_spill]] }
0x2bdf   : > { %v10146_v3 = vpop.f32.mrf.mxu1 }
0x2be0   : > { %v6038_v4 = vadd.f32 %v6032_v2, %v5878_v34 }
0x2be1   : > { %v6034_v5 = vpop.f32.mrf.mxu1 }
0x2be2   : > { %v6035_v6 = vadd.f32 %v9309_v58, %v6034_v5  ;;  %v6044_v7 = vsel %vm2054_vm2, %v6038_v4, 0.0 }
0x2be3   : > { %6045 = vadd.xlane.f32.xlu0 %v6044_v7  ;;  %v10147_v49 = vpop.f32.mrf.mxu1 }
0x2be4   : > { %v6039_v9 = vadd.f32 %v6035_v6, %v5879_v35  ;;  %v10703_v35 = vld [vmem:[%s13043_s28 + $0x8] sm:$0xff]   ;;  %s13047_s28 = sld [smem:[#allocation82_spill]]  ;;  %v6249_v49 = vsel %vm6247_vm7, %v6232_v8, 0 }
0x2be5   : > { %10148 = vmatprep.subr.bf16.mxu0 %v10703_v35  ;;  %10165 = vmatpush3.bf16.msra.mxu1 %v6249_v49 }
0x2be6   : > { %v6047_v11 = vsel %vm2054_vm2, %v6039_v9, 0.0  ;;  %10149 = vmatpush3.bf16.msra.mxu0 %v10703_v35 }
0x2be7   : > { %4001 = vadd.xlane.f32.xlu0 %v4000_v10  ;;  %6048 = vadd.xlane.f32.xlu1 %v6047_v11 }
0x2be8   : > { %10150 = vmatprep.subr.bf16.mxu0 %v10704_v36 }
0x2bea   : > { %10151 = vmatpush3.bf16.msra.mxu0 %v10704_v36  ;;  %s13048_s2 = smov %s13047_s28  ;;  %v6300_v6 = vld [vmem:[%s13047_s28] sm:$0xf]  ;;  %s13052_s28 = sld [smem:[#allocation77_spill]] }
0x2beb   : > { %4004 = vadd.xlane.f32.xlu1 %v4003_v41  ;;  %v6309_v7 = vsel %vm6247_vm7, %v6300_v6, 0 }
0x2bf0   : > { %s13053_s6 = smov %s13052_s28 }
0x2c6c   : > { %v6046_v13 = vpop.xlane.xlu0 %6045 }
0x2c6d   : > { %v6050_v51 = vmul.f32 0.03125, %v6046_v13 }
0x2c6f   : > { %v6052_v16 = vsub.f32 %v6038_v4, %v6050_v51 }
0x2c70   : > { %v4002_v42 = vpop.xlane.xlu0 %4001  ;;  %v6049_v44 = vpop.xlane.xlu1 %6048 }
0x2c71   : > { %v4006_v17 = vmul.f32 0.03125, %v4002_v42  ;;  %v6051_v62 = vmul.f32 0.03125, %v6049_v44  ;;  %v6054_v19 = vmul.f32 %v6052_v16, %v6052_v16 }
0x2c73   : > { %v4008_v1 = vadd.f32 1e-05, %v4006_v17  ;;  %v6053_v20 = vsub.f32 %v6039_v9, %v6051_v62  ;;  %v6056_v21 = vsel %vm2054_vm2, %v6054_v19, 0.0  ;;  %v6360_v9 = vld [vmem:[%s12957_s3] sm:$0xf] }
0x2c74   : > { %6057 = vadd.xlane.f32.xlu0 %v6056_v21  ;;  %v4005_v28 = vpop.xlane.xlu1 %4004  ;;  %10372 = vmatprep.subr.msk.bf16.mxu1 %vm6247_vm7, %v6360_v9  ;;  %v9329_v17 = vld [vmem:[%s13050_s7] ss:$0 sm:$0xff] }
0x2c75   : > { %10803 = vrsqrt.f32 %v4008_v1  ;;  %v4007_v29 = vmul.f32 0.03125, %v4005_v28  ;;  %v6055_v22 = vmul.f32 %v6053_v20, %v6053_v20  ;;  %v9326_v21 = vld [vmem:[%s13052_s28] ss:$0 sm:$0xff]  ;;  %s13057_s28 = sld [smem:[#allocation80_spill]] }
0x2c77   : > { %v4009_v23 = vadd.f32 1e-05, %v4007_v29  ;;  %v6059_v24 = vsel %vm2054_vm2, %v6055_v22, 0.0 }
0x2c78   : > { %6060 = vadd.xlane.f32.xlu1 %v6059_v24 }
0x2c79   : > { %10805 = vrsqrt.f32 %v4009_v23 }
0x2c7b   : > { %s13058_s13 = smov %s13057_s28 }
0x2c82   : > { %v10804_v25 = vpop.eup %10803 }
0x2c83   : > { %v4012_v26 = vmul.f32 %v10804_v25, %v3996_v61 }
0x2c85   : > { %v4020_v31 = vmul.f32 %v9151_v56, %v4012_v26 }
0x2c86   : > { %v10806_v27 = vpop.eup %10805 }
0x2c87   : > { %v4013_v30 = vmul.f32 %v10806_v27, %v3997_v48  ;;  %v4028_v60 = vadd.f32 %v9152_v57, %v4020_v31  ;;  %v10706_v48 = vld [vmem:[%s13046_s4 + $0x8] sm:$0xff]   ;;  %s13051_s4 = smov %s13050_s7  ;;  %s13055_s7 = sld [smem:[#allocation83_spill]] }
0x2c89   : > { %v4021_v32 = vmul.f32 %v9151_v56, %v4013_v30 }
0x2c8b   : > { %v4029_v33 = vadd.f32 %v9152_v57, %v4021_v32 }
0x2c8d   : > { %v6086_v34 = vpack.c.bf16 %v4029_v33, %v4028_v60  ;;  %v9332_v60 = vld [vmem:[%s13054_s10] ss:$0 sm:$0xff]  ;;  %s13056_s11 = smov %s13055_s7 }
0x2c8f   : > { %10152 = vmatprep.mubr.msk.bf16.mxu0 %vm2054_vm2, %v6086_v34 }
0x2cfd   : > { %v6058_v37 = vpop.xlane.xlu0 %6057 }
0x2cfe   : > { %v6062_v14 = vmul.f32 0.03125, %v6058_v37 }
0x2d00   : > { %v6064_v38 = vadd.f32 1e-05, %v6062_v14 }
0x2d01   : > { %v6061_v39 = vpop.xlane.xlu1 %6060 }
0x2d02   : > { %10807 = vrsqrt.f32 %v6064_v38  ;;  %v6063_v40 = vmul.f32 0.03125, %v6061_v39 }
0x2d04   : > { %v6065_v15 = vadd.f32 1e-05, %v6063_v40  ;;  %v9344_v40 = vld [vmem:[%s13048_s2 + $0x4] sm:$0xf] }
0x2d06   : > { %10809 = vrsqrt.f32 %v6065_v15 }
0x2d0f   : > { %v10808_v43 = vpop.eup %10807 }
0x2d10   : > { %v6068_v45 = vmul.f32 %v10808_v43, %v6052_v16  ;;  %v6369_v16 = vsel %vm6247_vm7, %v6360_v9, 0 }
0x2d12   : > { %v6076_v50 = vmul.f32 %v9316_v18, %v6068_v45 }
0x2d13   : > { %v10810_v46 = vpop.eup %10809 }
0x2d14   : > { %v6069_v47 = vmul.f32 %v10810_v46, %v6053_v20  ;;  %v6084_v54 = vadd.f32 %v9317_v52, %v6076_v50 }
0x2d16   : > { %v6077_v53 = vmul.f32 %v9316_v18, %v6069_v47  ;;  %v6664_v47 = vsel %vm6247_vm7, %v9344_v40, 0 }
0x2d18   : > { %v6085_v55 = vadd.f32 %v9317_v52, %v6077_v53 }
0x2d1a   : > { %v6087_v58 = vpack.c.bf16 %v6085_v55, %v6084_v54 }
0x2d1c   : > { %10153 = vmatmul.mubr.msk.bf16.vlgmr.msra.gmra.mxu0 %vm2054_vm2, %v6087_v58 }
0x2d1d   : > { %10160 = vmatprep.mubr.msk.bf16.mxu0 %vm2054_vm2, %v10705_v59 }
0x2ddc   : > { %v10154_v61 = vpop.f32.mrf.mxu0 }
0x2dde   : > { %v6144_v63 = vpop.f32.mrf.mxu0 }
0x2de0   : > { %v10155_v2 = vpop.f32.mrf.mxu0 }
0x2de1   : > { %v6164_v3 = vpack.c.bf16 %v10155_v2, %v10154_v61 }
0x2de2   : > { %v6147_v4 = vpop.f32.mrf.mxu0 }
0x2de3   : > { %v6163_v5 = vpack.c.bf16 %v6147_v4, %v6144_v63  ;;  %10156 = vmatprep.subr.bf16.mxu0 %v6164_v3  ;;  %v9346_v63 = vld [vmem:[%s13051_s4 + $0x1] ss:$0 sm:$0xff] }
0x2de4   : > { %10157 = vmatpush3.bf16.msra.mxu0 %v6164_v3 }
0x2de5   : > { %10158 = vmatprep.subr.bf16.mxu0 %v6163_v5 }
0x2de8   : > { %10159 = vmatpush3.bf16.msra.mxu0 %v6163_v5 }
0x2de9   : > { %10371 = vmatprep.subr.msk.bf16.mxu0 %vm6247_vm7, %v6300_v6 }
0x2deb   : > { %10161 = vmatmul.mubr.msk.bf16.vlgmr.msra.gmra.mxu0 %vm2054_vm2, %v10706_v48 }
0x2dec   : > { %10171 = vmatpush3.bf16.msra.mxu0 %v6309_v7 }
0x2eab   : > { %v12493_v10 = vpop.f32.mrf.mxu0 }
0x2ead   : > { %v12495_v11 = vpop.f32.mrf.mxu0 }
0x2eaf   : > { %v12497_v12 = vpop.f32.mrf.mxu0 }
0x2eb0   : > { %v12507_v51 = vpack.c.bf16 %v12497_v12, %v12493_v10 }
0x2eb1   : > { %v12499_v41 = vpop.f32.mrf.mxu0 }
0x2eb2   : > { %v12503_v13 = vpack.c.bf16 %v12499_v41, %v12495_v11 }
0x2eb4   : > { %10166 = vmatprep.mubr.msk.bf16.mxu1 %vm6240_vm8, %v12503_v13  ;;  %10172 = vmatprep.mubr.msk.bf16.mxu0 %vm6240_vm8, %v12503_v13 }
0x2eb5   : > { %10167 = vmatmul.mubr.msk.bf16.vlgmr.msra.gmra.mxu1 %vm6240_vm8, %v12507_v51  ;;  %10173 = vmatmul.mubr.msk.bf16.vlgmr.msra.gmra.mxu0 %vm6240_vm8, %v12507_v51 }
0x2eb6   : > { %10178 = vmatprep.mubr.msk.bf16.mxu1 %vm6240_vm8, %v12503_v13  ;;  %10177 = vmatpush3.bf16.msra.mxu1 %v6369_v16 }
0x2ebd   : > { %10179 = vmatmul.mubr.msk.bf16.vlgmr.msra.gmra.mxu1 %vm6240_vm8, %v12507_v51 }
0x2f75   : > { %v10168_v42 = vpop.f32.mrf.mxu1  ;;  %v10174_v44 = vpop.f32.mrf.mxu0 }
0x2f76   : > { %v6354_v28 = vadd.f32 %v10174_v44, %v9329_v17  ;;  %v6294_v18 = vadd.f32 %v10168_v42, %v9326_v21 }
0x2f77   : > { %v6285_v62 = vpop.f32.mrf.mxu1  ;;  %v6345_v19 = vpop.f32.mrf.mxu0 }
0x2f78   : > { %v6286_v22 = vadd.f32 %v9326_v21, %v6285_v62  ;;  %v6346_v25 = vadd.f32 %v9329_v17, %v6345_v19 }
0x2f79   : > { %v10169_v1 = vpop.f32.mrf.mxu1  ;;  %v10175_v20 = vpop.f32.mrf.mxu0 }
0x2f7a   : > { %v6357_v29 = vadd.f32 %v10175_v20, %v9329_v17  ;;  %v6297_v45 = vadd.f32 %v10169_v1, %v9326_v21 }
0x2f7b   : > { %v6288_v23 = vpop.f32.mrf.mxu1  ;;  %v6348_v24 = vpop.f32.mrf.mxu0 }
0x2f7c   : > { %v6423_v26 = vpack.c.bf16 %v6357_v29, %v6354_v28  ;;  %v6289_v56 = vadd.f32 %v9326_v21, %v6288_v23  ;;  %v6349_v27 = vadd.f32 %v9329_v17, %v6348_v24  ;;  %v6421_v46 = vpack.c.bf16 %v6297_v45, %v6294_v18 }
0x2f7d   : > { %v10180_v30 = vpop.f32.mrf.mxu1 }
0x2f7e   : > { %v6420_v31 = vpack.c.bf16 %v6289_v56, %v6286_v22  ;;  %v6422_v57 = vpack.c.bf16 %v6349_v27, %v6346_v25  ;;  %10373 = vmatprep.subr.msk.bf16.mxu0 %vm4041_vm6, %v6423_v26  ;;  %v6434_v32 = vsel %vm4041_vm6, %v6423_v26, 0  ;;  %v6414_v35 = vadd.f32 %v10180_v30, %v9332_v60 }
0x2f7f   : > { %v6405_v33 = vpop.f32.mrf.mxu1  ;;  %10183 = vmatpush3.bf16.xpose.msra.mxu0 %v6434_v32 }
0x2f80   : > { %10374 = vmatprep.subr.msk.bf16.mxu0 %vm4041_vm6, %v6422_v57  ;;  %10186 = vmatprep.mubr.msk.bf16.mxu0 %vm4041_vm6, %v6420_v31  ;;  %v6406_v14 = vadd.f32 %v9332_v60, %v6405_v33  ;;  %v6431_v43 = vsel %vm4041_vm6, %v6422_v57, 0 }
0x2f81   : > { %v10181_v34 = vpop.f32.mrf.mxu1 }
0x2f82   : > { %v6417_v36 = vadd.f32 %v10181_v34, %v9332_v60 }
0x2f83   : > { %v6408_v37 = vpop.f32.mrf.mxu1 }
0x2f84   : > { %v6532_v38 = vpack.c.bf16 %v6417_v36, %v6414_v35  ;;  %v6409_v39 = vadd.f32 %v9332_v60, %v6408_v37  ;;  %v9339_v60 = vld [vmem:[%s13049_s5 + $0x4] sm:$0xf] }
0x2f86   : > { %v6531_v15 = vpack.c.bf16 %v6409_v39, %v6406_v14  ;;  %10190 = vmatprep.subr.bf16.mxu1 %v6532_v38 }
0x2f87   : > { %10185 = vmatpush3.bf16.xpose.msra.mxu0 %v6431_v43  ;;  %10191 = vmatpush3.bf16.msra.mxu1 %v6532_v38 }
0x2f88   : > { %10192 = vmatprep.subr.bf16.mxu1 %v6531_v15  ;;  %10376 = vmatprep.subr.msk.bf16.mxu0 %vm6247_vm7, %v9344_v40 }
0x2f8b   : > { %10193 = vmatpush3.bf16.msra.mxu1 %v6531_v15 }
0x2f8c   : > { %10375 = vmatprep.subr.msk.bf16.mxu1 %vm6247_vm7, %v9339_v60 }
0x2f8e   : > { %10187 = vmatmul.mubr.msk.bf16.vlgmr.msra.gmra.mxu0 %vm4041_vm6, %v6421_v46 }
0x2f8f   : > { %10206 = vmatprep.mubr.msk.bf16.mxu0 %vm6240_vm8, %v12503_v13  ;;  %10205 = vmatpush3.bf16.msra.mxu0 %v6664_v47  ;;  %v6602_v47 = vsel %vm6247_vm7, %v9339_v60, 0 }
0x2f96   : > { %10207 = vmatmul.mubr.msk.bf16.vlgmr.msra.gmra.mxu0 %vm6240_vm8, %v12507_v51 }
0x304e   : > { %v10188_v50 = vpop.f32.mrf.mxu0 }
0x304f   : > { %v6491_v58 = vsel %vm2054_vm2, %v10188_v50, -inf }
0x3050   : > { %v6470_v52 = vpop.f32.mrf.mxu0 }
0x3051   : > { %v6485_v53 = vsel %vm2054_vm2, %v6470_v52, -inf }
0x3052   : > { %6486 = vmax.xlane.f32.xlu0 %v6485_v53  ;;  %v10189_v54 = vpop.f32.mrf.mxu0  ;;  %v6590_v53 = vld [vmem:[%s13055_s7] sm:$0x3]  ;;  %s13059_s7 = sld [smem:[#allocation81_spill]] }
0x3053   : > { %v6494_v3 = vsel %vm2054_vm2, %v10189_v54, -inf }
0x3054   : > { %v6473_v55 = vpop.f32.mrf.mxu0 }
0x3055   : > { %v6488_v59 = vsel %vm2054_vm2, %v6473_v55, -inf }
0x3056   : > { %6492 = vmax.xlane.f32.xlu0 %v6491_v58  ;;  %v10208_v61 = vpop.f32.mrf.mxu0  ;;  %6489 = vmax.xlane.f32.xlu1 %v6488_v59 }
0x3057   : > { %v6709_v5 = vadd.f32 %v10208_v61, %v9346_v63 }
0x3058   : > { %v6700_v2 = vpop.f32.mrf.mxu0  ;;  %s13060_s14 = smov %s13059_s7 }
0x3059   : > { %v6701_v7 = vadd.f32 %v9346_v63, %v6700_v2 }
0x305a   : > { %v10209_v4 = vpop.f32.mrf.mxu0  ;;  %6495 = vmax.xlane.f32.xlu1 %v6494_v3  ;;  %v9341_v3 = vld [vmem:[%s13053_s6 + $0x1] ss:$0 sm:$0xff] }
0x305b   : > { %v6712_v48 = vadd.f32 %v10209_v4, %v9346_v63 }
0x305c   : > { %v6703_v6 = vpop.f32.mrf.mxu0 }
0x305d   : > { %v6780_v8 = vpack.c.bf16 %v6712_v48, %v6709_v5  ;;  %v6704_v49 = vadd.f32 %v9346_v63, %v6703_v6 }
0x305f   : > { %v6779_v9 = vpack.c.bf16 %v6704_v49, %v6701_v7  ;;  %10378 = vmatprep.subr.msk.bf16.mxu0 %vm4041_vm6, %v6780_v8  ;;  %v6791_v16 = vsel %vm4041_vm6, %v6780_v8, 0  ;;  %v9351_v49 = vld [vmem:[%s13054_s10 + $0x1] ss:$0 sm:$0xff] }
0x3060   : > { %10217 = vmatpush3.bf16.xpose.msra.mxu0 %v6791_v16  ;;  %v7014_v16 = vsel %vm4045_vm5, %v6590_v53, 0 }
0x3061   : > { %10379 = vmatprep.subr.msk.bf16.mxu0 %vm4041_vm6, %v6779_v9  ;;  %v6788_v42 = vsel %vm4041_vm6, %v6779_v9, 0 }
0x3068   : > { %10219 = vmatpush3.bf16.xpose.msra.mxu0 %v6788_v42 }
0x3069   : > { %10381 = vmatprep.subr.msk.bf16.mxu0 %vm4045_vm5, %v6590_v53 }
0x30db   : > { %v6487_v44 = vpop.xlane.xlu0 %6486 }
0x30dc   : > { %v6497_v17 = vsub.f32 %v6470_v52, %v6487_v44 }
0x30de   : > { %v6501_v62 = vmul.f32 1.442695, %v6497_v17 }
0x30df   : > { %v6493_v19 = vpop.xlane.xlu0 %6492  ;;  %v6490_v1 = vpop.xlane.xlu1 %6489 }
0x30e0   : > { %10811 = vpow2.f32 %v6501_v62  ;;  %v6499_v20 = vsub.f32 %v10188_v50, %v6493_v19  ;;  %v6498_v21 = vsub.f32 %v6473_v55, %v6490_v1  ;;  %v9349_v50 = vld [vmem:[%s12957_s3 + $0x4] sm:$0xf] }
0x30e1   : > { %v6726_v52 = vsel %vm6247_vm7, %v9349_v50, 0 }
0x30e2   : > { %v6505_v28 = vmul.f32 1.442695, %v6499_v20  ;;  %v6503_v29 = vmul.f32 1.442695, %v6498_v21 }
0x30e3   : > { %v6496_v22 = vpop.xlane.xlu1 %6495 }
0x30e4   : > { %10813 = vpow2.f32 %v6505_v28  ;;  %v6500_v23 = vsub.f32 %v10189_v54, %v6496_v22 }
0x30e5   : > { %10815 = vpow2.f32 %v6503_v29 }
0x30e6   : > { %v6507_v24 = vmul.f32 1.442695, %v6500_v23 }
0x30e8   : > { %10817 = vpow2.f32 %v6507_v24 }
0x30ed   : > { %v10812_v25 = vpop.eup %10811 }
0x30ee   : > { %v6509_v26 = vsel %vm2054_vm2, %v10812_v25, 0.0 }
0x30ef   : > { %6510 = vadd.xlane.f32.xlu0 %v6509_v26 }
0x30f1   : > { %v10814_v56 = vpop.eup %10813 }
0x30f2   : > { %v10816_v27 = vpop.eup %10815  ;;  %v6515_v30 = vsel %vm2054_vm2, %v10814_v56, 0.0 }
0x30f3   : > { %6516 = vadd.xlane.f32.xlu0 %v6515_v30  ;;  %v6512_v31 = vsel %vm2054_vm2, %v10816_v27, 0.0 }
0x30f4   : > { %6513 = vadd.xlane.f32.xlu1 %v6512_v31 }
0x30f5   : > { %v10818_v57 = vpop.eup %10817 }
0x30f6   : > { %v6518_v32 = vsel %vm2054_vm2, %v10818_v57, 0.0 }
0x30f8   : > { %6519 = vadd.xlane.f32.xlu1 %v6518_v32 }
0x3178   : > { %v6511_v33 = vpop.xlane.xlu0 %6510 }
0x3179   : > { %10819 = vrcp.f32 %v6511_v33 }
0x317c   : > { %v6517_v34 = vpop.xlane.xlu0 %6516 }
0x317d   : > { %v6514_v35 = vpop.xlane.xlu1 %6513 }
0x317e   : > { %10821 = vrcp.f32 %v6514_v35 }
0x317f   : > { %10823 = vrcp.f32 %v6517_v34 }
0x3181   : > { %v6520_v36 = vpop.xlane.xlu1 %6519 }
0x3182   : > { %10825 = vrcp.f32 %v6520_v36 }
0x3186   : > { %v10820_v37 = vpop.eup %10819 }
0x3187   : > { %v6525_v38 = vmul.f32 %v10820_v37, %v10812_v25 }
0x318b   : > { %v10822_v14 = vpop.eup %10821 }
0x318c   : > { %v6526_v39 = vmul.f32 %v10822_v14, %v10816_v27  ;;  %v10824_v40 = vpop.eup %10823 }
0x318d   : > { %v6527_v45 = vmul.f32 %v10824_v40, %v10814_v56 }
0x318e   : > { %v6529_v15 = vpack.c.bf16 %v6526_v39, %v6525_v38 }
0x318f   : > { %v10826_v43 = vpop.eup %10825 }
0x3190   : > { %v6528_v18 = vmul.f32 %v10826_v43, %v10818_v57  ;;  %10194 = vmatprep.mubr.msk.bf16.mxu1 %vm2054_vm2, %v6529_v15 }
0x3192   : > { %v6530_v46 = vpack.c.bf16 %v6528_v18, %v6527_v45 }
0x3194   : > { %10195 = vmatmul.mubr.msk.bf16.vlgmr.msra.gmra.mxu1 %vm2054_vm2, %v6530_v46 }
0x3195   : > { %10199 = vmatpush3.bf16.msra.mxu1 %v6602_v47  ;;  %10200 = vmatprep.mubr.msk.bf16.mxu1 %vm6240_vm8, %v12503_v13 }
0x3196   : > { %10377 = vmatprep.subr.msk.bf16.mxu1 %vm6247_vm7, %v9349_v50 }
0x319c   : > { %10201 = vmatmul.mubr.msk.bf16.vlgmr.msra.gmra.mxu1 %vm6240_vm8, %v12507_v51 }
0x319d   : > { %10212 = vmatprep.mubr.msk.bf16.mxu1 %vm6240_vm8, %v12503_v13  ;;  %10211 = vmatpush3.bf16.msra.mxu1 %v6726_v52 }
0x31a4   : > { %10213 = vmatmul.mubr.msk.bf16.vlgmr.msra.gmra.mxu1 %vm6240_vm8, %v12507_v51 }
0x3254   : > { %v10196_v54 = vpop.f32.mrf.mxu1 }
0x3256   : > { %v6573_v55 = vpop.f32.mrf.mxu1 }
0x3258   : > { %v10197_v58 = vpop.f32.mrf.mxu1 }
0x3259   : > { %v6589_v29 = vpack.c.bf16 %v10197_v58, %v10196_v54 }
0x325a   : > { %v6576_v59 = vpop.f32.mrf.mxu1 }
0x325b   : > { %v6588_v42 = vpack.c.bf16 %v6576_v59, %v6573_v55 }
0x325c   : > { %v10202_v61 = vpop.f32.mrf.mxu1 }
0x325d   : > { %v6647_v6 = vadd.f32 %v10202_v61, %v9341_v3 }
0x325e   : > { %v6638_v63 = vpop.f32.mrf.mxu1 }
0x325f   : > { %v6639_v48 = vadd.f32 %v9341_v3, %v6638_v63 }
0x3260   : > { %v10203_v2 = vpop.f32.mrf.mxu1 }
0x3261   : > { %v6650_v4 = vadd.f32 %v10203_v2, %v9341_v3 }
0x3262   : > { %v6641_v5 = vpop.f32.mrf.mxu1 }
0x3263   : > { %v6642_v13 = vadd.f32 %v9341_v3, %v6641_v5  ;;  %v6778_v51 = vpack.c.bf16 %v6650_v4, %v6647_v6  ;;  %v9358_v6 = vld [vmem:[%s13056_s11 + $0x2] sm:$0x3] }
0x3264   : > { %v10214_v7 = vpop.f32.mrf.mxu1 }
0x3265   : > { %v6777_v8 = vpack.c.bf16 %v6642_v13, %v6639_v48  ;;  %v6771_v17 = vadd.f32 %v10214_v7, %v9351_v49  ;;  %v6956_v7 = vsel %vm4045_vm5, %v9358_v6, 0 }
0x3266   : > { %v6762_v9 = vpop.f32.mrf.mxu1 }
0x3267   : > { %10220 = vmatprep.mubr.msk.bf16.mxu0 %vm4041_vm6, %v6777_v8  ;;  %v6763_v1 = vadd.f32 %v9351_v49, %v6762_v9 }
0x3268   : > { %v10215_v44 = vpop.f32.mrf.mxu1  ;;  %10221 = vmatmul.mubr.msk.bf16.vlgmr.msra.gmra.mxu0 %vm4041_vm6, %v6778_v51 }
0x3269   : > { %v6774_v62 = vadd.f32 %v10215_v44, %v9351_v49  ;;  %10240 = vmatprep.mubr.msk.bf16.mxu0 %vm4041_vm6, %v6588_v42  ;;  %10239 = vmatpush3.bf16.msra.mxu0 %v7014_v16 }
0x326a   : > { %v6765_v19 = vpop.f32.mrf.mxu1 }
0x326b   : > { %v6889_v20 = vpack.c.bf16 %v6774_v62, %v6771_v17  ;;  %v6766_v21 = vadd.f32 %v9351_v49, %v6765_v19 }
0x326d   : > { %v6888_v28 = vpack.c.bf16 %v6766_v21, %v6763_v1  ;;  %10224 = vmatprep.subr.bf16.mxu1 %v6889_v20 }
0x326e   : > { %10225 = vmatpush3.bf16.msra.mxu1 %v6889_v20  ;;  %v9363_v20 = vld [vmem:[#allocation17] ss:$0 sm:$0xff] }
0x326f   : > { %10226 = vmatprep.subr.bf16.mxu1 %v6888_v28 }
0x3270   : > { %10241 = vmatmul.mubr.msk.bf16.vlgmr.msra.gmra.mxu0 %vm4041_vm6, %v6589_v29 }
0x3272   : > { %10227 = vmatpush3.bf16.msra.mxu1 %v6888_v28 }
0x3273   : > { %10380 = vmatprep.subr.msk.bf16.mxu1 %vm4045_vm5, %v9358_v6 }
0x3328   : > { %v10222_v22 = vpop.f32.mrf.mxu0 }
0x3329   : > { %v6848_v56 = vsel %vm2054_vm2, %v10222_v22, -inf }
0x332a   : > { %v6827_v23 = vpop.f32.mrf.mxu0 }
0x332b   : > { %v6842_v24 = vsel %vm2054_vm2, %v6827_v23, -inf }
0x332c   : > { %6843 = vmax.xlane.f32.xlu0 %v6842_v24  ;;  %v10223_v25 = vpop.f32.mrf.mxu0 }
0x332d   : > { %v6851_v30 = vsel %vm2054_vm2, %v10223_v25, -inf }
0x332e   : > { %v6830_v26 = vpop.f32.mrf.mxu0 }
0x332f   : > { %v6845_v27 = vsel %vm2054_vm2, %v6830_v26, -inf }
0x3330   : > { %6849 = vmax.xlane.f32.xlu0 %v6848_v56  ;;  %6846 = vmax.xlane.f32.xlu1 %v6845_v27  ;;  %v10242_v44 = vpop.f32.mrf.mxu0 }
0x3332   : > { %v7050_v17 = vpop.f32.mrf.mxu0 }
0x3334   : > { %6852 = vmax.xlane.f32.xlu1 %v6851_v30  ;;  %v10243_v1 = vpop.f32.mrf.mxu0 }
0x33b5   : > { %v6844_v31 = vpop.xlane.xlu0 %6843 }
0x33b6   : > { %v6854_v57 = vsub.f32 %v6827_v23, %v6844_v31 }
0x33b8   : > { %v6858_v32 = vmul.f32 1.442695, %v6854_v57 }
0x33b9   : > { %v6850_v60 = vpop.xlane.xlu0 %6849  ;;  %v6847_v33 = vpop.xlane.xlu1 %6846 }
0x33ba   : > { %10827 = vpow2.f32 %v6858_v32  ;;  %v6856_v34 = vsub.f32 %v10222_v22, %v6850_v60  ;;  %v6855_v35 = vsub.f32 %v6830_v26, %v6847_v33 }
0x33bc   : > { %v6862_v36 = vmul.f32 1.442695, %v6856_v34  ;;  %v6860_v37 = vmul.f32 1.442695, %v6855_v35 }
0x33bd   : > { %v6853_v14 = vpop.xlane.xlu1 %6852 }
0x33be   : > { %10829 = vpow2.f32 %v6862_v36  ;;  %v6857_v38 = vsub.f32 %v10223_v25, %v6853_v14  ;;  %v7053_v25 = vpop.f32.mrf.mxu0 }
0x33bf   : > { %10831 = vpow2.f32 %v6860_v37 }
0x33c0   : > { %v6864_v39 = vmul.f32 1.442695, %v6857_v38 }
0x33c2   : > { %10833 = vpow2.f32 %v6864_v39 }
0x33c7   : > { %v10828_v40 = vpop.eup %10827 }
0x33c8   : > { %v6866_v15 = vsel %vm2054_vm2, %v10828_v40, 0.0 }
0x33c9   : > { %6867 = vadd.xlane.f32.xlu0 %v6866_v15 }
0x33cb   : > { %v10830_v43 = vpop.eup %10829 }
0x33cc   : > { %v10832_v45 = vpop.eup %10831  ;;  %v6872_v18 = vsel %vm2054_vm2, %v10830_v43, 0.0 }
0x33cd   : > { %6873 = vadd.xlane.f32.xlu0 %v6872_v18  ;;  %v6869_v46 = vsel %vm2054_vm2, %v10832_v45, 0.0 }
0x33ce   : > { %6870 = vadd.xlane.f32.xlu1 %v6869_v46 }
0x33cf   : > { %v10834_v47 = vpop.eup %10833 }
0x33d0   : > { %v6875_v50 = vsel %vm2054_vm2, %v10834_v47, 0.0 }
0x33d2   : > { %6876 = vadd.xlane.f32.xlu1 %v6875_v50 }
0x3452   : > { %v6868_v52 = vpop.xlane.xlu0 %6867 }
0x3453   : > { %10835 = vrcp.f32 %v6868_v52 }
0x3456   : > { %v6874_v53 = vpop.xlane.xlu0 %6873 }
0x3457   : > { %v6871_v54 = vpop.xlane.xlu1 %6870 }
0x3458   : > { %10837 = vrcp.f32 %v6871_v54 }
0x3459   : > { %10839 = vrcp.f32 %v6874_v53 }
0x345b   : > { %v6877_v55 = vpop.xlane.xlu1 %6876 }
0x345c   : > { %10841 = vrcp.f32 %v6877_v55 }
0x3460   : > { %v10836_v58 = vpop.eup %10835 }
0x3461   : > { %v6882_v61 = vmul.f32 %v10836_v58, %v10828_v40  ;;  %v7157_v58 = vld [vmem:[%s13057_s28] sm:$0xf]  ;;  %s1943_s28 = sand.u32 1, %s11301_s1  }
0x3465   : > { %v10838_v59 = vpop.eup %10837 }
0x3466   : > { %v6883_v63 = vmul.f32 %v10838_v59, %v10832_v45  ;;  %v10840_v2 = vpop.eup %10839  ;;  %v7172_v59 = vsel %vm6247_vm7, %v7157_v58, 0 }
0x3467   : > { %v6884_v5 = vmul.f32 %v10840_v2, %v10830_v43 }
0x3468   : > { %v6886_v3 = vpack.c.bf16 %v6883_v63, %v6882_v61 }
0x3469   : > { %v10842_v4 = vpop.eup %10841 }
0x346a   : > { %v6885_v48 = vmul.f32 %v10842_v4, %v10834_v47  ;;  %10228 = vmatprep.mubr.msk.bf16.mxu1 %vm2054_vm2, %v6886_v3 }
0x346c   : > { %v6887_v13 = vpack.c.bf16 %v6885_v48, %v6884_v5 }
0x346e   : > { %10229 = vmatmul.mubr.msk.bf16.vlgmr.msra.gmra.mxu1 %vm2054_vm2, %v6887_v13 }
0x346f   : > { %10233 = vmatpush3.bf16.msra.mxu1 %v6956_v7 }
0x3470   : > { %10382 = vmatprep.subr.msk.bf16.mxu1 %vm6247_vm7, %v7157_v58 }
0x352e   : > { %v10230_v8 = vpop.f32.mrf.mxu1 }
0x3530   : > { %v6930_v51 = vpop.f32.mrf.mxu1 }
0x3532   : > { %v10231_v49 = vpop.f32.mrf.mxu1 }
0x3533   : > { %v6946_v42 = vpack.c.bf16 %v10231_v49, %v10230_v8 }
0x3534   : > { %v6933_v9 = vpop.f32.mrf.mxu1 }
0x3535   : > { %v6945_v16 = vpack.c.bf16 %v6933_v9, %v6930_v51 }
0x3537   : > { %10234 = vmatprep.mubr.msk.bf16.mxu1 %vm4041_vm6, %v6945_v16  ;;  %v9364_v16 = vld [vmem:[#allocation19] ss:$0 sm:$0xff] }
0x3538   : > { %10235 = vmatmul.mubr.msk.bf16.vlgmr.msra.gmra.mxu1 %vm4041_vm6, %v6946_v42 }
0x3539   : > { %10245 = vmatpush3.bf16.msra.mxu1 %v7172_v59 }
0x35f8   : > { %v10236_v62 = vpop.f32.mrf.mxu1 }
0x35f9   : > { %v7059_v19 = vadd.f32 %v10242_v44, %v10236_v62 }
0x35fa   : > { %v6992_v21 = vpop.f32.mrf.mxu1 }
0x35fb   : > { %v7051_v28 = vadd.f32 %v7050_v17, %v6992_v21  ;;  %v7074_v22 = vadd.f32 %v9363_v20, %v7059_v19 }
0x35fc   : > { %v10237_v29 = vpop.f32.mrf.mxu1 }
0x35fd   : > { %v7072_v23 = vadd.f32 %v9363_v20, %v7051_v28  ;;  %v7062_v24 = vadd.f32 %v10243_v1, %v10237_v29  ;;  %v7078_v32 = vadd.f32 %v12493_v10, %v7074_v22  ;;  %v9365_v1 = vld [vmem:[#allocation14] ss:$0 sm:$0xff] }
0x35fe   : > { %v6995_v26 = vpop.f32.mrf.mxu1 }
0x35ff   : > { %v7054_v56 = vadd.f32 %v7053_v25, %v6995_v26  ;;  %v7076_v27 = vadd.f32 %v7072_v23, %v12495_v11  ;;  %v7075_v30 = vadd.f32 %v9363_v20, %v7062_v24  ;;  %v7088_v34 = vsel %vm6240_vm8, %v7078_v32, 0.0 }
0x3601   : > { %v7073_v31 = vadd.f32 %v9363_v20, %v7054_v56  ;;  %v7082_v57 = vsel %vm6240_vm8, %v7076_v27, 0.0  ;;  %v7079_v35 = vadd.f32 %v12497_v12, %v7075_v30  ;;  %v10707_v30 = vld [vmem:[%s13059_s7 + $0x8] sm:$0xff]   ;;  %s9444_s7 = sshll.u32 %s11719_s0, 4  ;;  %s11387_s0 = smov [#allocation22]  }
0x3602   : > { %7083 = vadd.xlane.f32.xlu0 %v7082_v57  ;;  %10250 = vmatprep.subr.bf16.mxu0 %v10707_v30 }
0x3603   : > { %v7077_v60 = vadd.f32 %v7073_v31, %v12499_v41  ;;  %v7091_v36 = vsel %vm6240_vm8, %v7079_v35, 0.0  ;;  %10251 = vmatpush3.bf16.msra.mxu0 %v10707_v30  ;;  %v10708_v31 = vld [vmem:[%s13060_s14] sm:$0xff]  }
0x3604   : > { %10252 = vmatprep.subr.bf16.mxu0 %v10708_v31 }
0x3605   : > { %v7085_v33 = vsel %vm6240_vm8, %v7077_v60, 0.0 }
0x3606   : > { %7086 = vadd.xlane.f32.xlu1 %v7085_v33  ;;  %7089 = vadd.xlane.f32.xlu0 %v7088_v34 }
0x3607   : > { %10253 = vmatpush3.bf16.msra.mxu0 %v10708_v31 }
0x360a   : > { %7092 = vadd.xlane.f32.xlu1 %v7091_v36 }
0x368b   : > { %v7084_v11 = vpop.xlane.xlu0 %7083 }
0x368c   : > { %v7095_v37 = vmul.f32 0.125, %v7084_v11 }
0x368e   : > { %v7099_v14 = vsub.f32 %v7076_v27, %v7095_v37 }
0x368f   : > { %v7087_v38 = vpop.xlane.xlu1 %7086  ;;  %v7090_v39 = vpop.xlane.xlu0 %7089 }
0x3690   : > { %v7096_v10 = vmul.f32 0.125, %v7087_v38  ;;  %v7097_v40 = vmul.f32 0.125, %v7090_v39  ;;  %v7103_v15 = vmul.f32 %v7099_v14, %v7099_v14 }
0x3692   : > { %v7100_v41 = vsub.f32 %v7077_v60, %v7096_v10  ;;  %v7101_v43 = vsub.f32 %v7078_v32, %v7097_v40  ;;  %v7107_v45 = vsel %vm6240_vm8, %v7103_v15, 0.0  ;;  %v9366_v60 = vld [vmem:[#allocation11] ss:$0 sm:$0xff] }
0x3693   : > { %v7093_v18 = vpop.xlane.xlu1 %7092  ;;  %7108 = vadd.xlane.f32.xlu0 %v7107_v45 }
0x3694   : > { %v7098_v12 = vmul.f32 0.125, %v7093_v18  ;;  %v7104_v46 = vmul.f32 %v7100_v41, %v7100_v41  ;;  %v7105_v47 = vmul.f32 %v7101_v43, %v7101_v43 }
0x3696   : > { %v7102_v50 = vsub.f32 %v7079_v35, %v7098_v12  ;;  %v7110_v52 = vsel %vm6240_vm8, %v7104_v46, 0.0  ;;  %v7113_v53 = vsel %vm6240_vm8, %v7105_v47, 0.0 }
0x3697   : > { %7111 = vadd.xlane.f32.xlu1 %v7110_v52  ;;  %7114 = vadd.xlane.f32.xlu0 %v7113_v53 }
0x3698   : > { %v7106_v54 = vmul.f32 %v7102_v50, %v7102_v50 }
0x369a   : > { %v7116_v55 = vsel %vm6240_vm8, %v7106_v54, 0.0 }
0x369b   : > { %7117 = vadd.xlane.f32.xlu1 %v7116_v55 }
0x371c   : > { %v7109_v61 = vpop.xlane.xlu0 %7108 }
0x371d   : > { %v7119_v63 = vmul.f32 0.125, %v7109_v61 }
0x371f   : > { %v7123_v2 = vadd.f32 1e-05, %v7119_v63 }
0x3720   : > { %v7112_v3 = vpop.xlane.xlu1 %7111  ;;  %v7115_v4 = vpop.xlane.xlu0 %7114 }
0x3721   : > { %10843 = vrsqrt.f32 %v7123_v2  ;;  %v7120_v5 = vmul.f32 0.125, %v7112_v3  ;;  %v7121_v48 = vmul.f32 0.125, %v7115_v4 }
0x3723   : > { %v7124_v13 = vadd.f32 1e-05, %v7120_v5  ;;  %v7125_v6 = vadd.f32 1e-05, %v7121_v48 }
0x3724   : > { %v7118_v7 = vpop.xlane.xlu1 %7117 }
0x3725   : > { %10845 = vrsqrt.f32 %v7124_v13  ;;  %v7122_v8 = vmul.f32 0.125, %v7118_v7 }
0x3726   : > { %10847 = vrsqrt.f32 %v7125_v6 }
0x3727   : > { %v7126_v51 = vadd.f32 1e-05, %v7122_v8 }
0x3729   : > { %10849 = vrsqrt.f32 %v7126_v51 }
0x372e   : > { %v10844_v49 = vpop.eup %10843 }
0x372f   : > { %v7131_v9 = vmul.f32 %v10844_v49, %v7099_v14 }
0x3731   : > { %v7141_v62 = vmul.f32 %v9364_v16, %v7131_v9 }
0x3732   : > { %v10846_v42 = vpop.eup %10845 }
0x3733   : > { %v10848_v44 = vpop.eup %10847  ;;  %v7132_v17 = vmul.f32 %v10846_v42, %v7100_v41  ;;  %v7151_v22 = vadd.f32 %v9365_v1, %v7141_v62 }
0x3734   : > { %v7133_v19 = vmul.f32 %v10848_v44, %v7101_v43  ;;  %v9369_v43 = vld [vmem:[#allocation13] ss:$0 sm:$0xff] }
0x3735   : > { %v7142_v20 = vmul.f32 %v9364_v16, %v7132_v17 }
0x3736   : > { %v10850_v21 = vpop.eup %10849  ;;  %v7143_v29 = vmul.f32 %v9364_v16, %v7133_v19 }
0x3737   : > { %v7134_v28 = vmul.f32 %v10850_v21, %v7102_v50  ;;  %v7152_v23 = vadd.f32 %v9365_v1, %v7142_v20 }
0x3738   : > { %v7153_v26 = vadd.f32 %v9365_v1, %v7143_v29  ;;  %v9376_v29 = vld [vmem:[%s13049_s5 + $0x8] sm:$0xf] }
0x3739   : > { %v7144_v24 = vmul.f32 %v9364_v16, %v7134_v28  ;;  %v7155_v25 = vpack.c.bf16 %v7152_v23, %v7151_v22  ;;  %v9381_v28 = vld [vmem:[%s13048_s2 + $0x8] sm:$0xf]  ;;  %10383 = vmatprep.subr.msk.bf16.mxu1 %vm6247_vm7, %v9376_v29 }
0x373a   : > { %10384 = vmatprep.subr.msk.bf16.mxu0 %vm6247_vm7, %v9381_v28 }
0x373b   : > { %v7154_v56 = vadd.f32 %v9365_v1, %v7144_v24  ;;  %10246 = vmatprep.mubr.msk.bf16.mxu1 %vm6240_vm8, %v7155_v25  ;;  %v9386_v24 = vld [vmem:[%s12957_s3 + $0x8] sm:$0xf] }
0x373d   : > { %v7156_v27 = vpack.c.bf16 %v7154_v56, %v7153_v26 }
0x373f   : > { %10247 = vmatmul.mubr.msk.bf16.vlgmr.msra.gmra.mxu1 %vm6240_vm8, %v7156_v27 }
0x37ff   : > { %v10248_v57 = vpop.f32.mrf.mxu1 }
0x3800   : > { %v7217_v36 = vadd.f32 %v10248_v57, %v9366_v60 }
0x3801   : > { %v7208_v32 = vpop.f32.mrf.mxu1 }
0x3802   : > { %v7209_v34 = vadd.f32 %v9366_v60, %v7208_v32  ;;  %v7225_v10 = vmax.f32 %v7217_v36, 0.0 }
0x3803   : > { %v10249_v33 = vpop.f32.mrf.mxu1 }
0x3804   : > { %v7220_v35 = vadd.f32 %v10249_v33, %v9366_v60  ;;  %v7223_v38 = vmax.f32 %v7209_v34, 0.0 }
0x3805   : > { %v7211_v11 = vpop.f32.mrf.mxu1 }
0x3806   : > { %v7212_v37 = vadd.f32 %v9366_v60, %v7211_v11  ;;  %v7226_v14 = vmax.f32 %v7220_v35, 0.0 }
0x3808   : > { %v7224_v39 = vmax.f32 %v7212_v37, 0.0  ;;  %v7228_v15 = vpack.c.bf16 %v7226_v14, %v7225_v10  ;;  %v9374_v37 = vld [vmem:[#allocation20] ss:$0 sm:$0xff] }
0x380a   : > { %v7227_v40 = vpack.c.bf16 %v7224_v39, %v7223_v38 }
0x380c   : > { %10254 = vmatprep.mubr.msk.bf16.mxu0 %vm2054_vm2, %v7227_v40 }
0x380d   : > { %10255 = vmatmul.mubr.msk.bf16.vlgmr.msra.gmra.mxu0 %vm2054_vm2, %v7228_v15  ;;  %v9375_v15 = vld [vmem:[#allocation16] ss:$0 sm:$0xff] }
0x38cd   : > { %v10256_v41 = vpop.f32.mrf.mxu0 }
0x38ce   : > { %v7301_v18 = vadd.f32 %v10256_v41, %v9369_v43 }
0x38cf   : > { %v7292_v45 = vpop.f32.mrf.mxu0 }
0x38d0   : > { %v7293_v12 = vadd.f32 %v9369_v43, %v7292_v45  ;;  %v7309_v55 = vadd.f32 %v7301_v18, %v7153_v26 }
0x38d1   : > { %v10257_v46 = vpop.f32.mrf.mxu0 }
0x38d2   : > { %v7307_v47 = vadd.f32 %v7293_v12, %v7151_v22  ;;  %v7304_v52 = vadd.f32 %v10257_v46, %v9369_v43  ;;  %v7319_v61 = vsel %vm6240_vm8, %v7309_v55, 0.0  ;;  %v7466_v22 = vsel %vm6247_vm7, %v9381_v28, 0 }
0x38d3   : > { %v7295_v50 = vpop.f32.mrf.mxu0  ;;  %10265 = vmatpush3.bf16.msra.mxu0 %v7466_v22 }
0x38d4   : > { %v7296_v53 = vadd.f32 %v9369_v43, %v7295_v50  ;;  %v7313_v54 = vsel %vm6240_vm8, %v7307_v47, 0.0  ;;  %v7310_v63 = vadd.f32 %v7304_v52, %v7154_v56 }
0x38d5   : > { %7314 = vadd.xlane.f32.xlu0 %v7313_v54 }
0x38d6   : > { %v7308_v58 = vadd.f32 %v7296_v53, %v7152_v23  ;;  %v7322_v2 = vsel %vm6240_vm8, %v7310_v63, 0.0  ;;  %v7404_v23 = vsel %vm6247_vm7, %v9376_v29, 0 }
0x38d7   : > { %10259 = vmatpush3.bf16.msra.mxu1 %v7404_v23 }
0x38d8   : > { %v7316_v59 = vsel %vm6240_vm8, %v7308_v58, 0.0  ;;  %10385 = vmatprep.subr.msk.bf16.mxu1 %vm6247_vm7, %v9386_v24 }
0x38d9   : > { %7317 = vadd.xlane.f32.xlu1 %v7316_v59  ;;  %7320 = vadd.xlane.f32.xlu0 %v7319_v61  ;;  %v9383_v61 = vld [vmem:[%s13051_s4 + $0x2] ss:$0 sm:$0xff] }
0x38dd   : > { %7323 = vadd.xlane.f32.xlu1 %v7322_v2 }
0x395e   : > { %v7315_v3 = vpop.xlane.xlu0 %7314 }
0x395f   : > { %v7325_v4 = vmul.f32 0.125, %v7315_v3 }
0x3961   : > { %v7329_v5 = vsub.f32 %v7307_v47, %v7325_v4 }
0x3962   : > { %v7318_v48 = vpop.xlane.xlu1 %7317  ;;  %v7321_v13 = vpop.xlane.xlu0 %7320 }
0x3963   : > { %v7326_v6 = vmul.f32 0.125, %v7318_v48  ;;  %v7327_v7 = vmul.f32 0.125, %v7321_v13  ;;  %v7333_v8 = vmul.f32 %v7329_v5, %v7329_v5 }
0x3965   : > { %v7330_v51 = vsub.f32 %v7308_v58, %v7326_v6  ;;  %v7331_v49 = vsub.f32 %v7309_v55, %v7327_v7  ;;  %v7337_v9 = vsel %vm6240_vm8, %v7333_v8, 0.0  ;;  %v7528_v55 = vsel %vm6247_vm7, %v9386_v24, 0 }
0x3966   : > { %v7324_v16 = vpop.xlane.xlu1 %7323  ;;  %7338 = vadd.xlane.f32.xlu0 %v7337_v9 }
0x3967   : > { %v7328_v42 = vmul.f32 0.125, %v7324_v16  ;;  %v7334_v44 = vmul.f32 %v7330_v51, %v7330_v51  ;;  %v7335_v17 = vmul.f32 %v7331_v49, %v7331_v49 }
0x3969   : > { %v7332_v62 = vsub.f32 %v7310_v63, %v7328_v42  ;;  %v7340_v19 = vsel %vm6240_vm8, %v7334_v44, 0.0  ;;  %v7343_v1 = vsel %vm6240_vm8, %v7335_v17, 0.0 }
0x396a   : > { %7341 = vadd.xlane.f32.xlu1 %v7340_v19  ;;  %7344 = vadd.xlane.f32.xlu0 %v7343_v1  ;;  %v9388_v19 = vld [vmem:[%s13054_s10 + $0x2] ss:$0 sm:$0xff] }
0x396b   : > { %v7336_v20 = vmul.f32 %v7332_v62, %v7332_v62 }
0x396d   : > { %v7346_v21 = vsel %vm6240_vm8, %v7336_v20, 0.0 }
0x396e   : > { %7347 = vadd.xlane.f32.xlu1 %v7346_v21 }
0x39ef   : > { %v7339_v25 = vpop.xlane.xlu0 %7338 }
0x39f0   : > { %v7349_v26 = vmul.f32 0.125, %v7339_v25  ;;  %v9401_v25 = vld [vmem:[%s13048_s2 + $0xc] sm:$0xf]  ;;  %s1944_s2 = scalar_lea.vmem [#allocation22], %s1943_s28 }
0x39f2   : > { %v7353_v56 = vadd.f32 1e-05, %v7349_v26 }
0x39f3   : > { %v7342_v27 = vpop.xlane.xlu1 %7341  ;;  %v7345_v30 = vpop.xlane.xlu0 %7344 }
0x39f4   : > { %10851 = vrsqrt.f32 %v7353_v56  ;;  %v7350_v31 = vmul.f32 0.125, %v7342_v27  ;;  %v7351_v57 = vmul.f32 0.125, %v7345_v30 }
0x39f6   : > { %v7354_v32 = vadd.f32 1e-05, %v7350_v31  ;;  %v7355_v60 = vadd.f32 1e-05, %v7351_v57  ;;  %v7824_v57 = vsel %vm6247_vm7, %v9401_v25, 0 }
0x39f7   : > { %v7348_v33 = vpop.xlane.xlu1 %7347 }
0x39f8   : > { %10853 = vrsqrt.f32 %v7354_v32  ;;  %v7352_v34 = vmul.f32 0.125, %v7348_v33 }
0x39f9   : > { %10855 = vrsqrt.f32 %v7355_v60 }
0x39fa   : > { %v7356_v35 = vadd.f32 1e-05, %v7352_v34 }
0x39fc   : > { %10857 = vrsqrt.f32 %v7356_v35 }
0x3a01   : > { %v10852_v36 = vpop.eup %10851 }
0x3a02   : > { %v7361_v11 = vmul.f32 %v10852_v36, %v7329_v5  ;;  %v9378_v5 = vld [vmem:[%s13053_s6 + $0x2] ss:$0 sm:$0xff] }
0x3a04   : > { %v7371_v39 = vmul.f32 %v9374_v37, %v7361_v11 }
0x3a05   : > { %v10854_v14 = vpop.eup %10853 }
0x3a06   : > { %v10856_v38 = vpop.eup %10855  ;;  %v7362_v10 = vmul.f32 %v10854_v14, %v7330_v51  ;;  %v12628_v12 = vadd.f32 %v9375_v15, %v7371_v39  ;;  %v9403_v14 = vld [vmem:[%s13051_s4 + $0x3] ss:$0 sm:$0xff]  ;;  %s12779_s4 = scalar_lea.hbm %s11696_s8, %s9444_s7 }
0x3a07   : > { %v7363_v40 = vmul.f32 %v10856_v38, %v7331_v49 }
0x3a08   : > { %v7372_v41 = vmul.f32 %v9374_v37, %v7362_v10 }
0x3a09   : > { %v10858_v43 = vpop.eup %10857  ;;  %v7373_v45 = vmul.f32 %v9374_v37, %v7363_v40 }
0x3a0a   : > { %v7364_v18 = vmul.f32 %v10858_v43, %v7332_v62  ;;  %v12630_v46 = vadd.f32 %v9375_v15, %v7372_v41 }
0x3a0b   : > { %v12640_v52 = vadd.f32 %v9375_v15, %v7373_v45 }
0x3a0c   : > { %v7374_v47 = vmul.f32 %v9374_v37, %v7364_v18  ;;  %v12634_v50 = vpack.c.bf16 %v12630_v46, %v12628_v12 }
0x3a0e   : > { %10260 = vmatprep.mubr.msk.bf16.mxu1 %vm6240_vm8, %v12634_v50  ;;  %10266 = vmatprep.mubr.msk.bf16.mxu0 %vm6240_vm8, %v12634_v50  ;;  %v12642_v53 = vadd.f32 %v9375_v15, %v7374_v47 }
0x3a10   : > { %v12646_v54 = vpack.c.bf16 %v12642_v53, %v12640_v52 }
0x3a12   : > { %10261 = vmatmul.mubr.msk.bf16.vlgmr.msra.gmra.mxu1 %vm6240_vm8, %v12646_v54  ;;  %10267 = vmatmul.mubr.msk.bf16.vlgmr.msra.gmra.mxu0 %vm6240_vm8, %v12646_v54 }
0x3a13   : > { %10272 = vmatprep.mubr.msk.bf16.mxu1 %vm6240_vm8, %v12634_v50  ;;  %10271 = vmatpush3.bf16.msra.mxu1 %v7528_v55 }
0x3a1a   : > { %10273 = vmatmul.mubr.msk.bf16.vlgmr.msra.gmra.mxu1 %vm6240_vm8, %v12646_v54 }
0x3ad2   : > { %v10262_v58 = vpop.f32.mrf.mxu1  ;;  %v10268_v59 = vpop.f32.mrf.mxu0 }
0x3ad3   : > { %v7511_v48 = vadd.f32 %v10268_v59, %v9383_v61  ;;  %v7449_v30 = vadd.f32 %v10262_v58, %v9378_v5 }
0x3ad4   : > { %v7440_v63 = vpop.f32.mrf.mxu1  ;;  %v7502_v2 = vpop.f32.mrf.mxu0 }
0x3ad5   : > { %v7441_v6 = vadd.f32 %v9378_v5, %v7440_v63  ;;  %v7503_v51 = vadd.f32 %v9383_v61, %v7502_v2 }
0x3ad6   : > { %v10263_v3 = vpop.f32.mrf.mxu1  ;;  %v10269_v4 = vpop.f32.mrf.mxu0 }
0x3ad7   : > { %v7514_v13 = vadd.f32 %v10269_v4, %v9383_v61  ;;  %v7452_v27 = vadd.f32 %v10263_v3, %v9378_v5 }
0x3ad8   : > { %v7443_v7 = vpop.f32.mrf.mxu1  ;;  %v7505_v8 = vpop.f32.mrf.mxu0 }
0x3ad9   : > { %v7582_v49 = vpack.c.bf16 %v7514_v13, %v7511_v48  ;;  %v7444_v9 = vadd.f32 %v9378_v5, %v7443_v7  ;;  %v7506_v16 = vadd.f32 %v9383_v61, %v7505_v8  ;;  %v7580_v31 = vpack.c.bf16 %v7452_v27, %v7449_v30 }
0x3ada   : > { %v10274_v42 = vpop.f32.mrf.mxu1 }
0x3adb   : > { %v7579_v44 = vpack.c.bf16 %v7444_v9, %v7441_v6  ;;  %v7581_v17 = vpack.c.bf16 %v7506_v16, %v7503_v51  ;;  %10386 = vmatprep.subr.msk.bf16.mxu0 %vm4041_vm6, %v7582_v49  ;;  %v7593_v62 = vsel %vm4041_vm6, %v7582_v49, 0  ;;  %v7573_v21 = vadd.f32 %v10274_v42, %v9388_v19 }
0x3adc   : > { %v7564_v1 = vpop.f32.mrf.mxu1  ;;  %10277 = vmatpush3.bf16.xpose.msra.mxu0 %v7593_v62 }
0x3add   : > { %10387 = vmatprep.subr.msk.bf16.mxu0 %vm4041_vm6, %v7581_v17  ;;  %10280 = vmatprep.mubr.msk.bf16.mxu0 %vm4041_vm6, %v7579_v44  ;;  %v7565_v22 = vadd.f32 %v9388_v19, %v7564_v1  ;;  %v7590_v56 = vsel %vm4041_vm6, %v7581_v17, 0 }
0x3ade   : > { %v10275_v20 = vpop.f32.mrf.mxu1 }
0x3adf   : > { %v7576_v28 = vadd.f32 %v10275_v20, %v9388_v19 }
0x3ae0   : > { %v7567_v29 = vpop.f32.mrf.mxu1 }
0x3ae1   : > { %v7691_v23 = vpack.c.bf16 %v7576_v28, %v7573_v21  ;;  %v7568_v24 = vadd.f32 %v9388_v19, %v7567_v29  ;;  %v9396_v19 = vld [vmem:[%s13049_s5 + $0xc] sm:$0xf]  ;;  %s8697_s5 = scalar_lea.sflag [#allocation4], %s1943_s28 }
0x3ae3   : > { %v7690_v26 = vpack.c.bf16 %v7568_v24, %v7565_v22  ;;  %10284 = vmatprep.subr.bf16.mxu1 %v7691_v23 }
0x3ae4   : > { %10279 = vmatpush3.bf16.xpose.msra.mxu0 %v7590_v56  ;;  %10285 = vmatpush3.bf16.msra.mxu1 %v7691_v23 }
0x3ae5   : > { %10286 = vmatprep.subr.bf16.mxu1 %v7690_v26  ;;  %10389 = vmatprep.subr.msk.bf16.mxu0 %vm6247_vm7, %v9401_v25 }
0x3ae8   : > { %10287 = vmatpush3.bf16.msra.mxu1 %v7690_v26 }
0x3ae9   : > { %10388 = vmatprep.subr.msk.bf16.mxu1 %vm6247_vm7, %v9396_v19 }
0x3aeb   : > { %10281 = vmatmul.mubr.msk.bf16.vlgmr.msra.gmra.mxu0 %vm4041_vm6, %v7580_v31 }
0x3aec   : > { %10300 = vmatprep.mubr.msk.bf16.mxu0 %vm6240_vm8, %v12634_v50  ;;  %10299 = vmatpush3.bf16.msra.mxu0 %v7824_v57  ;;  %v7762_v57 = vsel %vm6247_vm7, %v9396_v19, 0 }
0x3af3   : > { %10301 = vmatmul.mubr.msk.bf16.vlgmr.msra.gmra.mxu0 %vm6240_vm8, %v12646_v54 }
0x3bab   : > { %v10282_v32 = vpop.f32.mrf.mxu0 }
0x3bac   : > { %v7650_v36 = vsel %vm2054_vm2, %v10282_v32, -inf }
0x3bad   : > { %v7629_v60 = vpop.f32.mrf.mxu0 }
0x3bae   : > { %v7644_v33 = vsel %vm2054_vm2, %v7629_v60, -inf }
0x3baf   : > { %7645 = vmax.xlane.f32.xlu0 %v7644_v33  ;;  %v10283_v34 = vpop.f32.mrf.mxu0  ;;  %v9395_v33 = vld [vmem:[%s13056_s11 + $0x4] sm:$0x3] }
0x3bb0   : > { %v7653_v39 = vsel %vm2054_vm2, %v10283_v34, -inf }
0x3bb1   : > { %v7632_v35 = vpop.f32.mrf.mxu0 }
0x3bb2   : > { %v7647_v11 = vsel %vm2054_vm2, %v7632_v35, -inf }
0x3bb3   : > { %7651 = vmax.xlane.f32.xlu0 %v7650_v36  ;;  %v10302_v37 = vpop.f32.mrf.mxu0  ;;  %7648 = vmax.xlane.f32.xlu1 %v7647_v11 }
0x3bb4   : > { %v7869_v40 = vadd.f32 %v10302_v37, %v9403_v14 }
0x3bb5   : > { %v7860_v38 = vpop.f32.mrf.mxu0 }
0x3bb6   : > { %v7861_v43 = vadd.f32 %v9403_v14, %v7860_v38 }
0x3bb7   : > { %v10303_v10 = vpop.f32.mrf.mxu0  ;;  %7654 = vmax.xlane.f32.xlu1 %v7653_v39  ;;  %v9398_v39 = vld [vmem:[%s13053_s6 + $0x3] ss:$0 sm:$0xff] }
0x3bb8   : > { %v7872_v15 = vadd.f32 %v10303_v10, %v9403_v14 }
0x3bb9   : > { %v7863_v41 = vpop.f32.mrf.mxu0 }
0x3bba   : > { %v7940_v45 = vpack.c.bf16 %v7872_v15, %v7869_v40  ;;  %v7864_v18 = vadd.f32 %v9403_v14, %v7863_v41 }
0x3bbc   : > { %v7939_v47 = vpack.c.bf16 %v7864_v18, %v7861_v43  ;;  %10391 = vmatprep.subr.msk.bf16.mxu0 %vm4041_vm6, %v7940_v45  ;;  %v7951_v55 = vsel %vm4041_vm6, %v7940_v45, 0  ;;  %v9408_v18 = vld [vmem:[%s13054_s10 + $0x3] ss:$0 sm:$0xff] }
0x3bbd   : > { %10311 = vmatpush3.bf16.xpose.msra.mxu0 %v7951_v55  ;;  %v8174_v55 = vsel %vm4045_vm5, %v9395_v33, 0 }
0x3bbe   : > { %10392 = vmatprep.subr.msk.bf16.mxu0 %vm4041_vm6, %v7939_v47  ;;  %v7948_v58 = vsel %vm4041_vm6, %v7939_v47, 0 }
0x3bc5   : > { %10313 = vmatpush3.bf16.xpose.msra.mxu0 %v7948_v58 }
0x3bc6   : > { %10394 = vmatprep.subr.msk.bf16.mxu0 %vm4045_vm5, %v9395_v33 }
0x3c38   : > { %v7646_v59 = vpop.xlane.xlu0 %7645 }
0x3c39   : > { %v7656_v61 = vsub.f32 %v7629_v60, %v7646_v59 }
0x3c3b   : > { %v7660_v63 = vmul.f32 1.442695, %v7656_v61 }
0x3c3c   : > { %v7652_v2 = vpop.xlane.xlu0 %7651  ;;  %v7649_v3 = vpop.xlane.xlu1 %7648 }
0x3c3d   : > { %10859 = vpow2.f32 %v7660_v63  ;;  %v7658_v4 = vsub.f32 %v10282_v32, %v7652_v2  ;;  %v7657_v5 = vsub.f32 %v7632_v35, %v7649_v3  ;;  %v9406_v32 = vld [vmem:[%s12957_s3 + $0xc] sm:$0xf]  ;;  %s8709_s3 = sshll.u32 %s1944_s2, 4  ;;  %s12781_s3 = int_to_ptr.vmem [resolvable:$true] %s8709_s3 }
0x3c3e   : > { %v7886_v60 = vsel %vm6247_vm7, %v9406_v32, 0  ;;  %s11221_s6 = scalar_lea.vmem %s12781_s3, 16 }
0x3c3f   : > { %v7664_v48 = vmul.f32 1.442695, %v7658_v4  ;;  %v7662_v13 = vmul.f32 1.442695, %v7657_v5  ;;  %p11222_p13 = scmp.ne.s32.totalorder %s12781_s3, %s11221_s6 }
0x3c40   : > { %v7655_v6 = vpop.xlane.xlu1 %7654 }
0x3c41   : > { %10861 = vpow2.f32 %v7664_v48  ;;  %v7659_v7 = vsub.f32 %v10283_v34, %v7655_v6  ;;  %p11223_p3 = pnand %p11222_p13, %p13062_p2 }
0x3c42   : > { %10863 = vpow2.f32 %v7662_v13 }
0x3c43   : > { %v7666_v8 = vmul.f32 1.442695, %v7659_v7  ;;  %p11224_p4 = pneg %p11223_p3 }
0x3c45   : > { %10865 = vpow2.f32 %v7666_v8 }
0x3c4a   : > { %v10860_v51 = vpop.eup %10859 }
0x3c4b   : > { %v7668_v49 = vsel %vm2054_vm2, %v10860_v51, 0.0 }
0x3c4c   : > { %7669 = vadd.xlane.f32.xlu0 %v7668_v49 }
0x3c4e   : > { %v10862_v9 = vpop.eup %10861 }
0x3c4f   : > { %v10864_v16 = vpop.eup %10863  ;;  %v7674_v42 = vsel %vm2054_vm2, %v10862_v9, 0.0 }
0x3c50   : > { %7675 = vadd.xlane.f32.xlu0 %v7674_v42  ;;  %v7671_v44 = vsel %vm2054_vm2, %v10864_v16, 0.0 }
0x3c51   : > { %7672 = vadd.xlane.f32.xlu1 %v7671_v44 }
0x3c52   : > { %v10866_v17 = vpop.eup %10865 }
0x3c53   : > { %v7677_v62 = vsel %vm2054_vm2, %v10866_v17, 0.0 }
0x3c55   : > { %7678 = vadd.xlane.f32.xlu1 %v7677_v62 }
0x3cd5   : > { %v7670_v1 = vpop.xlane.xlu0 %7669 }
0x3cd6   : > { %10867 = vrcp.f32 %v7670_v1 }
0x3cd9   : > { %v7676_v20 = vpop.xlane.xlu0 %7675 }
0x3cda   : > { %v7673_v21 = vpop.xlane.xlu1 %7672 }
0x3cdb   : > { %10869 = vrcp.f32 %v7673_v21 }
0x3cdc   : > { %10871 = vrcp.f32 %v7676_v20 }
0x3cde   : > { %v7679_v28 = vpop.xlane.xlu1 %7678 }
0x3cdf   : > { %10873 = vrcp.f32 %v7679_v28 }
0x3ce3   : > { %v10868_v29 = vpop.eup %10867 }
0x3ce4   : > { %v7684_v23 = vmul.f32 %v10868_v29, %v10860_v51 }
0x3ce8   : > { %v10870_v22 = vpop.eup %10869 }
0x3ce9   : > { %v7685_v24 = vmul.f32 %v10870_v22, %v10864_v16  ;;  %v10872_v25 = vpop.eup %10871 }
0x3cea   : > { %v7686_v27 = vmul.f32 %v10872_v25, %v10862_v9 }
0x3ceb   : > { %v7688_v26 = vpack.c.bf16 %v7685_v24, %v7684_v23 }
0x3cec   : > { %v10874_v56 = vpop.eup %10873 }
0x3ced   : > { %v7687_v30 = vmul.f32 %v10874_v56, %v10866_v17  ;;  %10288 = vmatprep.mubr.msk.bf16.mxu1 %vm2054_vm2, %v7688_v26 }
0x3cef   : > { %v7689_v31 = vpack.c.bf16 %v7687_v30, %v7686_v27 }
0x3cf1   : > { %10289 = vmatmul.mubr.msk.bf16.vlgmr.msra.gmra.mxu1 %vm2054_vm2, %v7689_v31 }
0x3cf2   : > { %10293 = vmatpush3.bf16.msra.mxu1 %v7762_v57  ;;  %10294 = vmatprep.mubr.msk.bf16.mxu1 %vm6240_vm8, %v12634_v50 }
0x3cf3   : > { %10390 = vmatprep.subr.msk.bf16.mxu1 %vm6247_vm7, %v9406_v32 }
0x3cf9   : > { %10295 = vmatmul.mubr.msk.bf16.vlgmr.msra.gmra.mxu1 %vm6240_vm8, %v12646_v54 }
0x3cfa   : > { %10306 = vmatprep.mubr.msk.bf16.mxu1 %vm6240_vm8, %v12634_v50  ;;  %10305 = vmatpush3.bf16.msra.mxu1 %v7886_v60 }
0x3d01   : > { %10307 = vmatmul.mubr.msk.bf16.vlgmr.msra.gmra.mxu1 %vm6240_vm8, %v12646_v54 }
0x3db1   : > { %v10290_v34 = vpop.f32.mrf.mxu1 }
0x3db3   : > { %v7732_v35 = vpop.f32.mrf.mxu1 }
0x3db5   : > { %v10291_v36 = vpop.f32.mrf.mxu1 }
0x3db6   : > { %v7748_v13 = vpack.c.bf16 %v10291_v36, %v10290_v34 }
0x3db7   : > { %v7735_v11 = vpop.f32.mrf.mxu1 }
0x3db8   : > { %v7747_v58 = vpack.c.bf16 %v7735_v11, %v7732_v35 }
0x3db9   : > { %v10296_v37 = vpop.f32.mrf.mxu1 }
0x3dba   : > { %v7807_v41 = vadd.f32 %v10296_v37, %v9398_v39 }
0x3dbb   : > { %v7798_v14 = vpop.f32.mrf.mxu1 }
0x3dbc   : > { %v7799_v15 = vadd.f32 %v9398_v39, %v7798_v14 }
0x3dbd   : > { %v10297_v38 = vpop.f32.mrf.mxu1 }
0x3dbe   : > { %v7810_v10 = vadd.f32 %v10297_v38, %v9398_v39 }
0x3dbf   : > { %v7801_v40 = vpop.f32.mrf.mxu1 }
0x3dc0   : > { %v7802_v50 = vadd.f32 %v9398_v39, %v7801_v40  ;;  %v7938_v54 = vpack.c.bf16 %v7810_v10, %v7807_v41  ;;  %v9415_v41 = vld [vmem:[%s13056_s11 + $0x6] sm:$0x3] }
0x3dc1   : > { %v10308_v43 = vpop.f32.mrf.mxu1 }
0x3dc2   : > { %v7937_v45 = vpack.c.bf16 %v7802_v50, %v7799_v15  ;;  %v7931_v61 = vadd.f32 %v10308_v43, %v9408_v18  ;;  %v8116_v43 = vsel %vm4045_vm5, %v9415_v41, 0 }
0x3dc3   : > { %v7922_v47 = vpop.f32.mrf.mxu1 }
0x3dc4   : > { %10314 = vmatprep.mubr.msk.bf16.mxu0 %vm4041_vm6, %v7937_v45  ;;  %v7923_v3 = vadd.f32 %v9408_v18, %v7922_v47 }
0x3dc5   : > { %v10309_v59 = vpop.f32.mrf.mxu1  ;;  %10315 = vmatmul.mubr.msk.bf16.vlgmr.msra.gmra.mxu0 %vm4041_vm6, %v7938_v54 }
0x3dc6   : > { %v7934_v63 = vadd.f32 %v10309_v59, %v9408_v18  ;;  %10334 = vmatprep.mubr.msk.bf16.mxu0 %vm4041_vm6, %v7747_v58  ;;  %10333 = vmatpush3.bf16.msra.mxu0 %v8174_v55 }
0x3dc7   : > { %v7925_v2 = vpop.f32.mrf.mxu1 }
0x3dc8   : > { %v8049_v4 = vpack.c.bf16 %v7934_v63, %v7931_v61  ;;  %v7926_v5 = vadd.f32 %v9408_v18, %v7925_v2 }
0x3dca   : > { %v8048_v48 = vpack.c.bf16 %v7926_v5, %v7923_v3  ;;  %10318 = vmatprep.subr.bf16.mxu1 %v8049_v4 }
0x3dcb   : > { %10319 = vmatpush3.bf16.msra.mxu1 %v8049_v4  ;;  %v9420_v4 = vld [vmem:[#allocation17 + $0x1] ss:$0 sm:$0xff] }
0x3dcc   : > { %10320 = vmatprep.subr.bf16.mxu1 %v8048_v48 }
0x3dcd   : > { %10335 = vmatmul.mubr.msk.bf16.vlgmr.msra.gmra.mxu0 %vm4041_vm6, %v7748_v13 }
0x3dcf   : > { %10321 = vmatpush3.bf16.msra.mxu1 %v8048_v48 }
0x3dd0   : > { %10393 = vmatprep.subr.msk.bf16.mxu1 %vm4045_vm5, %v9415_v41 }
0x3e85   : > { %v10316_v6 = vpop.f32.mrf.mxu0 }
0x3e86   : > { %v8008_v9 = vsel %vm2054_vm2, %v10316_v6, -inf }
0x3e87   : > { %v7987_v7 = vpop.f32.mrf.mxu0 }
0x3e88   : > { %v8002_v8 = vsel %vm2054_vm2, %v7987_v7, -inf }
0x3e89   : > { %8003 = vmax.xlane.f32.xlu0 %v8002_v8  ;;  %v10317_v51 = vpop.f32.mrf.mxu0 }
0x3e8a   : > { %v8011_v42 = vsel %vm2054_vm2, %v10317_v51, -inf }
0x3e8b   : > { %v7990_v49 = vpop.f32.mrf.mxu0 }
0x3e8c   : > { %v8005_v16 = vsel %vm2054_vm2, %v7990_v49, -inf }
0x3e8d   : > { %8009 = vmax.xlane.f32.xlu0 %v8008_v9  ;;  %8006 = vmax.xlane.f32.xlu1 %v8005_v16  ;;  %v10336_v59 = vpop.f32.mrf.mxu0 }
0x3e8f   : > { %v8210_v61 = vpop.f32.mrf.mxu0 }
0x3e91   : > { %8012 = vmax.xlane.f32.xlu1 %v8011_v42  ;;  %v10337_v3 = vpop.f32.mrf.mxu0 }
0x3f12   : > { %v8004_v44 = vpop.xlane.xlu0 %8003 }
0x3f13   : > { %v8014_v17 = vsub.f32 %v7987_v7, %v8004_v44 }
0x3f15   : > { %v8018_v62 = vmul.f32 1.442695, %v8014_v17 }
0x3f16   : > { %v8010_v19 = vpop.xlane.xlu0 %8009  ;;  %v8007_v1 = vpop.xlane.xlu1 %8006 }
0x3f17   : > { %10875 = vpow2.f32 %v8018_v62  ;;  %v8016_v20 = vsub.f32 %v10316_v6, %v8010_v19  ;;  %v8015_v21 = vsub.f32 %v7990_v49, %v8007_v1 }
0x3f19   : > { %v8022_v28 = vmul.f32 1.442695, %v8016_v20  ;;  %v8020_v29 = vmul.f32 1.442695, %v8015_v21 }
0x3f1a   : > { %v8013_v22 = vpop.xlane.xlu1 %8012 }
0x3f1b   : > { %10877 = vpow2.f32 %v8022_v28  ;;  %v8017_v23 = vsub.f32 %v10317_v51, %v8013_v22  ;;  %v8213_v51 = vpop.f32.mrf.mxu0 }
0x3f1c   : > { %10879 = vpow2.f32 %v8020_v29 }
0x3f1d   : > { %v8024_v24 = vmul.f32 1.442695, %v8017_v23 }
0x3f1f   : > { %10881 = vpow2.f32 %v8024_v24 }
0x3f24   : > { %v10876_v25 = vpop.eup %10875 }
0x3f25   : > { %v8026_v26 = vsel %vm2054_vm2, %v10876_v25, 0.0 }
0x3f26   : > { %8027 = vadd.xlane.f32.xlu0 %v8026_v26 }
0x3f28   : > { %v10878_v56 = vpop.eup %10877 }
0x3f29   : > { %v10880_v27 = vpop.eup %10879  ;;  %v8032_v30 = vsel %vm2054_vm2, %v10878_v56, 0.0 }
0x3f2a   : > { %8033 = vadd.xlane.f32.xlu0 %v8032_v30  ;;  %v8029_v31 = vsel %vm2054_vm2, %v10880_v27, 0.0 }
0x3f2b   : > { %8030 = vadd.xlane.f32.xlu1 %v8029_v31 }
0x3f2c   : > { %v10882_v57 = vpop.eup %10881 }
0x3f2d   : > { %v8035_v32 = vsel %vm2054_vm2, %v10882_v57, 0.0 }
0x3f2f   : > { %8036 = vadd.xlane.f32.xlu1 %v8035_v32 }
0x3faf   : > { %v8028_v60 = vpop.xlane.xlu0 %8027 }
0x3fb0   : > { %10883 = vrcp.f32 %v8028_v60 }
0x3fb3   : > { %v8034_v33 = vpop.xlane.xlu0 %8033 }
0x3fb4   : > { %v8031_v34 = vpop.xlane.xlu1 %8030 }
0x3fb5   : > { %10885 = vrcp.f32 %v8031_v34 }
0x3fb6   : > { %10887 = vrcp.f32 %v8034_v33 }
0x3fb8   : > { %v8037_v35 = vpop.xlane.xlu1 %8036 }
0x3fb9   : > { %10889 = vrcp.f32 %v8037_v35 }
0x3fbd   : > { %v10884_v36 = vpop.eup %10883 }
0x3fbe   : > { %v8042_v37 = vmul.f32 %v10884_v36, %v10876_v25  ;;  %v9423_v36 = vld [vmem:[%s13058_s13 + $0x4] sm:$0xf] }
0x3fc2   : > { %v10886_v11 = vpop.eup %10885 }
0x3fc3   : > { %v8043_v14 = vmul.f32 %v10886_v11, %v10880_v27  ;;  %v10888_v38 = vpop.eup %10887  ;;  %v8336_v11 = vsel %vm6247_vm7, %v9423_v36, 0 }
0x3fc4   : > { %v8044_v40 = vmul.f32 %v10888_v38, %v10878_v56 }
0x3fc5   : > { %v8046_v39 = vpack.c.bf16 %v8043_v14, %v8042_v37 }
0x3fc6   : > { %v10890_v10 = vpop.eup %10889 }
0x3fc7   : > { %v8045_v15 = vmul.f32 %v10890_v10, %v10882_v57  ;;  %10322 = vmatprep.mubr.msk.bf16.mxu1 %vm2054_vm2, %v8046_v39 }
0x3fc9   : > { %v8047_v50 = vpack.c.bf16 %v8045_v15, %v8044_v40 }
0x3fcb   : > { %10323 = vmatmul.mubr.msk.bf16.vlgmr.msra.gmra.mxu1 %vm2054_vm2, %v8047_v50 }
0x3fcc   : > { %10327 = vmatpush3.bf16.msra.mxu1 %v8116_v43 }
0x3fcd   : > { %10395 = vmatprep.subr.msk.bf16.mxu1 %vm6247_vm7, %v9423_v36 }
0x408b   : > { %v10324_v45 = vpop.f32.mrf.mxu1 }
0x408d   : > { %v8090_v54 = vpop.f32.mrf.mxu1 }
0x408f   : > { %v10325_v18 = vpop.f32.mrf.mxu1 }
0x4090   : > { %v8106_v58 = vpack.c.bf16 %v10325_v18, %v10324_v45 }
0x4091   : > { %v8093_v47 = vpop.f32.mrf.mxu1 }
0x4092   : > { %v8105_v55 = vpack.c.bf16 %v8093_v47, %v8090_v54 }
0x4094   : > { %10328 = vmatprep.mubr.msk.bf16.mxu1 %vm4041_vm6, %v8105_v55  ;;  %v9421_v55 = vld [vmem:[#allocation19 + $0x1] ss:$0 sm:$0xff] }
0x4095   : > { %10329 = vmatmul.mubr.msk.bf16.vlgmr.msra.gmra.mxu1 %vm4041_vm6, %v8106_v58 }
0x4096   : > { %10339 = vmatpush3.bf16.msra.mxu1 %v8336_v11 }
0x4097   : > { %10352 = vmatprep.subr.bf16.mxu1 %v11385_v0 }
0x4155   : > { %v10330_v63 = vpop.f32.mrf.mxu1 }
0x4156   : > { %v8219_v2 = vadd.f32 %v10336_v59, %v10330_v63 }
0x4157   : > { %v8152_v5 = vpop.f32.mrf.mxu1 }
0x4158   : > { %v8211_v48 = vadd.f32 %v8210_v61, %v8152_v5  ;;  %v8235_v6 = vadd.f32 %v9420_v4, %v8219_v2 }
0x4159   : > { %v10331_v13 = vpop.f32.mrf.mxu1 }
0x415a   : > { %v8233_v7 = vadd.f32 %v9420_v4, %v8211_v48  ;;  %v8222_v8 = vadd.f32 %v10337_v3, %v10331_v13  ;;  %v8239_v62 = vadd.f32 %v8235_v6, %v12640_v52  ;;  %v9422_v3 = vld [vmem:[#allocation14 + $0x1] ss:$0 sm:$0xff] }
0x415b   : > { %v8155_v49 = vpop.f32.mrf.mxu1 }
0x415c   : > { %v8214_v9 = vadd.f32 %v8213_v51, %v8155_v49  ;;  %v8237_v16 = vadd.f32 %v8233_v7, %v12628_v12  ;;  %v8236_v42 = vadd.f32 %v9420_v4, %v8222_v8  ;;  %v8251_v20 = vsel %vm6240_vm8, %v8239_v62, 0.0 }
0x415e   : > { %v8234_v44 = vadd.f32 %v9420_v4, %v8214_v9  ;;  %v8245_v17 = vsel %vm6240_vm8, %v8237_v16, 0.0  ;;  %v8240_v21 = vadd.f32 %v8236_v42, %v12642_v53  ;;  %v10709_v42 = vld [vmem:[%s13060_s14 + $0x18] sm:$0xff]  }
0x415f   : > { %8246 = vadd.xlane.f32.xlu0 %v8245_v17  ;;  %10344 = vmatprep.subr.bf16.mxu0 %v10709_v42 }
0x4160   : > { %v8238_v19 = vadd.f32 %v8234_v44, %v12630_v46  ;;  %v8254_v28 = vsel %vm6240_vm8, %v8240_v21, 0.0  ;;  %10345 = vmatpush3.bf16.msra.mxu0 %v10709_v42  ;;  %v10710_v44 = vld [vmem:[%s13060_s14 + $0x10] sm:$0xff]  }
0x4161   : > { %10346 = vmatprep.subr.bf16.mxu0 %v10710_v44 }
0x4162   : > { %v8248_v1 = vsel %vm6240_vm8, %v8238_v19, 0.0 }
0x4163   : > { %8249 = vadd.xlane.f32.xlu1 %v8248_v1  ;;  %8252 = vadd.xlane.f32.xlu0 %v8251_v20 }
0x4164   : > { %10347 = vmatpush3.bf16.msra.mxu0 %v10710_v44 }
0x4165   : > { %10358 = vmatprep.subr.bf16.mxu0 %v11385_v0 }
0x4167   : > { %8255 = vadd.xlane.f32.xlu1 %v8254_v28 }
0x41e8   : > { %v8247_v12 = vpop.xlane.xlu0 %8246 }
0x41e9   : > { %v8257_v29 = vmul.f32 0.125, %v8247_v12 }
0x41eb   : > { %v8261_v22 = vsub.f32 %v8237_v16, %v8257_v29 }
0x41ec   : > { %v8250_v23 = vpop.xlane.xlu1 %8249  ;;  %v8253_v24 = vpop.xlane.xlu0 %8252 }
0x41ed   : > { %v8258_v52 = vmul.f32 0.125, %v8250_v23  ;;  %v8259_v25 = vmul.f32 0.125, %v8253_v24  ;;  %v8265_v26 = vmul.f32 %v8261_v22, %v8261_v22 }
0x41ef   : > { %v8262_v46 = vsub.f32 %v8238_v19, %v8258_v52  ;;  %v8263_v56 = vsub.f32 %v8239_v62, %v8259_v25  ;;  %v8269_v27 = vsel %vm6240_vm8, %v8265_v26, 0.0  ;;  %v9424_v19 = vld [vmem:[#allocation11 + $0x1] ss:$0 sm:$0xff] }
0x41f0   : > { %v8256_v30 = vpop.xlane.xlu1 %8255  ;;  %8270 = vadd.xlane.f32.xlu0 %v8269_v27 }
0x41f1   : > { %v8260_v53 = vmul.f32 0.125, %v8256_v30  ;;  %v8266_v31 = vmul.f32 %v8262_v46, %v8262_v46  ;;  %v8267_v57 = vmul.f32 %v8263_v56, %v8263_v56 }
0x41f3   : > { %v8264_v32 = vsub.f32 %v8240_v21, %v8260_v53  ;;  %v8272_v60 = vsel %vm6240_vm8, %v8266_v31, 0.0  ;;  %v8275_v33 = vsel %vm6240_vm8, %v8267_v57, 0.0 }
0x41f4   : > { %8273 = vadd.xlane.f32.xlu1 %v8272_v60  ;;  %8276 = vadd.xlane.f32.xlu0 %v8275_v33 }
0x41f5   : > { %v8268_v34 = vmul.f32 %v8264_v32, %v8264_v32 }
0x41f7   : > { %v8278_v35 = vsel %vm6240_vm8, %v8268_v34, 0.0 }
0x41f8   : > { %8279 = vadd.xlane.f32.xlu1 %v8278_v35 }
0x4279   : > { %v8271_v37 = vpop.xlane.xlu0 %8270 }
0x427a   : > { %v8281_v14 = vmul.f32 0.125, %v8271_v37 }
0x427c   : > { %v8285_v38 = vadd.f32 1e-05, %v8281_v14 }
0x427d   : > { %v8274_v39 = vpop.xlane.xlu1 %8273  ;;  %v8277_v10 = vpop.xlane.xlu0 %8276 }
0x427e   : > { %10891 = vrsqrt.f32 %v8285_v38  ;;  %v8282_v40 = vmul.f32 0.125, %v8274_v39  ;;  %v8283_v15 = vmul.f32 0.125, %v8277_v10 }
0x4280   : > { %v8286_v50 = vadd.f32 1e-05, %v8282_v40  ;;  %v8287_v41 = vadd.f32 1e-05, %v8283_v15 }
0x4281   : > { %v8280_v43 = vpop.xlane.xlu1 %8279 }
0x4282   : > { %10893 = vrsqrt.f32 %v8286_v50  ;;  %v8284_v45 = vmul.f32 0.125, %v8280_v43 }
0x4283   : > { %10895 = vrsqrt.f32 %v8287_v41 }
0x4284   : > { %v8288_v54 = vadd.f32 1e-05, %v8284_v45 }
0x4286   : > { %10897 = vrsqrt.f32 %v8288_v54 }
0x428b   : > { %v10892_v18 = vpop.eup %10891 }
0x428c   : > { %v8293_v47 = vmul.f32 %v10892_v18, %v8261_v22 }
0x428e   : > { %v8303_v63 = vmul.f32 %v9421_v55, %v8293_v47 }
0x428f   : > { %v10894_v58 = vpop.eup %10893 }
0x4290   : > { %v10896_v59 = vpop.eup %10895  ;;  %v8294_v61 = vmul.f32 %v10894_v58, %v8262_v46  ;;  %v8313_v6 = vadd.f32 %v9422_v3, %v8303_v63 }
0x4291   : > { %v8295_v2 = vmul.f32 %v10896_v59, %v8263_v56  ;;  %v9431_v56 = vld [vmem:[#allocation13 + $0x1] ss:$0 sm:$0xff] }
0x4292   : > { %v8304_v4 = vmul.f32 %v9421_v55, %v8294_v61 }
0x4293   : > { %v10898_v5 = vpop.eup %10897  ;;  %v8305_v13 = vmul.f32 %v9421_v55, %v8295_v2 }
0x4294   : > { %v8296_v48 = vmul.f32 %v10898_v5, %v8264_v32  ;;  %v8314_v7 = vadd.f32 %v9422_v3, %v8304_v4 }
0x4295   : > { %v8315_v49 = vadd.f32 %v9422_v3, %v8305_v13 }
0x4296   : > { %v8306_v8 = vmul.f32 %v9421_v55, %v8296_v48  ;;  %v8317_v51 = vpack.c.bf16 %v8314_v7, %v8313_v6  ;;  %v8568_v48 = vld [vmem:[%s13061_s9] sm:$0xf]  ;;  %s11225_s9 = sshll.u32 %s11387_s0, 4  ;;  %s11226_s9 = int_to_ptr.vmem [resolvable:$false] %s11225_s9 }
0x4297   : > { %v8574_v13 = vsel %vm6247_vm7, %v8568_v48, 0  ;;  %s11227_s10 = scalar_lea.vmem %s11226_s9, 32  ;;  %p11228_p12 = scmp.lt.s32.totalorder %s12781_s3, %s11226_s9 }
0x4298   : > { %v8316_v9 = vadd.f32 %v9422_v3, %v8306_v8  ;;  %10340 = vmatprep.mubr.msk.bf16.mxu1 %vm6240_vm8, %v8317_v51  ;;  %p11229_p7 = scmp.lt.s32.totalorder %s11227_s10, %s11221_s6 }
0x429a   : > { %v8318_v16 = vpack.c.bf16 %v8316_v9, %v8315_v49  ;;  %p11230_p8 = por %p11229_p7, %p11228_p12 }
0x429c   : > { %10341 = vmatmul.mubr.msk.bf16.vlgmr.msra.gmra.mxu1 %vm6240_vm8, %v8318_v16  ;;  %p11231_p9 = pnand %p11230_p8, %p11224_p4 }
0x429d   : > { %10354 = vmatprep.mubr.msk.bf16.mxu1 %vm11386_vm0, %v11385_v0  ;;  %10353 = vmatpush3.bf16.msra.mxu1 %v8574_v13 }
0x435c   : > { %v10342_v17 = vpop.f32.mrf.mxu1 }
0x435d   : > { %v8381_v28 = vadd.f32 %v10342_v17, %v9424_v19 }
0x435e   : > { %v8372_v62 = vpop.f32.mrf.mxu1 }
0x435f   : > { %v8373_v20 = vadd.f32 %v9424_v19, %v8372_v62  ;;  %v8389_v52 = vmax.f32 %v8381_v28, 0.0 }
0x4360   : > { %v10343_v1 = vpop.f32.mrf.mxu1 }
0x4361   : > { %v8384_v21 = vadd.f32 %v10343_v1, %v9424_v19  ;;  %v8387_v23 = vmax.f32 %v8373_v20, 0.0  ;;  %v9436_v20 = vld [vmem:[#allocation20 + $0x1] ss:$0 sm:$0xff] }
0x4362   : > { %v8375_v12 = vpop.f32.mrf.mxu1 }
0x4363   : > { %v8376_v29 = vadd.f32 %v9424_v19, %v8375_v12  ;;  %v8390_v22 = vmax.f32 %v8384_v21, 0.0 }
0x4365   : > { %v8388_v24 = vmax.f32 %v8376_v29, 0.0  ;;  %v8392_v26 = vpack.c.bf16 %v8390_v22, %v8389_v52  ;;  %v9437_v29 = vld [vmem:[#allocation16 + $0x1] ss:$0 sm:$0xff] }
0x4367   : > { %v8391_v25 = vpack.c.bf16 %v8388_v24, %v8387_v23 }
0x4369   : > { %10348 = vmatprep.mubr.msk.bf16.mxu0 %vm2054_vm2, %v8391_v25 }
0x436a   : > { %10349 = vmatmul.mubr.msk.bf16.vlgmr.msra.gmra.mxu0 %vm2054_vm2, %v8392_v26 }
0x436b   : > { %10366 = vmatprep.mubr.msk.bf16.mxu0 %vm11386_vm0, %v11385_v0 }
0x442a   : > { %v10350_v46 = vpop.f32.mrf.mxu0 }
0x442b   : > { %v8467_v30 = vadd.f32 %v10350_v46, %v9431_v56 }
0x442c   : > { %v8458_v27 = vpop.f32.mrf.mxu0 }
0x442d   : > { %v8459_v53 = vadd.f32 %v9431_v56, %v8458_v27  ;;  %v8475_v60 = vadd.f32 %v8467_v30, %v8315_v49 }
0x442e   : > { %v10351_v31 = vpop.f32.mrf.mxu0 }
0x442f   : > { %v8473_v57 = vadd.f32 %v8459_v53, %v8313_v6  ;;  %v8470_v33 = vadd.f32 %v10351_v31, %v9431_v56  ;;  %v8487_v14 = vsel %vm6240_vm8, %v8475_v60, 0.0 }
0x4430   : > { %v8461_v32 = vpop.f32.mrf.mxu0 }
0x4431   : > { %v8462_v34 = vadd.f32 %v9431_v56, %v8461_v32  ;;  %v8481_v35 = vsel %vm6240_vm8, %v8473_v57, 0.0  ;;  %v8476_v11 = vadd.f32 %v8470_v33, %v8316_v9 }
0x4432   : > { %8482 = vadd.xlane.f32.xlu0 %v8481_v35 }
0x4433   : > { %v8474_v36 = vadd.f32 %v8462_v34, %v8314_v7  ;;  %v8490_v38 = vsel %vm6240_vm8, %v8476_v11, 0.0 }
0x4435   : > { %v8484_v37 = vsel %vm6240_vm8, %v8474_v36, 0.0 }
0x4436   : > { %8485 = vadd.xlane.f32.xlu1 %v8484_v37  ;;  %8488 = vadd.xlane.f32.xlu0 %v8487_v14 }
0x443a   : > { %8491 = vadd.xlane.f32.xlu1 %v8490_v38 }
0x44bb   : > { %v8483_v39 = vpop.xlane.xlu0 %8482 }
0x44bc   : > { %v8493_v10 = vmul.f32 0.125, %v8483_v39 }
0x44be   : > { %v8497_v40 = vsub.f32 %v8473_v57, %v8493_v10 }
0x44bf   : > { %v8486_v15 = vpop.xlane.xlu1 %8485  ;;  %v8489_v50 = vpop.xlane.xlu0 %8488 }
0x44c0   : > { %v8494_v41 = vmul.f32 0.125, %v8486_v15  ;;  %v8495_v43 = vmul.f32 0.125, %v8489_v50  ;;  %v8501_v45 = vmul.f32 %v8497_v40, %v8497_v40  ;;  %v10711_v50 = vld [vmem:[%s11686_s12 + $0x18] sm:$0xff]  }
0x44c1   : > { %10359 = vmatpush3.bf16.msra.mxu0 %v10711_v50 }
0x44c2   : > { %v8498_v54 = vsub.f32 %v8474_v36, %v8494_v41  ;;  %v8499_v18 = vsub.f32 %v8475_v60, %v8495_v43  ;;  %v8505_v47 = vsel %vm6240_vm8, %v8501_v45, 0.0  ;;  %10360 = vmatprep.subr.bf16.mxu0 %v11385_v0  ;;  %v10712_v41 = vld [vmem:[%s11686_s12 + $0x10] sm:$0xff]   ;;  %v10713_v43 = vld [vmem:[%s11686_s12 + $0x8] sm:$0xff]   ;;  %v10714_v45 = vld [vmem:[%s11686_s12] sm:$0xff]  }
0x44c3   : > { %v8492_v55 = vpop.xlane.xlu1 %8491  ;;  %8506 = vadd.xlane.f32.xlu0 %v8505_v47 }
0x44c4   : > { %v8496_v58 = vmul.f32 0.125, %v8492_v55  ;;  %v8502_v59 = vmul.f32 %v8498_v54, %v8498_v54  ;;  %v8503_v61 = vmul.f32 %v8499_v18, %v8499_v18 }
0x44c5   : > { %10361 = vmatpush3.bf16.msra.mxu0 %v10712_v41 }
0x44c6   : > { %v8500_v63 = vsub.f32 %v8476_v11, %v8496_v58  ;;  %v8508_v2 = vsel %vm6240_vm8, %v8502_v59, 0.0  ;;  %v8511_v3 = vsel %vm6240_vm8, %v8503_v61, 0.0  ;;  %10362 = vmatprep.subr.bf16.mxu0 %v11385_v0 }
0x44c7   : > { %8509 = vadd.xlane.f32.xlu1 %v8508_v2  ;;  %8512 = vadd.xlane.f32.xlu0 %v8511_v3  ;;  %v8626_v2 = vld [vmem:[#allocation2] sm:$0x1] }
0x44c8   : > { %v8504_v4 = vmul.f32 %v8500_v63, %v8500_v63 }
0x44c9   : > { %10363 = vmatpush3.bf16.msra.mxu0 %v10713_v43 }
0x44ca   : > { %v8514_v5 = vsel %vm6240_vm8, %v8504_v4, 0.0  ;;  %10364 = vmatprep.subr.bf16.mxu0 %v11385_v0 }
0x44cb   : > { %8515 = vadd.xlane.f32.xlu1 %v8514_v5 }
0x44cd   : > { %10365 = vmatpush3.bf16.msra.mxu0 %v10714_v45 }
0x454c   : > { %v8507_v6 = vpop.xlane.xlu0 %8506 }
0x454d   : > { %v8517_v7 = vmul.f32 0.125, %v8507_v6 }
0x454f   : > { %v8521_v8 = vadd.f32 1e-05, %v8517_v7 }
0x4550   : > { %v8510_v51 = vpop.xlane.xlu1 %8509  ;;  %v8513_v49 = vpop.xlane.xlu0 %8512 }
0x4551   : > { %10899 = vrsqrt.f32 %v8521_v8  ;;  %v8518_v9 = vmul.f32 0.125, %v8510_v51  ;;  %v8519_v16 = vmul.f32 0.125, %v8513_v49 }
0x4553   : > { %v8522_v42 = vadd.f32 1e-05, %v8518_v9  ;;  %v8523_v44 = vadd.f32 1e-05, %v8519_v16 }
0x4554   : > { %v8516_v17 = vpop.xlane.xlu1 %8515 }
0x4555   : > { %10901 = vrsqrt.f32 %v8522_v42  ;;  %v8520_v62 = vmul.f32 0.125, %v8516_v17 }
0x4556   : > { %10903 = vrsqrt.f32 %v8523_v44 }
0x4557   : > { %v8524_v19 = vadd.f32 1e-05, %v8520_v62 }
0x4559   : > { %10905 = vrsqrt.f32 %v8524_v19 }
0x455e   : > { %v10900_v1 = vpop.eup %10899 }
0x455f   : > { %v8529_v21 = vmul.f32 %v10900_v1, %v8497_v40 }
0x4561   : > { %v8539_v28 = vmul.f32 %v9436_v20, %v8529_v21 }
0x4562   : > { %v10902_v12 = vpop.eup %10901 }
0x4563   : > { %v10904_v22 = vpop.eup %10903  ;;  %v8530_v23 = vmul.f32 %v10902_v12, %v8498_v54  ;;  %v8549_v52 = vadd.f32 %v9437_v29, %v8539_v28  ;;  %v8569_v54 = vld [vmem:[#allocation5] sm:$0x1] }
0x4564   : > { %v8531_v24 = vmul.f32 %v10904_v22, %v8499_v18 }
0x4565   : > { %v8540_v25 = vmul.f32 %v9436_v20, %v8530_v23  ;;  %v8553_v53 = vsel %vm6240_vm8, %v8549_v52, 0.0 }
0x4566   : > { %v10906_v26 = vpop.eup %10905  ;;  %v8541_v46 = vmul.f32 %v9436_v20, %v8531_v24 }
0x4567   : > { %v8550_v56 = vadd.f32 %v9437_v29, %v8540_v25  ;;  %v8532_v27 = vmul.f32 %v10906_v26, %v8500_v63 }
0x4568   : > { %v8551_v30 = vadd.f32 %v9437_v29, %v8541_v46 }
0x4569   : > { %v8554_v31 = vsel %vm6240_vm8, %v8550_v56, 0.0  ;;  %v8542_v57 = vmul.f32 %v9436_v20, %v8532_v27 }
0x456a   : > { %v8555_v32 = vadd.f32 %v8554_v31, %v8553_v53  ;;  %v8556_v60 = vsel %vm6240_vm8, %v8551_v30, 0.0 }
0x456b   : > { %v8552_v33 = vadd.f32 %v9437_v29, %v8542_v57 }
0x456c   : > { %v8557_v34 = vadd.f32 %v8556_v60, %v8555_v32 }
0x456d   : > { %v8558_v35 = vsel %vm6240_vm8, %v8552_v33, 0.0 }
0x456e   : > { %v8559_v36 = vadd.f32 %v8558_v35, %v8557_v34 }
0x4570   : > { %v8560_v11 = vrot.slane %v8559_v36, 4 }
0x4572   : > { %v8561_v37 = vadd.f32 %v8560_v11, %v8559_v36 }
0x4574   : > { %v8562_v14 = vrot.slane %v8561_v37, 2 }
0x4576   : > { %v8563_v38 = vadd.f32 %v8562_v14, %v8561_v37 }
0x4578   : > { %v8564_v39 = vrot.slane %v8563_v38, 1 }
0x457a   : > { %v8565_v10 = vadd.f32 %v8564_v39, %v8563_v38 }
0x457c   : > { %v8566_v40 = vmul.f32 0.03125, %v8565_v10 }
0x457e   : > { %v8567_v15 = vpack.c.bf16 %v8566_v40, %v8566_v40 }
0x4580   : > { %10355 = vmatmul.mubr.msk.bf16.vlgmr.msra.gmra.mxu1 %vm6240_vm8, %v8567_v15 }
0x4640   : > { %v8610_v18 = vpop.f32.mrf.mxu1 }
0x4641   : > { %v8611_v47 = vadd.f32 %v8610_v18, %v8569_v54 }
0x4642   : > { %v10356_v55 = vpop.f32.mrf.mxu1 }
0x4643   : > { %10907 = vtanh.f32 %v8611_v47 }
0x4644   : > { %v8613_v58 = vpop.f32.mrf.mxu1 }
0x4646   : > { %v10357_v59 = vpop.f32.mrf.mxu1 }
0x4650   : > { %v10908_v61 = vpop.eup %10907 }
0x4651   : > { %v8617_v63 = vpack.c.bf16 %v10908_v61, %v10908_v61 }
0x4653   : > { %10367 = vmatmul.mubr.msk.bf16.vlgmr.msra.gmra.mxu0 %vm2933_vm4, %v8617_v63 }
0x4713   : > { %v8688_v0 = vpop.f32.mrf.mxu0 }
0x4714   : > { %v8689_v3 = vadd.f32 %v8688_v0, %v8626_v2 }
0x4715   : > { %v10368_v4 = vpop.f32.mrf.mxu0 }
0x4716   : > { %8695 = vst.msk [vmem:[%s1944_s2] sm:$0x1] %vm8694_vm9, %v8689_v3 }
0x4717   : > { %v8691_v5 = vpop.f32.mrf.mxu0 }
0x4718   : > { %11234 = shalt.err (!%p11231_p9)
}
0x4719   : > { %s11235_s2 = scalar_lea.hbm %s12779_s4, 16  ;;  %s11239_s28 = scalar_lea.hbm %s11696_s8, 32 }
0x471a   : > { %p11236_p11 = scmp.ne.s32.totalorder %s12779_s4, %s11235_s2  ;;  %p11240_p10 = scmp.lt.s32.totalorder %s12779_s4, %s11696_s8 }
0x471b   : > { %p11241_p0 = scmp.lt.s32.totalorder %s11239_s28, %s11235_s2 }
0x471c   : > { %p11237_p5 = pnand %p11236_p11, %p13062_p2 }
0x471d   : > { %p11242_p1 = por %p11241_p0, %p11240_p10 }
0x471e   : > { %p11238_p6 = pneg %p11237_p5 }
0x4720   : > { %p11243_p13 = pnand %p11242_p1, %p11238_p6 }
0x4722   : > { %11246 = shalt.err (!%p11243_p13)
}
0x4723   : > { %10444 = dma.vmem_to_hbm [thread:$0]  (%p13062_p2), %s12781_s3, 16, %s12779_s4, %s8697_s5   ;;  %v10369_v48 = vpop.f32.mrf.mxu0 }
0x4724 PF: > { %s13063_s9 = sld [smem:[#allocation89_spill]] }
0x4725   : > { %s13064_s6 = sld [smem:[#allocation87_spill]] }
0x4726   : > { %s13065_s10 = sld [smem:[#allocation92_spill]] }
0x472a   : > { %p10511_p3 = scmp.ge.s32.totalorder %s13063_s9, 2 }
0x472b   : > { %s8721_s7 = sand.u32 1, %s13064_s6  }
0x472c   : > { %p13066_p4 = scmp.ne.s32.totalorder %s13065_s10, 0  ;;  %s8722_s0 = scalar_lea.sflag [#allocation4], %s8721_s7 }
0x472e   : > { %p10484_p12 = pnand %p10511_p3, %p13066_p4 }
0x4730   : > { %p10485_p7 = pneg %p10484_p12 }
0x4732   : > { %11292 = dma.done.wait (%p10485_p7), %s8722_s0, 16  }
0x4733   : > { %11294 = vsyncadd (%p10485_p7), %s8722_s0, 4294967280  ;;  %s13067_s7 = sld [smem:[#allocation90_spill]]  ;;  %s13070_s28 = smov %s11301_s1 }
0x4734   : > { %s13068_s2 = sld [smem:[#allocation88_spill]] }
0x4735   : > { %s13069_s22 = sld [smem:[#allocation91_spill]] }
0x4739   : > { %p138_p8 = scmp.ge.s32.totalorder %s13067_s7, 4  }
0x473a   : > { %s13071_s1 = smov %s13068_s2 }
0x473b   : > { %13072 = sst [smem:[#allocation87_spill]] %s13069_s22  ;;  %140 = sbr.rel (!%p138_p8) target bundleno = 135 (0x87), region = 497 }
0x4740   :  { %8726 = vsyncpa [#allocation3], 1 }
0x4741   :  { %8728 = vsyncpa [#allocation3 + $0x1], 1 }
0x4742   :  { %8729 = vsyncpa [#allocation6], 1 }
0x4743   :  { %8730 = vsyncpa [#allocation9], 1 }
0x4744   :  { %8731 = vsyncpa [#allocation12], 1 }
0x4745   :  { %8732 = vsyncpa [#allocation15], 1 }
0x4746   :  { %8733 = vsyncpa [#allocation18], 1 }
0x4747   :  { %8734 = vsyncpa [#allocation21], 1 }
0x4748   :  { %8735 = vsyncpa [#allocation4], 1 }
0x4749   :  { %8737 = vsyncpa [#allocation4 + $0x1], 1 }

</bundles_post_ra>
